<compile_context>
chip_gen: v7x
topology: tpu7x:2x2x1
jax: 0.10.0
libtpu: 0.0.40
codegen_flags: <defaults>
</compile_context>

<pallas_src>
import numpy as np
import jax
import jax.numpy as jnp
from jax.experimental import pallas as pl
from jax.experimental.pallas import tpu as pltpu

# --- module hyper-parameters ------------------------------------------------
C_IN, C_OUT = 8, 16
KH = KW = 3
STRIDE = 2
PADDING = 2
DILATION = 2
EPS = 1e-5            # BatchNorm2d default eps
LEAKY_SLOPE = 0.01    # LeakyReLU default negative_slope

_DOT_KW = dict(preferred_element_type=jnp.float32,
               precision=jax.lax.Precision.HIGHEST)


# ---------------------------------------------------------------------------
# Fused kernel: dilated strided Conv2d + BatchNorm2d (batch stats) + LeakyReLU
# ---------------------------------------------------------------------------
def _fused_conv_bn_lrelu_kernel(x_ref, sel_ref, w_ref, b_ref, gamma_ref,
                                beta_ref, o_ref):
    B, Cout, S_out = o_ref.shape
    Cin = x_ref.shape[0] // B
    n_taps = sel_ref.shape[0]

    X = x_ref[...]                                     # (B*Cin, H*W)

    # --- conv: per-tap "select" matmul (spatial gather) + channel projection
    acc = [jnp.zeros((Cout, S_out), jnp.float32) for _ in range(B)]
    for t in range(n_taps):                            # static unroll: 9 taps
        # patch[b*Cin+ci, p] = x[b, ci, src_t(p)]  (0 for padded sources)
        patch = jnp.dot(X, sel_ref[t], **_DOT_KW)      # (B*Cin, S_out)
        w_t = w_ref[t]                                 # (Cout, Cin)
        for b in range(B):                             # 8-aligned sublane slices
            acc[b] = acc[b] + jnp.dot(
                w_t, patch[b * Cin:(b + 1) * Cin, :], **_DOT_KW)

    # batch elements side-by-side on the lane axis -> (Cout, B*S_out) = (16, 128)
    y = jnp.concatenate(acc, axis=1) + b_ref[...]      # + conv bias (Cout, 1)

    # --- BatchNorm2d, training-mode batch statistics (biased variance), per channel
    mu = jnp.mean(y, axis=1, keepdims=True)                         # (Cout, 1)
    var = jnp.mean((y - mu) * (y - mu), axis=1, keepdims=True)      # two-pass
    yn = (y - mu) * jax.lax.rsqrt(var + EPS)
    yn = yn * gamma_ref[...] + beta_ref[...]

    # --- LeakyReLU
    out = jnp.where(yn >= 0.0, yn, LEAKY_SLOPE * yn)

    for b in range(B):
        o_ref[b] = out[:, b * S_out:(b + 1) * S_out]


def _build_selection(H, W, Ho, Wo):
    """(KH*KW, H*W, Ho*Wo) 0/1 matrices mapping output pixels to their (unpadded)
    input source for each kernel tap; out-of-bounds (padding) sources -> zero column."""
    sel = np.zeros((KH * KW, H * W, Ho * Wo), np.float32)
    for ki in range(KH):
        for kj in range(KW):
            t = ki * KW + kj
            for i in range(Ho):
                hin = i * STRIDE + ki * DILATION - PADDING
                if not (0 <= hin < H):
                    continue
                for j in range(Wo):
                    win = j * STRIDE + kj * DILATION - PADDING
                    if not (0 <= win < W):
                        continue
                    sel[t, hin * W + win, i * Wo + j] = 1.0
    return jnp.asarray(sel)


def dilated_downsample_pool_forward(x, weight, bias, gamma, beta):
    B, Cin, H, W = x.shape
    Cout = weight.shape[0]
    Ho = (H + 2 * PADDING - DILATION * (KH - 1) - 1) // STRIDE + 1
    Wo = (W + 2 * PADDING - DILATION * (KW - 1) - 1) // STRIDE + 1
    S_in, S_out = H * W, Ho * Wo

    # parameter / constant prep (host-side, free): tap-major conv weights + selection mats
    sel = _build_selection(H, W, Ho, Wo)                         # (9, S_in, S_out)
    w_taps = weight.transpose(2, 3, 0, 1).reshape(KH * KW, Cout, Cin)
    x2 = x.reshape(B * Cin, S_in)                                # free reshape

    full = lambda *s: pl.BlockSpec(s, lambda i, _s=s: (0,) * len(_s))

    out = pl.pallas_call(
        _fused_conv_bn_lrelu_kernel,
        out_shape=jax.ShapeDtypeStruct((B, Cout, S_out), jnp.float32),
        grid_spec=pltpu.PrefetchScalarGridSpec(
            num_scalar_prefetch=0,
            grid=(1,),            # single step: BN batch stats couple all batch elements
            in_specs=[
                full(B * Cin, S_in),
                full(KH * KW, S_in, S_out),
                full(KH * KW, Cout, Cin),
                full(Cout, 1),
                full(Cout, 1),
                full(Cout, 1),
            ],
            out_specs=full(B, Cout, S_out),
        ),
        compiler_params=pltpu.CompilerParams(dimension_semantics=("arbitrary",)),
    )(x2, sel, w_taps, bias[:, None], gamma[:, None], beta[:, None])

    return out.reshape(B, Cout, Ho, Wo)


# ---------------------------------------------------------------------------
# Pure-JAX reference (mirrors PyTorch semantics) for verification
# ---------------------------------------------------------------------------
def reference_forward(x, weight, bias, gamma, beta):
    y = jax.lax.conv_general_dilated(
        x, weight,
        window_strides=(STRIDE, STRIDE),
        padding=((PADDING, PADDING), (PADDING, PADDING)),
        rhs_dilation=(DILATION, DILATION),
        dimension_numbers=("NCHW", "OIHW", "NCHW"),
        precision=jax.lax.Precision.HIGHEST,
    ) + bias[None, :, None, None]
    # BatchNorm2d forward in training mode: batch statistics, biased variance.
    mu = y.mean(axis=(0, 2, 3), keepdims=True)
    var = ((y - mu) ** 2).mean(axis=(0, 2, 3), keepdims=True)
    yn = (y - mu) / jnp.sqrt(var + EPS)
    yn = yn * gamma[None, :, None, None] + beta[None, :, None, None]
    return jnp.where(yn >= 0.0, yn, LEAKY_SLOPE * yn)


if __name__ == "__main__":
    B, H, W = 2, 16, 16

    key = jax.random.PRNGKey(0)
    ks = jax.random.split(key, 5)
    weight = 0.2 * jax.random.normal(ks[0], (C_OUT, C_IN, KH, KW), jnp.float32)
    bias = 0.1 * jax.random.normal(ks[1], (C_OUT,), jnp.float32)
    gamma = 1.0 + 0.1 * jax.random.normal(ks[2], (C_OUT,), jnp.float32)
    beta = 0.1 * jax.random.normal(ks[3], (C_OUT,), jnp.float32)
    x = jax.random.normal(ks[4], (B, C_IN, H, W), jnp.float32)

    out = jax.block_until_ready(
        dilated_downsample_pool_forward(x, weight, bias, gamma, beta))
    ref = jax.block_until_ready(reference_forward(x, weight, bias, gamma, beta))

    Ho = (H + 2 * PADDING - DILATION * (KH - 1) - 1) // STRIDE + 1
    Wo = (W + 2 * PADDING - DILATION * (KW - 1) - 1) // STRIDE + 1
    assert out.shape == ref.shape == (B, C_OUT, Ho, Wo), (out.shape, ref.shape)

    max_diff = float(jnp.max(jnp.abs(out - ref)))
    # With precision=HIGHEST the observed error is ~1e-5; keep a margin well below any
    # structural bug (which would be O(1)) but far tighter than the previous 1e-1.
    assert max_diff < 2e-2, f"max abs diff too large: {max_diff}"
    print("KERNEL_OK")
</pallas_src>

<mosaic_0001>
module attributes {stable_mosaic.version = 11 : i64} {
  func.func @_fused_conv_bn_lrelu_kernel(%arg0: i32, %arg1: memref<16x256xf32, #tpu.memory_space<vmem>>, %arg2: memref<9x256x64xf32, #tpu.memory_space<vmem>>, %arg3: memref<9x16x8xf32, #tpu.memory_space<vmem>>, %arg4: memref<16x1xf32, #tpu.memory_space<vmem>>, %arg5: memref<16x1xf32, #tpu.memory_space<vmem>>, %arg6: memref<16x1xf32, #tpu.memory_space<vmem>>, %arg7: memref<2x16x64xf32, #tpu.memory_space<vmem>>) attributes {dimension_semantics = [#tpu.dimension_semantics<arbitrary>], iteration_bounds = array<i64: 1>, scalar_prefetch = 0 : i64, scratch_operands = 0 : i64, tpu.core_type = #tpu.core_type<tc>, window_params = [{pipeline_mode = #tpu.pipeline_mode<synchronous>, transform_indices = @transform_0, window_bounds = array<i64: 16, 256>}, {pipeline_mode = #tpu.pipeline_mode<synchronous>, transform_indices = @transform_1, window_bounds = array<i64: 9, 256, 64>}, {pipeline_mode = #tpu.pipeline_mode<synchronous>, transform_indices = @transform_2, window_bounds = array<i64: 9, 16, 8>}, {pipeline_mode = #tpu.pipeline_mode<synchronous>, transform_indices = @transform_3, window_bounds = array<i64: 16, 1>}, {pipeline_mode = #tpu.pipeline_mode<synchronous>, transform_indices = @transform_4, window_bounds = array<i64: 16, 1>}, {pipeline_mode = #tpu.pipeline_mode<synchronous>, transform_indices = @transform_5, window_bounds = array<i64: 16, 1>}, {pipeline_mode = #tpu.pipeline_mode<synchronous>, transform_indices = @transform_6, window_bounds = array<i64: 2, 16, 64>}]} {
    %c0 = arith.constant 0 : index
    %c0_0 = arith.constant 0 : index
    %0 = vector.load %arg1[%c0, %c0_0] : memref<16x256xf32, #tpu.memory_space<vmem>>, vector<16x256xf32>
    %cst = arith.constant 0.000000e+00 : f32
    %1 = vector.broadcast %cst : f32 to vector<16x64xf32>
    %cst_1 = arith.constant 0.000000e+00 : f32
    %2 = vector.broadcast %cst_1 : f32 to vector<16x64xf32>
    %c0_2 = arith.constant 0 : index
    %c0_3 = arith.constant 0 : index
    %c0_4 = arith.constant 0 : index
    %3 = vector.load %arg2[%c0_2, %c0_3, %c0_4] : memref<9x256x64xf32, #tpu.memory_space<vmem>>, vector<1x256x64xf32>
    %4 = vector.shape_cast %3 : vector<1x256x64xf32> to vector<256x64xf32>
    %cst_5 = arith.constant dense<0.000000e+00> : vector<16x64xf32>
    %5 = tpu.matmul %0, %4, %cst_5 {dimension_numbers = #tpu.dot_dimension_numbers<[1], [0], [0], [1], [0, 0, 1, 1], [], []>, precision = #tpu.contract_precision<fp32>} : vector<16x256xf32>, vector<256x64xf32>, vector<16x64xf32> -> vector<16x64xf32>
    %c0_6 = arith.constant 0 : index
    %c0_7 = arith.constant 0 : index
    %c0_8 = arith.constant 0 : index
    %6 = vector.load %arg3[%c0_6, %c0_7, %c0_8] : memref<9x16x8xf32, #tpu.memory_space<vmem>>, vector<1x16x8xf32>
    %7 = vector.shape_cast %6 : vector<1x16x8xf32> to vector<16x8xf32>
    %8 = vector.extract_strided_slice %5 {offsets = [0, 0], sizes = [8, 64], strides = [1, 1]} : vector<16x64xf32> to vector<8x64xf32>
    %cst_9 = arith.constant dense<0.000000e+00> : vector<16x64xf32>
    %9 = tpu.matmul %7, %8, %cst_9 {dimension_numbers = #tpu.dot_dimension_numbers<[1], [0], [0], [1], [0, 0, 1, 1], [], []>, precision = #tpu.contract_precision<fp32>} : vector<16x8xf32>, vector<8x64xf32>, vector<16x64xf32> -> vector<16x64xf32>
    %10 = arith.addf %1, %9 : vector<16x64xf32>
    %11 = vector.extract_strided_slice %5 {offsets = [8, 0], sizes = [8, 64], strides = [1, 1]} : vector<16x64xf32> to vector<8x64xf32>
    %cst_10 = arith.constant dense<0.000000e+00> : vector<16x64xf32>
    %12 = tpu.matmul %7, %11, %cst_10 {dimension_numbers = #tpu.dot_dimension_numbers<[1], [0], [0], [1], [0, 0, 1, 1], [], []>, precision = #tpu.contract_precision<fp32>} : vector<16x8xf32>, vector<8x64xf32>, vector<16x64xf32> -> vector<16x64xf32>
    %13 = arith.addf %2, %12 : vector<16x64xf32>
    %c1 = arith.constant 1 : index
    %c0_11 = arith.constant 0 : index
    %c0_12 = arith.constant 0 : index
    %14 = vector.load %arg2[%c1, %c0_11, %c0_12] : memref<9x256x64xf32, #tpu.memory_space<vmem>>, vector<1x256x64xf32>
    %15 = vector.shape_cast %14 : vector<1x256x64xf32> to vector<256x64xf32>
    %cst_13 = arith.constant dense<0.000000e+00> : vector<16x64xf32>
    %16 = tpu.matmul %0, %15, %cst_13 {dimension_numbers = #tpu.dot_dimension_numbers<[1], [0], [0], [1], [0, 0, 1, 1], [], []>, precision = #tpu.contract_precision<fp32>} : vector<16x256xf32>, vector<256x64xf32>, vector<16x64xf32> -> vector<16x64xf32>
    %c1_14 = arith.constant 1 : index
    %c0_15 = arith.constant 0 : index
    %c0_16 = arith.constant 0 : index
    %17 = vector.load %arg3[%c1_14, %c0_15, %c0_16] : memref<9x16x8xf32, #tpu.memory_space<vmem>>, vector<1x16x8xf32>
    %18 = vector.shape_cast %17 : vector<1x16x8xf32> to vector<16x8xf32>
    %19 = vector.extract_strided_slice %16 {offsets = [0, 0], sizes = [8, 64], strides = [1, 1]} : vector<16x64xf32> to vector<8x64xf32>
    %cst_17 = arith.constant dense<0.000000e+00> : vector<16x64xf32>
    %20 = tpu.matmul %18, %19, %cst_17 {dimension_numbers = #tpu.dot_dimension_numbers<[1], [0], [0], [1], [0, 0, 1, 1], [], []>, precision = #tpu.contract_precision<fp32>} : vector<16x8xf32>, vector<8x64xf32>, vector<16x64xf32> -> vector<16x64xf32>
    %21 = arith.addf %10, %20 : vector<16x64xf32>
    %22 = vector.extract_strided_slice %16 {offsets = [8, 0], sizes = [8, 64], strides = [1, 1]} : vector<16x64xf32> to vector<8x64xf32>
    %cst_18 = arith.constant dense<0.000000e+00> : vector<16x64xf32>
    %23 = tpu.matmul %18, %22, %cst_18 {dimension_numbers = #tpu.dot_dimension_numbers<[1], [0], [0], [1], [0, 0, 1, 1], [], []>, precision = #tpu.contract_precision<fp32>} : vector<16x8xf32>, vector<8x64xf32>, vector<16x64xf32> -> vector<16x64xf32>
    %24 = arith.addf %13, %23 : vector<16x64xf32>
    %c2 = arith.constant 2 : index
    %c0_19 = arith.constant 0 : index
    %c0_20 = arith.constant 0 : index
    %25 = vector.load %arg2[%c2, %c0_19, %c0_20] : memref<9x256x64xf32, #tpu.memory_space<vmem>>, vector<1x256x64xf32>
    %26 = vector.shape_cast %25 : vector<1x256x64xf32> to vector<256x64xf32>
    %cst_21 = arith.constant dense<0.000000e+00> : vector<16x64xf32>
    %27 = tpu.matmul %0, %26, %cst_21 {dimension_numbers = #tpu.dot_dimension_numbers<[1], [0], [0], [1], [0, 0, 1, 1], [], []>, precision = #tpu.contract_precision<fp32>} : vector<16x256xf32>, vector<256x64xf32>, vector<16x64xf32> -> vector<16x64xf32>
    %c2_22 = arith.constant 2 : index
    %c0_23 = arith.constant 0 : index
    %c0_24 = arith.constant 0 : index
    %28 = vector.load %arg3[%c2_22, %c0_23, %c0_24] : memref<9x16x8xf32, #tpu.memory_space<vmem>>, vector<1x16x8xf32>
    %29 = vector.shape_cast %28 : vector<1x16x8xf32> to vector<16x8xf32>
    %30 = vector.extract_strided_slice %27 {offsets = [0, 0], sizes = [8, 64], strides = [1, 1]} : vector<16x64xf32> to vector<8x64xf32>
    %cst_25 = arith.constant dense<0.000000e+00> : vector<16x64xf32>
    %31 = tpu.matmul %29, %30, %cst_25 {dimension_numbers = #tpu.dot_dimension_numbers<[1], [0], [0], [1], [0, 0, 1, 1], [], []>, precision = #tpu.contract_precision<fp32>} : vector<16x8xf32>, vector<8x64xf32>, vector<16x64xf32> -> vector<16x64xf32>
    %32 = arith.addf %21, %31 : vector<16x64xf32>
    %33 = vector.extract_strided_slice %27 {offsets = [8, 0], sizes = [8, 64], strides = [1, 1]} : vector<16x64xf32> to vector<8x64xf32>
    %cst_26 = arith.constant dense<0.000000e+00> : vector<16x64xf32>
    %34 = tpu.matmul %29, %33, %cst_26 {dimension_numbers = #tpu.dot_dimension_numbers<[1], [0], [0], [1], [0, 0, 1, 1], [], []>, precision = #tpu.contract_precision<fp32>} : vector<16x8xf32>, vector<8x64xf32>, vector<16x64xf32> -> vector<16x64xf32>
    %35 = arith.addf %24, %34 : vector<16x64xf32>
    %c3 = arith.constant 3 : index
    %c0_27 = arith.constant 0 : index
    %c0_28 = arith.constant 0 : index
    %36 = vector.load %arg2[%c3, %c0_27, %c0_28] : memref<9x256x64xf32, #tpu.memory_space<vmem>>, vector<1x256x64xf32>
    %37 = vector.shape_cast %36 : vector<1x256x64xf32> to vector<256x64xf32>
    %cst_29 = arith.constant dense<0.000000e+00> : vector<16x64xf32>
    %38 = tpu.matmul %0, %37, %cst_29 {dimension_numbers = #tpu.dot_dimension_numbers<[1], [0], [0], [1], [0, 0, 1, 1], [], []>, precision = #tpu.contract_precision<fp32>} : vector<16x256xf32>, vector<256x64xf32>, vector<16x64xf32> -> vector<16x64xf32>
    %c3_30 = arith.constant 3 : index
    %c0_31 = arith.constant 0 : index
    %c0_32 = arith.constant 0 : index
    %39 = vector.load %arg3[%c3_30, %c0_31, %c0_32] : memref<9x16x8xf32, #tpu.memory_space<vmem>>, vector<1x16x8xf32>
    %40 = vector.shape_cast %39 : vector<1x16x8xf32> to vector<16x8xf32>
    %41 = vector.extract_strided_slice %38 {offsets = [0, 0], sizes = [8, 64], strides = [1, 1]} : vector<16x64xf32> to vector<8x64xf32>
    %cst_33 = arith.constant dense<0.000000e+00> : vector<16x64xf32>
    %42 = tpu.matmul %40, %41, %cst_33 {dimension_numbers = #tpu.dot_dimension_numbers<[1], [0], [0], [1], [0, 0, 1, 1], [], []>, precision = #tpu.contract_precision<fp32>} : vector<16x8xf32>, vector<8x64xf32>, vector<16x64xf32> -> vector<16x64xf32>
    %43 = arith.addf %32, %42 : vector<16x64xf32>
    %44 = vector.extract_strided_slice %38 {offsets = [8, 0], sizes = [8, 64], strides = [1, 1]} : vector<16x64xf32> to vector<8x64xf32>
    %cst_34 = arith.constant dense<0.000000e+00> : vector<16x64xf32>
    %45 = tpu.matmul %40, %44, %cst_34 {dimension_numbers = #tpu.dot_dimension_numbers<[1], [0], [0], [1], [0, 0, 1, 1], [], []>, precision = #tpu.contract_precision<fp32>} : vector<16x8xf32>, vector<8x64xf32>, vector<16x64xf32> -> vector<16x64xf32>
    %46 = arith.addf %35, %45 : vector<16x64xf32>
    %c4 = arith.constant 4 : index
    %c0_35 = arith.constant 0 : index
    %c0_36 = arith.constant 0 : index
    %47 = vector.load %arg2[%c4, %c0_35, %c0_36] : memref<9x256x64xf32, #tpu.memory_space<vmem>>, vector<1x256x64xf32>
    %48 = vector.shape_cast %47 : vector<1x256x64xf32> to vector<256x64xf32>
    %cst_37 = arith.constant dense<0.000000e+00> : vector<16x64xf32>
    %49 = tpu.matmul %0, %48, %cst_37 {dimension_numbers = #tpu.dot_dimension_numbers<[1], [0], [0], [1], [0, 0, 1, 1], [], []>, precision = #tpu.contract_precision<fp32>} : vector<16x256xf32>, vector<256x64xf32>, vector<16x64xf32> -> vector<16x64xf32>
    %c4_38 = arith.constant 4 : index
    %c0_39 = arith.constant 0 : index
    %c0_40 = arith.constant 0 : index
    %50 = vector.load %arg3[%c4_38, %c0_39, %c0_40] : memref<9x16x8xf32, #tpu.memory_space<vmem>>, vector<1x16x8xf32>
    %51 = vector.shape_cast %50 : vector<1x16x8xf32> to vector<16x8xf32>
    %52 = vector.extract_strided_slice %49 {offsets = [0, 0], sizes = [8, 64], strides = [1, 1]} : vector<16x64xf32> to vector<8x64xf32>
    %cst_41 = arith.constant dense<0.000000e+00> : vector<16x64xf32>
    %53 = tpu.matmul %51, %52, %cst_41 {dimension_numbers = #tpu.dot_dimension_numbers<[1], [0], [0], [1], [0, 0, 1, 1], [], []>, precision = #tpu.contract_precision<fp32>} : vector<16x8xf32>, vector<8x64xf32>, vector<16x64xf32> -> vector<16x64xf32>
    %54 = arith.addf %43, %53 : vector<16x64xf32>
    %55 = vector.extract_strided_slice %49 {offsets = [8, 0], sizes = [8, 64], strides = [1, 1]} : vector<16x64xf32> to vector<8x64xf32>
    %cst_42 = arith.constant dense<0.000000e+00> : vector<16x64xf32>
    %56 = tpu.matmul %51, %55, %cst_42 {dimension_numbers = #tpu.dot_dimension_numbers<[1], [0], [0], [1], [0, 0, 1, 1], [], []>, precision = #tpu.contract_precision<fp32>} : vector<16x8xf32>, vector<8x64xf32>, vector<16x64xf32> -> vector<16x64xf32>
    %57 = arith.addf %46, %56 : vector<16x64xf32>
    %c5 = arith.constant 5 : index
    %c0_43 = arith.constant 0 : index
    %c0_44 = arith.constant 0 : index
    %58 = vector.load %arg2[%c5, %c0_43, %c0_44] : memref<9x256x64xf32, #tpu.memory_space<vmem>>, vector<1x256x64xf32>
    %59 = vector.shape_cast %58 : vector<1x256x64xf32> to vector<256x64xf32>
    %cst_45 = arith.constant dense<0.000000e+00> : vector<16x64xf32>
    %60 = tpu.matmul %0, %59, %cst_45 {dimension_numbers = #tpu.dot_dimension_numbers<[1], [0], [0], [1], [0, 0, 1, 1], [], []>, precision = #tpu.contract_precision<fp32>} : vector<16x256xf32>, vector<256x64xf32>, vector<16x64xf32> -> vector<16x64xf32>
    %c5_46 = arith.constant 5 : index
    %c0_47 = arith.constant 0 : index
    %c0_48 = arith.constant 0 : index
    %61 = vector.load %arg3[%c5_46, %c0_47, %c0_48] : memref<9x16x8xf32, #tpu.memory_space<vmem>>, vector<1x16x8xf32>
    %62 = vector.shape_cast %61 : vector<1x16x8xf32> to vector<16x8xf32>
    %63 = vector.extract_strided_slice %60 {offsets = [0, 0], sizes = [8, 64], strides = [1, 1]} : vector<16x64xf32> to vector<8x64xf32>
    %cst_49 = arith.constant dense<0.000000e+00> : vector<16x64xf32>
    %64 = tpu.matmul %62, %63, %cst_49 {dimension_numbers = #tpu.dot_dimension_numbers<[1], [0], [0], [1], [0, 0, 1, 1], [], []>, precision = #tpu.contract_precision<fp32>} : vector<16x8xf32>, vector<8x64xf32>, vector<16x64xf32> -> vector<16x64xf32>
    %65 = arith.addf %54, %64 : vector<16x64xf32>
    %66 = vector.extract_strided_slice %60 {offsets = [8, 0], sizes = [8, 64], strides = [1, 1]} : vector<16x64xf32> to vector<8x64xf32>
    %cst_50 = arith.constant dense<0.000000e+00> : vector<16x64xf32>
    %67 = tpu.matmul %62, %66, %cst_50 {dimension_numbers = #tpu.dot_dimension_numbers<[1], [0], [0], [1], [0, 0, 1, 1], [], []>, precision = #tpu.contract_precision<fp32>} : vector<16x8xf32>, vector<8x64xf32>, vector<16x64xf32> -> vector<16x64xf32>
    %68 = arith.addf %57, %67 : vector<16x64xf32>
    %c6 = arith.constant 6 : index
    %c0_51 = arith.constant 0 : index
    %c0_52 = arith.constant 0 : index
    %69 = vector.load %arg2[%c6, %c0_51, %c0_52] : memref<9x256x64xf32, #tpu.memory_space<vmem>>, vector<1x256x64xf32>
    %70 = vector.shape_cast %69 : vector<1x256x64xf32> to vector<256x64xf32>
    %cst_53 = arith.constant dense<0.000000e+00> : vector<16x64xf32>
    %71 = tpu.matmul %0, %70, %cst_53 {dimension_numbers = #tpu.dot_dimension_numbers<[1], [0], [0], [1], [0, 0, 1, 1], [], []>, precision = #tpu.contract_precision<fp32>} : vector<16x256xf32>, vector<256x64xf32>, vector<16x64xf32> -> vector<16x64xf32>
    %c6_54 = arith.constant 6 : index
    %c0_55 = arith.constant 0 : index
    %c0_56 = arith.constant 0 : index
    %72 = vector.load %arg3[%c6_54, %c0_55, %c0_56] : memref<9x16x8xf32, #tpu.memory_space<vmem>>, vector<1x16x8xf32>
    %73 = vector.shape_cast %72 : vector<1x16x8xf32> to vector<16x8xf32>
    %74 = vector.extract_strided_slice %71 {offsets = [0, 0], sizes = [8, 64], strides = [1, 1]} : vector<16x64xf32> to vector<8x64xf32>
    %cst_57 = arith.constant dense<0.000000e+00> : vector<16x64xf32>
    %75 = tpu.matmul %73, %74, %cst_57 {dimension_numbers = #tpu.dot_dimension_numbers<[1], [0], [0], [1], [0, 0, 1, 1], [], []>, precision = #tpu.contract_precision<fp32>} : vector<16x8xf32>, vector<8x64xf32>, vector<16x64xf32> -> vector<16x64xf32>
    %76 = arith.addf %65, %75 : vector<16x64xf32>
    %77 = vector.extract_strided_slice %71 {offsets = [8, 0], sizes = [8, 64], strides = [1, 1]} : vector<16x64xf32> to vector<8x64xf32>
    %cst_58 = arith.constant dense<0.000000e+00> : vector<16x64xf32>
    %78 = tpu.matmul %73, %77, %cst_58 {dimension_numbers = #tpu.dot_dimension_numbers<[1], [0], [0], [1], [0, 0, 1, 1], [], []>, precision = #tpu.contract_precision<fp32>} : vector<16x8xf32>, vector<8x64xf32>, vector<16x64xf32> -> vector<16x64xf32>
    %79 = arith.addf %68, %78 : vector<16x64xf32>
    %c7 = arith.constant 7 : index
    %c0_59 = arith.constant 0 : index
    %c0_60 = arith.constant 0 : index
    %80 = vector.load %arg2[%c7, %c0_59, %c0_60] : memref<9x256x64xf32, #tpu.memory_space<vmem>>, vector<1x256x64xf32>
    %81 = vector.shape_cast %80 : vector<1x256x64xf32> to vector<256x64xf32>
    %cst_61 = arith.constant dense<0.000000e+00> : vector<16x64xf32>
    %82 = tpu.matmul %0, %81, %cst_61 {dimension_numbers = #tpu.dot_dimension_numbers<[1], [0], [0], [1], [0, 0, 1, 1], [], []>, precision = #tpu.contract_precision<fp32>} : vector<16x256xf32>, vector<256x64xf32>, vector<16x64xf32> -> vector<16x64xf32>
    %c7_62 = arith.constant 7 : index
    %c0_63 = arith.constant 0 : index
    %c0_64 = arith.constant 0 : index
    %83 = vector.load %arg3[%c7_62, %c0_63, %c0_64] : memref<9x16x8xf32, #tpu.memory_space<vmem>>, vector<1x16x8xf32>
    %84 = vector.shape_cast %83 : vector<1x16x8xf32> to vector<16x8xf32>
    %85 = vector.extract_strided_slice %82 {offsets = [0, 0], sizes = [8, 64], strides = [1, 1]} : vector<16x64xf32> to vector<8x64xf32>
    %cst_65 = arith.constant dense<0.000000e+00> : vector<16x64xf32>
    %86 = tpu.matmul %84, %85, %cst_65 {dimension_numbers = #tpu.dot_dimension_numbers<[1], [0], [0], [1], [0, 0, 1, 1], [], []>, precision = #tpu.contract_precision<fp32>} : vector<16x8xf32>, vector<8x64xf32>, vector<16x64xf32> -> vector<16x64xf32>
    %87 = arith.addf %76, %86 : vector<16x64xf32>
    %88 = vector.extract_strided_slice %82 {offsets = [8, 0], sizes = [8, 64], strides = [1, 1]} : vector<16x64xf32> to vector<8x64xf32>
    %cst_66 = arith.constant dense<0.000000e+00> : vector<16x64xf32>
    %89 = tpu.matmul %84, %88, %cst_66 {dimension_numbers = #tpu.dot_dimension_numbers<[1], [0], [0], [1], [0, 0, 1, 1], [], []>, precision = #tpu.contract_precision<fp32>} : vector<16x8xf32>, vector<8x64xf32>, vector<16x64xf32> -> vector<16x64xf32>
    %90 = arith.addf %79, %89 : vector<16x64xf32>
    %c8 = arith.constant 8 : index
    %c0_67 = arith.constant 0 : index
    %c0_68 = arith.constant 0 : index
    %91 = vector.load %arg2[%c8, %c0_67, %c0_68] : memref<9x256x64xf32, #tpu.memory_space<vmem>>, vector<1x256x64xf32>
    %92 = vector.shape_cast %91 : vector<1x256x64xf32> to vector<256x64xf32>
    %cst_69 = arith.constant dense<0.000000e+00> : vector<16x64xf32>
    %93 = tpu.matmul %0, %92, %cst_69 {dimension_numbers = #tpu.dot_dimension_numbers<[1], [0], [0], [1], [0, 0, 1, 1], [], []>, precision = #tpu.contract_precision<fp32>} : vector<16x256xf32>, vector<256x64xf32>, vector<16x64xf32> -> vector<16x64xf32>
    %c8_70 = arith.constant 8 : index
    %c0_71 = arith.constant 0 : index
    %c0_72 = arith.constant 0 : index
    %94 = vector.load %arg3[%c8_70, %c0_71, %c0_72] : memref<9x16x8xf32, #tpu.memory_space<vmem>>, vector<1x16x8xf32>
    %95 = vector.shape_cast %94 : vector<1x16x8xf32> to vector<16x8xf32>
    %96 = vector.extract_strided_slice %93 {offsets = [0, 0], sizes = [8, 64], strides = [1, 1]} : vector<16x64xf32> to vector<8x64xf32>
    %cst_73 = arith.constant dense<0.000000e+00> : vector<16x64xf32>
    %97 = tpu.matmul %95, %96, %cst_73 {dimension_numbers = #tpu.dot_dimension_numbers<[1], [0], [0], [1], [0, 0, 1, 1], [], []>, precision = #tpu.contract_precision<fp32>} : vector<16x8xf32>, vector<8x64xf32>, vector<16x64xf32> -> vector<16x64xf32>
    %98 = arith.addf %87, %97 : vector<16x64xf32>
    %99 = vector.extract_strided_slice %93 {offsets = [8, 0], sizes = [8, 64], strides = [1, 1]} : vector<16x64xf32> to vector<8x64xf32>
    %cst_74 = arith.constant dense<0.000000e+00> : vector<16x64xf32>
    %100 = tpu.matmul %95, %99, %cst_74 {dimension_numbers = #tpu.dot_dimension_numbers<[1], [0], [0], [1], [0, 0, 1, 1], [], []>, precision = #tpu.contract_precision<fp32>} : vector<16x8xf32>, vector<8x64xf32>, vector<16x64xf32> -> vector<16x64xf32>
    %101 = arith.addf %90, %100 : vector<16x64xf32>
    %102 = tpu.concatenate %98, %101 in 1 : vector<16x64xf32>, vector<16x64xf32> -> vector<16x128xf32>
    %c0_75 = arith.constant 0 : index
    %c0_76 = arith.constant 0 : index
    %103 = vector.load %arg4[%c0_75, %c0_76] : memref<16x1xf32, #tpu.memory_space<vmem>>, vector<16x1xf32>
    %104 = vector.broadcast %103 : vector<16x1xf32> to vector<16x128xf32>
    %105 = arith.addf %102, %104 : vector<16x128xf32>
    %cst_77 = arith.constant dense<0.000000e+00> : vector<16xf32>
    %106 = vector.multi_reduction <add>, %105, %cst_77 [1] : vector<16x128xf32> to vector<16xf32>
    %107 = vector.shape_cast %106 : vector<16xf32> to vector<16x1xf32>
    %cst_78 = arith.constant 1.280000e+02 : f32
    %108 = vector.broadcast %cst_78 : f32 to vector<16x1xf32>
    %109 = arith.divf %107, %108 : vector<16x1xf32>
    %110 = vector.broadcast %109 : vector<16x1xf32> to vector<16x128xf32>
    %111 = arith.subf %105, %110 : vector<16x128xf32>
    %112 = vector.broadcast %109 : vector<16x1xf32> to vector<16x128xf32>
    %113 = arith.subf %105, %112 : vector<16x128xf32>
    %114 = arith.mulf %111, %113 : vector<16x128xf32>
    %cst_79 = arith.constant dense<0.000000e+00> : vector<16xf32>
    %115 = vector.multi_reduction <add>, %114, %cst_79 [1] : vector<16x128xf32> to vector<16xf32>
    %116 = vector.shape_cast %115 : vector<16xf32> to vector<16x1xf32>
    %cst_80 = arith.constant 1.280000e+02 : f32
    %117 = vector.broadcast %cst_80 : f32 to vector<16x1xf32>
    %118 = arith.divf %116, %117 : vector<16x1xf32>
    %119 = vector.broadcast %109 : vector<16x1xf32> to vector<16x128xf32>
    %120 = arith.subf %105, %119 : vector<16x128xf32>
    %cst_81 = arith.constant 9.99999974E-6 : f32
    %121 = vector.broadcast %cst_81 : f32 to vector<16x1xf32>
    %122 = arith.addf %118, %121 : vector<16x1xf32>
    %123 = math.rsqrt %122 : vector<16x1xf32>
    %124 = vector.broadcast %123 : vector<16x1xf32> to vector<16x128xf32>
    %125 = arith.mulf %120, %124 : vector<16x128xf32>
    %c0_82 = arith.constant 0 : index
    %c0_83 = arith.constant 0 : index
    %126 = vector.load %arg5[%c0_82, %c0_83] : memref<16x1xf32, #tpu.memory_space<vmem>>, vector<16x1xf32>
    %127 = vector.broadcast %126 : vector<16x1xf32> to vector<16x128xf32>
    %128 = arith.mulf %125, %127 : vector<16x128xf32>
    %c0_84 = arith.constant 0 : index
    %c0_85 = arith.constant 0 : index
    %129 = vector.load %arg6[%c0_84, %c0_85] : memref<16x1xf32, #tpu.memory_space<vmem>>, vector<16x1xf32>
    %130 = vector.broadcast %129 : vector<16x1xf32> to vector<16x128xf32>
    %131 = arith.addf %128, %130 : vector<16x128xf32>
    %cst_86 = arith.constant 0.000000e+00 : f32
    %132 = vector.broadcast %cst_86 : f32 to vector<16x128xf32>
    %133 = arith.cmpf oge, %131, %132 : vector<16x128xf32>
    %cst_87 = arith.constant 0.00999999977 : f32
    %134 = vector.broadcast %cst_87 : f32 to vector<16x128xf32>
    %135 = arith.mulf %134, %131 : vector<16x128xf32>
    %136 = arith.select %133, %131, %135 : vector<16x128xi1>, vector<16x128xf32>
    %137 = vector.extract_strided_slice %136 {offsets = [0, 0], sizes = [16, 64], strides = [1, 1]} : vector<16x128xf32> to vector<16x64xf32>
    %c0_88 = arith.constant 0 : index
    %c0_89 = arith.constant 0 : index
    %c0_90 = arith.constant 0 : index
    %138 = vector.load %arg7[%c0_88, %c0_89, %c0_90] : memref<2x16x64xf32, #tpu.memory_space<vmem>>, vector<1x16x64xf32>
    %139 = vector.shape_cast %138 : vector<1x16x64xf32> to vector<16x64xf32>
    %140 = vector.shape_cast %137 : vector<16x64xf32> to vector<1x16x64xf32>
    tpu.vector_store %arg7[%c0_88, %c0_89, %c0_90], %140 {strides = array<i32>} : memref<2x16x64xf32, #tpu.memory_space<vmem>>, vector<1x16x64xf32>,
    %141 = vector.extract_strided_slice %136 {offsets = [0, 64], sizes = [16, 64], strides = [1, 1]} : vector<16x128xf32> to vector<16x64xf32>
    %c1_91 = arith.constant 1 : index
    %c0_92 = arith.constant 0 : index
    %c0_93 = arith.constant 0 : index
    %142 = vector.load %arg7[%c1_91, %c0_92, %c0_93] : memref<2x16x64xf32, #tpu.memory_space<vmem>>, vector<1x16x64xf32>
    %143 = vector.shape_cast %142 : vector<1x16x64xf32> to vector<16x64xf32>
    %144 = vector.shape_cast %141 : vector<16x64xf32> to vector<1x16x64xf32>
    tpu.vector_store %arg7[%c1_91, %c0_92, %c0_93], %144 {strides = array<i32>} : memref<2x16x64xf32, #tpu.memory_space<vmem>>, vector<1x16x64xf32>,
    return
  }
  func.func @transform_0(%arg0: i32) -> (i32, i32) {
    %c0_i32 = arith.constant 0 : i32
    %c0_i32_0 = arith.constant 0 : i32
    %c0_i32_1 = arith.constant 0 : i32
    return %c0_i32, %c0_i32_0 : i32, i32
  }
  func.func @transform_1(%arg0: i32) -> (i32, i32, i32) {
    %c0_i32 = arith.constant 0 : i32
    %c0_i32_0 = arith.constant 0 : i32
    %c0_i32_1 = arith.constant 0 : i32
    %c0_i32_2 = arith.constant 0 : i32
    return %c0_i32, %c0_i32_0, %c0_i32_1 : i32, i32, i32
  }
  func.func @transform_2(%arg0: i32) -> (i32, i32, i32) {
    %c0_i32 = arith.constant 0 : i32
    %c0_i32_0 = arith.constant 0 : i32
    %c0_i32_1 = arith.constant 0 : i32
    %c0_i32_2 = arith.constant 0 : i32
    return %c0_i32, %c0_i32_0, %c0_i32_1 : i32, i32, i32
  }
  func.func @transform_3(%arg0: i32) -> (i32, i32) {
    %c0_i32 = arith.constant 0 : i32
    %c0_i32_0 = arith.constant 0 : i32
    %c0_i32_1 = arith.constant 0 : i32
    return %c0_i32, %c0_i32_0 : i32, i32
  }
  func.func @transform_4(%arg0: i32) -> (i32, i32) {
    %c0_i32 = arith.constant 0 : i32
    %c0_i32_0 = arith.constant 0 : i32
    %c0_i32_1 = arith.constant 0 : i32
    return %c0_i32, %c0_i32_0 : i32, i32
  }
  func.func @transform_5(%arg0: i32) -> (i32, i32) {
    %c0_i32 = arith.constant 0 : i32
    %c0_i32_0 = arith.constant 0 : i32
    %c0_i32_1 = arith.constant 0 : i32
    return %c0_i32, %c0_i32_0 : i32, i32
  }
  func.func @transform_6(%arg0: i32) -> (i32, i32, i32) {
    %c0_i32 = arith.constant 0 : i32
    %c0_i32_0 = arith.constant 0 : i32
    %c0_i32_1 = arith.constant 0 : i32
    %c0_i32_2 = arith.constant 0 : i32
    return %c0_i32, %c0_i32_0, %c0_i32_1 : i32, i32, i32
  }
}

</mosaic_0001>

<bundles_post_ra>
// kernel: tpu_custom_call.1
= control target key start
LH: loop header
LB: loop body
LE: loop exit
PB: predicated region body
PF: predicated region fallthrough
CT: control target
= control target key end

     0   :  { %s30148_s0 = inlined_call_operand.vmem [shape: f32[16,256], index: 0, kind: input, shape index: {}]   ;;  %s30149_s1 = inlined_call_operand.vmem [shape: f32[9,256,64], index: 1, kind: input, shape index: {}]   ;;  %s30150_s2 = inlined_call_operand.vmem [shape: f32[9,16,8], index: 2, kind: input, shape index: {}]   ;;  %s30151_s3 = inlined_call_operand.vmem [shape: f32[16,1], index: 3, kind: input, shape index: {}]   ;;  %s30152_s4 = inlined_call_operand.vmem [shape: f32[16,1], index: 4, kind: input, shape index: {}]   ;;  %s30153_s5 = inlined_call_operand.vmem [shape: f32[16,1], index: 5, kind: input, shape index: {}]   ;;  %s30154_s6 = inlined_call_operand.hbm [shape: f32[2,16,64], index: 6, kind: output, shape index: {}]  }
   0x1   :  { %v44_v0 = vld [vmem:[%s30149_s1 + $0x80] sm:$0xff]  ;;  %v45_v1 = vld [vmem:[%s30149_s1 + $0x88] sm:$0xff]  ;;  %v46_v7 = vld [vmem:[%s30149_s1 + $0x90] sm:$0xff] }
   0x2   :  { %v28_v2 = vld [vmem:[%s30149_s1] sm:$0xff]  ;;  %v109_v3 = vand.u32 4294901760, %v44_v0  ;;  %v112_v4 = vand.u32 4294901760, %v45_v1  ;;  %v29_v5 = vld [vmem:[%s30149_s1 + $0x8] sm:$0xff]  ;;  %v47_v8 = vld [vmem:[%s30149_s1 + $0x98] sm:$0xff]  ;;  %v115_v10 = vand.u32 4294901760, %v46_v7 }
   0x3   :  { %v61_v6 = vand.u32 4294901760, %v28_v2  ;;  %v64_v9 = vand.u32 4294901760, %v29_v5  ;;  %v118_v11 = vand.u32 4294901760, %v47_v8  ;;  %v30_v12 = vld [vmem:[%s30149_s1 + $0x10] sm:$0xff]  ;;  %v31_v13 = vld [vmem:[%s30149_s1 + $0x18] sm:$0xff]  ;;  %v48_v18 = vld [vmem:[%s30149_s1 + $0xa0] sm:$0xff] }
   0x4   :  { %v22835_v14 = vpack.c.bf16 %v112_v4, %v109_v3  ;;  %v67_v16 = vand.u32 4294901760, %v30_v12  ;;  %v70_v17 = vand.u32 4294901760, %v31_v13  ;;  %v49_v19 = vld [vmem:[%s30149_s1 + $0xa8] sm:$0xff]  ;;  %v32_v23 = vld [vmem:[%s30149_s1 + $0x20] sm:$0xff]  ;;  %v22858_v25 = vsub.f32 %v46_v7, %v115_v10  ;;  %v50_v37 = vld [vmem:[%s30149_s1 + $0xb0] sm:$0xff] }
   0x5   :  { %v22837_v15 = vsub.f32 %v28_v2, %v61_v6  ;;  %v22845_v20 = vpack.c.bf16 %v64_v9, %v61_v6  ;;  %v22847_v21 = vsub.f32 %v29_v5, %v64_v9  ;;  %v22849_v22 = vpack.c.bf16 %v118_v11, %v115_v10  ;;  %v33_v24 = vld [vmem:[%s30149_s1 + $0x28] sm:$0xff]  ;;  %v51_v42 = vld [vmem:[%s30149_s1 + $0xb8] sm:$0xff]  ;;  %v34_v55 = vld [vmem:[%s30149_s1 + $0x30] sm:$0xff] }
   0x6   :  { %20797 = vmatprep.subr.bf16.mxu0 %v22835_v14  ;;  %v22860_v26 = vsub.f32 %v47_v8, %v118_v11  ;;  %v22862_v27 = vpack.c.bf16 %v70_v17, %v67_v16  ;;  %v22864_v28 = vsub.f32 %v30_v12, %v67_v16  ;;  %v121_v29 = vand.u32 4294901760, %v48_v18  ;;  %v35_v56 = vld [vmem:[%s30149_s1 + $0x38] sm:$0xff]  ;;  %v52_v5 = vld [vmem:[%s30149_s1 + $0xc0] sm:$0xff]  ;;  %v53_v6 = vld [vmem:[%s30149_s1 + $0xc8] sm:$0xff] }
   0x7   :  { %20799 = vmatpush3.bf16.msra.mxu0 %v22845_v20  ;;  %v124_v30 = vand.u32 4294901760, %v49_v19  ;;  %v22867_v31 = vsub.f32 %v44_v0, %v109_v3  ;;  %v22869_v32 = vsub.f32 %v45_v1, %v112_v4  ;;  %v73_v33 = vand.u32 4294901760, %v32_v23  ;;  %v36_v11 = vld [vmem:[%s30149_s1 + $0x40] sm:$0xff] }
   0x8   :  { %20801 = vmatprep.subr.bf16.mxu0 %v22849_v22  ;;  %v76_v34 = vand.u32 4294901760, %v33_v24  ;;  %v30171_v35 = vand.u32 4294901760, %v22837_v15  ;;  %v30170_v36 = vand.u32 4294901760, %v22847_v21  ;;  %v22877_v38 = vsub.f32 %v31_v13, %v70_v17 }
   0x9   :  { %v22879_v39 = vpack.c.bf16 %v124_v30, %v121_v29  ;;  %v22881_v40 = vsub.f32 %v48_v18, %v121_v29  ;;  %v30176_v41 = vand.u32 4294901760, %v22867_v31  ;;  %v22887_v43 = vsub.f32 %v49_v19, %v124_v30  ;;  %v37_v29 = vld [vmem:[%s30149_s1 + $0x48] sm:$0xff] }
   0xa   :  { %v30173_v44 = vand.u32 4294901760, %v22869_v32  ;;  %v22890_v45 = vpack.c.bf16 %v76_v34, %v73_v33  ;;  %v22892_v46 = vsub.f32 %v32_v23, %v73_v33  ;;  %v191_v48 = vsub.f32 %v22837_v15, %v30171_v35 }
   0xb   :  { %20803 = vmatpush3.bf16.msra.mxu0 %v22862_v27  ;;  %v303_v47 = vsub.f32 %v22867_v31, %v30176_v41  ;;  %v198_v49 = vsub.f32 %v22847_v21, %v30170_v36  ;;  %v127_v50 = vand.u32 4294901760, %v50_v37  ;;  %v130_v52 = vand.u32 4294901760, %v51_v42 }
   0xc   :  { %20805 = vmatprep.subr.bf16.mxu0 %v22879_v39  ;;  %v310_v51 = vsub.f32 %v22869_v32, %v30173_v44  ;;  %v30168_v53 = vand.u32 4294901760, %v22858_v25  ;;  %v30167_v54 = vand.u32 4294901760, %v22860_v26  ;;  %v22916_v58 = vsub.f32 %v33_v24, %v76_v34 }
   0xd   :  { %v304_v57 = vand.u32 4294901760, %v303_v47  ;;  %v192_v59 = vand.u32 4294901760, %v191_v48  ;;  %v199_v60 = vand.u32 4294901760, %v198_v49  ;;  %v22918_v62 = vpack.c.bf16 %v130_v52, %v127_v50 }
   0xe   :  { %v311_v61 = vand.u32 4294901760, %v310_v51  ;;  %v22920_v63 = vsub.f32 %v50_v37, %v127_v50  ;;  %v317_v0 = vsub.f32 %v22858_v25, %v30168_v53  ;;  %v324_v2 = vsub.f32 %v22860_v26, %v30167_v54 }
   0xf   :  { %20807 = vmatpush3.bf16.msra.mxu0 %v22890_v45  ;;  %v20830_v1 = vpack.c.bf16 %v199_v60, %v192_v59  ;;  %v79_v3 = vand.u32 4294901760, %v34_v55  ;;  %v82_v4 = vand.u32 4294901760, %v35_v56  ;;  %v30166_v9 = vand.u32 4294901760, %v22864_v28 }
  0x10   :  { %v20828_v7 = vpack.c.bf16 %v311_v61, %v304_v57  ;;  %20809 = vmatprep.subr.bf16.mxu0 %v22918_v62  ;;  %v318_v8 = vand.u32 4294901760, %v317_v0  ;;  %v30163_v10 = vand.u32 4294901760, %v22877_v38  ;;  %v22941_v12 = vsub.f32 %v51_v42, %v130_v52  ;;  %v55_v57 = vld [vmem:[%s30149_s1 + $0xd8] sm:$0xff] }
  0x11   :  { %v325_v13 = vand.u32 4294901760, %v324_v2  ;;  %v22943_v16 = vpack.c.bf16 %v82_v4, %v79_v3  ;;  %v22945_v17 = vsub.f32 %v34_v55, %v79_v3  ;;  %v205_v18 = vsub.f32 %v22864_v28, %v30166_v9 }
  0x12   :  { %20829 = vmatprep.subr.bf16.mxu1 %v20828_v7  ;;  %v212_v19 = vsub.f32 %v22877_v38, %v30163_v10  ;;  %v133_v23 = vand.u32 4294901760, %v52_v5  ;;  %v136_v24 = vand.u32 4294901760, %v53_v6  ;;  %v30161_v33 = vand.u32 4294901760, %v22881_v40 }
  0x13   :  { %20831 = vmatpush3.bf16.msra.mxu1 %v20830_v1  ;;  %v20832_v30 = vpack.c.bf16 %v325_v13, %v318_v8  ;;  %20811 = vmatpush3.bf16.msra.mxu0 %v22943_v16  ;;  %v30160_v34 = vand.u32 4294901760, %v22887_v43  ;;  %v85_v37 = vand.u32 4294901760, %v36_v11  ;;  %v22959_v42 = vsub.f32 %v35_v56, %v82_v4  ;;  %v54_v56 = vld [vmem:[%s30149_s1 + $0xd0] sm:$0xff] }
  0x14   :  { %v206_v47 = vand.u32 4294901760, %v205_v18  ;;  %v213_v48 = vand.u32 4294901760, %v212_v19  ;;  %v22961_v49 = vpack.c.bf16 %v136_v24, %v133_v23  ;;  %v22963_v50 = vsub.f32 %v52_v5, %v133_v23  ;;  %v38_v1 = vld [vmem:[%s30149_s1 + $0x50] sm:$0xff]  ;;  %v39_v18 = vld [vmem:[%s30149_s1 + $0x58] sm:$0xff] }
  0x15   :  { %20833 = vmatprep.subr.bf16.mxu1 %v20832_v30  ;;  %v331_v51 = vsub.f32 %v22881_v40, %v30161_v33  ;;  %v338_v52 = vsub.f32 %v22887_v43, %v30160_v34  ;;  %v88_v55 = vand.u32 4294901760, %v37_v29  ;;  %v22978_v60 = vsub.f32 %v53_v6, %v136_v24 }
  0x16   :  { %v20834_v59 = vpack.c.bf16 %v213_v48, %v206_v47  ;;  %20813 = vmatprep.subr.bf16.mxu0 %v22961_v49  ;;  %v30158_v61 = vand.u32 4294901760, %v22892_v46  ;;  %v30157_v0 = vand.u32 4294901760, %v22916_v58  ;;  %v22987_v5 = vsub.f32 %v36_v11, %v85_v37 }
  0x17   :  { %v332_v2 = vand.u32 4294901760, %v331_v51  ;;  %v339_v3 = vand.u32 4294901760, %v338_v52  ;;  %v22985_v4 = vpack.c.bf16 %v88_v55, %v85_v37  ;;  %v139_v8 = vand.u32 4294901760, %v54_v56 }
  0x18   :  { %20835 = vmatpush3.bf16.msra.mxu1 %v20834_v59  ;;  %v219_v6 = vsub.f32 %v22892_v46, %v30158_v61  ;;  %v226_v7 = vsub.f32 %v22916_v58, %v30157_v0  ;;  %v142_v13 = vand.u32 4294901760, %v55_v57 }
  0x19   :  { %11 = vsyncpa [#allocation3], 0  ;;  %v20836_v19 = vpack.c.bf16 %v339_v3, %v332_v2  ;;  %20815 = vmatpush3.bf16.msra.mxu0 %v22985_v4  ;;  %v30156_v11 = vand.u32 4294901760, %v22920_v63  ;;  %v30155_v23 = vand.u32 4294901760, %v22941_v12  ;;  %v91_v24 = vand.u32 4294901760, %v38_v1 }
  0x1a   :  { %v23001_v30 = vsub.f32 %v37_v29, %v88_v55  ;;  %v220_v37 = vand.u32 4294901760, %v219_v6  ;;  %v227_v47 = vand.u32 4294901760, %v226_v7  ;;  %v23003_v48 = vpack.c.bf16 %v142_v13, %v139_v8  ;;  %v56_v29 = vld [vmem:[%s30149_s1 + $0xe0] sm:$0xff]  ;;  %v57_v55 = vld [vmem:[%s30149_s1 + $0xe8] sm:$0xff] }
  0x1b   :  { %20837 = vmatprep.subr.bf16.mxu1 %v20836_v19  ;;  %v23005_v51 = vsub.f32 %v54_v56, %v139_v8  ;;  %v345_v52 = vsub.f32 %v22920_v63, %v30156_v11  ;;  %v352_v59 = vsub.f32 %v22941_v12, %v30155_v23  ;;  %v94_v2 = vand.u32 4294901760, %v39_v18  ;;  %v40_v8 = vld [vmem:[%s30149_s1 + $0x60] sm:$0xff] }
  0x1c   :  { %30767 = vst [vmem:[#allocation5_spill] sm:$0xff] %v23003_v48  ;;  %v20838_v3 = vpack.c.bf16 %v227_v47, %v220_v37  ;;  %20817 = vmatprep.subr.bf16.mxu0 %v23003_v48  ;;  %v23020_v56 = vsub.f32 %v55_v57, %v142_v13  ;;  %v30159_v6 = vand.u32 4294901760, %v22945_v17  ;;  %v30162_v7 = vand.u32 4294901760, %v22959_v42 }
  0x1d   :  { %v346_v19 = vand.u32 4294901760, %v345_v52  ;;  %v353_v23 = vand.u32 4294901760, %v352_v59  ;;  %v23027_v11 = vpack.c.bf16 %v94_v2, %v91_v24  ;;  %v23029_v0 = vsub.f32 %v38_v1, %v91_v24  ;;  %v41_v52 = vld [vmem:[%s30149_s1 + $0x68] sm:$0xff] }
  0x1e   :  { %20839 = vmatpush3.bf16.msra.mxu1 %v20838_v3  ;;  %v233_v57 = vsub.f32 %v22945_v17, %v30159_v6  ;;  %v240_v13 = vsub.f32 %v22959_v42, %v30162_v7  ;;  %v145_v37 = vand.u32 4294901760, %v56_v29  ;;  %v148_v47 = vand.u32 4294901760, %v57_v55 }
  0x1f   :  { %30768 = vst [vmem:[#allocation6_spill] sm:$0xff] %v23027_v11  ;;  %v20840_v59 = vpack.c.bf16 %v353_v23, %v346_v19  ;;  %20819 = vmatpush3.bf16.msra.mxu0 %v23027_v11  ;;  %v30165_v1 = vand.u32 4294901760, %v22963_v50  ;;  %v30164_v24 = vand.u32 4294901760, %v22978_v60  ;;  %v97_v3 = vand.u32 4294901760, %v40_v8 }
  0x20   :  { %v23043_v61 = vsub.f32 %v39_v18, %v94_v2  ;;  %v234_v6 = vand.u32 4294901760, %v233_v57  ;;  %v241_v34 = vand.u32 4294901760, %v240_v13  ;;  %v23045_v33 = vpack.c.bf16 %v148_v47, %v145_v37  ;;  %v58_v18 = vld [vmem:[%s30149_s1 + $0xf0] sm:$0xff]  ;;  %v59_v2 = vld [vmem:[%s30149_s1 + $0xf8] sm:$0xff] }
  0x21   :  { %20841 = vmatprep.subr.bf16.mxu1 %v20840_v59  ;;  %v23047_v7 = vsub.f32 %v56_v29, %v145_v37  ;;  %v359_v23 = vsub.f32 %v22963_v50, %v30165_v1  ;;  %v366_v19 = vsub.f32 %v22978_v60, %v30164_v24  ;;  %v100_v10 = vand.u32 4294901760, %v41_v52  ;;  %v42_v59 = vld [vmem:[%s30149_s1 + $0x70] sm:$0xff] }
  0x22   :  { %30769 = vst [vmem:[#allocation7_spill] sm:$0xff] %v23045_v33  ;;  %v20842_v57 = vpack.c.bf16 %v241_v34, %v234_v6  ;;  %20821 = vmatprep.subr.bf16.mxu0 %v23045_v33  ;;  %v23062_v29 = vsub.f32 %v57_v55, %v148_v47  ;;  %v30169_v13 = vand.u32 4294901760, %v22987_v5  ;;  %v30172_v37 = vand.u32 4294901760, %v23001_v30 }
  0x23   :  { %v360_v24 = vand.u32 4294901760, %v359_v23  ;;  %v367_v1 = vand.u32 4294901760, %v366_v19  ;;  %v23069_v9 = vpack.c.bf16 %v100_v10, %v97_v3  ;;  %v23071_v54 = vsub.f32 %v40_v8, %v97_v3  ;;  %v43_v23 = vld [vmem:[%s30149_s1 + $0x78] sm:$0xff] }
  0x24   :  { %20843 = vmatpush3.bf16.msra.mxu1 %v20842_v57  ;;  %v247_v34 = vsub.f32 %v22987_v5, %v30169_v13  ;;  %v254_v55 = vsub.f32 %v23001_v30, %v30172_v37  ;;  %v151_v6 = vand.u32 4294901760, %v58_v18  ;;  %v154_v47 = vand.u32 4294901760, %v59_v2 }
  0x25   :  { %30770 = vst [vmem:[#allocation8_spill] sm:$0xff] %v23069_v9  ;;  %v20844_v19 = vpack.c.bf16 %v367_v1, %v360_v24  ;;  %20823 = vmatpush3.bf16.msra.mxu0 %v23069_v9  ;;  %v30175_v8 = vand.u32 4294901760, %v23005_v51  ;;  %v30174_v3 = vand.u32 4294901760, %v23020_v56  ;;  %v103_v57 = vand.u32 4294901760, %v42_v59 }
  0x26   :  { %v23085_v53 = vsub.f32 %v41_v52, %v100_v10  ;;  %v248_v13 = vand.u32 4294901760, %v247_v34  ;;  %v255_v36 = vand.u32 4294901760, %v254_v55  ;;  %v23087_v35 = vpack.c.bf16 %v154_v47, %v151_v6  ;;  %v25_v10 = vld [vmem:[%s30148_s0 + $0x8] sm:$0xff] }
  0x27   :  { %20845 = vmatprep.subr.bf16.mxu1 %v20844_v19  ;;  %v23089_v37 = vsub.f32 %v58_v18, %v151_v6  ;;  %v373_v1 = vsub.f32 %v23005_v51, %v30175_v8  ;;  %v380_v24 = vsub.f32 %v23020_v56, %v30174_v3  ;;  %v106_v44 = vand.u32 4294901760, %v43_v23  ;;  %v24_v6 = vld [vmem:[%s30148_s0] sm:$0xff] }
  0x28   :  { %30771 = vst [vmem:[#allocation9_spill] sm:$0xff] %v23087_v35  ;;  %v20846_v52 = vpack.c.bf16 %v255_v36, %v248_v13  ;;  %20825 = vmatprep.subr.bf16.mxu0 %v23087_v35  ;;  %v23101_v34 = vsub.f32 %v59_v2, %v154_v47  ;;  %v30179_v18 = vand.u32 4294901760, %v23029_v0  ;;  %v30180_v55 = vand.u32 4294901760, %v23043_v61 }
  0x29   :  { %v374_v19 = vand.u32 4294901760, %v373_v1  ;;  %v381_v3 = vand.u32 4294901760, %v380_v24  ;;  %v23108_v8 = vpack.c.bf16 %v106_v44, %v103_v57  ;;  %v23110_v41 = vsub.f32 %v42_v59, %v103_v57 }
  0x2a   :  { %20847 = vmatpush3.bf16.msra.mxu1 %v20846_v52  ;;  %v261_v36 = vsub.f32 %v23029_v0, %v30179_v18  ;;  %v268_v2 = vsub.f32 %v23043_v61, %v30180_v55  ;;  %v23118_v13 = vand.u32 4294901760, %v25_v10  ;;  %v30183_v47 = vand.u32 4294901760, %v23047_v7 }
  0x2b   :  { %30772 = vst [vmem:[#allocation10_spill] sm:$0xff] %v23108_v8  ;;  %v20848_v35 = vpack.c.bf16 %v381_v3, %v374_v19  ;;  %20827 = vmatpush3.bf16.msra.mxu0 %v23108_v8  ;;  %v30189_v1 = vand.u32 4294901760, %v23062_v29  ;;  %v20860_v59 = vpack.c.bf16 %v22869_v32, %v22867_v31  ;;  %v23125_v57 = vand.u32 4294901760, %v24_v6 }
  0x2c   :  { %30773 = vst [vmem:[#allocation11_spill] sm:$0xff] %v23118_v13  ;;  %v262_v24 = vand.u32 4294901760, %v261_v36  ;;  %v269_v52 = vand.u32 4294901760, %v268_v2  ;;  %v23128_v18 = vsub.f32 %v25_v10, %v23118_v13  ;;  %v387_v55 = vsub.f32 %v23047_v7, %v30183_v47  ;;  %412 = vmatprep.mubr.f32.mxu1 %v23118_v13 }
  0x2d   :  { %30774 = vst [vmem:[#allocation12_spill] sm:$0xff] %v23125_v57  ;;  %20849 = vmatprep.subr.bf16.mxu1 %v20848_v35  ;;  %v394_v3 = vsub.f32 %v23062_v29, %v30189_v1  ;;  %20861 = vmatprep.subr.bf16.mxu0 %v20860_v59  ;;  %v23138_v19 = vsub.f32 %v24_v6, %v23125_v57  ;;  %v30188_v36 = vand.u32 4294901760, %v23071_v54  ;;  %v30192_v10 = vand.u32 4294901760, %v23085_v53 }
  0x2e   :  { %30775 = vst [vmem:[#allocation13_spill] sm:$0xff] %v23128_v18  ;;  %v23142_v2 = vsub.f32 %v43_v23, %v106_v44  ;;  %v20850_v8 = vpack.c.bf16 %v269_v52, %v262_v24  ;;  %v23145_v47 = vand.u32 4294901760, %v23128_v18  ;;  %v388_v13 = vand.u32 4294901760, %v387_v55 }
  0x2f   :  { %30776 = vst [vmem:[#allocation14_spill] sm:$0xff] %v23138_v19  ;;  %v395_v35 = vand.u32 4294901760, %v394_v3  ;;  %v23148_v9 = vand.u32 4294901760, %v23138_v19  ;;  %v275_v6 = vsub.f32 %v23071_v54, %v30188_v36  ;;  %v282_v59 = vsub.f32 %v23085_v53, %v30192_v10 }
  0x30   :  { %30777 = vst [vmem:[#allocation15_spill] sm:$0xff] %v23145_v47  ;;  %20851 = vmatpush3.bf16.msra.mxu1 %v20850_v8  ;;  %v159_v44 = vsub.f32 %v23128_v18, %v23145_v47  ;;  %v20862_v23 = vpack.c.bf16 %v22847_v21, %v22837_v15  ;;  %v30195_v55 = vand.u32 4294901760, %v23089_v37  ;;  %v30198_v24 = vand.u32 4294901760, %v23101_v34 }
  0x31   :  { %30778 = vst [vmem:[#allocation16_spill] sm:$0xff] %v23148_v9  ;;  %v20852_v52 = vpack.c.bf16 %v395_v35, %v388_v13  ;;  %v165_v3 = vsub.f32 %v23138_v19, %v23148_v9  ;;  %v276_v36 = vand.u32 4294901760, %v275_v6  ;;  %v283_v1 = vand.u32 4294901760, %v282_v59  ;;  %v27_v13 = vld [vmem:[%s30148_s0 + $0x18] sm:$0xff] }
  0x32   :  { %v23164_v33 = vand.u32 4294901760, %v159_v44  ;;  %v401_v8 = vsub.f32 %v23089_v37, %v30195_v55  ;;  %v408_v10 = vsub.f32 %v23101_v34, %v30198_v24  ;;  %v30199_v11 = vand.u32 4294901760, %v23110_v41 }
  0x33   :  { %20853 = vmatprep.subr.bf16.mxu1 %v20852_v52  ;;  %v23176_v35 = vand.u32 4294901760, %v165_v3  ;;  %v20854_v6 = vpack.c.bf16 %v283_v1, %v276_v36  ;;  %v20864_v59 = vpack.c.bf16 %v22860_v26, %v22858_v25  ;;  %v30200_v44 = vand.u32 4294901760, %v23142_v2  ;;  %v26_v52 = vld [vmem:[%s30148_s0 + $0x10] sm:$0xff] }
  0x34   :  { %30779 = vst [vmem:[#allocation17_spill] sm:$0xff] %v23164_v33  ;;  %161 = vmatprep.mubr.f32.mxu0 %v23164_v33  ;;  %v402_v55 = vand.u32 4294901760, %v401_v8  ;;  %v409_v9 = vand.u32 4294901760, %v408_v10  ;;  %v289_v24 = vsub.f32 %v23110_v41, %v30199_v11  ;;  %v23189_v36 = vand.u32 4294901760, %v27_v13 }
  0x35   :  { %30780 = vst [vmem:[#allocation18_spill] sm:$0xff] %v23176_v35  ;;  %167 = vmatmul.mubr.f32.vlgmr.msra.gmra.mrb[0].mxu0 %v23176_v35  ;;  %20855 = vmatpush3.bf16.msra.mxu1 %v20854_v6  ;;  %v296_v1 = vsub.f32 %v23142_v2, %v30200_v44  ;;  %v20866_v8 = vpack.c.bf16 %v22877_v38, %v22864_v28  ;;  %v23201_v35 = vand.u32 4294901760, %v26_v52  ;;  %v30790_v19 = vand.u32 4294901760, %v22858_v25 }
  0x36   :  { %30781 = vst [vmem:[#allocation19_spill] sm:$0xff] %v23189_v36  ;;  %20863 = vmatpush3.bf16.msra.mxu0 %v20862_v23  ;;  %v20856_v3 = vpack.c.bf16 %v409_v9, %v402_v55  ;;  %v290_v10 = vand.u32 4294901760, %v289_v24  ;;  %v20868_v6 = vpack.c.bf16 %v22887_v43, %v22881_v40  ;;  %v23199_v44 = vsub.f32 %v27_v13, %v23189_v36 }
  0x37   :  { %20865 = vmatprep.subr.bf16.mxu0 %v20864_v59  ;;  %v297_v11 = vand.u32 4294901760, %v296_v1  ;;  %30783 = vst [vmem:[#allocation21_spill] sm:$0xff] %v23201_v35  ;;  %v20870_v23 = vpack.c.bf16 %v22916_v58, %v22892_v46  ;;  %v20872_v9 = vpack.c.bf16 %v22941_v12, %v22920_v63  ;;  %v30784_v55 = vand.u32 4294901760, %v22867_v31 }
  0x38   :  { %20857 = vmatprep.subr.bf16.mxu1 %v20856_v3  ;;  %30782 = vst [vmem:[#allocation20_spill] sm:$0xff] %v23199_v44  ;;  %v30785_v24 = vand.u32 4294901760, %v22869_v32  ;;  %v23212_v1 = vand.u32 4294901760, %v23199_v44  ;;  %v23215_v13 = vsub.f32 %v26_v52, %v23201_v35  ;;  %v30789_v3 = vand.u32 4294901760, %v22847_v21 }
  0x39   :  { %v20858_v33 = vpack.c.bf16 %v297_v11, %v290_v10  ;;  %v30788_v11 = vand.u32 4294901760, %v22837_v15  ;;  %v30791_v48 = vand.u32 4294901760, %v22860_v26  ;;  %v30792_v32 = vand.u32 4294901760, %v22864_v28 }
  0x3a   :  { %v20924_v59 = vpack.c.bf16 %v30785_v24, %v30784_v55  ;;  %20867 = vmatpush3.bf16.msra.mxu0 %v20866_v8  ;;  %30786 = vst [vmem:[#allocation22_spill] sm:$0xff] %v23212_v1  ;;  %30787 = vst [vmem:[#allocation23_spill] sm:$0xff] %v23215_v13  ;;  %v30793_v8 = vand.u32 4294901760, %v22877_v38  ;;  %v30794_v52 = vand.u32 4294901760, %v22881_v40  ;;  %v30795_v15 = vand.u32 4294901760, %v22887_v43 }
  0x3b   :  { %v20926_v10 = vpack.c.bf16 %v30789_v3, %v30788_v11  ;;  %v20928_v31 = vpack.c.bf16 %v30791_v48, %v30790_v19  ;;  %20859 = vmatpush3.bf16.msra.mxu1 %v20858_v33  ;;  %20869 = vmatprep.subr.bf16.mxu0 %v20868_v6  ;;  %v30796_v21 = vand.u32 4294901760, %v22892_v46  ;;  %v30797_v25 = vand.u32 4294901760, %v22916_v58 }
  0x3c   :  { %v23229_v55 = vpack.c.bf16 %v30793_v8, %v30792_v32  ;;  %v23235_v24 = vpack.c.bf16 %v30795_v15, %v30794_v52  ;;  %20893 = vmatprep.subr.bf16.mxu1 %v22835_v14  ;;  %v174_v28 = vsub.f32 %v23199_v44, %v23212_v1  ;;  %v23247_v38 = vand.u32 4294901760, %v23215_v13 }
  0x3d   :  { %v23241_v26 = vpack.c.bf16 %v30797_v25, %v30796_v21  ;;  %v30799_v40 = vand.u32 4294901760, %v22920_v63  ;;  %v30800_v43 = vand.u32 4294901760, %v22941_v12  ;;  %v30801_v46 = vand.u32 4294901760, %v22945_v17  ;;  %v30810_v25 = vld [vmem:[#allocation6_spill] sm:$0xff] }
  0x3e   :  { %30798 = vst [vmem:[#allocation24_spill] sm:$0xff] %v23247_v38  ;;  %v30802_v58 = vand.u32 4294901760, %v22959_v42  ;;  %v30803_v19 = vand.u32 4294901760, %v22963_v50  ;;  %v30804_v6 = vand.u32 4294901760, %v22978_v60  ;;  %v30805_v3 = vand.u32 4294901760, %v22987_v5  ;;  %414 = vmatmul.mubr.f32.vlgmr.msra.gmra.mrb[0].mxu1 %v23125_v57  ;;  %20871 = vmatpush3.bf16.msra.mxu0 %v20870_v23 }
  0x3f   :  { %v23253_v33 = vpack.c.bf16 %v30800_v43, %v30799_v40  ;;  %v30806_v63 = vand.u32 4294901760, %v23001_v30  ;;  %v20874_v12 = vpack.c.bf16 %v22959_v42, %v22945_v17  ;;  %v23276_v8 = vand.u32 4294901760, %v174_v28  ;;  %20895 = vmatpush3.bf16.msra.mxu1 %v22845_v20  ;;  %20873 = vmatprep.subr.bf16.mxu0 %v20872_v9  ;;  %v30809_v9 = vld [vmem:[#allocation5_spill] sm:$0xff]  ;;  %v30811_v28 = vld [vmem:[#allocation7_spill] sm:$0xff]  ;;  %v30812_v40 = vld [vmem:[#allocation14_spill] sm:$0xff] }
  0x40   :  { %v23259_v48 = vpack.c.bf16 %v30802_v58, %v30801_v46  ;;  %v23265_v11 = vpack.c.bf16 %v30804_v6, %v30803_v19  ;;  %v180_v52 = vsub.f32 %v23215_v13, %v23247_v38  ;;  %v20876_v15 = vpack.c.bf16 %v22978_v60, %v22963_v50  ;;  %20897 = vmatprep.subr.bf16.mxu1 %v22849_v22  ;;  %v17624_v43 = vld [vmem:[%s30149_s1 + $0x180] sm:$0xff]  ;;  %v17625_v46 = vld [vmem:[%s30149_s1 + $0x188] sm:$0xff]  ;;  %v30813_v58 = vld [vmem:[#allocation8_spill] sm:$0xff] }
  0x41   :  { %v23271_v32 = vpack.c.bf16 %v30806_v63, %v30805_v3  ;;  %30807 = vst [vmem:[#allocation25_spill] sm:$0xff] %v23276_v8  ;;  %176 = vmatprep.mubr.f32.mxu0 %v23276_v8  ;;  %419 = vmatprep.mubr.f32.mxu1 %v23189_v36  ;;  %v20878_v17 = vpack.c.bf16 %v23001_v30, %v22987_v5  ;;  %v17609_v19 = vld [vmem:[%s30149_s1 + $0x108] sm:$0xff]  ;;  %v30814_v6 = vld [vmem:[#allocation9_spill] sm:$0xff]  ;;  %v1065_v3 = vand.u32 4294901760, %v17625_v46  ;;  %v30815_v63 = vld [vmem:[#allocation11_spill] sm:$0xff]  ;;  %vm1934_vm0 = vcmask 64512  }
  0x42   :  { %v23285_v21 = vand.u32 4294901760, %v180_v52  ;;  %20875 = vmatpush3.bf16.msra.mxu0 %v20874_v12  ;;  %421 = vmatmul.mubr.f32.gmra.mrb[2].mxu1 %v23201_v35  ;;  %v20880_v42 = vpack.c.bf16 %v23020_v56, %v23005_v51  ;;  %v20882_v50 = vpack.c.bf16 %v23043_v61, %v23029_v0  ;;  %v20884_v60 = vpack.c.bf16 %v23062_v29, %v23047_v7  ;;  %v30816_v52 = vld [vmem:[#allocation10_spill] sm:$0xff] }
  0x43   :  { %20899 = vmatpush3.bf16.msra.mxu1 %v22862_v27  ;;  %20877 = vmatprep.subr.bf16.mxu0 %v20876_v15  ;;  %v20886_v5 = vpack.c.bf16 %v23085_v53, %v23071_v54  ;;  %v20888_v30 = vpack.c.bf16 %v23101_v34, %v23089_v37  ;;  %v20890_v23 = vpack.c.bf16 %v23142_v2, %v23110_v41  ;;  %v17626_v15 = vld [vmem:[%s30149_s1 + $0x190] sm:$0xff]  ;;  %vm17505_vm1 = vcmask 523264  }
  0x44   :  { %30808 = vst [vmem:[#allocation26_spill] sm:$0xff] %v23285_v21  ;;  %20901 = vmatprep.subr.bf16.mxu1 %v22879_v39  ;;  %182 = vmatmul.mubr.f32.gmra.mrb[2].mxu0 %v23285_v21 }
  0x45   :  { %556 = vmatprep.mubr.f32.mxu0 %v23128_v18  ;;  %672 = vmatprep.mubr.f32.mxu1 %v23145_v47 }
  0x46   :  { %20879 = vmatpush3.bf16.msra.mxu0 %v20878_v17  ;;  %v17627_v17 = vld [vmem:[%s30149_s1 + $0x198] sm:$0xff] }
  0x47   :  { %20903 = vmatpush3.bf16.msra.mxu1 %v22890_v45  ;;  %20881 = vmatprep.subr.bf16.mxu0 %v20880_v42 }
  0x48   :  { %20905 = vmatprep.subr.bf16.mxu1 %v22918_v62 }
  0x4a   :  { %20883 = vmatpush3.bf16.msra.mxu0 %v20882_v50  ;;  %v30817_v50 = vld [vmem:[#allocation16_spill] sm:$0xff] }
  0x4b   :  { %20907 = vmatpush3.bf16.msra.mxu1 %v22943_v16  ;;  %20885 = vmatprep.subr.bf16.mxu0 %v20884_v60 }
  0x4c   :  { %20909 = vmatprep.subr.bf16.mxu1 %v22961_v49 }
  0x4e   :  { %20887 = vmatpush3.bf16.msra.mxu0 %v20886_v5  ;;  %v1068_v5 = vand.u32 4294901760, %v17626_v15 }
  0x4f   :  { %20911 = vmatpush3.bf16.msra.mxu1 %v22985_v4  ;;  %20889 = vmatprep.subr.bf16.mxu0 %v20888_v30  ;;  %v1071_v30 = vand.u32 4294901760, %v17627_v17 }
  0x50   :  { %20913 = vmatprep.subr.bf16.mxu1 %v30809_v9 }
  0x52   :  { %20891 = vmatpush3.bf16.msra.mxu0 %v20890_v23  ;;  %v17610_v23 = vld [vmem:[%s30149_s1 + $0x110] sm:$0xff] }
  0x53   :  { %20915 = vmatpush3.bf16.msra.mxu1 %v30810_v25  ;;  %20925 = vmatprep.subr.bf16.mxu0 %v20924_v59  ;;  %v17608_v59 = vld [vmem:[%s30149_s1 + $0x100] sm:$0xff] }
  0x54   :  { %20917 = vmatprep.subr.bf16.mxu1 %v30811_v28  ;;  %v1014_v12 = vand.u32 4294901760, %v17608_v59 }
  0x55   :  { %559 = vmatmul.mubr.f32.vlgmr.msra.gmra.mrb[4].mxu0 %v30812_v40 }
  0x56   :  { %20927 = vmatpush3.bf16.msra.mxu0 %v20926_v10  ;;  %565 = vmatprep.mubr.f32.mxu0 %v23199_v44  ;;  %v1062_v10 = vand.u32 4294901760, %v17624_v43  ;;  %v23350_v60 = vsub.f32 %v17608_v59, %v1014_v12  ;;  %v30820_v59 = vand.u32 4294901760, %v23029_v0  ;;  %v17629_v0 = vld [vmem:[%s30149_s1 + $0x1a8] sm:$0xff] }
  0x57   :  { %20919 = vmatpush3.bf16.msra.mxu1 %v30813_v58  ;;  %20929 = vmatprep.subr.bf16.mxu0 %v20928_v31  ;;  %v1017_v31 = vand.u32 4294901760, %v17609_v19 }
  0x58   :  { %20921 = vmatprep.subr.bf16.mxu1 %v30814_v6  ;;  %v23344_v42 = vsub.f32 %v17624_v43, %v1062_v10  ;;  %v30819_v43 = vand.u32 4294901760, %v23020_v56  ;;  %v23386_v56 = vsub.f32 %v17626_v15, %v1068_v5 }
  0x59   :  { %568 = vmatmul.mubr.f32.gmra.mrb[6].mxu0 %v23215_v13 }
  0x5a   :  { %20931 = vmatpush3.bf16.msra.mxu0 %v23229_v55  ;;  %853 = vmatprep.mubr.f32.mxu0 %v30815_v63  ;;  %v23346_v55 = vsub.f32 %v17625_v46, %v1065_v3 }
  0x5b   :  { %20923 = vmatpush3.bf16.msra.mxu1 %v30816_v52  ;;  %20933 = vmatprep.subr.bf16.mxu0 %v23235_v24  ;;  %v23352_v24 = vsub.f32 %v17609_v19, %v1017_v31  ;;  %v30821_v19 = vand.u32 4294901760, %v23043_v61 }
  0x5c   :  { %20957 = vmatprep.subr.bf16.mxu1 %v22835_v14  ;;  %v17611_v14 = vld [vmem:[%s30149_s1 + $0x118] sm:$0xff]  ;;  %v30216_v61 = vand.u32 4294901760, %v23346_v55 }
  0x5d   :  { %v1023_v44 = vand.u32 4294901760, %v17611_v14 }
  0x5e   :  { %676 = vmatmul.mubr.f32.vlgmr.msra.gmra.mrb[4].mxu1 %v30817_v50  ;;  %20935 = vmatpush3.bf16.msra.mxu0 %v23241_v26  ;;  %v30818_v26 = vand.u32 4294901760, %v23005_v51  ;;  %v20946_v50 = vpack.c.bf16 %v30821_v19, %v30820_v59  ;;  %v1020_v51 = vand.u32 4294901760, %v17610_v23  ;;  %v30825_v59 = vand.u32 4294901760, %v23085_v53 }
  0x5f   :  { %20959 = vmatpush3.bf16.msra.mxu1 %v22845_v20  ;;  %683 = vmatprep.mubr.f32.mxu1 %v23212_v1  ;;  %v17628_v20 = vld [vmem:[%s30149_s1 + $0x1a0] sm:$0xff]  ;;  %v30217_v1 = vand.u32 4294901760, %v23344_v42  ;;  %v1077_v53 = vand.u32 4294901760, %v17629_v0 }
  0x60   :  { %20937 = vmatprep.subr.bf16.mxu0 %v23253_v33  ;;  %20961 = vmatprep.subr.bf16.mxu1 %v22849_v22  ;;  %v20944_v46 = vpack.c.bf16 %v30819_v43, %v30818_v26  ;;  %v30822_v33 = vand.u32 4294901760, %v23047_v7  ;;  %v30823_v22 = vand.u32 4294901760, %v23062_v29  ;;  %v23388_v26 = vsub.f32 %v17627_v17, %v1071_v30 }
  0x61   :  { %v30215_v7 = vand.u32 4294901760, %v23350_v60  ;;  %v30824_v43 = vand.u32 4294901760, %v23071_v54  ;;  %v30828_v17 = vand.u32 4294901760, %v23110_v41  ;;  %v23413_v54 = vpack.c.bf16 %v1017_v31, %v1014_v12  ;;  %v17612_v41 = vld [vmem:[%s30149_s1 + $0x120] sm:$0xff]  ;;  %v17630_v12 = vld [vmem:[%s30149_s1 + $0x1b0] sm:$0xff] }
  0x62   :  { %v20948_v13 = vpack.c.bf16 %v30823_v22, %v30822_v33  ;;  %687 = vmatmul.mubr.f32.gmra.mrb[6].mxu1 %v23247_v38  ;;  %20939 = vmatpush3.bf16.msra.mxu0 %v23259_v48  ;;  %v30826_v33 = vand.u32 4294901760, %v23089_v37  ;;  %v30827_v48 = vand.u32 4294901760, %v23101_v34  ;;  %v30829_v22 = vand.u32 4294901760, %v23142_v2  ;;  %v17613_v34 = vld [vmem:[%s30149_s1 + $0x128] sm:$0xff] }
  0x63   :  { %20963 = vmatpush3.bf16.msra.mxu1 %v22862_v27  ;;  %20941 = vmatprep.subr.bf16.mxu0 %v23265_v11  ;;  %v20950_v19 = vpack.c.bf16 %v30825_v59, %v30824_v43  ;;  %v1074_v27 = vand.u32 4294901760, %v17628_v20  ;;  %v23411_v11 = vpack.c.bf16 %v1065_v3, %v1062_v10  ;;  %30830 = vst [vmem:[#allocation5_spill] sm:$0xff] %v23413_v54  ;;  %v30218_v43 = vand.u32 4294901760, %v23388_v26 }
  0x64   :  { %v23402_v15 = vpack.c.bf16 %v30827_v48, %v30826_v33  ;;  %v23408_v29 = vpack.c.bf16 %v30829_v22, %v30828_v17  ;;  %20965 = vmatprep.subr.bf16.mxu1 %v22879_v39  ;;  %964 = vmatprep.mubr.f32.mxu1 %v30815_v63  ;;  %v1256_v37 = vsub.f32 %v23344_v42, %v30217_v1  ;;  %v1026_v33 = vand.u32 4294901760, %v17612_v41 }
  0x65   :  { %v23425_v39 = vpack.c.bf16 %v1071_v30, %v1068_v5  ;;  %v23427_v2 = vsub.f32 %v17610_v23, %v1020_v51  ;;  %v23429_v10 = vsub.f32 %v17611_v14, %v1023_v44  ;;  %v1263_v3 = vsub.f32 %v23346_v55, %v30216_v61  ;;  %v17631_v23 = vld [vmem:[%s30149_s1 + $0x1b8] sm:$0xff]  ;;  %v17614_v61 = vld [vmem:[%s30149_s1 + $0x130] sm:$0xff] }
  0x66   :  { %20943 = vmatpush3.bf16.msra.mxu0 %v23271_v32  ;;  %v1144_v31 = vsub.f32 %v23350_v60, %v30215_v7  ;;  %v30832_v5 = vand.u32 4294901760, %v23352_v24  ;;  %v30219_v14 = vand.u32 4294901760, %v23386_v56  ;;  %v23450_v32 = vpack.c.bf16 %v1023_v44, %v1020_v51 }
  0x67   :  { %30831 = vst [vmem:[#allocation6_spill] sm:$0xff] %v23425_v39  ;;  %20967 = vmatpush3.bf16.msra.mxu1 %v22890_v45  ;;  %20945 = vmatprep.subr.bf16.mxu0 %v20944_v46  ;;  %v23452_v59 = vsub.f32 %v17628_v20, %v1074_v27  ;;  %v1029_v48 = vand.u32 4294901760, %v17613_v34  ;;  %v23455_v17 = vpack.c.bf16 %v1077_v53, %v1074_v27  ;;  %v1080_v7 = vand.u32 4294901760, %v17630_v12  ;;  %v17615_v45 = vld [vmem:[%s30149_s1 + $0x138] sm:$0xff] }
  0x68   :  { %v1151_v30 = vsub.f32 %v23352_v24, %v30832_v5  ;;  %30833 = vst [vmem:[#allocation7_spill] sm:$0xff] %v23450_v32  ;;  %20969 = vmatprep.subr.bf16.mxu1 %v22918_v62  ;;  %v23457_v22 = vsub.f32 %v17629_v0, %v1077_v53  ;;  %v1257_v5 = vand.u32 4294901760, %v1256_v37  ;;  %v1264_v44 = vand.u32 4294901760, %v1263_v3 }
  0x69   :  { %30834 = vst [vmem:[#allocation8_spill] sm:$0xff] %v23455_v17  ;;  %v1083_v46 = vand.u32 4294901760, %v17631_v23  ;;  %v30220_v20 = vand.u32 4294901760, %v23427_v2  ;;  %v1145_v51 = vand.u32 4294901760, %v1144_v31  ;;  %v1270_v27 = vsub.f32 %v23386_v56, %v30219_v14 }
  0x6a   :  { %20947 = vmatpush3.bf16.msra.mxu0 %v20946_v50  ;;  %v1152_v0 = vand.u32 4294901760, %v1151_v30  ;;  %v1277_v53 = vsub.f32 %v23388_v26, %v30218_v43  ;;  %v23474_v37 = vsub.f32 %v17612_v41, %v1026_v33  ;;  %v23476_v3 = vsub.f32 %v17613_v34, %v1029_v48  ;;  %v17632_v30 = vld [vmem:[%s30149_s1 + $0x1c0] sm:$0xff] }
  0x6b   :  { %20971 = vmatpush3.bf16.msra.mxu1 %v22943_v16  ;;  %20949 = vmatprep.subr.bf16.mxu0 %v20948_v13  ;;  %v1032_v1 = vand.u32 4294901760, %v17614_v61  ;;  %v1035_v62 = vand.u32 4294901760, %v17615_v45  ;;  %v23479_v50 = vpack.c.bf16 %v1029_v48, %v1026_v33  ;;  %v23481_v31 = vsub.f32 %v17630_v12, %v1080_v7  ;;  %v17633_v33 = vld [vmem:[%s30149_s1 + $0x1c8] sm:$0xff] }
  0x6c   :  { %20973 = vmatprep.subr.bf16.mxu1 %v22961_v49  ;;  %v30224_v43 = vand.u32 4294901760, %v23452_v59  ;;  %v30223_v16 = vand.u32 4294901760, %v23457_v22  ;;  %v23488_v13 = vpack.c.bf16 %v1264_v44, %v1257_v5  ;;  %v23490_v41 = vpack.c.bf16 %v1083_v46, %v1080_v7  ;;  %v17616_v44 = vld [vmem:[%s30149_s1 + $0x140] sm:$0xff] }
  0x6d   :  { %30835 = vst [vmem:[#allocation9_spill] sm:$0xff] %v23479_v50  ;;  %v1158_v49 = vsub.f32 %v23427_v2, %v30220_v20  ;;  %v30837_v34 = vand.u32 4294901760, %v23429_v10  ;;  %v23501_v48 = vpack.c.bf16 %v1152_v0, %v1145_v51  ;;  %v23503_v14 = vsub.f32 %v17631_v23, %v1083_v46  ;;  %v17617_v20 = vld [vmem:[%s30149_s1 + $0x148] sm:$0xff] }
  0x6e   :  { %30836 = vst [vmem:[#allocation10_spill] sm:$0xff] %v23490_v41  ;;  %20951 = vmatpush3.bf16.msra.mxu0 %v20950_v19  ;;  %v1271_v5 = vand.u32 4294901760, %v1270_v27  ;;  %v1278_v7 = vand.u32 4294901760, %v1277_v53  ;;  %v1086_v19 = vand.u32 4294901760, %v17632_v30  ;;  %v30225_v23 = vand.u32 4294901760, %v23474_v37 }
  0x6f   :  { %v1165_v12 = vsub.f32 %v23429_v10, %v30837_v34  ;;  %20975 = vmatpush3.bf16.msra.mxu1 %v22985_v4  ;;  %20953 = vmatprep.subr.bf16.mxu0 %v23402_v15  ;;  %v23513_v34 = vpack.c.bf16 %v1035_v62, %v1032_v1  ;;  %v23518_v51 = vsub.f32 %v17614_v61, %v1032_v1  ;;  %v1089_v0 = vand.u32 4294901760, %v17633_v33  ;;  %v17634_v1 = vld [vmem:[%s30149_s1 + $0x1d0] sm:$0xff]  ;;  %v17635_v61 = vld [vmem:[%s30149_s1 + $0x1d8] sm:$0xff] }
  0x70   :  { %20977 = vmatprep.subr.bf16.mxu1 %v30809_v9  ;;  %v1284_v27 = vsub.f32 %v23452_v59, %v30224_v43  ;;  %v1291_v4 = vsub.f32 %v23457_v22, %v30223_v16  ;;  %v1159_v15 = vand.u32 4294901760, %v1158_v49  ;;  %v1038_v38 = vand.u32 4294901760, %v17616_v44 }
  0x71   :  { %30838 = vst [vmem:[#allocation27_spill] sm:$0xff] %v23513_v34  ;;  %v1166_v53 = vand.u32 4294901760, %v1165_v12  ;;  %v1041_v40 = vand.u32 4294901760, %v17617_v20  ;;  %v23527_v46 = vpack.c.bf16 %v1278_v7, %v1271_v5  ;;  %v23529_v9 = vsub.f32 %v17615_v45, %v1035_v62 }
  0x72   :  { %20955 = vmatpush3.bf16.msra.mxu0 %v23408_v29  ;;  %v23541_v29 = vsub.f32 %v17632_v30, %v1086_v19  ;;  %v1172_v45 = vsub.f32 %v23474_v37, %v30225_v23  ;;  %v30840_v62 = vand.u32 4294901760, %v23476_v3  ;;  %v23550_v5 = vpack.c.bf16 %v1089_v0, %v1086_v19 }
  0x73   :  { %20979 = vmatpush3.bf16.msra.mxu1 %v30810_v25  ;;  %20989 = vmatprep.subr.bf16.mxu0 %v23411_v11  ;;  %v23552_v7 = vsub.f32 %v17633_v33, %v1089_v0  ;;  %v1285_v43 = vand.u32 4294901760, %v1284_v27  ;;  %v1292_v25 = vand.u32 4294901760, %v1291_v4  ;;  %v23555_v30 = vpack.c.bf16 %v1166_v53, %v1159_v15 }
  0x74   :  { %30839 = vst [vmem:[#allocation28_spill] sm:$0xff] %v23541_v29  ;;  %v1179_v12 = vsub.f32 %v23476_v3, %v30840_v62  ;;  %20981 = vmatprep.subr.bf16.mxu1 %v30811_v28  ;;  %30841 = vst [vmem:[#allocation29_spill] sm:$0xff] %v23550_v5  ;;  %v23557_v49 = vpack.c.bf16 %v1041_v40, %v1038_v38  ;;  %v1092_v16 = vand.u32 4294901760, %v17634_v1  ;;  %v1095_v23 = vand.u32 4294901760, %v17635_v61  ;;  %v17618_v62 = vld [vmem:[%s30149_s1 + $0x150] sm:$0xff]  ;;  %v17619_v28 = vld [vmem:[%s30149_s1 + $0x158] sm:$0xff] }
  0x75   :  { %30842 = vst [vmem:[#allocation30_spill] sm:$0xff] %v23552_v7  ;;  %855 = vmatmul.mubr.f32.vlgmr.msra.gmra.mrb[8].mxu0 %v23125_v57  ;;  %v23567_v33 = vsub.f32 %v17616_v44, %v1038_v38  ;;  %v30843_v19 = vand.u32 4294901760, %v23481_v31  ;;  %v30844_v27 = vand.u32 4294901760, %v23503_v14  ;;  %v1173_v15 = vand.u32 4294901760, %v1172_v45  ;;  %v17636_v38 = vld [vmem:[%s30149_s1 + $0x1e0] sm:$0xff] }
  0x76   :  { %20991 = vmatpush3.bf16.msra.mxu0 %v23413_v54  ;;  %860 = vmatprep.mubr.f32.mxu0 %v23189_v36  ;;  %v1180_v53 = vand.u32 4294901760, %v1179_v12  ;;  %v23583_v44 = vpack.c.bf16 %v1292_v25, %v1285_v43  ;;  %v23588_v45 = vpack.c.bf16 %v1095_v23, %v1092_v16  ;;  %v23590_v12 = vsub.f32 %v17634_v1, %v1092_v16  ;;  %v17637_v54 = vld [vmem:[%s30149_s1 + $0x1e8] sm:$0xff] }
  0x77   :  { %v1298_v0 = vsub.f32 %v23481_v31, %v30843_v19  ;;  %v1305_v4 = vsub.f32 %v23503_v14, %v30844_v27  ;;  %20983 = vmatpush3.bf16.msra.mxu1 %v30813_v58  ;;  %20993 = vmatprep.subr.bf16.mxu0 %v23425_v39  ;;  %v23585_v19 = vsub.f32 %v17617_v20, %v1041_v40  ;;  %v1044_v27 = vand.u32 4294901760, %v17618_v62  ;;  %v30848_v39 = vld [vmem:[#allocation17_spill] sm:$0xff] }
  0x78   :  { %20985 = vmatprep.subr.bf16.mxu1 %v30814_v6  ;;  %v1047_v58 = vand.u32 4294901760, %v17619_v28  ;;  %30846 = vst [vmem:[#allocation32_spill] sm:$0xff] %v23590_v12  ;;  %v23598_v40 = vsub.f32 %v17635_v61, %v1095_v23  ;;  %v1098_v25 = vand.u32 4294901760, %v17636_v38  ;;  %v23603_v16 = vpack.c.bf16 %v1180_v53, %v1173_v15  ;;  %v23621_v15 = vld [vmem:[%s30149_s1 + $0x160] sm:$0xff]  ;;  %v23626_v53 = vld [vmem:[%s30149_s1 + $0x168] sm:$0xff] }
  0x79   :  { %30845 = vst [vmem:[#allocation31_spill] sm:$0xff] %v23585_v19  ;;  %862 = vmatmul.mubr.f32.gmra.mrb[10].mxu0 %v23201_v35  ;;  %v1299_v43 = vand.u32 4294901760, %v1298_v0  ;;  %v1306_v20 = vand.u32 4294901760, %v1305_v4  ;;  %v30849_v1 = vand.u32 4294901760, %v23518_v51  ;;  %v30850_v6 = vand.u32 4294901760, %v23529_v9 }
  0x7a   :  { %20995 = vmatpush3.bf16.msra.mxu0 %v23450_v32  ;;  %30847 = vst [vmem:[#allocation33_spill] sm:$0xff] %v23598_v40  ;;  %1114 = vmatprep.mubr.f32.mxu0 %v30848_v39  ;;  %v23612_v61 = vpack.c.bf16 %v1047_v58, %v1044_v27  ;;  %v23614_v0 = vsub.f32 %v17618_v62, %v1044_v27  ;;  %v30852_v62 = vand.u32 4294901760, %v23552_v7  ;;  %v23644_v39 = vld [vmem:[%s30149_s1 + $0x1f8] sm:$0xff] }
  0x7b   :  { %20987 = vmatpush3.bf16.msra.mxu1 %v30816_v52  ;;  %20997 = vmatprep.subr.bf16.mxu0 %v23455_v17  ;;  %v1186_v47 = vsub.f32 %v23518_v51, %v30849_v1  ;;  %v1193_v23 = vsub.f32 %v23529_v9, %v30850_v6  ;;  %v23616_v4 = vsub.f32 %v17619_v28, %v1047_v58  ;;  %v1101_v52 = vand.u32 4294901760, %v17637_v54  ;;  %v23639_v1 = vld [vmem:[%s30149_s1 + $0x1f0] sm:$0xff] }
  0x7c   :  { %21021 = vmatprep.subr.bf16.mxu1 %v23488_v13  ;;  %v30851_v6 = vand.u32 4294901760, %v23541_v29  ;;  %v1319_v28 = vsub.f32 %v23552_v7, %v30852_v62  ;;  %v23648_v62 = vsub.f32 %v17636_v38, %v1098_v25  ;;  %v1050_v7 = vand.u32 4294901760, %v23621_v15 }
  0x7d   :  { %v1187_v17 = vand.u32 4294901760, %v1186_v47  ;;  %v1194_v32 = vand.u32 4294901760, %v1193_v23  ;;  %v23658_v38 = vpack.c.bf16 %v1101_v52, %v1098_v25  ;;  %v23667_v47 = vld [vmem:[%s30149_s1 + $0x170] sm:$0xff]  ;;  %v23672_v23 = vld [vmem:[%s30149_s1 + $0x178] sm:$0xff]  ;;  %v30853_v25 = vand.u32 4294901760, %v23567_v33 }
  0x7e   :  { %v1312_v13 = vsub.f32 %v23541_v29, %v30851_v6  ;;  %966 = vmatmul.mubr.f32.vlgmr.msra.gmra.mrb[8].mxu1 %v23125_v57  ;;  %20999 = vmatpush3.bf16.msra.mxu0 %v23479_v50  ;;  %v21032_v6 = vpack.c.bf16 %v1306_v20, %v1299_v43  ;;  %v1053_v29 = vand.u32 4294901760, %v23626_v53  ;;  %v23660_v43 = vsub.f32 %v17637_v54, %v1101_v52 }
  0x7f   :  { %21023 = vmatpush3.bf16.msra.mxu1 %v23501_v48  ;;  %971 = vmatprep.mubr.f32.mxu1 %v23189_v36  ;;  %v1104_v20 = vand.u32 4294901760, %v23639_v1  ;;  %v1107_v48 = vand.u32 4294901760, %v23644_v39  ;;  %v1200_v54 = vsub.f32 %v23567_v33, %v30853_v25  ;;  %v30854_v52 = vand.u32 4294901760, %v23585_v19 }
  0x80   :  { %21001 = vmatprep.subr.bf16.mxu0 %v23490_v41  ;;  %21025 = vmatprep.subr.bf16.mxu1 %v23527_v46  ;;  %v1313_v58 = vand.u32 4294901760, %v1312_v13  ;;  %v1320_v46 = vand.u32 4294901760, %v1319_v28  ;;  %v30855_v41 = vand.u32 4294901760, %v23590_v12  ;;  %v30856_v36 = vand.u32 4294901760, %v23598_v40 }
  0x81   :  { %v1207_v27 = vsub.f32 %v23585_v19, %v30854_v52  ;;  %v23693_v52 = vsub.f32 %v23621_v15, %v1050_v7  ;;  %v23705_v25 = vsub.f32 %v23644_v39, %v1107_v48  ;;  %v30258_v15 = vand.u32 4294901760, %v23660_v43 }
  0x82   :  { %973 = vmatmul.mubr.f32.gmra.mrb[10].mxu1 %v23201_v35  ;;  %21003 = vmatpush3.bf16.msra.mxu0 %v23513_v34  ;;  %v1326_v50 = vsub.f32 %v23590_v12, %v30855_v41  ;;  %v1333_v13 = vsub.f32 %v23598_v40, %v30856_v36  ;;  %v23696_v34 = vsub.f32 %v23626_v53, %v1053_v29  ;;  %v1056_v41 = vand.u32 4294901760, %v23667_v47 }
  0x83   :  { %21027 = vmatpush3.bf16.msra.mxu1 %v23555_v30  ;;  %21005 = vmatprep.subr.bf16.mxu0 %v23550_v5  ;;  %v1059_v12 = vand.u32 4294901760, %v23672_v23  ;;  %v23702_v36 = vsub.f32 %v23639_v1, %v1104_v20  ;;  %v21034_v53 = vpack.c.bf16 %v1194_v32, %v1187_v17  ;;  %v21036_v28 = vpack.c.bf16 %v1320_v46, %v1313_v58 }
  0x84   :  { %21029 = vmatprep.subr.bf16.mxu1 %v23583_v44  ;;  %1365 = vmatprep.mubr.f32.mxu1 %v30815_v63  ;;  %v1201_v5 = vand.u32 4294901760, %v1200_v54  ;;  %v1208_v40 = vand.u32 4294901760, %v1207_v27  ;;  %v1327_v35 = vand.u32 4294901760, %v1326_v50  ;;  %v1334_v44 = vand.u32 4294901760, %v1333_v13 }
  0x85   :  { %v30857_v1 = vand.u32 4294901760, %v23614_v0  ;;  %v30858_v39 = vand.u32 4294901760, %v23616_v4  ;;  %v23720_v32 = vsub.f32 %v23667_v47, %v1056_v41  ;;  %v23723_v17 = vsub.f32 %v23672_v23, %v1059_v12 }
  0x86   :  { %21007 = vmatpush3.bf16.msra.mxu0 %v23557_v49  ;;  %v30263_v50 = vand.u32 4294901760, %v23693_v52  ;;  %v30859_v58 = vand.u32 4294901760, %v23648_v62  ;;  %v30262_v54 = vand.u32 4294901760, %v23702_v36  ;;  %v30261_v47 = vand.u32 4294901760, %v23705_v25 }
  0x87   :  { %v1214_v19 = vsub.f32 %v23614_v0, %v30857_v1  ;;  %v1221_v30 = vsub.f32 %v23616_v4, %v30858_v39  ;;  %21031 = vmatpush3.bf16.msra.mxu1 %v23603_v16  ;;  %21009 = vmatprep.subr.bf16.mxu0 %v23588_v45  ;;  %v1347_v16 = vsub.f32 %v23660_v43, %v30258_v15  ;;  %v30860_v15 = vand.u32 4294901760, %v23696_v34 }
  0x88   :  { %21033 = vmatprep.subr.bf16.mxu1 %v21032_v6  ;;  %v1340_v46 = vsub.f32 %v23648_v62, %v30859_v58  ;;  %v23735_v13 = vpack.c.bf16 %v1053_v29, %v1050_v7  ;;  %v23737_v23 = vpack.c.bf16 %v1107_v48, %v1104_v20  ;;  %v21038_v1 = vpack.c.bf16 %v1208_v40, %v1201_v5 }
  0x89   :  { %v21040_v6 = vpack.c.bf16 %v1334_v44, %v1327_v35  ;;  %v1215_v39 = vand.u32 4294901760, %v1214_v19  ;;  %v1222_v27 = vand.u32 4294901760, %v1221_v30  ;;  %v1228_v58 = vsub.f32 %v23693_v52, %v30263_v50 }
  0x8a   :  { %21011 = vmatpush3.bf16.msra.mxu0 %v23612_v61  ;;  %v1235_v29 = vsub.f32 %v23696_v34, %v30860_v15  ;;  %v30259_v7 = vand.u32 4294901760, %v23720_v32  ;;  %v30260_v20 = vand.u32 4294901760, %v23723_v17  ;;  %v1341_v5 = vand.u32 4294901760, %v1340_v46 }
  0x8b   :  { %21035 = vmatpush3.bf16.msra.mxu1 %v21034_v53  ;;  %21013 = vmatprep.subr.bf16.mxu0 %v23658_v38  ;;  %v1348_v35 = vand.u32 4294901760, %v1347_v16  ;;  %v1354_v19 = vsub.f32 %v23702_v36, %v30262_v54  ;;  %v1361_v40 = vsub.f32 %v23705_v25, %v30261_v47  ;;  %v23756_v48 = vpack.c.bf16 %v1059_v12, %v1056_v41  ;;  %v30877_v47 = vld [vmem:[#allocation29_spill] sm:$0xff] }
  0x8c   :  { %21037 = vmatprep.subr.bf16.mxu1 %v21036_v28  ;;  %v21042_v30 = vpack.c.bf16 %v1222_v27, %v1215_v39  ;;  %v21052_v15 = vpack.c.bf16 %v23346_v55, %v23344_v42  ;;  %v1229_v28 = vand.u32 4294901760, %v1228_v58  ;;  %v1236_v53 = vand.u32 4294901760, %v1235_v29 }
  0x8d   :  { %v1242_v44 = vsub.f32 %v23720_v32, %v30259_v7  ;;  %v1249_v46 = vsub.f32 %v23723_v17, %v30260_v20  ;;  %v21044_v12 = vpack.c.bf16 %v1348_v35, %v1341_v5  ;;  %v1355_v41 = vand.u32 4294901760, %v1354_v19  ;;  %v30861_v20 = vld [vmem:[#allocation18_spill] sm:$0xff] }
  0x8e   :  { %21015 = vmatpush3.bf16.msra.mxu0 %v23735_v13  ;;  %v1362_v27 = vand.u32 4294901760, %v1361_v40  ;;  %v21054_v16 = vpack.c.bf16 %v23352_v24, %v23350_v60  ;;  %v21056_v39 = vpack.c.bf16 %v23388_v26, %v23386_v56  ;;  %v21060_v35 = vpack.c.bf16 %v23457_v22, %v23452_v59 }
  0x8f   :  { %21039 = vmatpush3.bf16.msra.mxu1 %v21038_v1  ;;  %21017 = vmatprep.subr.bf16.mxu0 %v23737_v23  ;;  %v21046_v1 = vpack.c.bf16 %v1236_v53, %v1229_v28  ;;  %v1243_v58 = vand.u32 4294901760, %v1242_v44  ;;  %v1250_v29 = vand.u32 4294901760, %v1249_v46  ;;  %v21062_v19 = vpack.c.bf16 %v23476_v3, %v23474_v37  ;;  %v30864_v28 = vld [vmem:[#allocation30_spill] sm:$0xff]  ;;  %v30866_v46 = vld [vmem:[#allocation19_spill] sm:$0xff] }
  0x90   :  { %21041 = vmatprep.subr.bf16.mxu1 %v21040_v6  ;;  %v21048_v7 = vpack.c.bf16 %v1362_v27, %v1355_v41  ;;  %v21058_v6 = vpack.c.bf16 %v23429_v10, %v23427_v2  ;;  %v21064_v40 = vpack.c.bf16 %v23503_v14, %v23481_v31  ;;  %v30865_v44 = vld [vmem:[#allocation6_spill] sm:$0xff]  ;;  %v30868_v27 = vld [vmem:[#allocation21_spill] sm:$0xff]  ;;  %v30879_v54 = vand.u32 4294901760, %v23346_v55  ;;  %v30885_v55 = vld [vmem:[#allocation20_spill] sm:$0xff] }
  0x91   :  { %v21050_v5 = vpack.c.bf16 %v1250_v29, %v1243_v58  ;;  %v30872_v29 = vld [vmem:[#allocation8_spill] sm:$0xff] }
  0x92   :  { %21019 = vmatpush3.bf16.msra.mxu0 %v23756_v48 }
  0x93   :  { %21043 = vmatpush3.bf16.msra.mxu1 %v21042_v30  ;;  %21053 = vmatprep.subr.bf16.mxu0 %v21052_v15  ;;  %v30862_v30 = vld [vmem:[#allocation5_spill] sm:$0xff]  ;;  %v30863_v15 = vld [vmem:[#allocation28_spill] sm:$0xff] }
  0x94   :  { %21045 = vmatprep.subr.bf16.mxu1 %v21044_v12  ;;  %v21068_v53 = vpack.c.bf16 %v30864_v28, %v30863_v15  ;;  %v30867_v12 = vld [vmem:[#allocation31_spill] sm:$0xff] }
  0x95   :  { %1120 = vmatmul.mubr.f32.vlgmr.msra.gmra.mrb[12].mxu0 %v30861_v20  ;;  %v21070_v41 = vpack.c.bf16 %v30867_v12, %v23567_v33 }
  0x96   :  { %21055 = vmatpush3.bf16.msra.mxu0 %v21054_v16  ;;  %1129 = vmatprep.mubr.f32.mxu0 %v23276_v8  ;;  %v30869_v16 = vld [vmem:[#allocation7_spill] sm:$0xff] }
  0x97   :  { %21047 = vmatpush3.bf16.msra.mxu1 %v21046_v1  ;;  %21057 = vmatprep.subr.bf16.mxu0 %v21056_v39  ;;  %v30870_v1 = vld [vmem:[#allocation32_spill] sm:$0xff]  ;;  %v30871_v39 = vld [vmem:[#allocation33_spill] sm:$0xff] }
  0x98   :  { %21049 = vmatprep.subr.bf16.mxu1 %v21048_v7  ;;  %v21066_v7 = vpack.c.bf16 %v23529_v9, %v23518_v51  ;;  %v21072_v58 = vpack.c.bf16 %v30871_v39, %v30870_v1 }
  0x99   :  { %1135 = vmatmul.mubr.f32.gmra.mrb[14].mxu0 %v23285_v21 }
  0x9a   :  { %21059 = vmatpush3.bf16.msra.mxu0 %v21058_v6  ;;  %1509 = vmatprep.mubr.f32.mxu0 %v23128_v18  ;;  %v30873_v6 = vld [vmem:[#allocation15_spill] sm:$0xff] }
  0x9b   :  { %21051 = vmatpush3.bf16.msra.mxu1 %v21050_v5  ;;  %21061 = vmatprep.subr.bf16.mxu0 %v21060_v35  ;;  %v21074_v5 = vpack.c.bf16 %v23616_v4, %v23614_v0  ;;  %v30874_v35 = vld [vmem:[#allocation9_spill] sm:$0xff] }
  0x9c   :  { %21085 = vmatprep.subr.bf16.mxu1 %v23411_v11 }
  0x9e   :  { %1367 = vmatmul.mubr.f32.vlgmr.msra.gmra.mrb[12].mxu1 %v23125_v57  ;;  %21063 = vmatpush3.bf16.msra.mxu0 %v21062_v19  ;;  %v21076_v19 = vpack.c.bf16 %v23660_v43, %v23648_v62 }
  0x9f   :  { %21087 = vmatpush3.bf16.msra.mxu1 %v30862_v30  ;;  %21065 = vmatprep.subr.bf16.mxu0 %v21064_v40  ;;  %v30875_v40 = vld [vmem:[#allocation10_spill] sm:$0xff] }
  0xa0   :  { %21089 = vmatprep.subr.bf16.mxu1 %v30865_v44  ;;  %1372 = vmatprep.mubr.f32.mxu1 %v30866_v46 }
  0xa2   :  { %21067 = vmatpush3.bf16.msra.mxu0 %v21066_v7  ;;  %1374 = vmatmul.mubr.f32.gmra.mrb[14].mxu1 %v30868_v27  ;;  %v21078_v7 = vpack.c.bf16 %v23696_v34, %v23693_v52 }
  0xa3   :  { %21091 = vmatpush3.bf16.msra.mxu1 %v30869_v16  ;;  %21069 = vmatprep.subr.bf16.mxu0 %v21068_v53  ;;  %v30876_v53 = vld [vmem:[#allocation27_spill] sm:$0xff] }
  0xa4   :  { %21093 = vmatprep.subr.bf16.mxu1 %v30872_v29  ;;  %1625 = vmatprep.mubr.f32.mxu1 %v30873_v6  ;;  %v30881_v6 = vand.u32 4294901760, %v23352_v24  ;;  %v30887_v24 = vand.u32 4294901760, %v23429_v10  ;;  %v30894_v10 = vand.u32 4294901760, %v23503_v14  ;;  %v30901_v14 = vld [vmem:[#allocation24_spill] sm:$0xff] }
  0xa6   :  { %21071 = vmatpush3.bf16.msra.mxu0 %v21070_v41  ;;  %v21080_v41 = vpack.c.bf16 %v23705_v25, %v23702_v36 }
  0xa7   :  { %21095 = vmatpush3.bf16.msra.mxu1 %v30874_v35  ;;  %21073 = vmatprep.subr.bf16.mxu0 %v21072_v58  ;;  %v21082_v58 = vpack.c.bf16 %v23723_v17, %v23720_v32 }
  0xa8   :  { %21097 = vmatprep.subr.bf16.mxu1 %v30875_v40 }
  0xaa   :  { %21075 = vmatpush3.bf16.msra.mxu0 %v21074_v5  ;;  %v30878_v5 = vand.u32 4294901760, %v23344_v42  ;;  %v30884_v42 = vld [vmem:[#allocation14_spill] sm:$0xff] }
  0xab   :  { %21099 = vmatpush3.bf16.msra.mxu1 %v30876_v53  ;;  %21077 = vmatprep.subr.bf16.mxu0 %v21076_v19  ;;  %v30880_v19 = vand.u32 4294901760, %v23350_v60  ;;  %v30886_v60 = vand.u32 4294901760, %v23427_v2  ;;  %v30892_v2 = vand.u32 4294901760, %v23476_v3  ;;  %v30897_v3 = vand.u32 4294901760, %v23529_v9 }
  0xac   :  { %21101 = vmatprep.subr.bf16.mxu1 %v30877_v47  ;;  %v21116_v50 = vpack.c.bf16 %v30879_v54, %v30878_v5  ;;  %v30903_v9 = vand.u32 4294901760, %v30867_v12  ;;  %v30908_v12 = vand.u32 4294901760, %v23648_v62  ;;  %v30914_v62 = vand.u32 4294901760, %v23720_v32 }
  0xad   :  { %v21118_v18 = vpack.c.bf16 %v30881_v6, %v30880_v19  ;;  %v21122_v54 = vpack.c.bf16 %v30887_v24, %v30886_v60  ;;  %v30890_v6 = vld [vmem:[#allocation23_spill] sm:$0xff]  ;;  %v30898_v19 = vld [vmem:[#allocation22_spill] sm:$0xff] }
  0xae   :  { %21079 = vmatpush3.bf16.msra.mxu0 %v21078_v7  ;;  %v30882_v7 = vand.u32 4294901760, %v23386_v56  ;;  %v30888_v56 = vand.u32 4294901760, %v23452_v59 }
  0xaf   :  { %21103 = vmatpush3.bf16.msra.mxu1 %v23557_v49  ;;  %21081 = vmatprep.subr.bf16.mxu0 %v21080_v41  ;;  %v30883_v41 = vand.u32 4294901760, %v23388_v26  ;;  %v30889_v26 = vand.u32 4294901760, %v23457_v22  ;;  %v30895_v22 = vld [vmem:[#allocation16_spill] sm:$0xff] }
  0xb0   :  { %21105 = vmatprep.subr.bf16.mxu1 %v23588_v45 }
  0xb1   :  { %v21120_v21 = vpack.c.bf16 %v30883_v41, %v30882_v7  ;;  %v30899_v7 = vand.u32 4294901760, %v30863_v15  ;;  %v30905_v15 = vand.u32 4294901760, %v30871_v39  ;;  %v30910_v39 = vand.u32 4294901760, %v23693_v52 }
  0xb2   :  { %21083 = vmatpush3.bf16.msra.mxu0 %v21082_v58 }
  0xb3   :  { %21107 = vmatpush3.bf16.msra.mxu1 %v23612_v61  ;;  %21117 = vmatprep.subr.bf16.mxu0 %v21116_v50  ;;  %v21124_v50 = vpack.c.bf16 %v30889_v26, %v30888_v56 }
  0xb4   :  { %21109 = vmatprep.subr.bf16.mxu1 %v23658_v38 }
  0xb5   :  { %1512 = vmatmul.mubr.f32.vlgmr.msra.gmra.mrb[16].mxu0 %v30884_v42 }
  0xb6   :  { %21119 = vmatpush3.bf16.msra.mxu0 %v21118_v18  ;;  %1518 = vmatprep.mubr.f32.mxu0 %v30885_v55  ;;  %v30891_v18 = vand.u32 4294901760, %v23474_v37  ;;  %v30896_v37 = vand.u32 4294901760, %v23518_v51  ;;  %v30902_v51 = vand.u32 4294901760, %v23567_v33  ;;  %v30907_v33 = vand.u32 4294901760, %v23616_v4  ;;  %v24241_v55 = vld [vmem:[%s30149_s1 + $0x2d0] sm:$0xff] }
  0xb7   :  { %21111 = vmatpush3.bf16.msra.mxu1 %v23735_v13  ;;  %21121 = vmatprep.subr.bf16.mxu0 %v21120_v21  ;;  %v30893_v21 = vand.u32 4294901760, %v23481_v31  ;;  %v30913_v4 = vand.u32 4294901760, %v23705_v25  ;;  %30935 = vst [vmem:[#allocation35_spill] sm:$0xff] %v24241_v55 }
  0xb8   :  { %21113 = vmatprep.subr.bf16.mxu1 %v23737_v23  ;;  %v21126_v58 = vpack.c.bf16 %v30892_v2, %v30891_v18  ;;  %v21130_v5 = vpack.c.bf16 %v30897_v3, %v30896_v37  ;;  %v21134_v41 = vpack.c.bf16 %v30903_v9, %v30902_v51 }
  0xb9   :  { %1521 = vmatmul.mubr.f32.gmra.mrb[18].mxu0 %v30890_v6  ;;  %v21128_v59 = vpack.c.bf16 %v30894_v10, %v30893_v21  ;;  %v24255_v6 = vld [vmem:[%s30149_s1 + $0x2d8] sm:$0xff] }
  0xba   :  { %21123 = vmatpush3.bf16.msra.mxu0 %v21122_v54  ;;  %1806 = vmatprep.mubr.f32.mxu0 %v30815_v63  ;;  %30939 = vst [vmem:[#allocation37_spill] sm:$0xff] %v24255_v6 }
  0xbb   :  { %21115 = vmatpush3.bf16.msra.mxu1 %v23756_v48  ;;  %21125 = vmatprep.subr.bf16.mxu0 %v21124_v50 }
  0xbc   :  { %21149 = vmatprep.subr.bf16.mxu1 %v23411_v11  ;;  %v30900_v11 = vand.u32 4294901760, %v30864_v28 }
  0xbe   :  { %1629 = vmatmul.mubr.f32.vlgmr.msra.gmra.mrb[16].mxu1 %v30895_v22  ;;  %21127 = vmatpush3.bf16.msra.mxu0 %v21126_v58  ;;  %v21132_v31 = vpack.c.bf16 %v30900_v11, %v30899_v7  ;;  %v17640_v58 = vld [vmem:[%s30150_s2 + $0x10] sm:$0xff] }
  0xbf   :  { %21151 = vmatpush3.bf16.msra.mxu1 %v30862_v30  ;;  %1636 = vmatprep.mubr.f32.mxu1 %v30898_v19  ;;  %v30904_v30 = vand.u32 4294901760, %v30870_v1  ;;  %v1936_v21 = vsel %vm1934_vm0, %v17640_v58, 0  ;;  %v24198_v19 = vld [vmem:[%s30149_s1 + $0x2c8] sm:$0xff] }
  0xc0   :  { %21129 = vmatprep.subr.bf16.mxu0 %v21128_v59  ;;  %21153 = vmatprep.subr.bf16.mxu1 %v30865_v44  ;;  %v30906_v44 = vand.u32 4294901760, %v23614_v0  ;;  %v30912_v0 = vand.u32 4294901760, %v23702_v36  ;;  %v23920_v59 = vand.u32 4294901760, %v1936_v21  ;;  %30926 = vst [vmem:[#allocation9_spill] sm:$0xff] %v24198_v19 }
  0xc1   :  { %v21136_v28 = vpack.c.bf16 %v30905_v15, %v30904_v30 }
  0xc2   :  { %1640 = vmatmul.mubr.f32.gmra.mrb[18].mxu1 %v30901_v14  ;;  %21131 = vmatpush3.bf16.msra.mxu0 %v21130_v5  ;;  %v21138_v60 = vpack.c.bf16 %v30907_v33, %v30906_v44  ;;  %v23923_v5 = vsub.f32 %v1936_v21, %v23920_v59 }
  0xc3   :  { %21155 = vmatpush3.bf16.msra.mxu1 %v30869_v16  ;;  %21133 = vmatprep.subr.bf16.mxu0 %v21132_v31  ;;  %v30909_v16 = vand.u32 4294901760, %v23660_v43  ;;  %v30915_v43 = vand.u32 4294901760, %v23723_v17 }
  0xc4   :  { %21157 = vmatprep.subr.bf16.mxu1 %v30872_v29  ;;  %1917 = vmatprep.mubr.f32.mxu1 %v30815_v63  ;;  %v30911_v29 = vand.u32 4294901760, %v23696_v34  ;;  %v23926_v11 = vand.u32 4294901760, %v23923_v5 }
  0xc5   :  { %v21140_v1 = vpack.c.bf16 %v30909_v16, %v30908_v12 }
  0xc6   :  { %21135 = vmatpush3.bf16.msra.mxu0 %v21134_v41  ;;  %v21142_v24 = vpack.c.bf16 %v30911_v29, %v30910_v39  ;;  %v2010_v41 = vsub.f32 %v23923_v5, %v23926_v11 }
  0xc7   :  { %21159 = vmatpush3.bf16.msra.mxu1 %v30874_v35  ;;  %21137 = vmatprep.subr.bf16.mxu0 %v21136_v28  ;;  %v21144_v35 = vpack.c.bf16 %v30913_v4, %v30912_v0 }
  0xc8   :  { %21161 = vmatprep.subr.bf16.mxu1 %v30875_v40  ;;  %v21146_v40 = vpack.c.bf16 %v30915_v43, %v30914_v62  ;;  %v2011_v15 = vand.u32 4294901760, %v2010_v41 }
  0xca   :  { %21139 = vmatpush3.bf16.msra.mxu0 %v21138_v60 }
  0xcb   :  { %21163 = vmatpush3.bf16.msra.mxu1 %v30876_v53  ;;  %21141 = vmatprep.subr.bf16.mxu0 %v21140_v1 }
  0xcc   :  { %21165 = vmatprep.subr.bf16.mxu1 %v30877_v47 }
  0xce   :  { %21143 = vmatpush3.bf16.msra.mxu0 %v21142_v24 }
  0xcf   :  { %21167 = vmatpush3.bf16.msra.mxu1 %v23557_v49  ;;  %21145 = vmatprep.subr.bf16.mxu0 %v21144_v35 }
  0xd0   :  { %21169 = vmatprep.subr.bf16.mxu1 %v23588_v45 }
  0xd2   :  { %21147 = vmatpush3.bf16.msra.mxu0 %v21146_v40 }
  0xd3   :  { %21171 = vmatpush3.bf16.msra.mxu1 %v23612_v61 }
  0xd4   :  { %21173 = vmatprep.subr.bf16.mxu1 %v23658_v38 }
  0xd5   :  { %1808 = vmatmul.mubr.f32.vlgmr.msra.gmra.mrb[20].mxu0 %v23125_v57 }
  0xd6   :  { %1813 = vmatprep.mubr.f32.mxu0 %v30866_v46 }
  0xd7   :  { %21175 = vmatpush3.bf16.msra.mxu1 %v23735_v13 }
  0xd8   :  { %21177 = vmatprep.subr.bf16.mxu1 %v23737_v23 }
  0xd9   :  { %1815 = vmatmul.mubr.f32.gmra.mrb[22].mxu0 %v30868_v27 }
  0xda   :  { %20258 = vmatprep.mubr.f32.mxu0 %v2011_v15 }
  0xdb   :  { %21179 = vmatpush3.bf16.msra.mxu1 %v23756_v48 }
  0xde   :  { %1919 = vmatmul.mubr.f32.vlgmr.msra.gmra.mrb[20].mxu1 %v23125_v57 }
  0xdf   :  { %1924 = vmatprep.mubr.f32.mxu1 %v30866_v46 }
  0xe2   :  { %1926 = vmatmul.mubr.f32.gmra.mrb[22].mxu1 %v30868_v27 }
  0xe3   :  { %20318 = vmatprep.mubr.f32.mxu1 %v2011_v15 }
 0x108   :  { %v17912_v34 = vpop.f32.mrb[0].mxu0 }
 0x109   :  { %v17913_v49 = vpop.f32.mrb[1].mxu0 }
 0x10a   :  { %v17914_v45 = vadd.f32 %v17913_v49, %v17912_v34 }
 0x111   :  { %v17950_v61 = vpop.f32.mrb[0].mxu1 }
 0x112   :  { %v17951_v38 = vpop.f32.mrb[1].mxu1 }
 0x113   :  { %v17952_v25 = vadd.f32 %v17951_v38, %v17950_v61 }
 0x115   :  { %v416_v52 = vadd.f32 %v17952_v25, %v17914_v45  ;;  %v17953_v36 = vpop.f32.mrb[2].mxu1 }
 0x116   :  { %v17954_v32 = vpop.f32.mrb[3].mxu1 }
 0x117   :  { %v17915_v17 = vpop.f32.mrb[2].mxu0  ;;  %v17955_v47 = vadd.f32 %v17954_v32, %v17953_v36 }
 0x118   :  { %v17916_v13 = vpop.f32.mrb[3].mxu0 }
 0x119   :  { %v17917_v23 = vadd.f32 %v17916_v13, %v17915_v17 }
 0x11b   :  { %v423_v48 = vadd.f32 %v17955_v47, %v17917_v23 }
 0x128   :  { %v17988_v53 = vpop.f32.mrb[4].mxu0 }
 0x129   :  { %v17989_v54 = vpop.f32.mrb[5].mxu0 }
 0x12a   :  { %v17990_v56 = vadd.f32 %v17989_v54, %v17988_v53 }
 0x12c   :  { %v561_v26 = vadd.f32 %v17990_v56, %v416_v52  ;;  %v17991_v50 = vpop.f32.mrb[6].mxu0 }
 0x12d   :  { %v17992_v18 = vpop.f32.mrb[7].mxu0 }
 0x12e   :  { %v17993_v2 = vadd.f32 %v17992_v18, %v17991_v50 }
 0x130   :  { %v570_v10 = vadd.f32 %v17993_v2, %v423_v48 }
 0x131   :  { %v18026_v37 = vpop.f32.mrb[4].mxu1 }
 0x132   :  { %v18027_v3 = vpop.f32.mrb[5].mxu1 }
 0x133   :  { %v18028_v7 = vadd.f32 %v18027_v3, %v18026_v37 }
 0x135   :  { %v678_v31 = vadd.f32 %v18028_v7, %v561_v26  ;;  %v18029_v51 = vpop.f32.mrb[6].mxu1 }
 0x136   :  { %v18030_v9 = vpop.f32.mrb[7].mxu1 }
 0x137   :  { %v18031_v30 = vadd.f32 %v18030_v9, %v18029_v51 }
 0x139   :  { %v689_v28 = vadd.f32 %v18031_v30, %v570_v10  ;;  %v17641_v30 = vld [vmem:[%s30150_s2 + $0x18] sm:$0xff] }
 0x13a   :  { %v1939_v15 = vsel %vm1934_vm0, %v17641_v30, 0 }
 0x148   :  { %v18064_v44 = vpop.f32.mrb[8].mxu0 }
 0x149   :  { %v18065_v33 = vpop.f32.mrb[9].mxu0 }
 0x14a   :  { %v18066_v60 = vadd.f32 %v18065_v33, %v18064_v44 }
 0x14c   :  { %v857_v12 = vadd.f32 %v18066_v60, %v678_v31  ;;  %v18067_v16 = vpop.f32.mrb[10].mxu0 }
 0x14d   :  { %v18068_v1 = vpop.f32.mrb[11].mxu0 }
 0x14e   :  { %v18069_v39 = vadd.f32 %v18068_v1, %v18067_v16 }
 0x150   :  { %v864_v29 = vadd.f32 %v18069_v39, %v689_v28  ;;  %v23938_v28 = vand.u32 4294901760, %v1939_v15 }
 0x151   :  { %v18102_v24 = vpop.f32.mrb[8].mxu1 }
 0x152   :  { %v18103_v0 = vpop.f32.mrb[9].mxu1 }
 0x153   :  { %v18104_v4 = vadd.f32 %v18103_v0, %v18102_v24 }
 0x155   :  { %v23930_v35 = vadd.f32 %v18104_v4, %v857_v12  ;;  %v18105_v62 = vpop.f32.mrb[10].mxu1  ;;  %v23941_v12 = vsub.f32 %v1939_v15, %v23938_v28  ;;  %v24028_v15 = vld [vmem:[%s30149_s1 + $0x298] sm:$0xff] }
 0x156   :  { %v18106_v43 = vpop.f32.mrb[11].mxu1 }
 0x157   :  { %v18107_v40 = vadd.f32 %v18106_v43, %v18105_v62  ;;  %v23944_v24 = vand.u32 4294901760, %v23941_v12 }
 0x159   :  { %v23932_v34 = vadd.f32 %v18107_v40, %v864_v29  ;;  %v2020_v40 = vsub.f32 %v23941_v12, %v23944_v24 }
 0x168   :  { %v18140_v49 = vpop.f32.mrb[12].mxu0 }
 0x169   :  { %v18141_v45 = vpop.f32.mrb[13].mxu0 }
 0x16a   :  { %v18142_v61 = vadd.f32 %v18141_v45, %v18140_v49 }
 0x16c   :  { %v18143_v38 = vpop.f32.mrb[14].mxu0 }
 0x16d   :  { %v18144_v25 = vpop.f32.mrb[15].mxu0 }
 0x16e   :  { %v18145_v52 = vadd.f32 %v18144_v25, %v18143_v38 }
 0x171   :  { %v18178_v36 = vpop.f32.mrb[12].mxu1 }
 0x172   :  { %v18179_v32 = vpop.f32.mrb[13].mxu1 }
 0x173   :  { %v18180_v17 = vadd.f32 %v18179_v32, %v18178_v36 }
 0x175   :  { %v1369_v47 = vadd.f32 %v18180_v17, %v18142_v61  ;;  %v18181_v13 = vpop.f32.mrb[14].mxu1 }
 0x176   :  { %v18182_v23 = vpop.f32.mrb[15].mxu1 }
 0x177   :  { %v18183_v48 = vadd.f32 %v18182_v23, %v18181_v13  ;;  %v23958_v13 = vand.u32 4294901760, %v23930_v35 }
 0x179   :  { %v1376_v53 = vadd.f32 %v18183_v48, %v18145_v52  ;;  %v2021_v52 = vand.u32 4294901760, %v2020_v40  ;;  %v24069_v40 = vld [vmem:[%s30149_s1 + $0x2a0] sm:$0xff] }
 0x188   :  { %v18216_v54 = vpop.f32.mrb[16].mxu0 }
 0x189   :  { %v18217_v56 = vpop.f32.mrb[17].mxu0 }
 0x18a   :  { %v18218_v26 = vadd.f32 %v18217_v56, %v18216_v54  ;;  %v23969_v56 = vsub.f32 %v23930_v35, %v23958_v13  ;;  %v23985_v35 = vld [vmem:[%s30149_s1 + $0x288] sm:$0xff] }
 0x18c   :  { %v1514_v50 = vadd.f32 %v18218_v26, %v1369_v47  ;;  %v18219_v18 = vpop.f32.mrb[18].mxu0  ;;  %v23973_v26 = vand.u32 4294901760, %v23932_v34 }
 0x18d   :  { %v18220_v2 = vpop.f32.mrb[19].mxu0 }
 0x18e   :  { %v18221_v58 = vadd.f32 %v18220_v2, %v18219_v18  ;;  %v23979_v18 = vld [vmem:[%s30149_s1 + $0x280] sm:$0xff] }
 0x190   :  { %v1523_v21 = vadd.f32 %v18221_v58, %v1376_v53  ;;  %v23989_v58 = vand.u32 4294901760, %v23969_v56 }
 0x191   :  { %v18254_v10 = vpop.f32.mrb[16].mxu1 }
 0x192   :  { %v18255_v37 = vpop.f32.mrb[17].mxu1 }
 0x193   :  { %v18256_v3 = vadd.f32 %v18255_v37, %v18254_v10  ;;  %v23998_v10 = vsub.f32 %v23932_v34, %v23973_v26  ;;  %v30273_v37 = vand.u32 4294901760, %v23979_v18  ;;  %v978_v34 = vld [vmem:[%s30150_s2] sm:$0xff] }
 0x195   :  { %v1631_v7 = vadd.f32 %v18256_v3, %v1514_v50  ;;  %v18257_v31 = vpop.f32.mrb[18].mxu1  ;;  %v24005_v3 = vld [vmem:[%s30149_s1 + $0x208] sm:$0xff] }
 0x196   :  { %v18258_v51 = vpop.f32.mrb[19].mxu1  ;;  %v30268_v30 = vand.u32 4294901760, %v24005_v3 }
 0x197   :  { %v18259_v9 = vadd.f32 %v18258_v51, %v18257_v31  ;;  %v979_v31 = vld [vmem:[%s30150_s2 + $0x8] sm:$0xff] }
 0x199   :  { %v1642_v41 = vadd.f32 %v18259_v9, %v1523_v21  ;;  %v23994_v21 = vld [vmem:[%s30149_s1 + $0x200] sm:$0xff]  ;;  %v24019_v9 = vld [vmem:[%s30149_s1 + $0x290] sm:$0xff] }
 0x19a   :  { %v30270_v51 = vand.u32 4294901760, %v23994_v21 }
 0x1a8   :  { %v18292_v44 = vpop.f32.mrb[20].mxu0 }
 0x1a9   :  { %v18293_v33 = vpop.f32.mrb[21].mxu0 }
 0x1aa   :  { %v18294_v60 = vadd.f32 %v18293_v33, %v18292_v44  ;;  %v24033_v44 = vld [vmem:[%s30149_s1 + $0x210] sm:$0xff]  ;;  %v24038_v33 = vld [vmem:[%s30149_s1 + $0x218] sm:$0xff] }
 0x1ac   :  { %v1810_v16 = vadd.f32 %v18294_v60, %v1631_v7  ;;  %v18295_v1 = vpop.f32.mrb[22].mxu0  ;;  %v30271_v7 = vand.u32 4294901760, %v23985_v35  ;;  %v24047_v60 = vsub.f32 %v23979_v18, %v30273_v37 }
 0x1ad   :  { %v18296_v39 = vpop.f32.mrb[23].mxu0 }
 0x1ae   :  { %v18297_v29 = vadd.f32 %v18296_v39, %v18295_v1  ;;  %v2434_v1 = vsel %vm1934_vm0, %v979_v31, 0  ;;  %v24054_v39 = vsub.f32 %v23985_v35, %v30271_v7 }
 0x1b0   :  { %v1817_v0 = vadd.f32 %v18297_v29, %v1642_v41  ;;  %v2526_v41 = vsub.f32 %v23969_v56, %v23989_v58  ;;  %v30269_v29 = vand.u32 4294901760, %v24019_v9 }
 0x1b1   :  { %v18330_v4 = vpop.f32.mrb[20].mxu1 }
 0x1b2   :  { %v18331_v62 = vpop.f32.mrb[21].mxu1 }
 0x1b3   :  { %v18332_v43 = vadd.f32 %v18331_v62, %v18330_v4  ;;  %v30272_v4 = vand.u32 4294901760, %v24028_v15  ;;  %v30274_v62 = vand.u32 4294901760, %v24033_v44 }
 0x1b5   :  { %v1921_v49 = vadd.f32 %v18332_v43, %v1810_v16  ;;  %v18333_v45 = vpop.f32.mrb[22].mxu1  ;;  %v2431_v16 = vsel %vm1934_vm0, %v978_v34, 0  ;;  %v30275_v43 = vand.u32 4294901760, %v24038_v33  ;;  %v30278_v34 = vand.u32 4294901760, %v24069_v40 }
 0x1b6   :  { %v18334_v61 = vpop.f32.mrb[23].mxu1 }
 0x1b7   :  { %v23948_v38 = vand.u32 4294901760, %v1921_v49  ;;  %v18335_v25 = vadd.f32 %v18334_v61, %v18333_v45  ;;  %v24078_v45 = vand.u32 4294901760, %v2526_v41  ;;  %v24083_v61 = vsub.f32 %v24005_v3, %v30268_v30  ;;  %v24119_v41 = vld [vmem:[%s30149_s1 + $0x2b8] sm:$0xff] }
 0x1b8   :  { %30919 = vst [vmem:[#allocation6_spill] sm:$0xff] %v24119_v41  ;;  %v24125_v30 = vsub.f32 %v24028_v15, %v30272_v4 }
 0x1b9   :  { %v2029_v36 = vsub.f32 %v1921_v49, %v23948_v38  ;;  %v1928_v32 = vadd.f32 %v18335_v25, %v1817_v0  ;;  %20256 = vmatprep.subr.mxu0 %v23948_v38  ;;  %v24061_v0 = vsub.f32 %v23994_v21, %v30270_v51  ;;  %v24074_v49 = vld [vmem:[%s30149_s1 + $0x2a8] sm:$0xff]  ;;  %v24135_v51 = vsub.f32 %v24038_v33, %v30275_v43  ;;  %v24147_v25 = vld [vmem:[%s30149_s1 + $0x230] sm:$0xff]  ;;  %v24152_v43 = vld [vmem:[%s30149_s1 + $0x238] sm:$0xff] }
 0x1ba   :  { %20257 = vmatpush3.msra.mxu0 %v23948_v38  ;;  %v30279_v31 = vand.u32 4294901760, %v24074_v49  ;;  %30920 = vst [vmem:[#allocation31_spill] sm:$0xff] %v24147_v25  ;;  %30921 = vst [vmem:[#allocation7_spill] sm:$0xff] %v24152_v43  ;;  %v30937_v42 = vand.u32 4294901760, %v24125_v30 }
 0x1bb   :  { %v23953_v17 = vand.u32 4294901760, %v1928_v32  ;;  %20259 = vmatmul.mubr.f32.vlgmr.msra.gmra.mrb[24].mxu0 %v2021_v52  ;;  %v23955_v47 = vand.u32 4294901760, %v2029_v36  ;;  %v30280_v7 = vand.u32 4294901760, %v24061_v0  ;;  %v30941_v8 = vand.u32 4294901760, %v24135_v51 }
 0x1bc   :  { %20263 = vmatprep.mubr.f32.mxu0 %v23920_v59 }
 0x1bd   :  { %v3013_v23 = vsub.f32 %v1928_v32, %v23953_v17  ;;  %20316 = vmatprep.subr.mxu1 %v23953_v17  ;;  %v2031_v48 = vsub.f32 %v2029_v36, %v23955_v47  ;;  %v30277_v32 = vand.u32 4294901760, %v24047_v60 }
 0x1be   :  { %20317 = vmatpush3.msra.mxu1 %v23953_v17 }
 0x1bf   :  { %20319 = vmatmul.mubr.f32.vlgmr.msra.gmra.mrb[24].mxu1 %v2021_v52  ;;  %v2032_v53 = vand.u32 4294901760, %v2031_v48  ;;  %v23965_v54 = vand.u32 4294901760, %v3013_v23  ;;  %v24088_v52 = vand.u32 4294901760, %v2431_v16  ;;  %v24101_v48 = vld [vmem:[%s30149_s1 + $0x228] sm:$0xff] }
 0x1c0   :  { %20323 = vmatprep.mubr.f32.mxu1 %v23920_v59  ;;  %30917 = vst [vmem:[#allocation28_spill] sm:$0xff] %v24101_v48 }
 0x1c1   :  { %20261 = vmatprep.subr.mxu0 %v2032_v53  ;;  %v3015_v50 = vsub.f32 %v3013_v23, %v23965_v54 }
 0x1c2   :  { %20262 = vmatpush3.msra.mxu0 %v2032_v53  ;;  %v24106_v53 = vld [vmem:[%s30149_s1 + $0x2b0] sm:$0xff] }
 0x1c3   :  { %20264 = vmatmul.mubr.f32.vlgmr.msra.gmra.mrb[24].mxu0 %v23938_v28  ;;  %20266 = vmatprep.subr.mxu0 %v2029_v36  ;;  %v3016_v2 = vand.u32 4294901760, %v3015_v50  ;;  %30918 = vst [vmem:[#allocation30_spill] sm:$0xff] %v24106_v53  ;;  %v24111_v50 = vsub.f32 %v24019_v9, %v30269_v29  ;;  %v24130_v29 = vsub.f32 %v24033_v44, %v30274_v62  ;;  %v24182_v62 = vld [vmem:[%s30149_s1 + $0x2c0] sm:$0xff] }
 0x1c4   :  { %20267 = vmatpush3.msra.mxu0 %v2029_v36  ;;  %20268 = vmatprep.mubr.f32.mxu0 %v23923_v5  ;;  %v24090_v36 = vand.u32 4294901760, %v2434_v1  ;;  %30923 = vst [vmem:[#allocation33_spill] sm:$0xff] %v24182_v62  ;;  %v30947_v27 = vand.u32 4294901760, %v24182_v62 }
 0x1c5   :  { %20271 = vmatprep.subr.mxu0 %v23948_v38  ;;  %20321 = vmatprep.subr.mxu1 %v3016_v2  ;;  %v30940_v57 = vand.u32 4294901760, %v24130_v29 }
 0x1c6   :  { %20322 = vmatpush3.msra.mxu1 %v3016_v2  ;;  %v30276_v2 = vand.u32 4294901760, %v24054_v39  ;;  %v24159_v4 = vsub.f32 %v2434_v1, %v24090_v36  ;;  %v30933_v1 = vand.u32 4294901760, %v24119_v41 }
 0x1c7   :  { %20324 = vmatmul.mubr.f32.vlgmr.msra.gmra.mrb[24].mxu1 %v23938_v28  ;;  %20326 = vmatprep.subr.mxu1 %v3013_v23  ;;  %v24261_v20 = vpack.c.bf16 %v30941_v8, %v30940_v57  ;;  %v24279_v57 = vld [vmem:[%s30149_s1 + $0x250] sm:$0xff]  ;;  %v24284_v8 = vld [vmem:[%s30149_s1 + $0x258] sm:$0xff] }
 0x1c8   :  { %20327 = vmatpush3.msra.mxu1 %v3013_v23  ;;  %20328 = vmatprep.mubr.f32.mxu1 %v23923_v5  ;;  %v24042_v5 = vand.u32 4294901760, %v23998_v10  ;;  %v24096_v23 = vld [vmem:[%s30149_s1 + $0x220] sm:$0xff]  ;;  %v24166_v37 = vpack.c.bf16 %v30276_v2, %v30277_v32  ;;  %v30924_v2 = vand.u32 4294901760, %v24083_v61  ;;  %30945 = vst [vmem:[#allocation39_spill] sm:$0xff] %v24279_v57  ;;  %30946 = vst [vmem:[#allocation40_spill] sm:$0xff] %v24284_v8 }
 0x1c9   :  { %20331 = vmatprep.subr.mxu1 %v23953_v17  ;;  %30916 = vst [vmem:[#allocation5_spill] sm:$0xff] %v24096_v23  ;;  %30942 = vst [vmem:[#allocation38_spill] sm:$0xff] %v24261_v20  ;;  %v24296_v20 = vsub.f32 %v24182_v62, %v30947_v27 }
 0x1ca   :  { %30922 = vst [vmem:[#allocation32_spill] sm:$0xff] %v24166_v37  ;;  %v24188_v32 = vpack.c.bf16 %v30924_v2, %v30280_v7  ;;  %v30927_v2 = vand.u32 4294901760, %v24096_v23 }
 0x1cb   :  { %20269 = vmatmul.mubr.f32.vlgmr.msra.gmra.mrb[24].mxu0 %v23941_v12  ;;  %30948 = vst [vmem:[#allocation41_spill] sm:$0xff] %v24296_v20 }
 0x1cc   :  { %20272 = vmatpush3.msra.mxu0 %v23948_v38  ;;  %20273 = vmatprep.mubr.f32.mxu0 %v23926_v11  ;;  %30925 = vst [vmem:[#allocation8_spill] sm:$0xff] %v24188_v32  ;;  %v24205_v7 = vsub.f32 %v24096_v23, %v30927_v2  ;;  %v24226_v2 = vld [vmem:[%s30149_s1 + $0x248] sm:$0xff]  ;;  %v30936_v32 = vand.u32 4294901760, %v24111_v50 }
 0x1cd   :  { %20276 = vmatprep.subr.mxu0 %v23955_v47  ;;  %30932 = vst [vmem:[#allocation29_spill] sm:$0xff] %v24226_v2 }
 0x1ce   :  { %v24247_v37 = vpack.c.bf16 %v30937_v42, %v30936_v32  ;;  %v30943_v42 = vand.u32 4294901760, %v24147_v25 }
 0x1cf   :  { %20329 = vmatmul.mubr.f32.vlgmr.msra.gmra.mrb[24].mxu1 %v23941_v12  ;;  %v24171_v12 = vsub.f32 %v24069_v40, %v30278_v34  ;;  %v30929_v34 = vand.u32 4294901760, %v24106_v53 }
 0x1d0   :  { %20332 = vmatpush3.msra.mxu1 %v23953_v17  ;;  %20333 = vmatprep.mubr.f32.mxu1 %v23926_v11  ;;  %v24156_v11 = vsub.f32 %v2431_v16, %v24088_v52  ;;  %v24176_v16 = vsub.f32 %v24074_v49, %v30279_v31  ;;  %v30928_v31 = vand.u32 4294901760, %v24101_v48  ;;  %30938 = vst [vmem:[#allocation36_spill] sm:$0xff] %v24247_v37 }
 0x1d1   :  { %20336 = vmatprep.subr.mxu1 %v23965_v54  ;;  %v24216_v22 = vsub.f32 %v24106_v53, %v30929_v34  ;;  %v24235_v34 = vsub.f32 %v24119_v41, %v30933_v1  ;;  %v24267_v32 = vsub.f32 %v24147_v25, %v30943_v42  ;;  %v30944_v1 = vand.u32 4294901760, %v24152_v43 }
 0x1d2   :  { %v24210_v14 = vsub.f32 %v24101_v48, %v30928_v31  ;;  %v24230_v31 = vand.u32 4294901760, %v24156_v11  ;;  %v30949_v25 = vand.u32 4294901760, %v24171_v12  ;;  %v30952_v42 = vand.u32 4294901760, %v24198_v19 }
 0x1d3   :  { %20274 = vmatmul.mubr.f32.vlgmr.msra.gmra.mrb[24].mxu0 %v23944_v24  ;;  %30930 = vst [vmem:[#allocation10_spill] sm:$0xff] %v24216_v22  ;;  %30934 = vst [vmem:[#allocation34_spill] sm:$0xff] %v24235_v34  ;;  %v24272_v46 = vsub.f32 %v24152_v43, %v30944_v1  ;;  %v24316_v43 = vld [vmem:[%s30149_s1 + $0x2e0] sm:$0xff]  ;;  %v30967_v41 = vand.u32 4294901760, %v24216_v22  ;;  %v30968_v62 = vand.u32 4294901760, %v24235_v34  ;;  %v30972_v48 = vand.u32 4294901760, %v24267_v32 }
 0x1d4   :  { %20277 = vmatpush3.msra.mxu0 %v23955_v47  ;;  %20278 = vmatprep.mubr.f32.mxu0 %v23920_v59  ;;  %v24221_v47 = vld [vmem:[%s30149_s1 + $0x240] sm:$0xff]  ;;  %v24309_v37 = vsub.f32 %v24198_v19, %v30952_v42  ;;  %30954 = vst [vmem:[#allocation44_spill] sm:$0xff] %v24316_v43 }
 0x1d5   :  { %30931 = vst [vmem:[#allocation27_spill] sm:$0xff] %v24221_v47  ;;  %20281 = vmatprep.subr.mxu0 %v23948_v38  ;;  %v30959_v27 = vand.u32 4294901760, %v24221_v47  ;;  %v30973_v23 = vand.u32 4294901760, %v24272_v46 }
 0x1d6   :  { %30953 = vst [vmem:[#allocation43_spill] sm:$0xff] %v24309_v37 }
 0x1d7   :  { %20334 = vmatmul.mubr.f32.vlgmr.msra.gmra.mrb[24].mxu1 %v23944_v24  ;;  %v30950_v24 = vand.u32 4294901760, %v24176_v16  ;;  %v24333_v63 = vsub.f32 %v24221_v47, %v30959_v27  ;;  %v30963_v27 = vand.u32 4294901760, %v24241_v55  ;;  %v24382_v22 = vpack.c.bf16 %v30973_v23, %v30972_v48  ;;  %v24419_v23 = vld [vmem:[%s30149_s1 + $0x270] sm:$0xff] }
 0x1d8   :  { %20337 = vmatpush3.msra.mxu1 %v23965_v54  ;;  %20338 = vmatprep.mubr.f32.mxu1 %v23920_v59  ;;  %v24321_v54 = vld [vmem:[%s30149_s1 + $0x2e8] sm:$0xff]  ;;  %30977 = vst [vmem:[#allocation55_spill] sm:$0xff] %v24419_v23 }
 0x1d9   :  { %20341 = vmatprep.subr.mxu1 %v23953_v17  ;;  %v24304_v1 = vpack.c.bf16 %v30950_v24, %v30949_v25  ;;  %30955 = vst [vmem:[#allocation45_spill] sm:$0xff] %v24321_v54  ;;  %v30956_v25 = vand.u32 4294901760, %v24205_v7  ;;  %v30957_v24 = vand.u32 4294901760, %v24210_v14  ;;  %30960 = vst [vmem:[#allocation47_spill] sm:$0xff] %v24333_v63 }
 0x1da   :  { %30974 = vst [vmem:[#allocation54_spill] sm:$0xff] %v24382_v22 }
 0x1db   :  { %30951 = vst [vmem:[#allocation42_spill] sm:$0xff] %v24304_v1  ;;  %v24327_v42 = vpack.c.bf16 %v30957_v24, %v30956_v25  ;;  %20279 = vmatmul.mubr.f32.vlgmr.msra.gmra.mrb[24].mxu0 %v23938_v28  ;;  %v30961_v1 = vand.u32 4294901760, %v24226_v2  ;;  %v2505_v25 = vsub.f32 %v24156_v11, %v24230_v31  ;;  %v24347_v24 = vand.u32 4294901760, %v24159_v4 }
 0x1dc   :  { %20282 = vmatpush3.msra.mxu0 %v23948_v38  ;;  %20283 = vmatprep.mubr.f32.mxu0 %v23920_v59  ;;  %v24362_v38 = vld [vmem:[%s30149_s1 + $0x268] sm:$0xff] }
 0x1dd   :  { %30958 = vst [vmem:[#allocation46_spill] sm:$0xff] %v24327_v42  ;;  %v24338_v19 = vsub.f32 %v24226_v2, %v30961_v1  ;;  %v24352_v42 = vsub.f32 %v24241_v55, %v30963_v27  ;;  %v24357_v1 = vld [vmem:[%s30149_s1 + $0x260] sm:$0xff]  ;;  %30966 = vst [vmem:[#allocation51_spill] sm:$0xff] %v24362_v38  ;;  %v24368_v2 = vpack.c.bf16 %v30968_v62, %v30967_v41  ;;  %20286 = vmatprep.subr.mxu0 %v23958_v13  ;;  %v24424_v62 = vld [vmem:[%s30149_s1 + $0x278] sm:$0xff] }
 0x1de   :  { %30965 = vst [vmem:[#allocation50_spill] sm:$0xff] %v24357_v1  ;;  %v30970_v27 = vand.u32 4294901760, %v24255_v6  ;;  %v2506_v53 = vand.u32 4294901760, %v2505_v25  ;;  %v2515_v48 = vsub.f32 %v24159_v4, %v24347_v24  ;;  %30978 = vst [vmem:[#allocation56_spill] sm:$0xff] %v24424_v62  ;;  %v30982_v41 = vand.u32 4294901760, %v24316_v43 }
 0x1df   :  { %30962 = vst [vmem:[#allocation48_spill] sm:$0xff] %v24338_v19  ;;  %30964 = vst [vmem:[#allocation49_spill] sm:$0xff] %v24352_v42  ;;  %20339 = vmatmul.mubr.f32.vlgmr.msra.gmra.mrb[24].mxu1 %v23938_v28 }
 0x1e0   :  { %30969 = vst [vmem:[#allocation52_spill] sm:$0xff] %v24368_v2  ;;  %v24374_v55 = vsub.f32 %v24255_v6, %v30970_v27  ;;  %v30975_v2 = vand.u32 4294901760, %v24279_v57  ;;  %v30976_v27 = vand.u32 4294901760, %v24284_v8  ;;  %20342 = vmatpush3.msra.mxu1 %v23953_v17  ;;  %20343 = vmatprep.mubr.f32.mxu1 %v23920_v59  ;;  %v30979_v17 = vand.u32 4294901760, %v24296_v20 }
 0x1e1   :  { %v30980_v59 = vand.u32 4294901760, %v24309_v37  ;;  %20346 = vmatprep.subr.mxu1 %v23973_v26  ;;  %v24436_v22 = vsub.f32 %v24316_v43, %v30982_v41  ;;  %v30984_v20 = vand.u32 4294901760, %v24333_v63  ;;  %v30985_v37 = vand.u32 4294901760, %v24338_v19 }
 0x1e2   :  { %30971 = vst [vmem:[#allocation53_spill] sm:$0xff] %v24374_v55  ;;  %v24389_v34 = vsub.f32 %v24279_v57, %v30975_v2  ;;  %v24394_v47 = vsub.f32 %v24284_v8, %v30976_v27  ;;  %v24404_v2 = vld [vmem:[%s30149_s1 + $0x2f0] sm:$0xff]  ;;  %v24409_v27 = vld [vmem:[%s30149_s1 + $0x2f8] sm:$0xff]  ;;  %v30983_v8 = vand.u32 4294901760, %v24321_v54  ;;  %v30989_v43 = vand.u32 4294901760, %v24352_v42 }
 0x1e3   :  { %v24430_v25 = vpack.c.bf16 %v30980_v59, %v30979_v17  ;;  %v24448_v17 = vpack.c.bf16 %v30985_v37, %v30984_v20  ;;  %20284 = vmatmul.mubr.f32.vlgmr.msra.gmra.mrb[24].mxu0 %v23938_v28  ;;  %v30990_v41 = vand.u32 4294901760, %v24374_v55 }
 0x1e4   :  { %v24441_v57 = vsub.f32 %v24321_v54, %v30983_v8  ;;  %v30987_v8 = vand.u32 4294901760, %v24357_v1  ;;  %v30988_v54 = vand.u32 4294901760, %v24362_v38  ;;  %20287 = vmatpush3.msra.mxu0 %v23958_v13  ;;  %20288 = vmatprep.mubr.f32.mxu0 %v2506_v53  ;;  %v30993_v37 = vand.u32 4294901760, %v24389_v34 }
 0x1e5   :  { %30981 = vst [vmem:[#allocation57_spill] sm:$0xff] %v24430_v25  ;;  %30986 = vst [vmem:[#allocation58_spill] sm:$0xff] %v24448_v17  ;;  %v24472_v59 = vpack.c.bf16 %v30990_v41, %v30989_v43  ;;  %20291 = vmatprep.subr.mxu0 %v24078_v45  ;;  %v2516_v17 = vand.u32 4294901760, %v2515_v48  ;;  %v30994_v25 = vand.u32 4294901760, %v24394_v47  ;;  %v30997_v43 = vand.u32 4294901760, %v24409_v27 }
 0x1e6   :  { %v24458_v6 = vsub.f32 %v24357_v1, %v30987_v8  ;;  %v24463_v20 = vsub.f32 %v24362_v38, %v30988_v54  ;;  %v30992_v8 = vsub.f32 %v23998_v10, %v24042_v5  ;;  %v30996_v1 = vand.u32 4294901760, %v24404_v2 }
 0x1e7   :  { %30991 = vst [vmem:[#allocation59_spill] sm:$0xff] %v24472_v59  ;;  %v24482_v38 = vpack.c.bf16 %v30994_v25, %v30993_v37  ;;  %v24492_v41 = vsub.f32 %v24409_v27, %v30997_v43  ;;  %v30325_v59 = vand.u32 4294901760, %v24436_v22  ;;  %v30318_v48 = vand.u32 4294901760, %v24441_v57  ;;  %20344 = vmatmul.mubr.f32.vlgmr.msra.gmra.mrb[24].mxu1 %v23938_v28 }
 0x1e8   :  { %v3505_v54 = vand.u32 4294901760, %v30992_v8  ;;  %v24487_v42 = vsub.f32 %v24404_v2, %v30996_v1  ;;  %v30998_v8 = vand.u32 4294901760, %v24419_v23  ;;  %v30999_v37 = vand.u32 4294901760, %v24424_v62  ;;  %20347 = vmatpush3.msra.mxu1 %v23973_v26  ;;  %20348 = vmatprep.mubr.f32.mxu1 %v2506_v53 }
 0x1e9   :  { %30995 = vst [vmem:[#allocation60_spill] sm:$0xff] %v24482_v38  ;;  %v30324_v38 = vand.u32 4294901760, %v24458_v6  ;;  %v30319_v43 = vand.u32 4294901760, %v24463_v20  ;;  %v24514_v28 = vpack.c.bf16 %v30318_v48, %v30325_v59 }
 0x1ea   :  { %v24500_v25 = vsub.f32 %v24419_v23, %v30998_v8  ;;  %v24505_v1 = vsub.f32 %v24424_v62, %v30999_v37  ;;  %20351 = vmatprep.subr.mxu1 %v3505_v54  ;;  %v30323_v37 = vand.u32 4294901760, %v24487_v42  ;;  %v30322_v62 = vand.u32 4294901760, %v24492_v41 }
 0x1eb   :  { %31000 = vst [vmem:[#allocation61_spill] sm:$0xff] %v24514_v28  ;;  %v24520_v8 = vpack.c.bf16 %v30319_v43, %v30324_v38  ;;  %20289 = vmatmul.mubr.f32.vlgmr.msra.gmra.mrb[24].mxu0 %v2516_v17  ;;  %v31027_v38 = vld [vmem:[#allocation10_spill] sm:$0xff]  ;;  %v31053_v28 = vld [vmem:[#allocation49_spill] sm:$0xff] }
 0x1ec   :  { %v30321_v53 = vand.u32 4294901760, %v24500_v25  ;;  %v30320_v23 = vand.u32 4294901760, %v24505_v1  ;;  %20292 = vmatpush3.msra.mxu0 %v24078_v45  ;;  %20293 = vmatprep.mubr.f32.mxu0 %v24088_v52  ;;  %v24532_v48 = vpack.c.bf16 %v30322_v62, %v30323_v37  ;;  %v31021_v37 = vand.u32 4294901760, %v24210_v14 }
 0x1ed   :  { %31001 = vst [vmem:[#allocation62_spill] sm:$0xff] %v24520_v8  ;;  %20296 = vmatprep.subr.mxu0 %v23969_v56 }
 0x1ee   :  { %31002 = vst [vmem:[#allocation63_spill] sm:$0xff] %v24532_v48  ;;  %v24539_v43 = vpack.c.bf16 %v30320_v23, %v30321_v53  ;;  %v31019_v53 = vand.u32 4294901760, %v24028_v15  ;;  %v31023_v15 = vand.u32 4294901760, %v24038_v33 }
 0x1ef   :  { %20349 = vmatmul.mubr.f32.vlgmr.msra.gmra.mrb[24].mxu1 %v2516_v17 }
 0x1f0   :  { %31003 = vst [vmem:[#allocation64_spill] sm:$0xff] %v24539_v43  ;;  %20352 = vmatpush3.msra.mxu1 %v3505_v54  ;;  %20353 = vmatprep.mubr.f32.mxu1 %v24088_v52 }
 0x1f1   :  { %20356 = vmatprep.subr.mxu1 %v23998_v10 }
 0x1f3   :  { %20294 = vmatmul.mubr.f32.vlgmr.msra.gmra.mrb[24].mxu0 %v24090_v36 }
 0x1f4   :  { %20297 = vmatpush3.msra.mxu0 %v23969_v56  ;;  %20298 = vmatprep.mubr.f32.mxu0 %v24156_v11  ;;  %v31004_v56 = vand.u32 4294901760, %v24047_v60 }
 0x1f5   :  { %20301 = vmatprep.subr.mxu0 %v23958_v13 }
 0x1f7   :  { %20354 = vmatmul.mubr.f32.vlgmr.msra.gmra.mrb[24].mxu1 %v24090_v36 }
 0x1f8   :  { %20357 = vmatpush3.msra.mxu1 %v23998_v10  ;;  %20358 = vmatprep.mubr.f32.mxu1 %v24156_v11  ;;  %v4179_v10 = vsub.f32 %v24047_v60, %v31004_v56  ;;  %v31007_v11 = vand.u32 4294901760, %v23985_v35  ;;  %v31009_v56 = vand.u32 4294901760, %v24083_v61 }
 0x1f9   :  { %20361 = vmatprep.subr.mxu1 %v23973_v26 }
 0x1fa   :  { %v4180_v17 = vand.u32 4294901760, %v4179_v10  ;;  %v31010_v10 = vand.u32 4294901760, %v24111_v50 }
 0x1fb   :  { %20299 = vmatmul.mubr.f32.vlgmr.msra.gmra.mrb[24].mxu0 %v24159_v4 }
 0x1fc   :  { %20302 = vmatpush3.msra.mxu0 %v23958_v13  ;;  %20303 = vmatprep.mubr.f32.mxu0 %v24230_v31 }
 0x1fd   :  { %20306 = vmatprep.subr.mxu0 %v23989_v58 }
 0x1ff   :  { %20359 = vmatmul.mubr.f32.vlgmr.msra.gmra.mrb[24].mxu1 %v24159_v4  ;;  %v31005_v4 = vand.u32 4294901760, %v24054_v39 }
 0x200   :  { %20362 = vmatpush3.msra.mxu1 %v23973_v26  ;;  %20363 = vmatprep.mubr.f32.mxu1 %v24230_v31 }
 0x201   :  { %20366 = vmatprep.subr.mxu1 %v24042_v5  ;;  %v4186_v45 = vsub.f32 %v24054_v39, %v31005_v4  ;;  %v4193_v4 = vsub.f32 %v24111_v50, %v31010_v10 }
 0x203   :  { %20304 = vmatmul.mubr.f32.vlgmr.msra.gmra.mrb[24].mxu0 %v24347_v24  ;;  %v4187_v54 = vand.u32 4294901760, %v4186_v45  ;;  %v31011_v45 = vand.u32 4294901760, %v24125_v30 }
 0x204   :  { %20307 = vmatpush3.msra.mxu0 %v23989_v58  ;;  %20308 = vmatprep.mubr.f32.mxu0 %v24088_v52  ;;  %v31006_v58 = vand.u32 4294901760, %v23979_v18  ;;  %v4074_v18 = vsub.f32 %v24083_v61, %v31009_v56  ;;  %v31014_v56 = vand.u32 4294901760, %v24130_v29 }
 0x205   :  { %20311 = vmatprep.subr.mxu0 %v23958_v13  ;;  %v21212_v35 = vpack.c.bf16 %v4187_v54, %v4180_v17  ;;  %v31015_v54 = vand.u32 4294901760, %v24135_v51 }
 0x206   :  { %v24577_v31 = vpack.c.bf16 %v31007_v11, %v31006_v58  ;;  %v31012_v58 = vand.u32 4294901760, %v23994_v21  ;;  %v31013_v11 = vand.u32 4294901760, %v24005_v3  ;;  %v4081_v17 = vsub.f32 %v24130_v29, %v31014_v56 }
 0x207   :  { %20364 = vmatmul.mubr.f32.vlgmr.msra.gmra.mrb[24].mxu1 %v24347_v24  ;;  %v4088_v10 = vsub.f32 %v24135_v51, %v31015_v54  ;;  %v4075_v23 = vand.u32 4294901760, %v4074_v18  ;;  %v31016_v21 = vand.u32 4294901760, %v24171_v12  ;;  %v31018_v56 = vand.u32 4294901760, %v24019_v9 }
 0x208   :  { %20367 = vmatpush3.msra.mxu1 %v24042_v5  ;;  %20368 = vmatprep.mubr.f32.mxu1 %v24088_v52  ;;  %v31008_v5 = vand.u32 4294901760, %v24061_v0  ;;  %v31020_v18 = vand.u32 4294901760, %v24205_v7  ;;  %v31022_v9 = vand.u32 4294901760, %v24033_v44  ;;  %v31028_v44 = vand.u32 4294901760, %v31027_v38 }
 0x209   :  { %20371 = vmatprep.subr.mxu1 %v23973_v26  ;;  %v4207_v3 = vsub.f32 %v24171_v12, %v31016_v21  ;;  %v24620_v62 = vpack.c.bf16 %v31019_v53, %v31018_v56  ;;  %v31026_v56 = vand.u32 4294901760, %v24074_v49  ;;  %v31036_v49 = vld [vmem:[#allocation30_spill] sm:$0xff] }
 0x20a   :  { %v4067_v24 = vsub.f32 %v24061_v0, %v31008_v5  ;;  %v24600_v5 = vpack.c.bf16 %v31013_v11, %v31012_v58  ;;  %v31017_v58 = vand.u32 4294901760, %v24176_v16  ;;  %v4095_v21 = vsub.f32 %v24205_v7, %v31020_v18 }
 0x20b   :  { %20309 = vmatmul.mubr.f32.vlgmr.msra.gmra.mrb[24].mxu0 %v24090_v36  ;;  %v24634_v53 = vpack.c.bf16 %v31023_v15, %v31022_v9  ;;  %v4221_v33 = vsub.f32 %v31027_v38, %v31028_v44  ;;  %v31029_v9 = vld [vmem:[#allocation34_spill] sm:$0xff] }
 0x20c   :  { %20312 = vmatpush3.msra.mxu0 %v23958_v13  ;;  %20313 = vmatprep.mubr.f32.mxu0 %v24088_v52  ;;  %v4200_v13 = vsub.f32 %v24125_v30, %v31011_v45  ;;  %v4068_v45 = vand.u32 4294901760, %v4067_v24  ;;  %v4214_v11 = vsub.f32 %v24176_v16, %v31017_v58  ;;  %v4089_v24 = vand.u32 4294901760, %v4088_v10 }
 0x20d   :  { %21181 = vmatprep.subr.bf16.mxu0 %v24577_v31  ;;  %v4102_v58 = vsub.f32 %v24210_v14, %v31021_v37  ;;  %v31025_v10 = vand.u32 4294901760, %v24069_v40  ;;  %v31030_v15 = vand.u32 4294901760, %v31029_v9  ;;  %v4096_v44 = vand.u32 4294901760, %v4095_v21 }
 0x20e   :  { %v4201_v54 = vand.u32 4294901760, %v4200_v13  ;;  %v4215_v13 = vand.u32 4294901760, %v4214_v11  ;;  %v31033_v11 = vld [vmem:[#allocation28_spill] sm:$0xff] }
 0x20f   :  { %20369 = vmatmul.mubr.f32.vlgmr.msra.gmra.mrb[24].mxu1 %v24090_v36  ;;  %v24642_v37 = vpack.c.bf16 %v31026_v56, %v31025_v10  ;;  %v31034_v59 = vand.u32 4294901760, %v31033_v11  ;;  %v31037_v10 = vand.u32 4294901760, %v31036_v49  ;;  %v4103_v43 = vand.u32 4294901760, %v4102_v58  ;;  %v31042_v11 = vld [vmem:[#allocation41_spill] sm:$0xff]  ;;  %v31044_v49 = vld [vmem:[#allocation43_spill] sm:$0xff] }
 0x210   :  { %20372 = vmatpush3.msra.mxu1 %v23973_v26  ;;  %20373 = vmatprep.mubr.f32.mxu1 %v24088_v52  ;;  %v4194_v26 = vand.u32 4294901760, %v4193_v4  ;;  %v4082_v52 = vand.u32 4294901760, %v4081_v17  ;;  %v4208_v4 = vand.u32 4294901760, %v4207_v3  ;;  %v31024_v17 = vld [vmem:[#allocation17_spill] sm:$0xff]  ;;  %v31043_v21 = vand.u32 4294901760, %v31042_v11 }
 0x211   :  { %21213 = vmatprep.subr.bf16.mxu1 %v21212_v35  ;;  %v21214_v35 = vpack.c.bf16 %v4075_v23, %v4068_v45  ;;  %v4228_v23 = vsub.f32 %v31029_v9, %v31030_v15  ;;  %v31031_v45 = vld [vmem:[#allocation5_spill] sm:$0xff]  ;;  %v21222_v48 = vpack.c.bf16 %v4103_v43, %v4096_v44 }
 0x212   :  { %v21216_v18 = vpack.c.bf16 %v4201_v54, %v4194_v26  ;;  %v31032_v3 = vand.u32 4294901760, %v31031_v45  ;;  %v21218_v40 = vpack.c.bf16 %v4089_v24, %v4082_v52  ;;  %v31038_v26 = vld [vmem:[#allocation6_spill] sm:$0xff]  ;;  %v21220_v15 = vpack.c.bf16 %v4215_v13, %v4208_v4  ;;  %v31046_v13 = vld [vmem:[#allocation11_spill] sm:$0xff]  ;;  %v31056_v44 = vld [vmem:[#allocation33_spill] sm:$0xff] }
 0x213   :  { %20314 = vmatmul.mubr.f32.vlgmr.msra.gmra.mrb[24].mxu0 %v24090_v36  ;;  %v31039_v54 = vand.u32 4294901760, %v31038_v26  ;;  %v31040_v45 = vand.u32 4294901760, %v24267_v32  ;;  %v4222_v52 = vand.u32 4294901760, %v4221_v33  ;;  %v4229_v24 = vand.u32 4294901760, %v4228_v23 }
 0x214   :  { %21183 = vmatpush3.bf16.msra.mxu0 %v24600_v5  ;;  %4037 = vmatprep.mubr.f32.mxu0 %v31024_v17  ;;  %v24654_v17 = vpack.c.bf16 %v31034_v59, %v31032_v3  ;;  %v31041_v3 = vand.u32 4294901760, %v24272_v46  ;;  %v4235_v58 = vsub.f32 %v31042_v11, %v31043_v21  ;;  %v31052_v23 = vand.u32 4294901760, %v24338_v19 }
 0x215   :  { %21185 = vmatprep.subr.bf16.mxu0 %v24620_v62  ;;  %v24661_v56 = vpack.c.bf16 %v31039_v54, %v31037_v10  ;;  %v4109_v59 = vsub.f32 %v24267_v32, %v31040_v45  ;;  %v31047_v10 = vld [vmem:[#allocation31_spill] sm:$0xff] }
 0x216   :  { %31035 = vst [vmem:[#allocation10_spill] sm:$0xff] %v24654_v17  ;;  %v31048_v26 = vand.u32 4294901760, %v31047_v10  ;;  %v31049_v54 = vld [vmem:[#allocation7_spill] sm:$0xff]  ;;  %v4130_v21 = vsub.f32 %v24338_v19, %v31052_v23  ;;  %v31054_v10 = vand.u32 4294901760, %v31053_v28 }
 0x217   :  { %20374 = vmatmul.mubr.f32.vlgmr.msra.gmra.mrb[24].mxu1 %v24090_v36  ;;  %v4116_v36 = vsub.f32 %v24272_v46, %v31041_v3  ;;  %v31050_v45 = vand.u32 4294901760, %v31049_v54  ;;  %v31060_v19 = vld [vmem:[#allocation27_spill] sm:$0xff] }
 0x218   :  { %21187 = vmatpush3.bf16.msra.mxu0 %v24634_v53  ;;  %21215 = vmatpush3.bf16.msra.mxu1 %v21214_v35  ;;  %v31045_v35 = vand.u32 4294901760, %v31044_v49  ;;  %v4249_v54 = vsub.f32 %v31053_v28, %v31054_v10 }
 0x219   :  { %21189 = vmatprep.subr.bf16.mxu0 %v24642_v37  ;;  %21217 = vmatprep.subr.bf16.mxu1 %v21216_v18  ;;  %v24682_v3 = vpack.c.bf16 %v31050_v45, %v31048_v26  ;;  %v31051_v18 = vand.u32 4294901760, %v24333_v63  ;;  %v4117_v8 = vand.u32 4294901760, %v4116_v36  ;;  %v31055_v26 = vand.u32 4294901760, %v24374_v55 }
 0x21a   :  { %v4242_v4 = vsub.f32 %v31044_v49, %v31045_v35  ;;  %4288 = vmatprep.mubr.f32.mxu1 %v31046_v13  ;;  %v4110_v35 = vand.u32 4294901760, %v4109_v59  ;;  %v31057_v45 = vand.u32 4294901760, %v31056_v44  ;;  %v4236_v59 = vand.u32 4294901760, %v4235_v58  ;;  %v31068_v58 = vld [vmem:[#allocation37_spill] sm:$0xff] }
 0x21b   :  { %v4123_v33 = vsub.f32 %v24333_v63, %v31051_v18  ;;  %v4256_v43 = vsub.f32 %v24374_v55, %v31055_v26  ;;  %v31058_v18 = vld [vmem:[#allocation9_spill] sm:$0xff]  ;;  %v31061_v63 = vand.u32 4294901760, %v31060_v19  ;;  %v4131_v26 = vand.u32 4294901760, %v4130_v21 }
 0x21c   :  { %21191 = vmatpush3.bf16.msra.mxu0 %v24654_v17  ;;  %21219 = vmatpush3.bf16.msra.mxu1 %v21218_v40  ;;  %v31059_v23 = vand.u32 4294901760, %v31058_v18  ;;  %v21224_v40 = vpack.c.bf16 %v4229_v24, %v4222_v52  ;;  %v4243_v36 = vand.u32 4294901760, %v4242_v4  ;;  %v31062_v17 = vld [vmem:[#allocation29_spill] sm:$0xff]  ;;  %v31064_v55 = vand.u32 4294901760, %v24389_v34  ;;  %v31066_v24 = vld [vmem:[#allocation35_spill] sm:$0xff] }
 0x21d   :  { %21193 = vmatprep.subr.bf16.mxu0 %v24661_v56  ;;  %21221 = vmatprep.subr.bf16.mxu1 %v21220_v15  ;;  %v31063_v10 = vand.u32 4294901760, %v31062_v17  ;;  %v4124_v49 = vand.u32 4294901760, %v4123_v33  ;;  %v31065_v44 = vand.u32 4294901760, %v24394_v47  ;;  %v21226_v52 = vpack.c.bf16 %v4117_v8, %v4110_v35  ;;  %v31072_v8 = vld [vmem:[#allocation39_spill] sm:$0xff] }
 0x21e   :  { %v24702_v13 = vpack.c.bf16 %v31059_v23, %v31057_v45  ;;  %v4137_v15 = vsub.f32 %v24389_v34, %v31064_v55  ;;  %v31067_v19 = vand.u32 4294901760, %v31066_v24  ;;  %v31069_v17 = vand.u32 4294901760, %v31068_v58  ;;  %v31078_v58 = vld [vmem:[#allocation45_spill] sm:$0xff] }
 0x21f   :  { %v24708_v28 = vpack.c.bf16 %v31063_v10, %v31061_v63  ;;  %v4144_v45 = vsub.f32 %v24394_v47, %v31065_v44  ;;  %v4250_v4 = vand.u32 4294901760, %v4249_v54  ;;  %v4257_v33 = vand.u32 4294901760, %v4256_v43  ;;  %v31074_v10 = vld [vmem:[#allocation40_spill] sm:$0xff] }
 0x220   :  { %21195 = vmatpush3.bf16.msra.mxu0 %v24682_v3  ;;  %21223 = vmatpush3.bf16.msra.mxu1 %v21222_v48  ;;  %v24721_v63 = vpack.c.bf16 %v31069_v17, %v31067_v19  ;;  %v21228_v55 = vpack.c.bf16 %v4243_v36, %v4236_v59  ;;  %v31070_v21 = vand.u32 4294901760, %v24436_v22  ;;  %v31071_v23 = vand.u32 4294901760, %v24441_v57  ;;  %v31076_v43 = vld [vmem:[#allocation44_spill] sm:$0xff] }
 0x221   :  { %21197 = vmatprep.subr.bf16.mxu0 %v24702_v13  ;;  %21225 = vmatprep.subr.bf16.mxu1 %v21224_v40  ;;  %v31073_v35 = vand.u32 4294901760, %v31072_v8  ;;  %v31075_v44 = vand.u32 4294901760, %v31074_v10  ;;  %v21230_v54 = vpack.c.bf16 %v4131_v26, %v4124_v49  ;;  %v31077_v19 = vand.u32 4294901760, %v31076_v43  ;;  %v31087_v43 = vld [vmem:[#allocation51_spill] sm:$0xff] }
 0x222   :  { %v4263_v18 = vsub.f32 %v24436_v22, %v31070_v21  ;;  %v4270_v48 = vsub.f32 %v24441_v57, %v31071_v23  ;;  %v31079_v40 = vand.u32 4294901760, %v31078_v58  ;;  %v4138_v36 = vand.u32 4294901760, %v4137_v15 }
 0x223   :  { %v24734_v24 = vpack.c.bf16 %v31075_v44, %v31073_v35  ;;  %v4145_v17 = vand.u32 4294901760, %v4144_v45  ;;  %v21232_v21 = vpack.c.bf16 %v4257_v33, %v4250_v4  ;;  %v31081_v23 = vand.u32 4294901760, %v24458_v6  ;;  %v31085_v33 = vld [vmem:[#allocation50_spill] sm:$0xff] }
 0x224   :  { %v24740_v59 = vpack.c.bf16 %v31079_v40, %v31077_v19  ;;  %21199 = vmatpush3.bf16.msra.mxu0 %v24708_v28  ;;  %21227 = vmatpush3.bf16.msra.mxu1 %v21226_v52  ;;  %v31082_v35 = vand.u32 4294901760, %v24463_v20  ;;  %v4264_v26 = vand.u32 4294901760, %v4263_v18  ;;  %v4271_v10 = vand.u32 4294901760, %v4270_v48 }
 0x225   :  { %v4151_v8 = vsub.f32 %v24458_v6, %v31081_v23  ;;  %21201 = vmatprep.subr.bf16.mxu0 %v24721_v63  ;;  %21229 = vmatprep.subr.bf16.mxu1 %v21228_v55  ;;  %v31083_v15 = vand.u32 4294901760, %v24487_v42  ;;  %v31084_v52 = vand.u32 4294901760, %v24492_v41  ;;  %v31086_v44 = vand.u32 4294901760, %v31085_v33  ;;  %v31093_v33 = vld [vmem:[#allocation55_spill] sm:$0xff] }
 0x226   :  { %31080 = vst [vmem:[#allocation34_spill] sm:$0xff] %v24740_v59  ;;  %v4158_v49 = vsub.f32 %v24463_v20, %v31082_v35  ;;  %v31088_v19 = vand.u32 4294901760, %v31087_v43  ;;  %v21234_v40 = vpack.c.bf16 %v4145_v17, %v4138_v36  ;;  %v31089_v48 = vand.u32 4294901760, %v24500_v25  ;;  %v31095_v43 = vld [vmem:[#allocation56_spill] sm:$0xff] }
 0x227   :  { %v4277_v45 = vsub.f32 %v24487_v42, %v31083_v15  ;;  %v4284_v4 = vsub.f32 %v24492_v41, %v31084_v52  ;;  %v4152_v55 = vand.u32 4294901760, %v4151_v8  ;;  %v31090_v35 = vand.u32 4294901760, %v24505_v1 }
 0x228   :  { %v24760_v58 = vpack.c.bf16 %v31088_v19, %v31086_v44  ;;  %21203 = vmatpush3.bf16.msra.mxu0 %v24734_v24  ;;  %21231 = vmatpush3.bf16.msra.mxu1 %v21230_v54  ;;  %v4159_v18 = vand.u32 4294901760, %v4158_v49  ;;  %v4165_v23 = vsub.f32 %v24500_v25, %v31089_v48  ;;  %v31091_v52 = vand.u32 4294901760, %v24404_v2 }
 0x229   :  { %v4172_v15 = vsub.f32 %v24505_v1, %v31090_v35  ;;  %21205 = vmatprep.subr.bf16.mxu0 %v24740_v59  ;;  %21233 = vmatprep.subr.bf16.mxu1 %v21232_v21  ;;  %v31092_v36 = vand.u32 4294901760, %v24409_v27  ;;  %v21236_v54 = vpack.c.bf16 %v4271_v10, %v4264_v26  ;;  %v4278_v8 = vand.u32 4294901760, %v4277_v45 }
 0x22a   :  { %v4285_v49 = vand.u32 4294901760, %v4284_v4  ;;  %v31094_v44 = vand.u32 4294901760, %v31093_v33  ;;  %v31096_v19 = vand.u32 4294901760, %v31095_v43  ;;  %v21238_v35 = vpack.c.bf16 %v4159_v18, %v4152_v55  ;;  %v31097_v4 = vld [vmem:[#allocation18_spill] sm:$0xff]  ;;  %v31108_v55 = vld [vmem:[#allocation48_spill] sm:$0xff]  ;;  %v31127_v43 = vld [vmem:[#allocation57_spill] sm:$0xff] }
 0x22b   :  { %v24774_v17 = vpack.c.bf16 %v31092_v36, %v31091_v52  ;;  %v4166_v21 = vand.u32 4294901760, %v4165_v23  ;;  %v4173_v59 = vand.u32 4294901760, %v4172_v15  ;;  %v21244_v27 = vpack.c.bf16 %v24054_v39, %v24047_v60  ;;  %v31098_v39 = vld [vmem:[#allocation25_spill] sm:$0xff]  ;;  %v31123_v33 = vld [vmem:[#allocation24_spill] sm:$0xff] }
 0x22c   :  { %21207 = vmatpush3.bf16.msra.mxu0 %v24760_v58  ;;  %21235 = vmatpush3.bf16.msra.mxu1 %v21234_v40  ;;  %v24781_v48 = vpack.c.bf16 %v31096_v19, %v31094_v44  ;;  %v21240_v2 = vpack.c.bf16 %v4285_v49, %v4278_v8  ;;  %v21246_v10 = vpack.c.bf16 %v24083_v61, %v24061_v0  ;;  %v31099_v0 = vld [vmem:[#allocation12_spill] sm:$0xff]  ;;  %v31100_v61 = vld [vmem:[#allocation26_spill] sm:$0xff]  ;;  %v31109_v23 = vld [vmem:[#allocation49_spill] sm:$0xff] }
 0x22d   :  { %21209 = vmatprep.subr.bf16.mxu0 %v24774_v17  ;;  %21237 = vmatprep.subr.bf16.mxu1 %v21236_v54  ;;  %v21242_v26 = vpack.c.bf16 %v4173_v59, %v4166_v21  ;;  %v21248_v45 = vpack.c.bf16 %v24125_v30, %v24111_v50  ;;  %v21250_v40 = vpack.c.bf16 %v24135_v51, %v24130_v29  ;;  %v31101_v29 = vld [vmem:[#allocation19_spill] sm:$0xff]  ;;  %v31102_v50 = vld [vmem:[#allocation13_spill] sm:$0xff]  ;;  %v31120_v54 = vld [vmem:[#allocation22_spill] sm:$0xff] }
 0x22e   :  { %v21252_v60 = vpack.c.bf16 %v24176_v16, %v24171_v12  ;;  %v21254_v30 = vpack.c.bf16 %v24210_v14, %v24205_v7  ;;  %v21256_v51 = vpack.c.bf16 %v31029_v9, %v31027_v38  ;;  %v31103_v12 = vld [vmem:[#allocation21_spill] sm:$0xff]  ;;  %v21258_v16 = vpack.c.bf16 %v24272_v46, %v24267_v32  ;;  %v31104_v14 = vld [vmem:[#allocation43_spill] sm:$0xff]  ;;  %v31106_v38 = vld [vmem:[#allocation10_spill] sm:$0xff] }
 0x22f   :  { %v21260_v7 = vpack.c.bf16 %v31104_v14, %v31042_v11  ;;  %v31105_v59 = vld [vmem:[#allocation15_spill] sm:$0xff]  ;;  %v31110_v15 = vld [vmem:[#allocation53_spill] sm:$0xff]  ;;  %v21266_v32 = vpack.c.bf16 %v24394_v47, %v24389_v34  ;;  %v21268_v11 = vpack.c.bf16 %v24441_v57, %v24436_v22  ;;  %v21270_v52 = vpack.c.bf16 %v24463_v20, %v24458_v6  ;;  %v31111_v22 = vld [vmem:[#allocation34_spill] sm:$0xff] }
 0x230   :  { %21211 = vmatpush3.bf16.msra.mxu0 %v24781_v48  ;;  %21239 = vmatpush3.bf16.msra.mxu1 %v21238_v35  ;;  %v31107_v9 = vld [vmem:[#allocation47_spill] sm:$0xff]  ;;  %v21264_v46 = vpack.c.bf16 %v31110_v15, %v31109_v23  ;;  %v21272_v36 = vpack.c.bf16 %v24492_v41, %v24487_v42  ;;  %v21274_v47 = vpack.c.bf16 %v24505_v1, %v24500_v25  ;;  %v31112_v6 = vld [vmem:[#allocation32_spill] sm:$0xff]  ;;  %v31113_v34 = vld [vmem:[#allocation14_spill] sm:$0xff] }
 0x231   :  { %21241 = vmatprep.subr.bf16.mxu1 %v21240_v2  ;;  %21245 = vmatprep.subr.bf16.mxu0 %v21244_v27  ;;  %v21262_v18 = vpack.c.bf16 %v31108_v55, %v31107_v9  ;;  %v31114_v57 = vld [vmem:[#allocation8_spill] sm:$0xff]  ;;  %v31117_v41 = vld [vmem:[#allocation23_spill] sm:$0xff]  ;;  %v31119_v1 = vld [vmem:[#allocation38_spill] sm:$0xff] }
 0x232   :  { %v31115_v42 = vld [vmem:[#allocation20_spill] sm:$0xff]  ;;  %v31121_v8 = vld [vmem:[#allocation42_spill] sm:$0xff]  ;;  %v31122_v49 = vld [vmem:[#allocation11_spill] sm:$0xff] }
 0x233   :  { %4043 = vmatmul.mubr.f32.vlgmr.msra.gmra.mrb[26].mxu0 %v31097_v4  ;;  %v31116_v20 = vld [vmem:[#allocation36_spill] sm:$0xff]  ;;  %v31124_v44 = vld [vmem:[#allocation46_spill] sm:$0xff]  ;;  %v31129_v19 = vld [vmem:[#allocation59_spill] sm:$0xff] }
 0x234   :  { %21243 = vmatpush3.bf16.msra.mxu1 %v21242_v26  ;;  %21247 = vmatpush3.bf16.msra.mxu0 %v21246_v10  ;;  %v31118_v25 = vld [vmem:[#allocation16_spill] sm:$0xff]  ;;  %v31132_v35 = vld [vmem:[#allocation62_spill] sm:$0xff] }
 0x235   :  { %21249 = vmatprep.subr.bf16.mxu0 %v21248_v45  ;;  %21277 = vmatprep.subr.bf16.mxu1 %v24577_v31  ;;  %v25232_v4 = vld [vmem:[%s30149_s1 + $0x368] sm:$0xff] }
 0x236   :  { %4052 = vmatprep.mubr.f32.mxu0 %v31098_v39  ;;  %31175 = vst [vmem:[#allocation34_spill] sm:$0xff] %v25232_v4 }
 0x237   :  { %4290 = vmatmul.mubr.f32.vlgmr.msra.gmra.mrb[26].mxu1 %v31099_v0  ;;  %4058 = vmatmul.mubr.f32.gmra.mrb[28].mxu0 %v31100_v61  ;;  %v25213_v61 = vld [vmem:[%s30149_s1 + $0x360] sm:$0xff] }
 0x238   :  { %21251 = vmatpush3.bf16.msra.mxu0 %v21250_v40  ;;  %21279 = vmatpush3.bf16.msra.mxu1 %v24600_v5  ;;  %31169 = vst [vmem:[#allocation48_spill] sm:$0xff] %v25213_v61 }
 0x239   :  { %21253 = vmatprep.subr.bf16.mxu0 %v21252_v60  ;;  %21281 = vmatprep.subr.bf16.mxu1 %v24620_v62 }
 0x23a   :  { %4295 = vmatprep.mubr.f32.mxu1 %v31101_v29  ;;  %4432 = vmatprep.mubr.f32.mxu0 %v31102_v50 }
 0x23b   :  { %4297 = vmatmul.mubr.f32.gmra.mrb[28].mxu1 %v31103_v12 }
 0x23c   :  { %21255 = vmatpush3.bf16.msra.mxu0 %v21254_v30  ;;  %21283 = vmatpush3.bf16.msra.mxu1 %v24634_v53 }
 0x23d   :  { %21257 = vmatprep.subr.bf16.mxu0 %v21256_v51  ;;  %21285 = vmatprep.subr.bf16.mxu1 %v24642_v37 }
 0x23e   :  { %4548 = vmatprep.mubr.f32.mxu1 %v31105_v59 }
 0x240   :  { %21259 = vmatpush3.bf16.msra.mxu0 %v21258_v16  ;;  %21287 = vmatpush3.bf16.msra.mxu1 %v31106_v38 }
 0x241   :  { %21261 = vmatprep.subr.bf16.mxu0 %v21260_v7  ;;  %21289 = vmatprep.subr.bf16.mxu1 %v24661_v56 }
 0x244   :  { %21263 = vmatpush3.bf16.msra.mxu0 %v21262_v18  ;;  %21291 = vmatpush3.bf16.msra.mxu1 %v24682_v3 }
 0x245   :  { %21265 = vmatprep.subr.bf16.mxu0 %v21264_v46  ;;  %21293 = vmatprep.subr.bf16.mxu1 %v24702_v13 }
 0x248   :  { %21267 = vmatpush3.bf16.msra.mxu0 %v21266_v32  ;;  %21295 = vmatpush3.bf16.msra.mxu1 %v24708_v28 }
 0x249   :  { %21269 = vmatprep.subr.bf16.mxu0 %v21268_v11  ;;  %21297 = vmatprep.subr.bf16.mxu1 %v24721_v63 }
 0x24c   :  { %21271 = vmatpush3.bf16.msra.mxu0 %v21270_v52  ;;  %21299 = vmatpush3.bf16.msra.mxu1 %v24734_v24  ;;  %v17675_v52 = vld [vmem:[%s30150_s2 + $0x28] sm:$0xff] }
 0x24d   :  { %21273 = vmatprep.subr.bf16.mxu0 %v21272_v36  ;;  %21301 = vmatprep.subr.bf16.mxu1 %v31111_v22 }
 0x250   :  { %21275 = vmatpush3.bf16.msra.mxu0 %v21274_v47  ;;  %21303 = vmatpush3.bf16.msra.mxu1 %v24760_v58 }
 0x251   :  { %21305 = vmatprep.subr.bf16.mxu1 %v24774_v17  ;;  %21309 = vmatprep.subr.bf16.mxu0 %v31112_v6  ;;  %v24912_v6 = vld [vmem:[%s30149_s1 + $0x388] sm:$0xff] }
 0x253   :  { %4435 = vmatmul.mubr.f32.vlgmr.msra.gmra.mrb[30].mxu0 %v31113_v34 }
 0x254   :  { %21307 = vmatpush3.bf16.msra.mxu1 %v24781_v48  ;;  %21311 = vmatpush3.bf16.msra.mxu0 %v31114_v57  ;;  %v24917_v57 = vld [vmem:[%s30149_s1 + $0x300] sm:$0xff] }
 0x255   :  { %4441 = vmatprep.mubr.f32.mxu0 %v31115_v42  ;;  %21313 = vmatprep.subr.bf16.mxu0 %v31116_v20  ;;  %v25151_v42 = vld [vmem:[%s30149_s1 + $0x350] sm:$0xff] }
 0x256   :  { %21341 = vmatprep.subr.bf16.mxu1 %v24577_v31  ;;  %v31125_v31 = vld [vmem:[#allocation52_spill] sm:$0xff]  ;;  %31152 = vst [vmem:[#allocation40_spill] sm:$0xff] %v25151_v42 }
 0x257   :  { %4444 = vmatmul.mubr.f32.gmra.mrb[32].mxu0 %v31117_v41  ;;  %4552 = vmatmul.mubr.f32.vlgmr.msra.gmra.mrb[30].mxu1 %v31118_v25 }
 0x258   :  { %21315 = vmatpush3.bf16.msra.mxu0 %v31119_v1  ;;  %21343 = vmatpush3.bf16.msra.mxu1 %v24600_v5  ;;  %v31126_v5 = vld [vmem:[#allocation54_spill] sm:$0xff] }
 0x259   :  { %4559 = vmatprep.mubr.f32.mxu1 %v31120_v54  ;;  %21317 = vmatprep.subr.bf16.mxu0 %v31121_v8 }
 0x25a   :  { %21345 = vmatprep.subr.bf16.mxu1 %v24620_v62  ;;  %4729 = vmatprep.mubr.f32.mxu0 %v31122_v49  ;;  %v31128_v62 = vld [vmem:[#allocation58_spill] sm:$0xff] }
 0x25b   :  { %4563 = vmatmul.mubr.f32.gmra.mrb[32].mxu1 %v31123_v33 }
 0x25c   :  { %21319 = vmatpush3.bf16.msra.mxu0 %v31124_v44  ;;  %21347 = vmatpush3.bf16.msra.mxu1 %v24634_v53  ;;  %v31130_v53 = vld [vmem:[#allocation60_spill] sm:$0xff]  ;;  %v24924_v44 = vld [vmem:[%s30149_s1 + $0x308] sm:$0xff] }
 0x25d   :  { %21321 = vmatprep.subr.bf16.mxu0 %v31125_v31  ;;  %21349 = vmatprep.subr.bf16.mxu1 %v24642_v37  ;;  %v31131_v37 = vld [vmem:[#allocation61_spill] sm:$0xff] }
 0x25e   :  { %4840 = vmatprep.mubr.f32.mxu1 %v31122_v49 }
 0x260   :  { %21323 = vmatpush3.bf16.msra.mxu0 %v31126_v5  ;;  %21351 = vmatpush3.bf16.msra.mxu1 %v31106_v38  ;;  %v4861_v5 = vsel %vm1934_vm0, %v17675_v52, 0 }
 0x261   :  { %21325 = vmatprep.subr.bf16.mxu0 %v31127_v43  ;;  %21353 = vmatprep.subr.bf16.mxu1 %v24661_v56  ;;  %v31133_v56 = vld [vmem:[#allocation63_spill] sm:$0xff] }
 0x264   :  { %21327 = vmatpush3.bf16.msra.mxu0 %v31128_v62  ;;  %21355 = vmatpush3.bf16.msra.mxu1 %v24682_v3  ;;  %v31134_v3 = vld [vmem:[#allocation64_spill] sm:$0xff]  ;;  %v30342_v62 = vand.u32 4294901760, %v24912_v6 }
 0x265   :  { %21329 = vmatprep.subr.bf16.mxu0 %v31129_v19  ;;  %21357 = vmatprep.subr.bf16.mxu1 %v24702_v13  ;;  %v30341_v19 = vand.u32 4294901760, %v24917_v57 }
 0x268   :  { %21331 = vmatpush3.bf16.msra.mxu0 %v31130_v53  ;;  %21359 = vmatpush3.bf16.msra.mxu1 %v24708_v28  ;;  %v17674_v28 = vld [vmem:[%s30150_s2 + $0x20] sm:$0xff] }
 0x269   :  { %21333 = vmatprep.subr.bf16.mxu0 %v31131_v37  ;;  %21361 = vmatprep.subr.bf16.mxu1 %v24721_v63  ;;  %v4858_v13 = vsel %vm1934_vm0, %v17674_v28, 0  ;;  %v24933_v37 = vld [vmem:[%s30149_s1 + $0x390] sm:$0xff] }
 0x26a   :  { %v24891_v63 = vand.u32 4294901760, %v4858_v13 }
 0x26c   :  { %21335 = vmatpush3.bf16.msra.mxu0 %v31132_v35  ;;  %21363 = vmatpush3.bf16.msra.mxu1 %v24734_v24  ;;  %v24894_v24 = vsub.f32 %v4858_v13, %v24891_v63  ;;  %v30339_v35 = vand.u32 4294901760, %v24924_v44  ;;  %v24948_v13 = vand.u32 4294901760, %v4861_v5 }
 0x26d   :  { %21337 = vmatprep.subr.bf16.mxu0 %v31133_v56  ;;  %21365 = vmatprep.subr.bf16.mxu1 %v31111_v22  ;;  %v24907_v22 = vld [vmem:[%s30149_s1 + $0x380] sm:$0xff]  ;;  %v24939_v56 = vld [vmem:[%s30149_s1 + $0x398] sm:$0xff] }
 0x26e   :  { %v30343_v43 = vand.u32 4294901760, %v24907_v22 }
 0x270   :  { %21339 = vmatpush3.bf16.msra.mxu0 %v31134_v3  ;;  %21367 = vmatpush3.bf16.msra.mxu1 %v24760_v58  ;;  %v24897_v58 = vand.u32 4294901760, %v24894_v24  ;;  %v24944_v3 = vld [vmem:[%s30149_s1 + $0x310] sm:$0xff] }
 0x271   :  { %21369 = vmatprep.subr.bf16.mxu1 %v24774_v17 }
 0x272   :  { %v4932_v17 = vsub.f32 %v24894_v24, %v24897_v58 }
 0x273   :  { %4731 = vmatmul.mubr.f32.vlgmr.msra.gmra.mrb[34].mxu0 %v31099_v0 }
 0x274   :  { %21371 = vmatpush3.bf16.msra.mxu1 %v24781_v48  ;;  %4736 = vmatprep.mubr.f32.mxu0 %v31101_v29  ;;  %v4933_v48 = vand.u32 4294901760, %v4932_v17  ;;  %v24953_v17 = vld [vmem:[%s30149_s1 + $0x318] sm:$0xff] }
 0x277   :  { %4738 = vmatmul.mubr.f32.gmra.mrb[36].mxu0 %v31103_v12  ;;  %4842 = vmatmul.mubr.f32.vlgmr.msra.gmra.mrb[34].mxu1 %v31099_v0 }
 0x278   :  { %4847 = vmatprep.mubr.f32.mxu1 %v31101_v29  ;;  %20378 = vmatprep.mubr.f32.mxu0 %v4933_v48 }
 0x27b   :  { %4849 = vmatmul.mubr.f32.gmra.mrb[36].mxu1 %v31103_v12 }
 0x27c   :  { %20408 = vmatprep.mubr.f32.mxu1 %v4933_v48  ;;  %v24958_v48 = vsub.f32 %v24907_v22, %v30343_v43  ;;  %v25116_v43 = vld [vmem:[%s30149_s1 + $0x348] sm:$0xff] }
 0x27d   :  { %31144 = vst [vmem:[#allocation27_spill] sm:$0xff] %v25116_v43 }
 0x306   :  { %v18440_v21 = vpop.f32.mrb[26].mxu0 }
 0x307   :  { %v18441_v2 = vpop.f32.mrb[27].mxu0 }
 0x308   :  { %v18442_v27 = vadd.f32 %v18441_v2, %v18440_v21  ;;  %v24963_v21 = vsub.f32 %v24912_v6, %v30342_v62  ;;  %v24968_v2 = vsub.f32 %v24917_v57, %v30341_v19 }
 0x30a   :  { %v18478_v26 = vpop.f32.mrb[26].mxu1  ;;  %v18443_v10 = vpop.f32.mrb[28].mxu0 }
 0x30b   :  { %v18479_v45 = vpop.f32.mrb[27].mxu1  ;;  %v18444_v40 = vpop.f32.mrb[29].mxu0 }
 0x30c   :  { %v18480_v60 = vadd.f32 %v18479_v45, %v18478_v26  ;;  %v18445_v30 = vadd.f32 %v18444_v40, %v18443_v10  ;;  %v24974_v26 = vld [vmem:[%s30149_s1 + $0x3a0] sm:$0xff]  ;;  %v30337_v10 = vand.u32 4294901760, %v24939_v56  ;;  %v30335_v45 = vand.u32 4294901760, %v24944_v3 }
 0x30d   :  { %v24981_v40 = vsub.f32 %v24924_v44, %v30339_v35  ;;  %v25094_v35 = vld [vmem:[%s30149_s1 + $0x3c8] sm:$0xff] }
 0x30e   :  { %v4292_v51 = vadd.f32 %v18480_v60, %v18442_v27  ;;  %v18481_v16 = vpop.f32.mrb[28].mxu1  ;;  %v30338_v27 = vand.u32 4294901760, %v24933_v37  ;;  %v30336_v60 = vand.u32 4294901760, %v24953_v17  ;;  %31142 = vst [vmem:[#allocation33_spill] sm:$0xff] %v25094_v35  ;;  %v31165_v50 = vand.u32 4294901760, %v25094_v35 }
 0x30f   :  { %v18482_v14 = vpop.f32.mrb[29].mxu1 }
 0x310   :  { %v18483_v7 = vadd.f32 %v18482_v14, %v18481_v16  ;;  %v24995_v16 = vsub.f32 %v4861_v5, %v24948_v13  ;;  %v30340_v14 = vand.u32 4294901760, %v24974_v26  ;;  %v25049_v5 = vld [vmem:[%s30149_s1 + $0x338] sm:$0xff] }
 0x311   :  { %31138 = vst [vmem:[#allocation6_spill] sm:$0xff] %v25049_v5 }
 0x312   :  { %v4299_v38 = vadd.f32 %v18483_v7, %v18445_v30  ;;  %v24987_v30 = vld [vmem:[%s30149_s1 + $0x3a8] sm:$0xff] }
 0x313   :  { %v25001_v7 = vld [vmem:[%s30149_s1 + $0x328] sm:$0xff] }
 0x326   :  { %v18516_v9 = vpop.f32.mrb[30].mxu0 }
 0x327   :  { %v18517_v55 = vpop.f32.mrb[31].mxu0 }
 0x328   :  { %v18518_v18 = vadd.f32 %v18517_v55, %v18516_v9  ;;  %v25011_v9 = vsub.f32 %v24933_v37, %v30338_v27  ;;  %v30345_v55 = vand.u32 4294901760, %v24958_v48 }
 0x32a   :  { %v4437_v23 = vadd.f32 %v18518_v18, %v4292_v51  ;;  %v18519_v15 = vpop.f32.mrb[32].mxu0  ;;  %v18554_v46 = vpop.f32.mrb[30].mxu1  ;;  %v24992_v51 = vld [vmem:[%s30149_s1 + $0x320] sm:$0xff]  ;;  %v30344_v18 = vand.u32 4294901760, %v24963_v21  ;;  %v31147_v33 = vand.u32 4294901760, %v25011_v9 }
 0x32b   :  { %v18520_v32 = vpop.f32.mrb[33].mxu0  ;;  %v18555_v11 = vpop.f32.mrb[31].mxu1  ;;  %v30348_v52 = vand.u32 4294901760, %v24992_v51 }
 0x32c   :  { %v18521_v36 = vadd.f32 %v18520_v32, %v18519_v15  ;;  %v18556_v47 = vadd.f32 %v18555_v11, %v18554_v46  ;;  %v25019_v15 = vld [vmem:[%s30149_s1 + $0x3b8] sm:$0xff]  ;;  %v25024_v46 = vsub.f32 %v24939_v56, %v30337_v10  ;;  %v25029_v32 = vsub.f32 %v24944_v3, %v30335_v45 }
 0x32d   :  { %31136 = vst [vmem:[#allocation28_spill] sm:$0xff] %v25019_v15  ;;  %v30347_v11 = vand.u32 4294901760, %v24987_v30  ;;  %v30352_v45 = vand.u32 4294901760, %v25019_v15  ;;  %v25064_v10 = vand.u32 4294901760, %v24995_v16 }
 0x32e   :  { %v4446_v20 = vadd.f32 %v18521_v36, %v4299_v38  ;;  %v24919_v1 = vadd.f32 %v18556_v47, %v4437_v23  ;;  %v18557_v8 = vpop.f32.mrb[32].mxu1  ;;  %v25006_v38 = vld [vmem:[%s30149_s1 + $0x3b0] sm:$0xff]  ;;  %v30349_v23 = vand.u32 4294901760, %v24968_v2  ;;  %v25041_v47 = vsub.f32 %v24953_v17, %v30336_v60 }
 0x32f   :  { %v18558_v31 = vpop.f32.mrb[33].mxu1  ;;  %31135 = vst [vmem:[#allocation5_spill] sm:$0xff] %v25006_v38  ;;  %v25036_v36 = vld [vmem:[%s30149_s1 + $0x330] sm:$0xff]  ;;  %v25061_v60 = vpack.c.bf16 %v30344_v18, %v30345_v55  ;;  %v25082_v62 = vsub.f32 %v24987_v30, %v30347_v11  ;;  %v25088_v18 = vsub.f32 %v24992_v51, %v30348_v52  ;;  %v25121_v27 = vsub.f32 %v25019_v15, %v30352_v45 }
 0x330   :  { %v18559_v53 = vadd.f32 %v18558_v31, %v18557_v8  ;;  %31137 = vst [vmem:[#allocation30_spill] sm:$0xff] %v25036_v36  ;;  %v30350_v8 = vand.u32 4294901760, %v25001_v7  ;;  %v30351_v31 = vand.u32 4294901760, %v25006_v38  ;;  %v31148_v54 = vand.u32 4294901760, %v25024_v46 }
 0x331   :  { %31139 = vst [vmem:[#allocation41_spill] sm:$0xff] %v25061_v60  ;;  %v31154_v34 = vand.u32 4294901760, %v25041_v47  ;;  %v31181_v39 = vand.u32 4294901760, %v25121_v27 }
 0x332   :  { %v24946_v28 = vadd.f32 %v18559_v53, %v4446_v20  ;;  %v30346_v20 = vand.u32 4294901760, %v24981_v40  ;;  %v25054_v53 = vsub.f32 %v24974_v26, %v30340_v14  ;;  %v25071_v14 = vld [vmem:[%s30149_s1 + $0x3c0] sm:$0xff]  ;;  %v25104_v11 = vsub.f32 %v25001_v7, %v30350_v8 }
 0x333   :  { %31140 = vst [vmem:[#allocation31_spill] sm:$0xff] %v25071_v14  ;;  %v25111_v55 = vsub.f32 %v25006_v38, %v30351_v31  ;;  %v25133_v31 = vld [vmem:[%s30149_s1 + $0x3d8] sm:$0xff]  ;;  %v25139_v45 = vpack.c.bf16 %v31148_v54, %v31147_v33  ;;  %v31150_v8 = vand.u32 4294901760, %v25036_v36  ;;  %v30355_v33 = vand.u32 4294901760, %v25082_v62 }
 0x334   :  { %v25077_v19 = vpack.c.bf16 %v30346_v20, %v30349_v23  ;;  %v25099_v20 = vld [vmem:[%s30149_s1 + $0x340] sm:$0xff]  ;;  %v25128_v23 = vld [vmem:[%s30149_s1 + $0x3d0] sm:$0xff]  ;;  %31146 = vst [vmem:[#allocation35_spill] sm:$0xff] %v25133_v31  ;;  %v31160_v25 = vand.u32 4294901760, %v25071_v14  ;;  %v31163_v41 = vand.u32 4294901760, %v25054_v53 }
 0x335   :  { %31143 = vst [vmem:[#allocation9_spill] sm:$0xff] %v25099_v20  ;;  %31145 = vst [vmem:[#allocation29_spill] sm:$0xff] %v25128_v23  ;;  %v25144_v52 = vsub.f32 %v25036_v36, %v31150_v8  ;;  %v31156_v8 = vand.u32 4294901760, %v25049_v5  ;;  %v31167_v59 = vand.u32 4294901760, %v25099_v20  ;;  %v31180_v29 = vand.u32 4294901760, %v25111_v55 }
 0x336   :  { %31141 = vst [vmem:[#allocation7_spill] sm:$0xff] %v25077_v19  ;;  %31149 = vst [vmem:[#allocation37_spill] sm:$0xff] %v25139_v45  ;;  %v31153_v19 = vand.u32 4294901760, %v25029_v32  ;;  %v25184_v60 = vsub.f32 %v25071_v14, %v31160_v25  ;;  %v25202_v25 = vsub.f32 %v25094_v35, %v31165_v50  ;;  %v31173_v50 = vand.u32 4294901760, %v25116_v43 }
 0x337   :  { %31151 = vst [vmem:[#allocation39_spill] sm:$0xff] %v25144_v52  ;;  %v25163_v45 = vsub.f32 %v25049_v5, %v31156_v8  ;;  %v25179_v8 = vld [vmem:[%s30149_s1 + $0x3e0] sm:$0xff]  ;;  %v25207_v12 = vsub.f32 %v25099_v20, %v31167_v59  ;;  %v31176_v20 = vand.u32 4294901760, %v25128_v23  ;;  %v4942_v35 = vsub.f32 %v24995_v16, %v25064_v10 }
 0x338   :  { %v25157_v54 = vpack.c.bf16 %v31154_v34, %v31153_v19  ;;  %v25174_v19 = vld [vmem:[%s30149_s1 + $0x358] sm:$0xff]  ;;  %31159 = vst [vmem:[#allocation51_spill] sm:$0xff] %v25179_v8  ;;  %31161 = vst [vmem:[#allocation55_spill] sm:$0xff] %v25184_v60  ;;  %v25191_v34 = vld [vmem:[%s30149_s1 + $0x3e8] sm:$0xff]  ;;  %v25224_v0 = vsub.f32 %v25116_v43, %v31173_v50 }
 0x339   :  { %31157 = vst [vmem:[#allocation45_spill] sm:$0xff] %v25163_v45  ;;  %31158 = vst [vmem:[#allocation50_spill] sm:$0xff] %v25174_v19  ;;  %v31185_v59 = vand.u32 4294901760, %v25163_v45 }
 0x33a   :  { %31155 = vst [vmem:[#allocation44_spill] sm:$0xff] %v25157_v54  ;;  %31162 = vst [vmem:[#allocation56_spill] sm:$0xff] %v25191_v34  ;;  %v25197_v54 = vpack.c.bf16 %v30355_v33, %v31163_v41  ;;  %v31170_v41 = vand.u32 4294901760, %v25088_v18  ;;  %v31171_v33 = vand.u32 4294901760, %v25104_v11  ;;  %v31194_v15 = vand.u32 4294901760, %v25224_v0 }
 0x33b   :  { %31166 = vst [vmem:[#allocation10_spill] sm:$0xff] %v25202_v25  ;;  %31168 = vst [vmem:[#allocation47_spill] sm:$0xff] %v25207_v12 }
 0x33c   :  { %31164 = vst [vmem:[#allocation43_spill] sm:$0xff] %v25197_v54  ;;  %v25219_v54 = vpack.c.bf16 %v31171_v33, %v31170_v41  ;;  %31174 = vst [vmem:[#allocation53_spill] sm:$0xff] %v25224_v0  ;;  %v25237_v33 = vsub.f32 %v25128_v23, %v31176_v20  ;;  %v31178_v41 = vand.u32 4294901760, %v25133_v31  ;;  %v31183_v20 = vand.u32 4294901760, %v25151_v42 }
 0x33e   :  { %31172 = vst [vmem:[#allocation49_spill] sm:$0xff] %v25219_v54  ;;  %31177 = vst [vmem:[#allocation32_spill] sm:$0xff] %v25237_v33  ;;  %v25242_v50 = vsub.f32 %v25133_v31, %v31178_v41  ;;  %v25249_v54 = vpack.c.bf16 %v31181_v39, %v31180_v29  ;;  %v25256_v23 = vsub.f32 %v25151_v42, %v31183_v20  ;;  %v31184_v31 = vand.u32 4294901760, %v25144_v52  ;;  %v25283_v29 = vld [vmem:[%s30149_s1 + $0x3f0] sm:$0xff] }
 0x33f   :  { %v30379_v39 = vand.u32 4294901760, %v25184_v60  ;;  %v31187_v20 = vand.u32 4294901760, %v25174_v19  ;;  %v31193_v52 = vand.u32 4294901760, %v25207_v12  ;;  %v31197_v0 = vand.u32 4294901760, %v25237_v33 }
 0x340   :  { %31179 = vst [vmem:[#allocation8_spill] sm:$0xff] %v25242_v50  ;;  %31182 = vst [vmem:[#allocation36_spill] sm:$0xff] %v25249_v54  ;;  %v25263_v14 = vpack.c.bf16 %v31185_v59, %v31184_v31  ;;  %v31188_v31 = vand.u32 4294901760, %v25179_v8  ;;  %v25305_v54 = vld [vmem:[%s30149_s1 + $0x378] sm:$0xff] }
 0x341   :  { %v25272_v41 = vsub.f32 %v25174_v19, %v31187_v20  ;;  %v31189_v20 = vand.u32 4294901760, %v25191_v34  ;;  %v25324_v60 = vpack.c.bf16 %v31194_v15, %v31193_v52  ;;  %v30389_v15 = vand.u32 4294901760, %v25305_v54 }
 0x342   :  { %31186 = vst [vmem:[#allocation38_spill] sm:$0xff] %v25263_v14  ;;  %v25278_v59 = vsub.f32 %v25179_v8, %v31188_v31  ;;  %v31190_v14 = vand.u32 4294901760, %v25202_v25  ;;  %v4943_v52 = vand.u32 4294901760, %v4942_v35 }
 0x343   :  { %v25298_v31 = vsub.f32 %v25191_v34, %v31189_v20  ;;  %v31192_v34 = vand.u32 4294901760, %v25213_v61  ;;  %31195 = vst [vmem:[#allocation46_spill] sm:$0xff] %v25324_v60  ;;  %v30387_v12 = vand.u32 4294901760, %v25272_v41 }
 0x344   :  { %v25311_v8 = vpack.c.bf16 %v31190_v14, %v30379_v39  ;;  %v31196_v39 = vand.u32 4294901760, %v25232_v4 }
 0x345   :  { %v25317_v36 = vsub.f32 %v25213_v61, %v31192_v34 }
 0x346   :  { %v18592_v43 = vpop.f32.mrb[34].mxu0  ;;  %31191 = vst [vmem:[#allocation42_spill] sm:$0xff] %v25311_v8 }
 0x347   :  { %v18593_v5 = vpop.f32.mrb[35].mxu0 }
 0x348   :  { %v18594_v49 = vadd.f32 %v18593_v5, %v18592_v43  ;;  %v25288_v43 = vld [vmem:[%s30149_s1 + $0x3f8] sm:$0xff]  ;;  %v25293_v5 = vld [vmem:[%s30149_s1 + $0x370] sm:$0xff] }
 0x349   :  { %v30388_v8 = vand.u32 4294901760, %v25293_v5 }
 0x34a   :  { %v4733_v19 = vadd.f32 %v18594_v49, %v24919_v1  ;;  %v18595_v45 = vpop.f32.mrb[36].mxu0  ;;  %v18630_v20 = vpop.f32.mrb[34].mxu1  ;;  %v25329_v49 = vsub.f32 %v25232_v4, %v31196_v39  ;;  %v31198_v39 = vand.u32 4294901760, %v25242_v50 }
 0x34b   :  { %v18596_v25 = vpop.f32.mrb[37].mxu0  ;;  %v18631_v14 = vpop.f32.mrb[35].mxu1 }
 0x34c   :  { %v18597_v42 = vadd.f32 %v18596_v25, %v18595_v45  ;;  %v18632_v61 = vadd.f32 %v18631_v14, %v18630_v20  ;;  %v25341_v4 = vpack.c.bf16 %v31198_v39, %v31197_v0  ;;  %v30392_v45 = vand.u32 4294901760, %v25298_v31 }
 0x34d   :  { %v31200_v25 = vand.u32 4294901760, %v25256_v23  ;;  %v31202_v14 = vand.u32 4294901760, %v25283_v29  ;;  %v31203_v0 = vand.u32 4294901760, %v25288_v43 }
 0x34e   :  { %31199 = vst [vmem:[#allocation52_spill] sm:$0xff] %v25341_v4  ;;  %v4740_v1 = vadd.f32 %v18597_v42, %v24946_v28  ;;  %v4844_v34 = vadd.f32 %v18632_v61, %v4733_v19  ;;  %v18633_v38 = vpop.f32.mrb[36].mxu1  ;;  %v25364_v61 = vsub.f32 %v25293_v5, %v30388_v8  ;;  %v30391_v28 = vand.u32 4294901760, %v25317_v36 }
 0x34f   :  { %v25349_v20 = vpack.c.bf16 %v30387_v12, %v31200_v25  ;;  %v18634_v35 = vpop.f32.mrb[37].mxu1  ;;  %v25354_v60 = vsub.f32 %v25283_v29, %v31202_v14  ;;  %v25359_v42 = vsub.f32 %v25288_v43, %v31203_v0  ;;  %v25372_v25 = vsub.f32 %v25305_v54, %v30389_v15 }
 0x350   :  { %v25367_v19 = vand.u32 4294901760, %v4844_v34  ;;  %v18635_v39 = vadd.f32 %v18634_v35, %v18633_v38  ;;  %v30390_v14 = vand.u32 4294901760, %v25329_v49  ;;  %v31204_v0 = vand.u32 4294901760, %v25278_v59 }
 0x351   :  { %31201 = vst [vmem:[#allocation54_spill] sm:$0xff] %v25349_v20  ;;  %v30396_v35 = vand.u32 4294901760, %v25354_v60  ;;  %v30393_v15 = vand.u32 4294901760, %v25359_v42 }
 0x352   :  { %v25379_v12 = vpack.c.bf16 %v30392_v45, %v31204_v0  ;;  %v4951_v8 = vsub.f32 %v4844_v34, %v25367_v19  ;;  %v4851_v20 = vadd.f32 %v18635_v39, %v4740_v1  ;;  %20376 = vmatprep.subr.mxu0 %v25367_v19  ;;  %v25387_v38 = vpack.c.bf16 %v30390_v14, %v30391_v28 }
 0x353   :  { %20377 = vmatpush3.msra.mxu0 %v25367_v19  ;;  %v30395_v1 = vand.u32 4294901760, %v25364_v61  ;;  %v30394_v34 = vand.u32 4294901760, %v25372_v25  ;;  %v25401_v39 = vpack.c.bf16 %v30393_v15, %v30396_v35 }
 0x354   :  { %31205 = vst [vmem:[#allocation57_spill] sm:$0xff] %v25379_v12  ;;  %31206 = vst [vmem:[#allocation58_spill] sm:$0xff] %v25387_v38  ;;  %v25392_v4 = vand.u32 4294901760, %v4851_v20  ;;  %20379 = vmatmul.mubr.f32.vlgmr.msra.gmra.mrb[24].mxu0 %v4943_v52  ;;  %v4952_v0 = vand.u32 4294901760, %v4951_v8 }
 0x355   :  { %20383 = vmatprep.mubr.f32.mxu0 %v24891_v63  ;;  %31207 = vst [vmem:[#allocation59_spill] sm:$0xff] %v25401_v39  ;;  %v25409_v45 = vpack.c.bf16 %v30394_v34, %v30395_v1  ;;  %v31226_v1 = vand.u32 4294901760, %v25104_v11  ;;  %v31257_v39 = vld [vmem:[#allocation53_spill] sm:$0xff] }
 0x356   :  { %v5442_v14 = vsub.f32 %v4851_v20, %v25392_v4  ;;  %20406 = vmatprep.subr.mxu1 %v25392_v4  ;;  %v4953_v28 = vsub.f32 %v4951_v8, %v4952_v0 }
 0x357   :  { %31208 = vst [vmem:[#allocation60_spill] sm:$0xff] %v25409_v45  ;;  %20407 = vmatpush3.msra.mxu1 %v25392_v4 }
 0x358   :  { %20409 = vmatmul.mubr.f32.vlgmr.msra.gmra.mrb[24].mxu1 %v4943_v52  ;;  %v4954_v38 = vand.u32 4294901760, %v4953_v28  ;;  %v5443_v12 = vand.u32 4294901760, %v5442_v14  ;;  %v31212_v52 = vand.u32 4294901760, %v24912_v6 }
 0x359   :  { %20413 = vmatprep.mubr.f32.mxu1 %v24891_v63 }
 0x35a   :  { %20381 = vmatprep.subr.mxu0 %v4954_v38  ;;  %v5444_v15 = vsub.f32 %v5442_v14, %v5443_v12 }
 0x35b   :  { %20382 = vmatpush3.msra.mxu0 %v4954_v38 }
 0x35c   :  { %20384 = vmatmul.mubr.f32.vlgmr.msra.gmra.mrb[24].mxu0 %v24948_v13  ;;  %20386 = vmatprep.subr.mxu0 %v4951_v8  ;;  %v5445_v20 = vand.u32 4294901760, %v5444_v15  ;;  %v31210_v15 = vand.u32 4294901760, %v24963_v21 }
 0x35d   :  { %20387 = vmatpush3.msra.mxu0 %v4951_v8  ;;  %20388 = vmatprep.mubr.f32.mxu0 %v24894_v24 }
 0x35e   :  { %20391 = vmatprep.subr.mxu0 %v25367_v19  ;;  %20411 = vmatprep.subr.mxu1 %v5445_v20 }
 0x35f   :  { %20412 = vmatpush3.msra.mxu1 %v5445_v20  ;;  %v31215_v20 = vand.u32 4294901760, %v25011_v9 }
 0x360   :  { %20414 = vmatmul.mubr.f32.vlgmr.msra.gmra.mrb[24].mxu1 %v24948_v13  ;;  %20416 = vmatprep.subr.mxu1 %v5442_v14 }
 0x361   :  { %20417 = vmatpush3.msra.mxu1 %v5442_v14  ;;  %20418 = vmatprep.mubr.f32.mxu1 %v24894_v24  ;;  %v31209_v24 = vand.u32 4294901760, %v24958_v48 }
 0x362   :  { %20421 = vmatprep.subr.mxu1 %v25392_v4 }
 0x363   :  { %v6121_v8 = vsub.f32 %v24958_v48, %v31209_v24  ;;  %v6135_v24 = vsub.f32 %v25011_v9, %v31215_v20 }
 0x364   :  { %20389 = vmatmul.mubr.f32.vlgmr.msra.gmra.mrb[24].mxu0 %v24995_v16 }
 0x365   :  { %20392 = vmatpush3.msra.mxu0 %v25367_v19  ;;  %20393 = vmatprep.mubr.f32.mxu0 %v24897_v58  ;;  %v6122_v14 = vand.u32 4294901760, %v6121_v8  ;;  %v31216_v8 = vand.u32 4294901760, %v25024_v46 }
 0x366   :  { %20396 = vmatprep.subr.mxu0 %v4952_v0 }
 0x368   :  { %20419 = vmatmul.mubr.f32.vlgmr.msra.gmra.mrb[24].mxu1 %v24995_v16  ;;  %v6128_v16 = vsub.f32 %v24963_v21, %v31210_v15  ;;  %v31217_v15 = vand.u32 4294901760, %v24917_v57  ;;  %v31221_v57 = vand.u32 4294901760, %v25054_v53 }
 0x369   :  { %20422 = vmatpush3.msra.mxu1 %v25392_v4  ;;  %20423 = vmatprep.mubr.f32.mxu1 %v24897_v58  ;;  %v31211_v58 = vand.u32 4294901760, %v24907_v22 }
 0x36a   :  { %20426 = vmatprep.subr.mxu1 %v5443_v12  ;;  %v6129_v38 = vand.u32 4294901760, %v6128_v16  ;;  %v31218_v16 = vand.u32 4294901760, %v24924_v44  ;;  %v6149_v44 = vsub.f32 %v25054_v53, %v31221_v57 }
 0x36b   :  { %v25441_v28 = vpack.c.bf16 %v31212_v52, %v31211_v58  ;;  %v31219_v52 = vand.u32 4294901760, %v25029_v32 }
 0x36c   :  { %20394 = vmatmul.mubr.f32.vlgmr.msra.gmra.mrb[24].mxu0 %v25064_v10  ;;  %v21404_v6 = vpack.c.bf16 %v6129_v38, %v6122_v14  ;;  %v25464_v58 = vpack.c.bf16 %v31218_v16, %v31217_v15  ;;  %v31220_v38 = vand.u32 4294901760, %v25041_v47  ;;  %v31223_v16 = vand.u32 4294901760, %v24933_v37 }
 0x36d   :  { %20397 = vmatpush3.msra.mxu0 %v4952_v0  ;;  %20398 = vmatprep.mubr.f32.mxu0 %v24891_v63  ;;  %v31214_v0 = vand.u32 4294901760, %v24981_v40  ;;  %v6023_v14 = vsub.f32 %v25029_v32, %v31219_v52  ;;  %v31224_v52 = vand.u32 4294901760, %v24939_v56  ;;  %v31227_v37 = vand.u32 4294901760, %v24944_v3 }
 0x36e   :  { %20401 = vmatprep.subr.mxu0 %v25367_v19  ;;  %v31228_v56 = vand.u32 4294901760, %v24953_v17  ;;  %v31233_v3 = vand.u32 4294901760, %v25111_v55 }
 0x36f   :  { %v6016_v22 = vsub.f32 %v24981_v40, %v31214_v0  ;;  %v25484_v34 = vpack.c.bf16 %v31224_v52, %v31223_v16  ;;  %v31230_v16 = vand.u32 4294901760, %v24974_v26  ;;  %v31231_v52 = vand.u32 4294901760, %v24987_v30  ;;  %v31238_v30 = vld [vmem:[#allocation5_spill] sm:$0xff] }
 0x370   :  { %20424 = vmatmul.mubr.f32.vlgmr.msra.gmra.mrb[24].mxu1 %v25064_v10  ;;  %v6163_v17 = vsub.f32 %v25111_v55, %v31233_v3 }
 0x371   :  { %20427 = vmatpush3.msra.mxu1 %v5443_v12  ;;  %20428 = vmatprep.mubr.f32.mxu1 %v24891_v63  ;;  %v31213_v12 = vand.u32 4294901760, %v24968_v2  ;;  %v6017_v20 = vand.u32 4294901760, %v6016_v22  ;;  %v31225_v22 = vand.u32 4294901760, %v25088_v18 }
 0x372   :  { %20431 = vmatprep.subr.mxu1 %v25392_v4 }
 0x373   :  { %v6009_v10 = vsub.f32 %v24968_v2, %v31213_v12  ;;  %v6030_v12 = vsub.f32 %v25041_v47, %v31220_v38  ;;  %v6037_v57 = vsub.f32 %v25088_v18, %v31225_v22 }
 0x374   :  { %20399 = vmatmul.mubr.f32.vlgmr.msra.gmra.mrb[24].mxu0 %v24948_v13 }
 0x375   :  { %20402 = vmatpush3.msra.mxu0 %v25367_v19  ;;  %20403 = vmatprep.mubr.f32.mxu0 %v24891_v63  ;;  %v6142_v19 = vsub.f32 %v25024_v46, %v31216_v8  ;;  %v6010_v0 = vand.u32 4294901760, %v6009_v10  ;;  %v31222_v8 = vand.u32 4294901760, %v25082_v62  ;;  %v6031_v10 = vand.u32 4294901760, %v6030_v12  ;;  %v31229_v12 = vld [vmem:[#allocation17_spill] sm:$0xff] }
 0x376   :  { %21373 = vmatprep.subr.bf16.mxu0 %v25441_v28 }
 0x377   :  { %v6156_v15 = vsub.f32 %v25082_v62, %v31222_v8  ;;  %v6143_v38 = vand.u32 4294901760, %v6142_v19  ;;  %v6044_v8 = vsub.f32 %v25104_v11, %v31226_v1  ;;  %v6150_v19 = vand.u32 4294901760, %v6149_v44 }
 0x378   :  { %20429 = vmatmul.mubr.f32.vlgmr.msra.gmra.mrb[24].mxu1 %v24948_v13  ;;  %v25506_v1 = vpack.c.bf16 %v31231_v52, %v31230_v16  ;;  %v31236_v44 = vand.u32 4294901760, %v25001_v7  ;;  %v6038_v52 = vand.u32 4294901760, %v6037_v57 }
 0x379   :  { %20432 = vmatpush3.msra.mxu1 %v25392_v4  ;;  %20433 = vmatprep.mubr.f32.mxu1 %v24891_v63  ;;  %v6136_v4 = vand.u32 4294901760, %v6135_v24  ;;  %v6024_v63 = vand.u32 4294901760, %v6023_v14  ;;  %v21406_v24 = vpack.c.bf16 %v6017_v20, %v6010_v0  ;;  %v6157_v14 = vand.u32 4294901760, %v6156_v15 }
 0x37a   :  { %21405 = vmatprep.subr.bf16.mxu1 %v21404_v6  ;;  %v25498_v6 = vpack.c.bf16 %v31228_v56, %v31227_v37  ;;  %31232 = vst [vmem:[#allocation61_spill] sm:$0xff] %v25506_v1  ;;  %v31234_v37 = vand.u32 4294901760, %v25121_v27  ;;  %v31235_v20 = vand.u32 4294901760, %v24992_v51  ;;  %v31239_v56 = vand.u32 4294901760, %v31238_v30  ;;  %v31242_v51 = vld [vmem:[#allocation39_spill] sm:$0xff] }
 0x37b   :  { %v21408_v22 = vpack.c.bf16 %v6143_v38, %v6136_v4  ;;  %v21410_v26 = vpack.c.bf16 %v6031_v10, %v6024_v63  ;;  %v31240_v4 = vld [vmem:[#allocation28_spill] sm:$0xff]  ;;  %v6045_v3 = vand.u32 4294901760, %v6044_v8  ;;  %v31243_v35 = vand.u32 4294901760, %v31242_v51  ;;  %v31246_v30 = vld [vmem:[#allocation55_spill] sm:$0xff] }
 0x37c   :  { %20404 = vmatmul.mubr.f32.vlgmr.msra.gmra.mrb[24].mxu0 %v24948_v13  ;;  %v6170_v0 = vsub.f32 %v25121_v27, %v31234_v37  ;;  %v25518_v15 = vpack.c.bf16 %v31236_v44, %v31235_v20  ;;  %v31241_v38 = vand.u32 4294901760, %v31240_v4  ;;  %v21412_v37 = vpack.c.bf16 %v6157_v14, %v6150_v19  ;;  %v31244_v20 = vld [vmem:[#allocation45_spill] sm:$0xff]  ;;  %v31250_v14 = vld [vmem:[#allocation11_spill] sm:$0xff] }
 0x37d   :  { %21375 = vmatpush3.bf16.msra.mxu0 %v25464_v58  ;;  %5979 = vmatprep.mubr.f32.mxu0 %v31229_v12  ;;  %v6051_v7 = vsub.f32 %v31242_v51, %v31243_v35  ;;  %v31245_v44 = vand.u32 4294901760, %v31244_v20  ;;  %v6164_v63 = vand.u32 4294901760, %v6163_v17  ;;  %v31247_v57 = vand.u32 4294901760, %v31246_v30  ;;  %v31251_v35 = vld [vmem:[#allocation30_spill] sm:$0xff] }
 0x37e   :  { %21377 = vmatprep.subr.bf16.mxu0 %v25484_v34  ;;  %31237 = vst [vmem:[#allocation62_spill] sm:$0xff] %v25518_v15  ;;  %v25525_v16 = vpack.c.bf16 %v31241_v38, %v31239_v56  ;;  %v6171_v10 = vand.u32 4294901760, %v6170_v0  ;;  %v31248_v56 = vld [vmem:[#allocation10_spill] sm:$0xff]  ;;  %v31252_v4 = vand.u32 4294901760, %v31251_v35  ;;  %v21414_v45 = vpack.c.bf16 %v6045_v3, %v6038_v52  ;;  %v31261_v3 = vld [vmem:[#allocation31_spill] sm:$0xff] }
 0x37f   :  { %v6177_v8 = vsub.f32 %v31246_v30, %v31247_v57  ;;  %v31253_v38 = vld [vmem:[#allocation6_spill] sm:$0xff]  ;;  %v31259_v35 = vand.u32 4294901760, %v25237_v33 }
 0x380   :  { %20434 = vmatmul.mubr.f32.vlgmr.msra.gmra.mrb[24].mxu1 %v24948_v13  ;;  %v6058_v13 = vsub.f32 %v31244_v20, %v31245_v44  ;;  %v31254_v12 = vand.u32 4294901760, %v31253_v38 }
 0x381   :  { %21379 = vmatpush3.bf16.msra.mxu0 %v25498_v6  ;;  %21407 = vmatpush3.bf16.msra.mxu1 %v21406_v24  ;;  %v31249_v24 = vand.u32 4294901760, %v31248_v56  ;;  %v6191_v38 = vsub.f32 %v25237_v33, %v31259_v35 }
 0x382   :  { %21381 = vmatprep.subr.bf16.mxu0 %v25506_v1  ;;  %21409 = vmatprep.subr.bf16.mxu1 %v21408_v22  ;;  %v25546_v44 = vpack.c.bf16 %v31254_v12, %v31252_v4  ;;  %v31255_v22 = vld [vmem:[#allocation47_spill] sm:$0xff]  ;;  %v31258_v1 = vand.u32 4294901760, %v31257_v39  ;;  %v31260_v12 = vand.u32 4294901760, %v25242_v50  ;;  %v31262_v4 = vand.u32 4294901760, %v31261_v3 }
 0x383   :  { %v6184_v19 = vsub.f32 %v31248_v56, %v31249_v24  ;;  %6230 = vmatprep.mubr.f32.mxu1 %v31250_v14  ;;  %v31256_v17 = vand.u32 4294901760, %v31255_v22  ;;  %v6052_v24 = vand.u32 4294901760, %v6051_v7  ;;  %v6059_v14 = vand.u32 4294901760, %v6058_v13  ;;  %v31267_v56 = vld [vmem:[#allocation27_spill] sm:$0xff] }
 0x384   :  { %v6072_v57 = vsub.f32 %v31257_v39, %v31258_v1  ;;  %v6198_v52 = vsub.f32 %v25242_v50, %v31260_v12  ;;  %v6178_v7 = vand.u32 4294901760, %v6177_v8  ;;  %v31268_v35 = vand.u32 4294901760, %v31267_v56 }
 0x385   :  { %v6065_v0 = vsub.f32 %v31255_v22, %v31256_v17  ;;  %21383 = vmatpush3.bf16.msra.mxu0 %v25518_v15  ;;  %21411 = vmatpush3.bf16.msra.mxu1 %v21410_v26  ;;  %v31263_v17 = vld [vmem:[#allocation33_spill] sm:$0xff]  ;;  %v21416_v26 = vpack.c.bf16 %v6171_v10, %v6164_v63  ;;  %v6185_v13 = vand.u32 4294901760, %v6184_v19  ;;  %v31269_v50 = vand.u32 4294901760, %v25256_v23  ;;  %v31273_v19 = vld [vmem:[#allocation35_spill] sm:$0xff] }
 0x386   :  { %21385 = vmatprep.subr.bf16.mxu0 %v25525_v16  ;;  %21413 = vmatprep.subr.bf16.mxu1 %v21412_v37  ;;  %v31264_v1 = vand.u32 4294901760, %v31263_v17  ;;  %v31265_v22 = vld [vmem:[#allocation9_spill] sm:$0xff]  ;;  %v6073_v12 = vand.u32 4294901760, %v6072_v57  ;;  %v31270_v3 = vand.u32 4294901760, %v25272_v41  ;;  %v21418_v63 = vpack.c.bf16 %v6059_v14, %v6052_v24  ;;  %v31277_v14 = vld [vmem:[#allocation40_spill] sm:$0xff] }
 0x387   :  { %v31266_v15 = vand.u32 4294901760, %v31265_v22  ;;  %v6066_v30 = vand.u32 4294901760, %v6065_v0  ;;  %v6079_v37 = vsub.f32 %v25256_v23, %v31269_v50  ;;  %v31271_v10 = vld [vmem:[#allocation29_spill] sm:$0xff]  ;;  %v31274_v56 = vand.u32 4294901760, %v31273_v19  ;;  %v31283_v19 = vld [vmem:[#allocation56_spill] sm:$0xff] }
 0x388   :  { %v25566_v39 = vpack.c.bf16 %v31264_v1, %v31262_v4  ;;  %v6086_v4 = vsub.f32 %v25272_v41, %v31270_v3  ;;  %v31272_v8 = vand.u32 4294901760, %v31271_v10  ;;  %v6192_v22 = vand.u32 4294901760, %v6191_v38 }
 0x389   :  { %v25572_v33 = vpack.c.bf16 %v31268_v35, %v31266_v15  ;;  %21387 = vmatpush3.bf16.msra.mxu0 %v25546_v44  ;;  %21415 = vmatpush3.bf16.msra.mxu1 %v21414_v45  ;;  %v6199_v0 = vand.u32 4294901760, %v6198_v52  ;;  %v21420_v50 = vpack.c.bf16 %v6185_v13, %v6178_v7  ;;  %v31275_v57 = vand.u32 4294901760, %v25278_v59  ;;  %v31279_v35 = vld [vmem:[#allocation50_spill] sm:$0xff]  ;;  %v31281_v52 = vld [vmem:[#allocation51_spill] sm:$0xff] }
 0x38a   :  { %v25585_v15 = vpack.c.bf16 %v31274_v56, %v31272_v8  ;;  %21389 = vmatprep.subr.bf16.mxu0 %v25566_v39  ;;  %21417 = vmatprep.subr.bf16.mxu1 %v21416_v26  ;;  %v31276_v1 = vand.u32 4294901760, %v25298_v31  ;;  %v31278_v24 = vand.u32 4294901760, %v31277_v14  ;;  %v31280_v3 = vand.u32 4294901760, %v31279_v35 }
 0x38b   :  { %v6205_v17 = vsub.f32 %v25278_v59, %v31275_v57  ;;  %v21422_v38 = vpack.c.bf16 %v6073_v12, %v6066_v30  ;;  %v31282_v8 = vand.u32 4294901760, %v31281_v52  ;;  %v31284_v26 = vand.u32 4294901760, %v31283_v19  ;;  %v31291_v52 = vld [vmem:[#allocation34_spill] sm:$0xff] }
 0x38c   :  { %v6212_v45 = vsub.f32 %v25298_v31, %v31276_v1  ;;  %v25598_v10 = vpack.c.bf16 %v31280_v3, %v31278_v24  ;;  %v6080_v13 = vand.u32 4294901760, %v6079_v37  ;;  %v6087_v56 = vand.u32 4294901760, %v6086_v4 }
 0x38d   :  { %v25604_v7 = vpack.c.bf16 %v31284_v26, %v31282_v8  ;;  %21391 = vmatpush3.bf16.msra.mxu0 %v25572_v33  ;;  %21419 = vmatpush3.bf16.msra.mxu1 %v21418_v63  ;;  %v21424_v57 = vpack.c.bf16 %v6199_v0, %v6192_v22  ;;  %v31285_v1 = vand.u32 4294901760, %v25317_v36  ;;  %v31286_v24 = vand.u32 4294901760, %v25329_v49  ;;  %v31289_v0 = vld [vmem:[#allocation48_spill] sm:$0xff] }
 0x38e   :  { %21393 = vmatprep.subr.bf16.mxu0 %v25585_v15  ;;  %21421 = vmatprep.subr.bf16.mxu1 %v21420_v50  ;;  %v6206_v12 = vand.u32 4294901760, %v6205_v17  ;;  %v6213_v35 = vand.u32 4294901760, %v6212_v45  ;;  %v31287_v37 = vand.u32 4294901760, %v25354_v60  ;;  %v31288_v63 = vand.u32 4294901760, %v25359_v42 }
 0x38f   :  { %v6093_v14 = vsub.f32 %v25317_v36, %v31285_v1  ;;  %v6100_v30 = vsub.f32 %v25329_v49, %v31286_v24  ;;  %v31290_v3 = vand.u32 4294901760, %v31289_v0  ;;  %v31292_v8 = vand.u32 4294901760, %v31291_v52 }
 0x390   :  { %v6219_v4 = vsub.f32 %v25354_v60, %v31287_v37  ;;  %v6226_v22 = vsub.f32 %v25359_v42, %v31288_v63  ;;  %v21426_v26 = vpack.c.bf16 %v6087_v56, %v6080_v13  ;;  %v31293_v45 = vand.u32 4294901760, %v25364_v61 }
 0x391   :  { %v25624_v19 = vpack.c.bf16 %v31292_v8, %v31290_v3  ;;  %21395 = vmatpush3.bf16.msra.mxu0 %v25598_v10  ;;  %21423 = vmatpush3.bf16.msra.mxu1 %v21422_v38  ;;  %v6094_v50 = vand.u32 4294901760, %v6093_v14  ;;  %v6101_v17 = vand.u32 4294901760, %v6100_v30  ;;  %v31294_v24 = vand.u32 4294901760, %v25372_v25 }
 0x392   :  { %v6107_v1 = vsub.f32 %v25364_v61, %v31293_v45  ;;  %21397 = vmatprep.subr.bf16.mxu0 %v25604_v7  ;;  %21425 = vmatprep.subr.bf16.mxu1 %v21424_v57  ;;  %v31295_v63 = vand.u32 4294901760, %v25283_v29  ;;  %v31296_v13 = vand.u32 4294901760, %v25288_v43  ;;  %v21428_v38 = vpack.c.bf16 %v6213_v35, %v6206_v12  ;;  %v31299_v35 = vld [vmem:[#allocation18_spill] sm:$0xff] }
 0x393   :  { %v6114_v37 = vsub.f32 %v25372_v25, %v31294_v24  ;;  %v6220_v14 = vand.u32 4294901760, %v6219_v4  ;;  %v6227_v30 = vand.u32 4294901760, %v6226_v22  ;;  %v31297_v0 = vand.u32 4294901760, %v25293_v5  ;;  %v31308_v22 = vld [vmem:[#allocation10_spill] sm:$0xff]  ;;  %v31313_v24 = vld [vmem:[#allocation32_spill] sm:$0xff] }
 0x394   :  { %v25638_v56 = vpack.c.bf16 %v31296_v13, %v31295_v63  ;;  %v31298_v3 = vand.u32 4294901760, %v25305_v54  ;;  %v21430_v8 = vpack.c.bf16 %v6101_v17, %v6094_v50  ;;  %v6108_v57 = vand.u32 4294901760, %v6107_v1  ;;  %v31309_v50 = vld [vmem:[#allocation15_spill] sm:$0xff]  ;;  %v31312_v17 = vld [vmem:[#allocation53_spill] sm:$0xff] }
 0x395   :  { %21399 = vmatpush3.bf16.msra.mxu0 %v25624_v19  ;;  %21427 = vmatpush3.bf16.msra.mxu1 %v21426_v26  ;;  %v6115_v45 = vand.u32 4294901760, %v6114_v37  ;;  %v21432_v29 = vpack.c.bf16 %v6227_v30, %v6220_v14  ;;  %v21436_v43 = vpack.c.bf16 %v24963_v21, %v24958_v48  ;;  %v21438_v5 = vpack.c.bf16 %v24981_v40, %v24968_v2  ;;  %v31300_v21 = vld [vmem:[#allocation25_spill] sm:$0xff]  ;;  %v31301_v2 = vld [vmem:[#allocation12_spill] sm:$0xff]  ;;  %v31302_v40 = vld [vmem:[#allocation26_spill] sm:$0xff] }
 0x396   :  { %v25645_v52 = vpack.c.bf16 %v31298_v3, %v31297_v0  ;;  %21401 = vmatprep.subr.bf16.mxu0 %v25638_v56  ;;  %21429 = vmatprep.subr.bf16.mxu1 %v21428_v38  ;;  %v21440_v54 = vpack.c.bf16 %v25024_v46, %v25011_v9  ;;  %v21442_v4 = vpack.c.bf16 %v25041_v47, %v25029_v32  ;;  %v31303_v32 = vld [vmem:[#allocation19_spill] sm:$0xff]  ;;  %v31305_v47 = vld [vmem:[#allocation21_spill] sm:$0xff]  ;;  %v31314_v37 = vld [vmem:[#allocation8_spill] sm:$0xff] }
 0x397   :  { %v21434_v12 = vpack.c.bf16 %v6115_v45, %v6108_v57  ;;  %v21444_v48 = vpack.c.bf16 %v25082_v62, %v25054_v53  ;;  %v21446_v9 = vpack.c.bf16 %v25104_v11, %v25088_v18  ;;  %v21448_v46 = vpack.c.bf16 %v25121_v27, %v25111_v55  ;;  %v31304_v62 = vld [vmem:[#allocation13_spill] sm:$0xff]  ;;  %v31307_v11 = vld [vmem:[#allocation55_spill] sm:$0xff]  ;;  %v31310_v27 = vld [vmem:[#allocation62_spill] sm:$0xff] }
 0x398   :  { %v21450_v53 = vpack.c.bf16 %v31244_v20, %v31242_v51  ;;  %v31306_v18 = vld [vmem:[#allocation61_spill] sm:$0xff]  ;;  %v21452_v26 = vpack.c.bf16 %v31308_v22, %v31307_v11  ;;  %v31311_v55 = vld [vmem:[#allocation47_spill] sm:$0xff]  ;;  %v21456_v51 = vpack.c.bf16 %v31314_v37, %v31313_v24  ;;  %v21458_v20 = vpack.c.bf16 %v25272_v41, %v25256_v23  ;;  %v31316_v41 = vld [vmem:[#allocation14_spill] sm:$0xff] }
 0x399   :  { %21403 = vmatpush3.bf16.msra.mxu0 %v25645_v52  ;;  %21431 = vmatpush3.bf16.msra.mxu1 %v21430_v8  ;;  %v21454_v1 = vpack.c.bf16 %v31312_v17, %v31311_v55  ;;  %v21460_v63 = vpack.c.bf16 %v25298_v31, %v25278_v59  ;;  %v21462_v13 = vpack.c.bf16 %v25329_v49, %v25317_v36  ;;  %v31315_v36 = vld [vmem:[#allocation41_spill] sm:$0xff]  ;;  %v31318_v59 = vld [vmem:[#allocation20_spill] sm:$0xff]  ;;  %v31320_v49 = vld [vmem:[#allocation23_spill] sm:$0xff] }
 0x39a   :  { %21433 = vmatprep.subr.bf16.mxu1 %v21432_v29  ;;  %21437 = vmatprep.subr.bf16.mxu0 %v21436_v43  ;;  %v21464_v38 = vpack.c.bf16 %v25359_v42, %v25354_v60  ;;  %v21466_v23 = vpack.c.bf16 %v25372_v25, %v25364_v61  ;;  %v31317_v60 = vld [vmem:[#allocation7_spill] sm:$0xff]  ;;  %v31319_v31 = vld [vmem:[#allocation37_spill] sm:$0xff]  ;;  %v31321_v42 = vld [vmem:[#allocation16_spill] sm:$0xff] }
 0x39b   :  { %v31322_v61 = vld [vmem:[#allocation44_spill] sm:$0xff]  ;;  %v31323_v25 = vld [vmem:[#allocation22_spill] sm:$0xff]  ;;  %v31324_v14 = vld [vmem:[#allocation43_spill] sm:$0xff] }
 0x39c   :  { %5985 = vmatmul.mubr.f32.vlgmr.msra.gmra.mrb[38].mxu0 %v31299_v35  ;;  %v31325_v30 = vld [vmem:[#allocation11_spill] sm:$0xff]  ;;  %v31326_v0 = vld [vmem:[#allocation24_spill] sm:$0xff]  ;;  %v31327_v3 = vld [vmem:[#allocation49_spill] sm:$0xff] }
 0x39d   :  { %21435 = vmatpush3.bf16.msra.mxu1 %v21434_v12  ;;  %21439 = vmatpush3.bf16.msra.mxu0 %v21438_v5  ;;  %v31330_v8 = vld [vmem:[#allocation42_spill] sm:$0xff]  ;;  %v31332_v57 = vld [vmem:[#allocation52_spill] sm:$0xff]  ;;  %v31334_v45 = vld [vmem:[#allocation57_spill] sm:$0xff] }
 0x39e   :  { %21441 = vmatprep.subr.bf16.mxu0 %v21440_v54  ;;  %21469 = vmatprep.subr.bf16.mxu1 %v25441_v28  ;;  %v31335_v29 = vld [vmem:[#allocation58_spill] sm:$0xff] }
 0x39f   :  { %5994 = vmatprep.mubr.f32.mxu0 %v31300_v21  ;;  %v26096_v35 = vld [vmem:[%s30149_s1 + $0x468] sm:$0xff] }
 0x3a0   :  { %6232 = vmatmul.mubr.f32.vlgmr.msra.gmra.mrb[38].mxu1 %v31301_v2  ;;  %6000 = vmatmul.mubr.f32.gmra.mrb[40].mxu0 %v31302_v40  ;;  %v26077_v40 = vld [vmem:[%s30149_s1 + $0x460] sm:$0xff]  ;;  %31378 = vst [vmem:[#allocation8_spill] sm:$0xff] %v26096_v35 }
 0x3a1   :  { %21443 = vmatpush3.bf16.msra.mxu0 %v21442_v4  ;;  %21471 = vmatpush3.bf16.msra.mxu1 %v25464_v58  ;;  %31372 = vst [vmem:[#allocation47_spill] sm:$0xff] %v26077_v40 }
 0x3a2   :  { %21445 = vmatprep.subr.bf16.mxu0 %v21444_v48  ;;  %21473 = vmatprep.subr.bf16.mxu1 %v25484_v34 }
 0x3a3   :  { %6237 = vmatprep.mubr.f32.mxu1 %v31303_v32  ;;  %6374 = vmatprep.mubr.f32.mxu0 %v31304_v62 }
 0x3a4   :  { %6239 = vmatmul.mubr.f32.gmra.mrb[40].mxu1 %v31305_v47 }
 0x3a5   :  { %21447 = vmatpush3.bf16.msra.mxu0 %v21446_v9  ;;  %21475 = vmatpush3.bf16.msra.mxu1 %v25498_v6 }
 0x3a6   :  { %21449 = vmatprep.subr.bf16.mxu0 %v21448_v46  ;;  %21477 = vmatprep.subr.bf16.mxu1 %v31306_v18 }
 0x3a7   :  { %6490 = vmatprep.mubr.f32.mxu1 %v31309_v50 }
 0x3a9   :  { %21451 = vmatpush3.bf16.msra.mxu0 %v21450_v53  ;;  %21479 = vmatpush3.bf16.msra.mxu1 %v31310_v27 }
 0x3aa   :  { %21453 = vmatprep.subr.bf16.mxu0 %v21452_v26  ;;  %21481 = vmatprep.subr.bf16.mxu1 %v25525_v16 }
 0x3ad   :  { %21455 = vmatpush3.bf16.msra.mxu0 %v21454_v1  ;;  %21483 = vmatpush3.bf16.msra.mxu1 %v25546_v44 }
 0x3ae   :  { %21457 = vmatprep.subr.bf16.mxu0 %v21456_v51  ;;  %21485 = vmatprep.subr.bf16.mxu1 %v25566_v39 }
 0x3b1   :  { %21459 = vmatpush3.bf16.msra.mxu0 %v21458_v20  ;;  %21487 = vmatpush3.bf16.msra.mxu1 %v25572_v33 }
 0x3b2   :  { %21461 = vmatprep.subr.bf16.mxu0 %v21460_v63  ;;  %21489 = vmatprep.subr.bf16.mxu1 %v25585_v15  ;;  %v17709_v63 = vld [vmem:[%s30150_s2 + $0x38] sm:$0xff] }
 0x3b5   :  { %21463 = vmatpush3.bf16.msra.mxu0 %v21462_v13  ;;  %21491 = vmatpush3.bf16.msra.mxu1 %v25598_v10 }
 0x3b6   :  { %21465 = vmatprep.subr.bf16.mxu0 %v21464_v38  ;;  %21493 = vmatprep.subr.bf16.mxu1 %v25604_v7 }
 0x3b9   :  { %21467 = vmatpush3.bf16.msra.mxu0 %v21466_v23  ;;  %21495 = vmatpush3.bf16.msra.mxu1 %v25624_v19  ;;  %v25771_v23 = vld [vmem:[%s30149_s1 + $0x480] sm:$0xff] }
 0x3ba   :  { %21497 = vmatprep.subr.bf16.mxu1 %v25638_v56  ;;  %21501 = vmatprep.subr.bf16.mxu0 %v31315_v36  ;;  %v25776_v36 = vld [vmem:[%s30149_s1 + $0x488] sm:$0xff] }
 0x3bc   :  { %6377 = vmatmul.mubr.f32.vlgmr.msra.gmra.mrb[42].mxu0 %v31316_v41 }
 0x3bd   :  { %21499 = vmatpush3.bf16.msra.mxu1 %v25645_v52  ;;  %21503 = vmatpush3.bf16.msra.mxu0 %v31317_v60  ;;  %v25781_v60 = vld [vmem:[%s30149_s1 + $0x400] sm:$0xff] }
 0x3be   :  { %6383 = vmatprep.mubr.f32.mxu0 %v31318_v59  ;;  %21505 = vmatprep.subr.bf16.mxu0 %v31319_v31  ;;  %v26015_v59 = vld [vmem:[%s30149_s1 + $0x450] sm:$0xff] }
 0x3bf   :  { %21533 = vmatprep.subr.bf16.mxu1 %v25441_v28  ;;  %v31328_v28 = vld [vmem:[#allocation36_spill] sm:$0xff]  ;;  %31355 = vst [vmem:[#allocation40_spill] sm:$0xff] %v26015_v59 }
 0x3c0   :  { %6386 = vmatmul.mubr.f32.gmra.mrb[44].mxu0 %v31320_v49  ;;  %6494 = vmatmul.mubr.f32.vlgmr.msra.gmra.mrb[42].mxu1 %v31321_v42 }
 0x3c1   :  { %21507 = vmatpush3.bf16.msra.mxu0 %v31322_v61  ;;  %21535 = vmatpush3.bf16.msra.mxu1 %v25464_v58  ;;  %v31329_v58 = vld [vmem:[#allocation38_spill] sm:$0xff] }
 0x3c2   :  { %6501 = vmatprep.mubr.f32.mxu1 %v31323_v25  ;;  %21509 = vmatprep.subr.bf16.mxu0 %v31324_v14 }
 0x3c3   :  { %21537 = vmatprep.subr.bf16.mxu1 %v25484_v34  ;;  %6671 = vmatprep.mubr.f32.mxu0 %v31325_v30  ;;  %v31331_v34 = vld [vmem:[#allocation46_spill] sm:$0xff] }
 0x3c4   :  { %6505 = vmatmul.mubr.f32.gmra.mrb[44].mxu1 %v31326_v0 }
 0x3c5   :  { %21511 = vmatpush3.bf16.msra.mxu0 %v31327_v3  ;;  %21539 = vmatpush3.bf16.msra.mxu1 %v25498_v6  ;;  %v31333_v6 = vld [vmem:[#allocation54_spill] sm:$0xff] }
 0x3c6   :  { %21513 = vmatprep.subr.bf16.mxu0 %v31328_v28  ;;  %21541 = vmatprep.subr.bf16.mxu1 %v31306_v18  ;;  %v25788_v3 = vld [vmem:[%s30149_s1 + $0x408] sm:$0xff] }
 0x3c7   :  { %6782 = vmatprep.mubr.f32.mxu1 %v31325_v30 }
 0x3c9   :  { %21515 = vmatpush3.bf16.msra.mxu0 %v31329_v58  ;;  %21543 = vmatpush3.bf16.msra.mxu1 %v31310_v27  ;;  %v6803_v58 = vsel %vm1934_vm0, %v17709_v63, 0 }
 0x3ca   :  { %21517 = vmatprep.subr.bf16.mxu0 %v31330_v8  ;;  %21545 = vmatprep.subr.bf16.mxu1 %v25525_v16  ;;  %v31336_v16 = vld [vmem:[#allocation59_spill] sm:$0xff]  ;;  %v30415_v8 = vand.u32 4294901760, %v25771_v23 }
 0x3cd   :  { %21519 = vmatpush3.bf16.msra.mxu0 %v31331_v34  ;;  %21547 = vmatpush3.bf16.msra.mxu1 %v25546_v44  ;;  %v31337_v44 = vld [vmem:[#allocation60_spill] sm:$0xff]  ;;  %v30414_v34 = vand.u32 4294901760, %v25776_v36 }
 0x3ce   :  { %21521 = vmatprep.subr.bf16.mxu0 %v31332_v57  ;;  %21549 = vmatprep.subr.bf16.mxu1 %v25566_v39  ;;  %v30413_v57 = vand.u32 4294901760, %v25781_v60 }
 0x3d1   :  { %21523 = vmatpush3.bf16.msra.mxu0 %v31333_v6  ;;  %21551 = vmatpush3.bf16.msra.mxu1 %v25572_v33  ;;  %v17708_v33 = vld [vmem:[%s30150_s2 + $0x30] sm:$0xff] }
 0x3d2   :  { %21525 = vmatprep.subr.bf16.mxu0 %v31334_v45  ;;  %21553 = vmatprep.subr.bf16.mxu1 %v25585_v15  ;;  %v6800_v39 = vsel %vm1934_vm0, %v17708_v33, 0  ;;  %v25797_v45 = vld [vmem:[%s30149_s1 + $0x490] sm:$0xff] }
 0x3d3   :  { %v25755_v15 = vand.u32 4294901760, %v6800_v39 }
 0x3d5   :  { %21527 = vmatpush3.bf16.msra.mxu0 %v31335_v29  ;;  %21555 = vmatpush3.bf16.msra.mxu1 %v25598_v10  ;;  %v25758_v10 = vsub.f32 %v6800_v39, %v25755_v15  ;;  %v30411_v29 = vand.u32 4294901760, %v25788_v3  ;;  %v25812_v39 = vand.u32 4294901760, %v6803_v58 }
 0x3d6   :  { %21529 = vmatprep.subr.bf16.mxu0 %v31336_v16  ;;  %21557 = vmatprep.subr.bf16.mxu1 %v25604_v7  ;;  %v25803_v16 = vld [vmem:[%s30149_s1 + $0x498] sm:$0xff] }
 0x3d7   :  { %v25761_v7 = vand.u32 4294901760, %v25758_v10 }
 0x3d9   :  { %21531 = vmatpush3.bf16.msra.mxu0 %v31337_v44  ;;  %21559 = vmatpush3.bf16.msra.mxu1 %v25624_v19  ;;  %v6874_v19 = vsub.f32 %v25758_v10, %v25761_v7  ;;  %v25808_v44 = vld [vmem:[%s30149_s1 + $0x410] sm:$0xff] }
 0x3da   :  { %21561 = vmatprep.subr.bf16.mxu1 %v25638_v56 }
 0x3db   :  { %v6875_v56 = vand.u32 4294901760, %v6874_v19  ;;  %v25817_v19 = vld [vmem:[%s30149_s1 + $0x418] sm:$0xff] }
 0x3dc   :  { %6673 = vmatmul.mubr.f32.vlgmr.msra.gmra.mrb[46].mxu0 %v31301_v2 }
 0x3dd   :  { %21563 = vmatpush3.bf16.msra.mxu1 %v25645_v52  ;;  %6678 = vmatprep.mubr.f32.mxu0 %v31303_v32 }
 0x3e0   :  { %6680 = vmatmul.mubr.f32.gmra.mrb[48].mxu0 %v31305_v47  ;;  %6784 = vmatmul.mubr.f32.vlgmr.msra.gmra.mrb[46].mxu1 %v31301_v2 }
 0x3e1   :  { %6789 = vmatprep.mubr.f32.mxu1 %v31303_v32  ;;  %20438 = vmatprep.mubr.f32.mxu0 %v6875_v56 }
 0x3e4   :  { %6791 = vmatmul.mubr.f32.gmra.mrb[48].mxu1 %v31305_v47 }
 0x3e5   :  { %20468 = vmatprep.mubr.f32.mxu1 %v6875_v56  ;;  %v25822_v56 = vsub.f32 %v25771_v23, %v30415_v8  ;;  %v25980_v8 = vld [vmem:[%s30149_s1 + $0x448] sm:$0xff] }
 0x3e6   :  { %31347 = vst [vmem:[#allocation33_spill] sm:$0xff] %v25980_v8 }
 0x46f   :  { %v18704_v52 = vpop.f32.mrb[38].mxu0 }
 0x470   :  { %v18705_v43 = vpop.f32.mrb[39].mxu0 }
 0x471   :  { %v18706_v12 = vadd.f32 %v18705_v43, %v18704_v52  ;;  %v25827_v52 = vsub.f32 %v25776_v36, %v30414_v34  ;;  %v25832_v43 = vsub.f32 %v25781_v60, %v30413_v57 }
 0x473   :  { %v18742_v5 = vpop.f32.mrb[38].mxu1  ;;  %v18707_v54 = vpop.f32.mrb[40].mxu0 }
 0x474   :  { %v18743_v4 = vpop.f32.mrb[39].mxu1  ;;  %v18708_v48 = vpop.f32.mrb[41].mxu0 }
 0x475   :  { %v18744_v9 = vadd.f32 %v18743_v4, %v18742_v5  ;;  %v18709_v46 = vadd.f32 %v18708_v48, %v18707_v54  ;;  %v25838_v5 = vld [vmem:[%s30149_s1 + $0x4a0] sm:$0xff]  ;;  %v30409_v54 = vand.u32 4294901760, %v25803_v16  ;;  %v30407_v4 = vand.u32 4294901760, %v25808_v44 }
 0x476   :  { %v25845_v48 = vsub.f32 %v25788_v3, %v30411_v29  ;;  %v25958_v29 = vld [vmem:[%s30149_s1 + $0x4c8] sm:$0xff] }
 0x477   :  { %v6234_v53 = vadd.f32 %v18744_v9, %v18706_v12  ;;  %v18745_v18 = vpop.f32.mrb[40].mxu1  ;;  %v30410_v12 = vand.u32 4294901760, %v25797_v45  ;;  %v30408_v9 = vand.u32 4294901760, %v25817_v19  ;;  %31345 = vst [vmem:[#allocation6_spill] sm:$0xff] %v25958_v29  ;;  %v31368_v62 = vand.u32 4294901760, %v25958_v29 }
 0x478   :  { %v18746_v11 = vpop.f32.mrb[41].mxu1 }
 0x479   :  { %v18747_v22 = vadd.f32 %v18746_v11, %v18745_v18  ;;  %v25859_v18 = vsub.f32 %v6803_v58, %v25812_v39  ;;  %v30412_v11 = vand.u32 4294901760, %v25838_v5  ;;  %v25913_v58 = vld [vmem:[%s30149_s1 + $0x438] sm:$0xff] }
 0x47a   :  { %31341 = vst [vmem:[#allocation28_spill] sm:$0xff] %v25913_v58 }
 0x47b   :  { %v6241_v26 = vadd.f32 %v18747_v22, %v18709_v46  ;;  %v25851_v46 = vld [vmem:[%s30149_s1 + $0x4a8] sm:$0xff] }
 0x47c   :  { %v25865_v22 = vld [vmem:[%s30149_s1 + $0x428] sm:$0xff] }
 0x48f   :  { %v18780_v27 = vpop.f32.mrb[42].mxu0 }
 0x490   :  { %v18781_v55 = vpop.f32.mrb[43].mxu0 }
 0x491   :  { %v18782_v17 = vadd.f32 %v18781_v55, %v18780_v27  ;;  %v25875_v27 = vsub.f32 %v25797_v45, %v30410_v12  ;;  %v30417_v55 = vand.u32 4294901760, %v25822_v56 }
 0x493   :  { %v6379_v1 = vadd.f32 %v18782_v17, %v6234_v53  ;;  %v18783_v24 = vpop.f32.mrb[44].mxu0  ;;  %v18818_v37 = vpop.f32.mrb[42].mxu1  ;;  %v25856_v53 = vld [vmem:[%s30149_s1 + $0x420] sm:$0xff]  ;;  %v30416_v17 = vand.u32 4294901760, %v25827_v52  ;;  %v31350_v0 = vand.u32 4294901760, %v25875_v27 }
 0x494   :  { %v18784_v51 = vpop.f32.mrb[45].mxu0  ;;  %v18819_v20 = vpop.f32.mrb[43].mxu1  ;;  %v30420_v63 = vand.u32 4294901760, %v25856_v53 }
 0x495   :  { %v18785_v13 = vadd.f32 %v18784_v51, %v18783_v24  ;;  %v18820_v38 = vadd.f32 %v18819_v20, %v18818_v37  ;;  %v25883_v24 = vld [vmem:[%s30149_s1 + $0x4b8] sm:$0xff]  ;;  %v25888_v37 = vsub.f32 %v25803_v16, %v30409_v54  ;;  %v25893_v51 = vsub.f32 %v25808_v44, %v30407_v4 }
 0x496   :  { %31339 = vst [vmem:[#allocation64_spill] sm:$0xff] %v25883_v24  ;;  %v30419_v20 = vand.u32 4294901760, %v25851_v46  ;;  %v30424_v4 = vand.u32 4294901760, %v25883_v24  ;;  %v25928_v54 = vand.u32 4294901760, %v25859_v18 }
 0x497   :  { %v6388_v31 = vadd.f32 %v18785_v13, %v6241_v26  ;;  %v25783_v61 = vadd.f32 %v18820_v38, %v6379_v1  ;;  %v18821_v14 = vpop.f32.mrb[44].mxu1  ;;  %v25870_v26 = vld [vmem:[%s30149_s1 + $0x4b0] sm:$0xff]  ;;  %v30421_v1 = vand.u32 4294901760, %v25832_v43  ;;  %v25905_v38 = vsub.f32 %v25817_v19, %v30408_v9 }
 0x498   :  { %v18822_v28 = vpop.f32.mrb[45].mxu1  ;;  %31338 = vst [vmem:[#allocation63_spill] sm:$0xff] %v25870_v26  ;;  %v25900_v13 = vld [vmem:[%s30149_s1 + $0x430] sm:$0xff]  ;;  %v25925_v9 = vpack.c.bf16 %v30416_v17, %v30417_v55  ;;  %v25946_v34 = vsub.f32 %v25851_v46, %v30419_v20  ;;  %v25952_v17 = vsub.f32 %v25856_v53, %v30420_v63  ;;  %v25985_v12 = vsub.f32 %v25883_v24, %v30424_v4 }
 0x499   :  { %v18823_v6 = vadd.f32 %v18822_v28, %v18821_v14  ;;  %31340 = vst [vmem:[#allocation5_spill] sm:$0xff] %v25900_v13  ;;  %v30422_v14 = vand.u32 4294901760, %v25865_v22  ;;  %v30423_v28 = vand.u32 4294901760, %v25870_v26  ;;  %v31351_v25 = vand.u32 4294901760, %v25888_v37 }
 0x49a   :  { %31342 = vst [vmem:[#allocation39_spill] sm:$0xff] %v25925_v9  ;;  %v31357_v41 = vand.u32 4294901760, %v25905_v38  ;;  %v31384_v21 = vand.u32 4294901760, %v25985_v12 }
 0x49b   :  { %v25810_v33 = vadd.f32 %v18823_v6, %v6388_v31  ;;  %v30418_v31 = vand.u32 4294901760, %v25845_v48  ;;  %v25918_v6 = vsub.f32 %v25838_v5, %v30412_v11  ;;  %v25935_v11 = vld [vmem:[%s30149_s1 + $0x4c0] sm:$0xff]  ;;  %v25968_v20 = vsub.f32 %v25865_v22, %v30422_v14 }
 0x49c   :  { %31343 = vst [vmem:[#allocation45_spill] sm:$0xff] %v25935_v11  ;;  %v25975_v55 = vsub.f32 %v25870_v26, %v30423_v28  ;;  %v25997_v28 = vld [vmem:[%s30149_s1 + $0x4d8] sm:$0xff]  ;;  %v26003_v4 = vpack.c.bf16 %v31351_v25, %v31350_v0  ;;  %v31353_v14 = vand.u32 4294901760, %v25900_v13  ;;  %v30427_v0 = vand.u32 4294901760, %v25946_v34 }
 0x49d   :  { %v25941_v57 = vpack.c.bf16 %v30418_v31, %v30421_v1  ;;  %v25963_v31 = vld [vmem:[%s30149_s1 + $0x440] sm:$0xff]  ;;  %v25992_v1 = vld [vmem:[%s30149_s1 + $0x4d0] sm:$0xff]  ;;  %31349 = vst [vmem:[#allocation27_spill] sm:$0xff] %v25997_v28  ;;  %v31363_v42 = vand.u32 4294901760, %v25935_v11  ;;  %v31366_v49 = vand.u32 4294901760, %v25918_v6 }
 0x49e   :  { %31346 = vst [vmem:[#allocation31_spill] sm:$0xff] %v25963_v31  ;;  %31348 = vst [vmem:[#allocation9_spill] sm:$0xff] %v25992_v1  ;;  %v26008_v63 = vsub.f32 %v25900_v13, %v31353_v14  ;;  %v31359_v14 = vand.u32 4294901760, %v25913_v58  ;;  %v31370_v50 = vand.u32 4294901760, %v25963_v31  ;;  %v31383_v32 = vand.u32 4294901760, %v25975_v55 }
 0x49f   :  { %31344 = vst [vmem:[#allocation30_spill] sm:$0xff] %v25941_v57  ;;  %31352 = vst [vmem:[#allocation29_spill] sm:$0xff] %v26003_v4  ;;  %v31356_v57 = vand.u32 4294901760, %v25893_v51  ;;  %v26048_v9 = vsub.f32 %v25935_v11, %v31363_v42  ;;  %v26066_v42 = vsub.f32 %v25958_v29, %v31368_v62  ;;  %v31376_v62 = vand.u32 4294901760, %v25980_v8 }
 0x4a0   :  { %31354 = vst [vmem:[#allocation35_spill] sm:$0xff] %v26008_v63  ;;  %v26027_v4 = vsub.f32 %v25913_v58, %v31359_v14  ;;  %v26043_v14 = vld [vmem:[%s30149_s1 + $0x4e0] sm:$0xff]  ;;  %v26071_v47 = vsub.f32 %v25963_v31, %v31370_v50  ;;  %v31379_v31 = vand.u32 4294901760, %v25992_v1  ;;  %v6884_v29 = vsub.f32 %v25859_v18, %v25928_v54 }
 0x4a1   :  { %v26021_v25 = vpack.c.bf16 %v31357_v41, %v31356_v57  ;;  %v26038_v57 = vld [vmem:[%s30149_s1 + $0x458] sm:$0xff]  ;;  %31362 = vst [vmem:[#allocation48_spill] sm:$0xff] %v26043_v14  ;;  %31364 = vst [vmem:[#allocation34_spill] sm:$0xff] %v26048_v9  ;;  %v26055_v41 = vld [vmem:[%s30149_s1 + $0x4e8] sm:$0xff]  ;;  %v26088_v2 = vsub.f32 %v25980_v8, %v31376_v62 }
 0x4a2   :  { %31360 = vst [vmem:[#allocation51_spill] sm:$0xff] %v26027_v4  ;;  %31361 = vst [vmem:[#allocation56_spill] sm:$0xff] %v26038_v57  ;;  %v31388_v50 = vand.u32 4294901760, %v26027_v4 }
 0x4a3   :  { %31358 = vst [vmem:[#allocation50_spill] sm:$0xff] %v26021_v25  ;;  %31365 = vst [vmem:[#allocation61_spill] sm:$0xff] %v26055_v41  ;;  %v26061_v25 = vpack.c.bf16 %v30427_v0, %v31366_v49  ;;  %v31373_v49 = vand.u32 4294901760, %v25952_v17  ;;  %v31374_v0 = vand.u32 4294901760, %v25968_v20  ;;  %v31397_v24 = vand.u32 4294901760, %v26088_v2 }
 0x4a4   :  { %31369 = vst [vmem:[#allocation10_spill] sm:$0xff] %v26066_v42  ;;  %31371 = vst [vmem:[#allocation62_spill] sm:$0xff] %v26071_v47 }
 0x4a5   :  { %31367 = vst [vmem:[#allocation55_spill] sm:$0xff] %v26061_v25  ;;  %v26083_v25 = vpack.c.bf16 %v31374_v0, %v31373_v49  ;;  %31377 = vst [vmem:[#allocation32_spill] sm:$0xff] %v26088_v2  ;;  %v26101_v0 = vsub.f32 %v25992_v1, %v31379_v31  ;;  %v31381_v49 = vand.u32 4294901760, %v25997_v28  ;;  %v31386_v31 = vand.u32 4294901760, %v26015_v59 }
 0x4a7   :  { %31375 = vst [vmem:[#allocation53_spill] sm:$0xff] %v26083_v25  ;;  %31380 = vst [vmem:[#allocation41_spill] sm:$0xff] %v26101_v0  ;;  %v26106_v62 = vsub.f32 %v25997_v28, %v31381_v49  ;;  %v26113_v25 = vpack.c.bf16 %v31384_v21, %v31383_v32  ;;  %v26120_v1 = vsub.f32 %v26015_v59, %v31386_v31  ;;  %v31387_v28 = vand.u32 4294901760, %v26008_v63  ;;  %v26147_v32 = vld [vmem:[%s30149_s1 + $0x4f0] sm:$0xff] }
 0x4a8   :  { %v30451_v21 = vand.u32 4294901760, %v26048_v9  ;;  %v31390_v31 = vand.u32 4294901760, %v26038_v57  ;;  %v31396_v63 = vand.u32 4294901760, %v26071_v47  ;;  %v31400_v2 = vand.u32 4294901760, %v26101_v0 }
 0x4a9   :  { %31382 = vst [vmem:[#allocation7_spill] sm:$0xff] %v26106_v62  ;;  %31385 = vst [vmem:[#allocation37_spill] sm:$0xff] %v26113_v25  ;;  %v26127_v11 = vpack.c.bf16 %v31388_v50, %v31387_v28  ;;  %v31391_v28 = vand.u32 4294901760, %v26043_v14  ;;  %v26169_v25 = vld [vmem:[%s30149_s1 + $0x478] sm:$0xff] }
 0x4aa   :  { %v26136_v49 = vsub.f32 %v26038_v57, %v31390_v31  ;;  %v31392_v31 = vand.u32 4294901760, %v26055_v41  ;;  %v26188_v9 = vpack.c.bf16 %v31397_v24, %v31396_v63  ;;  %v30461_v24 = vand.u32 4294901760, %v26169_v25 }
 0x4ab   :  { %31389 = vst [vmem:[#allocation44_spill] sm:$0xff] %v26127_v11  ;;  %v26142_v50 = vsub.f32 %v26043_v14, %v31391_v28  ;;  %v31393_v11 = vand.u32 4294901760, %v26066_v42  ;;  %v6885_v63 = vand.u32 4294901760, %v6884_v29 }
 0x4ac   :  { %v26162_v28 = vsub.f32 %v26055_v41, %v31392_v31  ;;  %v31395_v41 = vand.u32 4294901760, %v26077_v40  ;;  %31398 = vst [vmem:[#allocation49_spill] sm:$0xff] %v26188_v9  ;;  %v30459_v47 = vand.u32 4294901760, %v26136_v49 }
 0x4ad   :  { %v26175_v14 = vpack.c.bf16 %v31393_v11, %v30451_v21  ;;  %v31399_v21 = vand.u32 4294901760, %v26096_v35 }
 0x4ae   :  { %v26181_v13 = vsub.f32 %v26077_v40, %v31395_v41 }
 0x4af   :  { %v18856_v8 = vpop.f32.mrb[46].mxu0  ;;  %31394 = vst [vmem:[#allocation43_spill] sm:$0xff] %v26175_v14 }
 0x4b0   :  { %v18857_v58 = vpop.f32.mrb[47].mxu0 }
 0x4b1   :  { %v18858_v30 = vadd.f32 %v18857_v58, %v18856_v8  ;;  %v26152_v8 = vld [vmem:[%s30149_s1 + $0x4f8] sm:$0xff]  ;;  %v26157_v58 = vld [vmem:[%s30149_s1 + $0x470] sm:$0xff] }
 0x4b2   :  { %v30460_v14 = vand.u32 4294901760, %v26157_v58 }
 0x4b3   :  { %v6675_v57 = vadd.f32 %v18858_v30, %v25783_v61  ;;  %v18859_v4 = vpop.f32.mrb[48].mxu0  ;;  %v18894_v31 = vpop.f32.mrb[46].mxu1  ;;  %v26193_v30 = vsub.f32 %v26096_v35, %v31399_v21  ;;  %v31401_v21 = vand.u32 4294901760, %v26106_v62 }
 0x4b4   :  { %v18860_v42 = vpop.f32.mrb[49].mxu0  ;;  %v18895_v11 = vpop.f32.mrb[47].mxu1 }
 0x4b5   :  { %v18861_v59 = vadd.f32 %v18860_v42, %v18859_v4  ;;  %v18896_v40 = vadd.f32 %v18895_v11, %v18894_v31  ;;  %v26205_v35 = vpack.c.bf16 %v31401_v21, %v31400_v2  ;;  %v30464_v4 = vand.u32 4294901760, %v26162_v28 }
 0x4b6   :  { %v31403_v42 = vand.u32 4294901760, %v26120_v1  ;;  %v31405_v11 = vand.u32 4294901760, %v26147_v32  ;;  %v31406_v2 = vand.u32 4294901760, %v26152_v8 }
 0x4b7   :  { %31402 = vst [vmem:[#allocation36_spill] sm:$0xff] %v26205_v35  ;;  %v6682_v61 = vadd.f32 %v18861_v59, %v25810_v33  ;;  %v6786_v41 = vadd.f32 %v18896_v40, %v6675_v57  ;;  %v18897_v26 = vpop.f32.mrb[48].mxu1  ;;  %v26228_v40 = vsub.f32 %v26157_v58, %v30460_v14  ;;  %v30463_v33 = vand.u32 4294901760, %v26181_v13 }
 0x4b8   :  { %v26213_v31 = vpack.c.bf16 %v30459_v47, %v31403_v42  ;;  %v18898_v29 = vpop.f32.mrb[49].mxu1  ;;  %v26218_v9 = vsub.f32 %v26147_v32, %v31405_v11  ;;  %v26223_v59 = vsub.f32 %v26152_v8, %v31406_v2  ;;  %v26236_v42 = vsub.f32 %v26169_v25, %v30461_v24 }
 0x4b9   :  { %v26231_v57 = vand.u32 4294901760, %v6786_v41  ;;  %v18899_v21 = vadd.f32 %v18898_v29, %v18897_v26  ;;  %v30462_v11 = vand.u32 4294901760, %v26193_v30  ;;  %v31407_v2 = vand.u32 4294901760, %v26142_v50 }
 0x4ba   :  { %31404 = vst [vmem:[#allocation38_spill] sm:$0xff] %v26213_v31  ;;  %v30468_v29 = vand.u32 4294901760, %v26218_v9  ;;  %v30465_v24 = vand.u32 4294901760, %v26223_v59 }
 0x4bb   :  { %v26243_v47 = vpack.c.bf16 %v30464_v4, %v31407_v2  ;;  %v6893_v14 = vsub.f32 %v6786_v41, %v26231_v57  ;;  %v6793_v31 = vadd.f32 %v18899_v21, %v6682_v61  ;;  %20436 = vmatprep.subr.mxu0 %v26231_v57  ;;  %v26251_v26 = vpack.c.bf16 %v30462_v11, %v30463_v33 }
 0x4bc   :  { %20437 = vmatpush3.msra.mxu0 %v26231_v57  ;;  %v30467_v61 = vand.u32 4294901760, %v26228_v40  ;;  %v30466_v41 = vand.u32 4294901760, %v26236_v42  ;;  %v26265_v21 = vpack.c.bf16 %v30465_v24, %v30468_v29 }
 0x4bd   :  { %31408 = vst [vmem:[#allocation42_spill] sm:$0xff] %v26243_v47  ;;  %31409 = vst [vmem:[#allocation46_spill] sm:$0xff] %v26251_v26  ;;  %v26256_v35 = vand.u32 4294901760, %v6793_v31  ;;  %20439 = vmatmul.mubr.f32.vlgmr.msra.gmra.mrb[24].mxu0 %v6885_v63  ;;  %v6894_v2 = vand.u32 4294901760, %v6893_v14 }
 0x4be   :  { %20443 = vmatprep.mubr.f32.mxu0 %v25755_v15  ;;  %31410 = vst [vmem:[#allocation52_spill] sm:$0xff] %v26265_v21  ;;  %v26273_v4 = vpack.c.bf16 %v30466_v41, %v30467_v61  ;;  %v31429_v61 = vand.u32 4294901760, %v25968_v20  ;;  %v31460_v21 = vld [vmem:[#allocation32_spill] sm:$0xff] }
 0x4bf   :  { %v7384_v11 = vsub.f32 %v6793_v31, %v26256_v35  ;;  %20466 = vmatprep.subr.mxu1 %v26256_v35  ;;  %v6895_v33 = vsub.f32 %v6893_v14, %v6894_v2 }
 0x4c0   :  { %31411 = vst [vmem:[#allocation54_spill] sm:$0xff] %v26273_v4  ;;  %20467 = vmatpush3.msra.mxu1 %v26256_v35 }
 0x4c1   :  { %20469 = vmatmul.mubr.f32.vlgmr.msra.gmra.mrb[24].mxu1 %v6885_v63  ;;  %v6896_v26 = vand.u32 4294901760, %v6895_v33  ;;  %v7385_v47 = vand.u32 4294901760, %v7384_v11  ;;  %v31415_v63 = vand.u32 4294901760, %v25776_v36 }
 0x4c2   :  { %20473 = vmatprep.mubr.f32.mxu1 %v25755_v15 }
 0x4c3   :  { %20441 = vmatprep.subr.mxu0 %v6896_v26  ;;  %v7386_v24 = vsub.f32 %v7384_v11, %v7385_v47 }
 0x4c4   :  { %20442 = vmatpush3.msra.mxu0 %v6896_v26 }
 0x4c5   :  { %20444 = vmatmul.mubr.f32.vlgmr.msra.gmra.mrb[24].mxu0 %v25812_v39  ;;  %20446 = vmatprep.subr.mxu0 %v6893_v14  ;;  %v7387_v31 = vand.u32 4294901760, %v7386_v24  ;;  %v31413_v24 = vand.u32 4294901760, %v25827_v52 }
 0x4c6   :  { %20447 = vmatpush3.msra.mxu0 %v6893_v14  ;;  %20448 = vmatprep.mubr.f32.mxu0 %v25758_v10 }
 0x4c7   :  { %20451 = vmatprep.subr.mxu0 %v26231_v57  ;;  %20471 = vmatprep.subr.mxu1 %v7387_v31 }
 0x4c8   :  { %20472 = vmatpush3.msra.mxu1 %v7387_v31  ;;  %v31418_v31 = vand.u32 4294901760, %v25875_v27 }
 0x4c9   :  { %20474 = vmatmul.mubr.f32.vlgmr.msra.gmra.mrb[24].mxu1 %v25812_v39  ;;  %20476 = vmatprep.subr.mxu1 %v7384_v11 }
 0x4ca   :  { %20477 = vmatpush3.msra.mxu1 %v7384_v11  ;;  %20478 = vmatprep.mubr.f32.mxu1 %v25758_v10  ;;  %v31412_v10 = vand.u32 4294901760, %v25822_v56 }
 0x4cb   :  { %20481 = vmatprep.subr.mxu1 %v26256_v35 }
 0x4cc   :  { %v8063_v14 = vsub.f32 %v25822_v56, %v31412_v10  ;;  %v8077_v10 = vsub.f32 %v25875_v27, %v31418_v31 }
 0x4cd   :  { %20449 = vmatmul.mubr.f32.vlgmr.msra.gmra.mrb[24].mxu0 %v25859_v18 }
 0x4ce   :  { %20452 = vmatpush3.msra.mxu0 %v26231_v57  ;;  %20453 = vmatprep.mubr.f32.mxu0 %v25761_v7  ;;  %v8064_v11 = vand.u32 4294901760, %v8063_v14  ;;  %v31419_v14 = vand.u32 4294901760, %v25888_v37 }
 0x4cf   :  { %20456 = vmatprep.subr.mxu0 %v6894_v2 }
 0x4d1   :  { %20479 = vmatmul.mubr.f32.vlgmr.msra.gmra.mrb[24].mxu1 %v25859_v18  ;;  %v8070_v18 = vsub.f32 %v25827_v52, %v31413_v24  ;;  %v31420_v24 = vand.u32 4294901760, %v25781_v60  ;;  %v31424_v60 = vand.u32 4294901760, %v25918_v6 }
 0x4d2   :  { %20482 = vmatpush3.msra.mxu1 %v26256_v35  ;;  %20483 = vmatprep.mubr.f32.mxu1 %v25761_v7  ;;  %v31414_v7 = vand.u32 4294901760, %v25771_v23 }
 0x4d3   :  { %20486 = vmatprep.subr.mxu1 %v7385_v47  ;;  %v8071_v26 = vand.u32 4294901760, %v8070_v18  ;;  %v31421_v18 = vand.u32 4294901760, %v25788_v3  ;;  %v8091_v3 = vsub.f32 %v25918_v6, %v31424_v60 }
 0x4d4   :  { %v26305_v33 = vpack.c.bf16 %v31415_v63, %v31414_v7  ;;  %v31422_v63 = vand.u32 4294901760, %v25893_v51 }
 0x4d5   :  { %20454 = vmatmul.mubr.f32.vlgmr.msra.gmra.mrb[24].mxu0 %v25928_v54  ;;  %v21596_v36 = vpack.c.bf16 %v8071_v26, %v8064_v11  ;;  %v26328_v7 = vpack.c.bf16 %v31421_v18, %v31420_v24  ;;  %v31423_v26 = vand.u32 4294901760, %v25905_v38  ;;  %v31426_v18 = vand.u32 4294901760, %v25797_v45 }
 0x4d6   :  { %20457 = vmatpush3.msra.mxu0 %v6894_v2  ;;  %20458 = vmatprep.mubr.f32.mxu0 %v25755_v15  ;;  %v31417_v2 = vand.u32 4294901760, %v25845_v48  ;;  %v7965_v11 = vsub.f32 %v25893_v51, %v31422_v63  ;;  %v31427_v63 = vand.u32 4294901760, %v25803_v16  ;;  %v31430_v45 = vand.u32 4294901760, %v25808_v44 }
 0x4d7   :  { %20461 = vmatprep.subr.mxu0 %v26231_v57  ;;  %v31431_v16 = vand.u32 4294901760, %v25817_v19  ;;  %v31436_v44 = vand.u32 4294901760, %v25975_v55 }
 0x4d8   :  { %v7958_v23 = vsub.f32 %v25845_v48, %v31417_v2  ;;  %v26348_v41 = vpack.c.bf16 %v31427_v63, %v31426_v18  ;;  %v31433_v18 = vand.u32 4294901760, %v25838_v5  ;;  %v31434_v63 = vand.u32 4294901760, %v25851_v46  ;;  %v31441_v46 = vld [vmem:[#allocation63_spill] sm:$0xff] }
 0x4d9   :  { %20484 = vmatmul.mubr.f32.vlgmr.msra.gmra.mrb[24].mxu1 %v25928_v54  ;;  %v8105_v19 = vsub.f32 %v25975_v55, %v31436_v44 }
 0x4da   :  { %20487 = vmatpush3.msra.mxu1 %v7385_v47  ;;  %20488 = vmatprep.mubr.f32.mxu1 %v25755_v15  ;;  %v31416_v47 = vand.u32 4294901760, %v25832_v43  ;;  %v7959_v31 = vand.u32 4294901760, %v7958_v23  ;;  %v31428_v23 = vand.u32 4294901760, %v25952_v17 }
 0x4db   :  { %20491 = vmatprep.subr.mxu1 %v26256_v35 }
 0x4dc   :  { %v7951_v54 = vsub.f32 %v25832_v43, %v31416_v47  ;;  %v7972_v47 = vsub.f32 %v25905_v38, %v31423_v26  ;;  %v7979_v60 = vsub.f32 %v25952_v17, %v31428_v23 }
 0x4dd   :  { %20459 = vmatmul.mubr.f32.vlgmr.msra.gmra.mrb[24].mxu0 %v25812_v39 }
 0x4de   :  { %20462 = vmatpush3.msra.mxu0 %v26231_v57  ;;  %20463 = vmatprep.mubr.f32.mxu0 %v25755_v15  ;;  %v8084_v57 = vsub.f32 %v25888_v37, %v31419_v14  ;;  %v7952_v2 = vand.u32 4294901760, %v7951_v54  ;;  %v31425_v14 = vand.u32 4294901760, %v25946_v34  ;;  %v7973_v54 = vand.u32 4294901760, %v7972_v47  ;;  %v31432_v47 = vld [vmem:[#allocation17_spill] sm:$0xff] }
 0x4df   :  { %21565 = vmatprep.subr.bf16.mxu0 %v26305_v33 }
 0x4e0   :  { %v8098_v24 = vsub.f32 %v25946_v34, %v31425_v14  ;;  %v8085_v26 = vand.u32 4294901760, %v8084_v57  ;;  %v7986_v14 = vsub.f32 %v25968_v20, %v31429_v61  ;;  %v8092_v57 = vand.u32 4294901760, %v8091_v3 }
 0x4e1   :  { %20489 = vmatmul.mubr.f32.vlgmr.msra.gmra.mrb[24].mxu1 %v25812_v39  ;;  %v26370_v61 = vpack.c.bf16 %v31434_v63, %v31433_v18  ;;  %v31439_v3 = vand.u32 4294901760, %v25865_v22  ;;  %v7980_v63 = vand.u32 4294901760, %v7979_v60 }
 0x4e2   :  { %20492 = vmatpush3.msra.mxu1 %v26256_v35  ;;  %20493 = vmatprep.mubr.f32.mxu1 %v25755_v15  ;;  %v8078_v35 = vand.u32 4294901760, %v8077_v10  ;;  %v7966_v15 = vand.u32 4294901760, %v7965_v11  ;;  %v21598_v10 = vpack.c.bf16 %v7959_v31, %v7952_v2  ;;  %v8099_v11 = vand.u32 4294901760, %v8098_v24 }
 0x4e3   :  { %21597 = vmatprep.subr.bf16.mxu1 %v21596_v36  ;;  %v26362_v36 = vpack.c.bf16 %v31431_v16, %v31430_v45  ;;  %31435 = vst [vmem:[#allocation57_spill] sm:$0xff] %v26370_v61  ;;  %v31437_v45 = vand.u32 4294901760, %v25985_v12  ;;  %v31438_v31 = vand.u32 4294901760, %v25856_v53  ;;  %v31442_v16 = vand.u32 4294901760, %v31441_v46  ;;  %v31445_v53 = vld [vmem:[#allocation35_spill] sm:$0xff]  ;;  %v31449_v46 = vld [vmem:[#allocation34_spill] sm:$0xff] }
 0x4e4   :  { %v21600_v23 = vpack.c.bf16 %v8085_v26, %v8078_v35  ;;  %v21602_v5 = vpack.c.bf16 %v7973_v54, %v7966_v15  ;;  %v31443_v35 = vld [vmem:[#allocation64_spill] sm:$0xff]  ;;  %v7987_v44 = vand.u32 4294901760, %v7986_v14  ;;  %v31446_v29 = vand.u32 4294901760, %v31445_v53 }
 0x4e5   :  { %20464 = vmatmul.mubr.f32.vlgmr.msra.gmra.mrb[24].mxu0 %v25812_v39  ;;  %v8112_v2 = vsub.f32 %v25985_v12, %v31437_v45  ;;  %v26382_v24 = vpack.c.bf16 %v31439_v3, %v31438_v31  ;;  %v31444_v26 = vand.u32 4294901760, %v31443_v35  ;;  %v21604_v45 = vpack.c.bf16 %v8099_v11, %v8092_v57  ;;  %v31447_v31 = vld [vmem:[#allocation51_spill] sm:$0xff] }
 0x4e6   :  { %21567 = vmatpush3.bf16.msra.mxu0 %v26328_v7  ;;  %7921 = vmatprep.mubr.f32.mxu0 %v31432_v47  ;;  %v7993_v22 = vsub.f32 %v31445_v53, %v31446_v29  ;;  %v31448_v3 = vand.u32 4294901760, %v31447_v31  ;;  %v8106_v15 = vand.u32 4294901760, %v8105_v19  ;;  %v31450_v60 = vand.u32 4294901760, %v31449_v46  ;;  %v31453_v11 = vld [vmem:[#allocation11_spill] sm:$0xff]  ;;  %v31454_v29 = vld [vmem:[#allocation5_spill] sm:$0xff] }
 0x4e7   :  { %21569 = vmatprep.subr.bf16.mxu0 %v26348_v41  ;;  %31440 = vst [vmem:[#allocation58_spill] sm:$0xff] %v26382_v24  ;;  %v26389_v18 = vpack.c.bf16 %v31444_v26, %v31442_v16  ;;  %v8113_v54 = vand.u32 4294901760, %v8112_v2  ;;  %v31451_v16 = vld [vmem:[#allocation10_spill] sm:$0xff]  ;;  %v31455_v35 = vand.u32 4294901760, %v31454_v29  ;;  %v31456_v26 = vld [vmem:[#allocation28_spill] sm:$0xff]  ;;  %v21606_v4 = vpack.c.bf16 %v7987_v44, %v7980_v63  ;;  %v31464_v44 = vld [vmem:[#allocation45_spill] sm:$0xff] }
 0x4e8   :  { %v8119_v14 = vsub.f32 %v31449_v46, %v31450_v60  ;;  %v31457_v47 = vand.u32 4294901760, %v31456_v26  ;;  %v31462_v29 = vand.u32 4294901760, %v26101_v0 }
 0x4e9   :  { %20494 = vmatmul.mubr.f32.vlgmr.msra.gmra.mrb[24].mxu1 %v25812_v39  ;;  %v8000_v39 = vsub.f32 %v31447_v31, %v31448_v3 }
 0x4ea   :  { %21571 = vmatpush3.bf16.msra.mxu0 %v26362_v36  ;;  %21599 = vmatpush3.bf16.msra.mxu1 %v21598_v10  ;;  %v31452_v10 = vand.u32 4294901760, %v31451_v16  ;;  %v26410_v3 = vpack.c.bf16 %v31457_v47, %v31455_v35  ;;  %v8133_v26 = vsub.f32 %v26101_v0, %v31462_v29  ;;  %v31463_v47 = vand.u32 4294901760, %v26106_v62 }
 0x4eb   :  { %21573 = vmatprep.subr.bf16.mxu0 %v26370_v61  ;;  %21601 = vmatprep.subr.bf16.mxu1 %v21600_v23  ;;  %v31458_v23 = vld [vmem:[#allocation62_spill] sm:$0xff]  ;;  %v31461_v61 = vand.u32 4294901760, %v31460_v21  ;;  %v31465_v35 = vand.u32 4294901760, %v31464_v44  ;;  %v31473_v44 = vand.u32 4294901760, %v26136_v49 }
 0x4ec   :  { %v8126_v57 = vsub.f32 %v31451_v16, %v31452_v10  ;;  %8172 = vmatprep.mubr.f32.mxu1 %v31453_v11  ;;  %v31459_v19 = vand.u32 4294901760, %v31458_v23  ;;  %v7994_v10 = vand.u32 4294901760, %v7993_v22  ;;  %v8001_v11 = vand.u32 4294901760, %v8000_v39  ;;  %v31470_v16 = vld [vmem:[#allocation33_spill] sm:$0xff] }
 0x4ed   :  { %v8014_v60 = vsub.f32 %v31460_v21, %v31461_v61  ;;  %v8140_v63 = vsub.f32 %v26106_v62, %v31463_v47  ;;  %v8120_v22 = vand.u32 4294901760, %v8119_v14  ;;  %v31471_v29 = vand.u32 4294901760, %v31470_v16 }
 0x4ee   :  { %v8007_v2 = vsub.f32 %v31458_v23, %v31459_v19  ;;  %21575 = vmatpush3.bf16.msra.mxu0 %v26382_v24  ;;  %21603 = vmatpush3.bf16.msra.mxu1 %v21602_v5  ;;  %v31466_v19 = vld [vmem:[#allocation6_spill] sm:$0xff]  ;;  %v21608_v5 = vpack.c.bf16 %v8113_v54, %v8106_v15  ;;  %v8127_v39 = vand.u32 4294901760, %v8126_v57  ;;  %v31468_v23 = vld [vmem:[#allocation31_spill] sm:$0xff]  ;;  %v31472_v62 = vand.u32 4294901760, %v26120_v1  ;;  %v31474_v54 = vld [vmem:[#allocation9_spill] sm:$0xff] }
 0x4ef   :  { %21577 = vmatprep.subr.bf16.mxu0 %v26389_v18  ;;  %21605 = vmatprep.subr.bf16.mxu1 %v21604_v45  ;;  %v31467_v61 = vand.u32 4294901760, %v31466_v19  ;;  %v31469_v24 = vand.u32 4294901760, %v31468_v23  ;;  %v8015_v47 = vand.u32 4294901760, %v8014_v60  ;;  %v21610_v15 = vpack.c.bf16 %v8001_v11, %v7994_v10  ;;  %v31476_v57 = vld [vmem:[#allocation27_spill] sm:$0xff]  ;;  %v31480_v11 = vld [vmem:[#allocation40_spill] sm:$0xff] }
 0x4f0   :  { %v8008_v46 = vand.u32 4294901760, %v8007_v2  ;;  %v8021_v45 = vsub.f32 %v26120_v1, %v31472_v62  ;;  %v31475_v14 = vand.u32 4294901760, %v31474_v54  ;;  %v31477_v16 = vand.u32 4294901760, %v31476_v57  ;;  %v31486_v57 = vld [vmem:[#allocation61_spill] sm:$0xff] }
 0x4f1   :  { %v26430_v21 = vpack.c.bf16 %v31467_v61, %v31465_v35  ;;  %v26436_v0 = vpack.c.bf16 %v31471_v29, %v31469_v24  ;;  %v8028_v35 = vsub.f32 %v26136_v49, %v31473_v44  ;;  %v8134_v23 = vand.u32 4294901760, %v8133_v26  ;;  %v31482_v29 = vld [vmem:[#allocation56_spill] sm:$0xff] }
 0x4f2   :  { %21579 = vmatpush3.bf16.msra.mxu0 %v26410_v3  ;;  %21607 = vmatpush3.bf16.msra.mxu1 %v21606_v4  ;;  %v26449_v24 = vpack.c.bf16 %v31477_v16, %v31475_v14  ;;  %v8141_v2 = vand.u32 4294901760, %v8140_v63  ;;  %v21612_v62 = vpack.c.bf16 %v8127_v39, %v8120_v22  ;;  %v31478_v60 = vand.u32 4294901760, %v26142_v50  ;;  %v31484_v63 = vld [vmem:[#allocation48_spill] sm:$0xff] }
 0x4f3   :  { %21581 = vmatprep.subr.bf16.mxu0 %v26430_v21  ;;  %21609 = vmatprep.subr.bf16.mxu1 %v21608_v5  ;;  %v31479_v61 = vand.u32 4294901760, %v26162_v28  ;;  %v31481_v10 = vand.u32 4294901760, %v31480_v11  ;;  %v31483_v44 = vand.u32 4294901760, %v31482_v29  ;;  %v21614_v26 = vpack.c.bf16 %v8015_v47, %v8008_v46 }
 0x4f4   :  { %v8147_v19 = vsub.f32 %v26142_v50, %v31478_v60  ;;  %v31485_v14 = vand.u32 4294901760, %v31484_v63  ;;  %v31487_v5 = vand.u32 4294901760, %v31486_v57  ;;  %v8022_v39 = vand.u32 4294901760, %v8021_v45  ;;  %v31494_v63 = vld [vmem:[#allocation8_spill] sm:$0xff] }
 0x4f5   :  { %v8154_v4 = vsub.f32 %v26162_v28, %v31479_v61  ;;  %v26462_v54 = vpack.c.bf16 %v31483_v44, %v31481_v10  ;;  %v8029_v16 = vand.u32 4294901760, %v8028_v35  ;;  %v21616_v60 = vpack.c.bf16 %v8141_v2, %v8134_v23  ;;  %v31492_v2 = vld [vmem:[#allocation47_spill] sm:$0xff] }
 0x4f6   :  { %v26468_v22 = vpack.c.bf16 %v31487_v5, %v31485_v14  ;;  %21583 = vmatpush3.bf16.msra.mxu0 %v26436_v0  ;;  %21611 = vmatpush3.bf16.msra.mxu1 %v21610_v15  ;;  %v31488_v61 = vand.u32 4294901760, %v26181_v13  ;;  %v31489_v10 = vand.u32 4294901760, %v26193_v30  ;;  %v8148_v47 = vand.u32 4294901760, %v8147_v19 }
 0x4f7   :  { %21585 = vmatprep.subr.bf16.mxu0 %v26449_v24  ;;  %21613 = vmatprep.subr.bf16.mxu1 %v21612_v62  ;;  %v8155_v29 = vand.u32 4294901760, %v8154_v4  ;;  %v31490_v45 = vand.u32 4294901760, %v26218_v9  ;;  %v31491_v15 = vand.u32 4294901760, %v26223_v59  ;;  %v31493_v44 = vand.u32 4294901760, %v31492_v2 }
 0x4f8   :  { %v8035_v11 = vsub.f32 %v26181_v13, %v31488_v61  ;;  %v8042_v46 = vsub.f32 %v26193_v30, %v31489_v10  ;;  %v31495_v14 = vand.u32 4294901760, %v31494_v63  ;;  %v21618_v5 = vpack.c.bf16 %v8029_v16, %v8022_v39 }
 0x4f9   :  { %v8161_v35 = vsub.f32 %v26218_v9, %v31490_v45  ;;  %v8168_v23 = vsub.f32 %v26223_v59, %v31491_v15  ;;  %v31496_v4 = vand.u32 4294901760, %v26228_v40  ;;  %v31497_v10 = vand.u32 4294901760, %v26236_v42 }
 0x4fa   :  { %v26488_v57 = vpack.c.bf16 %v31495_v14, %v31493_v44  ;;  %21587 = vmatpush3.bf16.msra.mxu0 %v26462_v54  ;;  %21615 = vmatpush3.bf16.msra.mxu1 %v21614_v26  ;;  %v8036_v62 = vand.u32 4294901760, %v8035_v11  ;;  %v8043_v19 = vand.u32 4294901760, %v8042_v46  ;;  %v31498_v15 = vand.u32 4294901760, %v26147_v32 }
 0x4fb   :  { %v8049_v61 = vsub.f32 %v26228_v40, %v31496_v4  ;;  %v8056_v45 = vsub.f32 %v26236_v42, %v31497_v10  ;;  %21589 = vmatprep.subr.bf16.mxu0 %v26468_v22  ;;  %21617 = vmatprep.subr.bf16.mxu1 %v21616_v60  ;;  %v31499_v39 = vand.u32 4294901760, %v26152_v8  ;;  %v21620_v26 = vpack.c.bf16 %v8155_v29, %v8148_v47  ;;  %v31502_v29 = vld [vmem:[#allocation18_spill] sm:$0xff]  ;;  %v31516_v10 = vld [vmem:[#allocation41_spill] sm:$0xff] }
 0x4fc   :  { %v8162_v11 = vand.u32 4294901760, %v8161_v35  ;;  %v8169_v46 = vand.u32 4294901760, %v8168_v23  ;;  %v31500_v2 = vand.u32 4294901760, %v26157_v58  ;;  %v31501_v44 = vand.u32 4294901760, %v26169_v25  ;;  %v31511_v23 = vld [vmem:[#allocation10_spill] sm:$0xff] }
 0x4fd   :  { %v26502_v16 = vpack.c.bf16 %v31499_v39, %v31498_v15  ;;  %v21622_v14 = vpack.c.bf16 %v8043_v19, %v8036_v62  ;;  %v8050_v60 = vand.u32 4294901760, %v8049_v61  ;;  %v8057_v4 = vand.u32 4294901760, %v8056_v45  ;;  %v31512_v62 = vld [vmem:[#allocation15_spill] sm:$0xff]  ;;  %v31515_v19 = vld [vmem:[#allocation32_spill] sm:$0xff] }
 0x4fe   :  { %21591 = vmatpush3.bf16.msra.mxu0 %v26488_v57  ;;  %21619 = vmatpush3.bf16.msra.mxu1 %v21618_v5  ;;  %v26509_v63 = vpack.c.bf16 %v31501_v44, %v31500_v2  ;;  %v21624_v32 = vpack.c.bf16 %v8169_v46, %v8162_v11  ;;  %v21628_v8 = vpack.c.bf16 %v25827_v52, %v25822_v56  ;;  %v31503_v52 = vld [vmem:[#allocation25_spill] sm:$0xff]  ;;  %v31517_v45 = vld [vmem:[#allocation7_spill] sm:$0xff]  ;;  %v31529_v2 = vld [vmem:[#allocation24_spill] sm:$0xff] }
 0x4ff   :  { %21593 = vmatprep.subr.bf16.mxu0 %v26502_v16  ;;  %21621 = vmatprep.subr.bf16.mxu1 %v21620_v26  ;;  %v21626_v47 = vpack.c.bf16 %v8057_v4, %v8050_v60  ;;  %v21630_v58 = vpack.c.bf16 %v25845_v48, %v25832_v43  ;;  %v21632_v25 = vpack.c.bf16 %v25888_v37, %v25875_v27  ;;  %v31504_v43 = vld [vmem:[#allocation12_spill] sm:$0xff]  ;;  %v31505_v48 = vld [vmem:[#allocation26_spill] sm:$0xff]  ;;  %v31527_v11 = vld [vmem:[#allocation55_spill] sm:$0xff] }
 0x500   :  { %v21634_v35 = vpack.c.bf16 %v25905_v38, %v25893_v51  ;;  %v21636_v56 = vpack.c.bf16 %v25946_v34, %v25918_v6  ;;  %v21638_v27 = vpack.c.bf16 %v25968_v20, %v25952_v17  ;;  %v21640_v37 = vpack.c.bf16 %v25985_v12, %v25975_v55  ;;  %v31506_v51 = vld [vmem:[#allocation19_spill] sm:$0xff]  ;;  %v31507_v34 = vld [vmem:[#allocation13_spill] sm:$0xff]  ;;  %v31510_v20 = vld [vmem:[#allocation34_spill] sm:$0xff] }
 0x501   :  { %v31508_v38 = vld [vmem:[#allocation21_spill] sm:$0xff]  ;;  %v21642_v6 = vpack.c.bf16 %v31447_v31, %v31445_v53  ;;  %v21644_v5 = vpack.c.bf16 %v31511_v23, %v31510_v20  ;;  %v31513_v12 = vld [vmem:[#allocation58_spill] sm:$0xff]  ;;  %v21648_v53 = vpack.c.bf16 %v31517_v45, %v31516_v10  ;;  %v21650_v31 = vpack.c.bf16 %v26136_v49, %v26120_v1  ;;  %v31528_v46 = vld [vmem:[#allocation11_spill] sm:$0xff] }
 0x502   :  { %21595 = vmatpush3.bf16.msra.mxu0 %v26509_v63  ;;  %21623 = vmatpush3.bf16.msra.mxu1 %v21622_v14  ;;  %v31509_v17 = vld [vmem:[#allocation57_spill] sm:$0xff]  ;;  %v31514_v55 = vld [vmem:[#allocation62_spill] sm:$0xff]  ;;  %v21652_v15 = vpack.c.bf16 %v26162_v28, %v26142_v50  ;;  %v21654_v39 = vpack.c.bf16 %v26193_v30, %v26181_v13  ;;  %v21656_v26 = vpack.c.bf16 %v26223_v59, %v26218_v9  ;;  %v31518_v13 = vld [vmem:[#allocation39_spill] sm:$0xff] }
 0x503   :  { %21625 = vmatprep.subr.bf16.mxu1 %v21624_v32  ;;  %21629 = vmatprep.subr.bf16.mxu0 %v21628_v8  ;;  %v21646_v61 = vpack.c.bf16 %v31515_v19, %v31514_v55  ;;  %v21658_v1 = vpack.c.bf16 %v26236_v42, %v26228_v40  ;;  %v31519_v49 = vld [vmem:[#allocation14_spill] sm:$0xff]  ;;  %v31521_v50 = vld [vmem:[#allocation20_spill] sm:$0xff]  ;;  %v31522_v28 = vld [vmem:[#allocation29_spill] sm:$0xff] }
 0x504   :  { %v31520_v9 = vld [vmem:[#allocation30_spill] sm:$0xff]  ;;  %v31523_v30 = vld [vmem:[#allocation23_spill] sm:$0xff]  ;;  %v31524_v59 = vld [vmem:[#allocation16_spill] sm:$0xff] }
 0x505   :  { %7927 = vmatmul.mubr.f32.vlgmr.msra.gmra.mrb[50].mxu0 %v31502_v29  ;;  %v31525_v40 = vld [vmem:[#allocation50_spill] sm:$0xff]  ;;  %v31530_v44 = vld [vmem:[#allocation53_spill] sm:$0xff]  ;;  %v31533_v14 = vld [vmem:[#allocation43_spill] sm:$0xff] }
 0x506   :  { %21627 = vmatpush3.bf16.msra.mxu1 %v21626_v47  ;;  %21631 = vmatpush3.bf16.msra.mxu0 %v21630_v58  ;;  %v31526_v42 = vld [vmem:[#allocation22_spill] sm:$0xff]  ;;  %v31535_v60 = vld [vmem:[#allocation36_spill] sm:$0xff] }
 0x507   :  { %21633 = vmatprep.subr.bf16.mxu0 %v21632_v25  ;;  %21661 = vmatprep.subr.bf16.mxu1 %v26305_v33  ;;  %v31537_v4 = vld [vmem:[#allocation42_spill] sm:$0xff] }
 0x508   :  { %7936 = vmatprep.mubr.f32.mxu0 %v31503_v52  ;;  %v31538_v32 = vld [vmem:[#allocation46_spill] sm:$0xff] }
 0x509   :  { %8174 = vmatmul.mubr.f32.vlgmr.msra.gmra.mrb[50].mxu1 %v31504_v43  ;;  %7942 = vmatmul.mubr.f32.gmra.mrb[52].mxu0 %v31505_v48  ;;  %v26941_v48 = vld [vmem:[%s30149_s1 + $0x560] sm:$0xff]  ;;  %v26960_v29 = vld [vmem:[%s30149_s1 + $0x568] sm:$0xff] }
 0x50a   :  { %21635 = vmatpush3.bf16.msra.mxu0 %v21634_v35  ;;  %21663 = vmatpush3.bf16.msra.mxu1 %v26328_v7  ;;  %31575 = vst [vmem:[#allocation62_spill] sm:$0xff] %v26941_v48  ;;  %31581 = vst [vmem:[#allocation7_spill] sm:$0xff] %v26960_v29 }
 0x50b   :  { %21637 = vmatprep.subr.bf16.mxu0 %v21636_v56  ;;  %21665 = vmatprep.subr.bf16.mxu1 %v26348_v41 }
 0x50c   :  { %8179 = vmatprep.mubr.f32.mxu1 %v31506_v51  ;;  %8316 = vmatprep.mubr.f32.mxu0 %v31507_v34 }
 0x50d   :  { %8181 = vmatmul.mubr.f32.gmra.mrb[52].mxu1 %v31508_v38 }
 0x50e   :  { %21639 = vmatpush3.bf16.msra.mxu0 %v21638_v27  ;;  %21667 = vmatpush3.bf16.msra.mxu1 %v26362_v36 }
 0x50f   :  { %21641 = vmatprep.subr.bf16.mxu0 %v21640_v37  ;;  %21669 = vmatprep.subr.bf16.mxu1 %v31509_v17 }
 0x510   :  { %8432 = vmatprep.mubr.f32.mxu1 %v31512_v62 }
 0x512   :  { %21643 = vmatpush3.bf16.msra.mxu0 %v21642_v6  ;;  %21671 = vmatpush3.bf16.msra.mxu1 %v31513_v12 }
 0x513   :  { %21645 = vmatprep.subr.bf16.mxu0 %v21644_v5  ;;  %21673 = vmatprep.subr.bf16.mxu1 %v26389_v18 }
 0x516   :  { %21647 = vmatpush3.bf16.msra.mxu0 %v21646_v61  ;;  %21675 = vmatpush3.bf16.msra.mxu1 %v26410_v3 }
 0x517   :  { %21649 = vmatprep.subr.bf16.mxu0 %v21648_v53  ;;  %21677 = vmatprep.subr.bf16.mxu1 %v26430_v21 }
 0x51a   :  { %21651 = vmatpush3.bf16.msra.mxu0 %v21650_v31  ;;  %21679 = vmatpush3.bf16.msra.mxu1 %v26436_v0 }
 0x51b   :  { %21653 = vmatprep.subr.bf16.mxu0 %v21652_v15  ;;  %21681 = vmatprep.subr.bf16.mxu1 %v26449_v24  ;;  %v17743_v15 = vld [vmem:[%s30150_s2 + $0x48] sm:$0xff] }
 0x51e   :  { %21655 = vmatpush3.bf16.msra.mxu0 %v21654_v39  ;;  %21683 = vmatpush3.bf16.msra.mxu1 %v26462_v54 }
 0x51f   :  { %21657 = vmatprep.subr.bf16.mxu0 %v21656_v26  ;;  %21685 = vmatprep.subr.bf16.mxu1 %v26468_v22 }
 0x522   :  { %21659 = vmatpush3.bf16.msra.mxu0 %v21658_v1  ;;  %21687 = vmatpush3.bf16.msra.mxu1 %v26488_v57  ;;  %v26635_v1 = vld [vmem:[%s30149_s1 + $0x580] sm:$0xff] }
 0x523   :  { %21689 = vmatprep.subr.bf16.mxu1 %v26502_v16  ;;  %21693 = vmatprep.subr.bf16.mxu0 %v31518_v13  ;;  %v26640_v13 = vld [vmem:[%s30149_s1 + $0x588] sm:$0xff] }
 0x525   :  { %8319 = vmatmul.mubr.f32.vlgmr.msra.gmra.mrb[54].mxu0 %v31519_v49 }
 0x526   :  { %21691 = vmatpush3.bf16.msra.mxu1 %v26509_v63  ;;  %21695 = vmatpush3.bf16.msra.mxu0 %v31520_v9  ;;  %v26645_v9 = vld [vmem:[%s30149_s1 + $0x500] sm:$0xff] }
 0x527   :  { %8325 = vmatprep.mubr.f32.mxu0 %v31521_v50  ;;  %21697 = vmatprep.subr.bf16.mxu0 %v31522_v28  ;;  %v26879_v50 = vld [vmem:[%s30149_s1 + $0x550] sm:$0xff] }
 0x528   :  { %21725 = vmatprep.subr.bf16.mxu1 %v26305_v33  ;;  %v31531_v33 = vld [vmem:[#allocation37_spill] sm:$0xff]  ;;  %31558 = vst [vmem:[#allocation40_spill] sm:$0xff] %v26879_v50 }
 0x529   :  { %8328 = vmatmul.mubr.f32.gmra.mrb[56].mxu0 %v31523_v30  ;;  %8436 = vmatmul.mubr.f32.vlgmr.msra.gmra.mrb[54].mxu1 %v31524_v59 }
 0x52a   :  { %21699 = vmatpush3.bf16.msra.mxu0 %v31525_v40  ;;  %21727 = vmatpush3.bf16.msra.mxu1 %v26328_v7  ;;  %v31532_v7 = vld [vmem:[#allocation44_spill] sm:$0xff] }
 0x52b   :  { %8443 = vmatprep.mubr.f32.mxu1 %v31526_v42  ;;  %21701 = vmatprep.subr.bf16.mxu0 %v31527_v11 }
 0x52c   :  { %21729 = vmatprep.subr.bf16.mxu1 %v26348_v41  ;;  %8613 = vmatprep.mubr.f32.mxu0 %v31528_v46  ;;  %v31534_v41 = vld [vmem:[#allocation49_spill] sm:$0xff] }
 0x52d   :  { %8447 = vmatmul.mubr.f32.gmra.mrb[56].mxu1 %v31529_v2 }
 0x52e   :  { %21703 = vmatpush3.bf16.msra.mxu0 %v31530_v44  ;;  %21731 = vmatpush3.bf16.msra.mxu1 %v26362_v36  ;;  %v31536_v36 = vld [vmem:[#allocation38_spill] sm:$0xff] }
 0x52f   :  { %21705 = vmatprep.subr.bf16.mxu0 %v31531_v33  ;;  %21733 = vmatprep.subr.bf16.mxu1 %v31509_v17  ;;  %v26652_v44 = vld [vmem:[%s30149_s1 + $0x508] sm:$0xff] }
 0x530   :  { %8724 = vmatprep.mubr.f32.mxu1 %v31528_v46 }
 0x532   :  { %21707 = vmatpush3.bf16.msra.mxu0 %v31532_v7  ;;  %21735 = vmatpush3.bf16.msra.mxu1 %v31513_v12  ;;  %v8745_v7 = vsel %vm1934_vm0, %v17743_v15, 0 }
 0x533   :  { %21709 = vmatprep.subr.bf16.mxu0 %v31533_v14  ;;  %21737 = vmatprep.subr.bf16.mxu1 %v26389_v18  ;;  %v31539_v18 = vld [vmem:[#allocation52_spill] sm:$0xff]  ;;  %v30487_v14 = vand.u32 4294901760, %v26635_v1 }
 0x536   :  { %21711 = vmatpush3.bf16.msra.mxu0 %v31534_v41  ;;  %21739 = vmatpush3.bf16.msra.mxu1 %v26410_v3  ;;  %v31540_v3 = vld [vmem:[#allocation54_spill] sm:$0xff]  ;;  %v30486_v41 = vand.u32 4294901760, %v26640_v13 }
 0x537   :  { %21713 = vmatprep.subr.bf16.mxu0 %v31535_v60  ;;  %21741 = vmatprep.subr.bf16.mxu1 %v26430_v21  ;;  %v30485_v60 = vand.u32 4294901760, %v26645_v9 }
 0x53a   :  { %21715 = vmatpush3.bf16.msra.mxu0 %v31536_v36  ;;  %21743 = vmatpush3.bf16.msra.mxu1 %v26436_v0  ;;  %v17742_v0 = vld [vmem:[%s30150_s2 + $0x40] sm:$0xff] }
 0x53b   :  { %21717 = vmatprep.subr.bf16.mxu0 %v31537_v4  ;;  %21745 = vmatprep.subr.bf16.mxu1 %v26449_v24  ;;  %v8742_v21 = vsel %vm1934_vm0, %v17742_v0, 0  ;;  %v26661_v4 = vld [vmem:[%s30149_s1 + $0x590] sm:$0xff] }
 0x53c   :  { %v26619_v24 = vand.u32 4294901760, %v8742_v21 }
 0x53e   :  { %21719 = vmatpush3.bf16.msra.mxu0 %v31538_v32  ;;  %21747 = vmatpush3.bf16.msra.mxu1 %v26462_v54  ;;  %v26622_v54 = vsub.f32 %v8742_v21, %v26619_v24  ;;  %v30483_v32 = vand.u32 4294901760, %v26652_v44  ;;  %v26676_v21 = vand.u32 4294901760, %v8745_v7 }
 0x53f   :  { %21721 = vmatprep.subr.bf16.mxu0 %v31539_v18  ;;  %21749 = vmatprep.subr.bf16.mxu1 %v26468_v22  ;;  %v26667_v18 = vld [vmem:[%s30149_s1 + $0x598] sm:$0xff] }
 0x540   :  { %v26625_v22 = vand.u32 4294901760, %v26622_v54 }
 0x542   :  { %21723 = vmatpush3.bf16.msra.mxu0 %v31540_v3  ;;  %21751 = vmatpush3.bf16.msra.mxu1 %v26488_v57  ;;  %v8816_v57 = vsub.f32 %v26622_v54, %v26625_v22  ;;  %v26672_v3 = vld [vmem:[%s30149_s1 + $0x510] sm:$0xff] }
 0x543   :  { %21753 = vmatprep.subr.bf16.mxu1 %v26502_v16 }
 0x544   :  { %v8817_v16 = vand.u32 4294901760, %v8816_v57  ;;  %v26681_v57 = vld [vmem:[%s30149_s1 + $0x518] sm:$0xff] }
 0x545   :  { %8615 = vmatmul.mubr.f32.vlgmr.msra.gmra.mrb[58].mxu0 %v31504_v43 }
 0x546   :  { %21755 = vmatpush3.bf16.msra.mxu1 %v26509_v63  ;;  %8620 = vmatprep.mubr.f32.mxu0 %v31506_v51 }
 0x549   :  { %8622 = vmatmul.mubr.f32.gmra.mrb[60].mxu0 %v31508_v38  ;;  %8726 = vmatmul.mubr.f32.vlgmr.msra.gmra.mrb[58].mxu1 %v31504_v43 }
 0x54a   :  { %8731 = vmatprep.mubr.f32.mxu1 %v31506_v51  ;;  %20498 = vmatprep.mubr.f32.mxu0 %v8817_v16 }
 0x54d   :  { %8733 = vmatmul.mubr.f32.gmra.mrb[60].mxu1 %v31508_v38 }
 0x54e   :  { %20528 = vmatprep.mubr.f32.mxu1 %v8817_v16  ;;  %v26686_v16 = vsub.f32 %v26635_v1, %v30487_v14  ;;  %v26844_v14 = vld [vmem:[%s30149_s1 + $0x548] sm:$0xff] }
 0x54f   :  { %31550 = vst [vmem:[#allocation6_spill] sm:$0xff] %v26844_v14 }
 0x5d8   :  { %v18968_v63 = vpop.f32.mrb[50].mxu0 }
 0x5d9   :  { %v18969_v8 = vpop.f32.mrb[51].mxu0 }
 0x5da   :  { %v18970_v47 = vadd.f32 %v18969_v8, %v18968_v63  ;;  %v26691_v63 = vsub.f32 %v26640_v13, %v30486_v41  ;;  %v26696_v8 = vsub.f32 %v26645_v9, %v30485_v60 }
 0x5dc   :  { %v19006_v58 = vpop.f32.mrb[50].mxu1  ;;  %v18971_v25 = vpop.f32.mrb[52].mxu0 }
 0x5dd   :  { %v19007_v35 = vpop.f32.mrb[51].mxu1  ;;  %v18972_v56 = vpop.f32.mrb[53].mxu0 }
 0x5de   :  { %v19008_v27 = vadd.f32 %v19007_v35, %v19006_v58  ;;  %v18973_v37 = vadd.f32 %v18972_v56, %v18971_v25  ;;  %v26702_v58 = vld [vmem:[%s30149_s1 + $0x5a0] sm:$0xff]  ;;  %v30481_v25 = vand.u32 4294901760, %v26667_v18  ;;  %v30479_v35 = vand.u32 4294901760, %v26672_v3 }
 0x5df   :  { %v26709_v56 = vsub.f32 %v26652_v44, %v30483_v32  ;;  %v26822_v32 = vld [vmem:[%s30149_s1 + $0x5c8] sm:$0xff] }
 0x5e0   :  { %v8176_v6 = vadd.f32 %v19008_v27, %v18970_v47  ;;  %v19009_v17 = vpop.f32.mrb[52].mxu1  ;;  %v30482_v47 = vand.u32 4294901760, %v26661_v4  ;;  %v30480_v27 = vand.u32 4294901760, %v26681_v57  ;;  %31548 = vst [vmem:[#allocation28_spill] sm:$0xff] %v26822_v32  ;;  %v31571_v34 = vand.u32 4294901760, %v26822_v32 }
 0x5e1   :  { %v19010_v20 = vpop.f32.mrb[53].mxu1 }
 0x5e2   :  { %v19011_v23 = vadd.f32 %v19010_v20, %v19009_v17  ;;  %v26723_v17 = vsub.f32 %v8745_v7, %v26676_v21  ;;  %v30484_v20 = vand.u32 4294901760, %v26702_v58  ;;  %v26777_v7 = vld [vmem:[%s30149_s1 + $0x538] sm:$0xff] }
 0x5e3   :  { %31544 = vst [vmem:[#allocation64_spill] sm:$0xff] %v26777_v7 }
 0x5e4   :  { %v8183_v5 = vadd.f32 %v19011_v23, %v18973_v37  ;;  %v26715_v37 = vld [vmem:[%s30149_s1 + $0x5a8] sm:$0xff] }
 0x5e5   :  { %v26729_v23 = vld [vmem:[%s30149_s1 + $0x528] sm:$0xff] }
 0x5f8   :  { %v19044_v12 = vpop.f32.mrb[54].mxu0 }
 0x5f9   :  { %v19045_v55 = vpop.f32.mrb[55].mxu0 }
 0x5fa   :  { %v19046_v19 = vadd.f32 %v19045_v55, %v19044_v12  ;;  %v26739_v12 = vsub.f32 %v26661_v4, %v30482_v47  ;;  %v30489_v55 = vand.u32 4294901760, %v26686_v16 }
 0x5fc   :  { %v8321_v61 = vadd.f32 %v19046_v19, %v8176_v6  ;;  %v19047_v10 = vpop.f32.mrb[56].mxu0  ;;  %v19082_v45 = vpop.f32.mrb[54].mxu1  ;;  %v26720_v6 = vld [vmem:[%s30149_s1 + $0x520] sm:$0xff]  ;;  %v30488_v19 = vand.u32 4294901760, %v26691_v63  ;;  %v31553_v2 = vand.u32 4294901760, %v26739_v12 }
 0x5fd   :  { %v19048_v53 = vpop.f32.mrb[57].mxu0  ;;  %v19083_v31 = vpop.f32.mrb[55].mxu1  ;;  %v30492_v15 = vand.u32 4294901760, %v26720_v6 }
 0x5fe   :  { %v19049_v39 = vadd.f32 %v19048_v53, %v19047_v10  ;;  %v19084_v26 = vadd.f32 %v19083_v31, %v19082_v45  ;;  %v26747_v10 = vld [vmem:[%s30149_s1 + $0x5b8] sm:$0xff]  ;;  %v26752_v45 = vsub.f32 %v26667_v18, %v30481_v25  ;;  %v26757_v53 = vsub.f32 %v26672_v3, %v30479_v35 }
 0x5ff   :  { %31542 = vst [vmem:[#allocation60_spill] sm:$0xff] %v26747_v10  ;;  %v30491_v31 = vand.u32 4294901760, %v26715_v37  ;;  %v30496_v35 = vand.u32 4294901760, %v26747_v10  ;;  %v26792_v25 = vand.u32 4294901760, %v26723_v17 }
 0x600   :  { %v8330_v28 = vadd.f32 %v19049_v39, %v8183_v5  ;;  %v26647_v40 = vadd.f32 %v19084_v26, %v8321_v61  ;;  %v19085_v11 = vpop.f32.mrb[56].mxu1  ;;  %v26734_v5 = vld [vmem:[%s30149_s1 + $0x5b0] sm:$0xff]  ;;  %v30493_v61 = vand.u32 4294901760, %v26696_v8  ;;  %v26769_v26 = vsub.f32 %v26681_v57, %v30480_v27 }
 0x601   :  { %v19086_v33 = vpop.f32.mrb[57].mxu1  ;;  %31541 = vst [vmem:[#allocation59_spill] sm:$0xff] %v26734_v5  ;;  %v26764_v39 = vld [vmem:[%s30149_s1 + $0x530] sm:$0xff]  ;;  %v26789_v27 = vpack.c.bf16 %v30488_v19, %v30489_v55  ;;  %v26810_v41 = vsub.f32 %v26715_v37, %v30491_v31  ;;  %v26816_v19 = vsub.f32 %v26720_v6, %v30492_v15  ;;  %v26849_v47 = vsub.f32 %v26747_v10, %v30496_v35 }
 0x602   :  { %v19087_v36 = vadd.f32 %v19086_v33, %v19085_v11  ;;  %31543 = vst [vmem:[#allocation63_spill] sm:$0xff] %v26764_v39  ;;  %v30494_v11 = vand.u32 4294901760, %v26729_v23  ;;  %v30495_v33 = vand.u32 4294901760, %v26734_v5  ;;  %v31554_v42 = vand.u32 4294901760, %v26752_v45 }
 0x603   :  { %31545 = vst [vmem:[#allocation35_spill] sm:$0xff] %v26789_v27  ;;  %v31560_v49 = vand.u32 4294901760, %v26769_v26  ;;  %v31587_v52 = vand.u32 4294901760, %v26849_v47 }
 0x604   :  { %v26674_v0 = vadd.f32 %v19087_v36, %v8330_v28  ;;  %v30490_v28 = vand.u32 4294901760, %v26709_v56  ;;  %v26782_v36 = vsub.f32 %v26702_v58, %v30484_v20  ;;  %v26799_v20 = vld [vmem:[%s30149_s1 + $0x5c0] sm:$0xff]  ;;  %v26832_v31 = vsub.f32 %v26729_v23, %v30494_v11 }
 0x605   :  { %31546 = vst [vmem:[#allocation51_spill] sm:$0xff] %v26799_v20  ;;  %v26839_v55 = vsub.f32 %v26734_v5, %v30495_v33  ;;  %v26861_v33 = vld [vmem:[%s30149_s1 + $0x5d8] sm:$0xff]  ;;  %v26867_v35 = vpack.c.bf16 %v31554_v42, %v31553_v2  ;;  %v31556_v11 = vand.u32 4294901760, %v26764_v39  ;;  %v30499_v2 = vand.u32 4294901760, %v26810_v41 }
 0x606   :  { %v26805_v60 = vpack.c.bf16 %v30490_v28, %v30493_v61  ;;  %v26827_v28 = vld [vmem:[%s30149_s1 + $0x540] sm:$0xff]  ;;  %v26856_v61 = vld [vmem:[%s30149_s1 + $0x5d0] sm:$0xff]  ;;  %31552 = vst [vmem:[#allocation33_spill] sm:$0xff] %v26861_v33  ;;  %v31566_v59 = vand.u32 4294901760, %v26799_v20  ;;  %v31569_v30 = vand.u32 4294901760, %v26782_v36 }
 0x607   :  { %31549 = vst [vmem:[#allocation45_spill] sm:$0xff] %v26827_v28  ;;  %31551 = vst [vmem:[#allocation31_spill] sm:$0xff] %v26856_v61  ;;  %v26872_v15 = vsub.f32 %v26764_v39, %v31556_v11  ;;  %v31562_v11 = vand.u32 4294901760, %v26777_v7  ;;  %v31573_v62 = vand.u32 4294901760, %v26827_v28  ;;  %v31586_v51 = vand.u32 4294901760, %v26839_v55 }
 0x608   :  { %31547 = vst [vmem:[#allocation5_spill] sm:$0xff] %v26805_v60  ;;  %31555 = vst [vmem:[#allocation9_spill] sm:$0xff] %v26867_v35  ;;  %v31559_v60 = vand.u32 4294901760, %v26757_v53  ;;  %v26912_v27 = vsub.f32 %v26799_v20, %v31566_v59  ;;  %v26930_v59 = vsub.f32 %v26822_v32, %v31571_v34  ;;  %v31579_v34 = vand.u32 4294901760, %v26844_v14 }
 0x609   :  { %31557 = vst [vmem:[#allocation27_spill] sm:$0xff] %v26872_v15  ;;  %v26891_v35 = vsub.f32 %v26777_v7, %v31562_v11  ;;  %v26907_v11 = vld [vmem:[%s30149_s1 + $0x5e0] sm:$0xff]  ;;  %v26935_v38 = vsub.f32 %v26827_v28, %v31573_v62  ;;  %v31582_v28 = vand.u32 4294901760, %v26856_v61  ;;  %v8826_v32 = vsub.f32 %v26723_v17, %v26792_v25 }
 0x60a   :  { %v26885_v42 = vpack.c.bf16 %v31560_v49, %v31559_v60  ;;  %v26902_v60 = vld [vmem:[%s30149_s1 + $0x558] sm:$0xff]  ;;  %31565 = vst [vmem:[#allocation47_spill] sm:$0xff] %v26907_v11  ;;  %31567 = vst [vmem:[#allocation8_spill] sm:$0xff] %v26912_v27  ;;  %v26919_v49 = vld [vmem:[%s30149_s1 + $0x5e8] sm:$0xff]  ;;  %v26952_v43 = vsub.f32 %v26844_v14, %v31579_v34 }
 0x60b   :  { %31563 = vst [vmem:[#allocation48_spill] sm:$0xff] %v26891_v35  ;;  %31564 = vst [vmem:[#allocation61_spill] sm:$0xff] %v26902_v60  ;;  %v31591_v62 = vand.u32 4294901760, %v26891_v35 }
 0x60c   :  { %31561 = vst [vmem:[#allocation56_spill] sm:$0xff] %v26885_v42  ;;  %31568 = vst [vmem:[#allocation57_spill] sm:$0xff] %v26919_v49  ;;  %v26925_v42 = vpack.c.bf16 %v30499_v2, %v31569_v30  ;;  %v31576_v30 = vand.u32 4294901760, %v26816_v19  ;;  %v31577_v2 = vand.u32 4294901760, %v26832_v31  ;;  %v31600_v10 = vand.u32 4294901760, %v26952_v43 }
 0x60d   :  { %31572 = vst [vmem:[#allocation10_spill] sm:$0xff] %v26930_v59  ;;  %31574 = vst [vmem:[#allocation58_spill] sm:$0xff] %v26935_v38 }
 0x60e   :  { %31570 = vst [vmem:[#allocation34_spill] sm:$0xff] %v26925_v42  ;;  %v26947_v42 = vpack.c.bf16 %v31577_v2, %v31576_v30  ;;  %31580 = vst [vmem:[#allocation41_spill] sm:$0xff] %v26952_v43  ;;  %v26965_v2 = vsub.f32 %v26856_v61, %v31582_v28  ;;  %v31584_v30 = vand.u32 4294901760, %v26861_v33  ;;  %v31589_v28 = vand.u32 4294901760, %v26879_v50 }
 0x610   :  { %31578 = vst [vmem:[#allocation32_spill] sm:$0xff] %v26947_v42  ;;  %31583 = vst [vmem:[#allocation39_spill] sm:$0xff] %v26965_v2  ;;  %v26970_v34 = vsub.f32 %v26861_v33, %v31584_v30  ;;  %v26977_v42 = vpack.c.bf16 %v31587_v52, %v31586_v51  ;;  %v26984_v61 = vsub.f32 %v26879_v50, %v31589_v28  ;;  %v31590_v33 = vand.u32 4294901760, %v26872_v15  ;;  %v27011_v51 = vld [vmem:[%s30149_s1 + $0x5f0] sm:$0xff] }
 0x611   :  { %v30523_v52 = vand.u32 4294901760, %v26912_v27  ;;  %v31593_v28 = vand.u32 4294901760, %v26902_v60  ;;  %v31599_v15 = vand.u32 4294901760, %v26935_v38  ;;  %v31603_v43 = vand.u32 4294901760, %v26965_v2 }
 0x612   :  { %31585 = vst [vmem:[#allocation30_spill] sm:$0xff] %v26970_v34  ;;  %31588 = vst [vmem:[#allocation29_spill] sm:$0xff] %v26977_v42  ;;  %v26991_v20 = vpack.c.bf16 %v31591_v62, %v31590_v33  ;;  %v31594_v33 = vand.u32 4294901760, %v26907_v11  ;;  %v27033_v42 = vld [vmem:[%s30149_s1 + $0x578] sm:$0xff] }
 0x613   :  { %v27000_v30 = vsub.f32 %v26902_v60, %v31593_v28  ;;  %v31595_v28 = vand.u32 4294901760, %v26919_v49  ;;  %v27052_v27 = vpack.c.bf16 %v31600_v10, %v31599_v15  ;;  %v30533_v10 = vand.u32 4294901760, %v27033_v42 }
 0x614   :  { %31592 = vst [vmem:[#allocation50_spill] sm:$0xff] %v26991_v20  ;;  %v27006_v62 = vsub.f32 %v26907_v11, %v31594_v33  ;;  %v31596_v20 = vand.u32 4294901760, %v26930_v59  ;;  %v8827_v15 = vand.u32 4294901760, %v8826_v32 }
 0x615   :  { %v27026_v33 = vsub.f32 %v26919_v49, %v31595_v28  ;;  %v31598_v49 = vand.u32 4294901760, %v26941_v48  ;;  %31601 = vst [vmem:[#allocation53_spill] sm:$0xff] %v27052_v27  ;;  %v30531_v38 = vand.u32 4294901760, %v27000_v30 }
 0x616   :  { %v27039_v11 = vpack.c.bf16 %v31596_v20, %v30523_v52  ;;  %v31602_v52 = vand.u32 4294901760, %v26960_v29 }
 0x617   :  { %v27045_v39 = vsub.f32 %v26941_v48, %v31598_v49 }
 0x618   :  { %v19120_v14 = vpop.f32.mrb[58].mxu0  ;;  %31597 = vst [vmem:[#allocation55_spill] sm:$0xff] %v27039_v11 }
 0x619   :  { %v19121_v7 = vpop.f32.mrb[59].mxu0 }
 0x61a   :  { %v19122_v46 = vadd.f32 %v19121_v7, %v19120_v14  ;;  %v27016_v14 = vld [vmem:[%s30149_s1 + $0x5f8] sm:$0xff]  ;;  %v27021_v7 = vld [vmem:[%s30149_s1 + $0x570] sm:$0xff] }
 0x61b   :  { %v30532_v11 = vand.u32 4294901760, %v27021_v7 }
 0x61c   :  { %v8617_v60 = vadd.f32 %v19122_v46, %v26647_v40  ;;  %v19123_v35 = vpop.f32.mrb[60].mxu0  ;;  %v19158_v28 = vpop.f32.mrb[58].mxu1  ;;  %v27057_v46 = vsub.f32 %v26960_v29, %v31602_v52  ;;  %v31604_v52 = vand.u32 4294901760, %v26970_v34 }
 0x61d   :  { %v19124_v59 = vpop.f32.mrb[61].mxu0  ;;  %v19159_v20 = vpop.f32.mrb[59].mxu1 }
 0x61e   :  { %v19125_v50 = vadd.f32 %v19124_v59, %v19123_v35  ;;  %v19160_v48 = vadd.f32 %v19159_v20, %v19158_v28  ;;  %v27069_v29 = vpack.c.bf16 %v31604_v52, %v31603_v43  ;;  %v30536_v35 = vand.u32 4294901760, %v27026_v33 }
 0x61f   :  { %v31606_v59 = vand.u32 4294901760, %v26984_v61  ;;  %v31608_v20 = vand.u32 4294901760, %v27011_v51  ;;  %v31609_v43 = vand.u32 4294901760, %v27016_v14 }
 0x620   :  { %31605 = vst [vmem:[#allocation37_spill] sm:$0xff] %v27069_v29  ;;  %v8624_v40 = vadd.f32 %v19125_v50, %v26674_v0  ;;  %v8728_v49 = vadd.f32 %v19160_v48, %v8617_v60  ;;  %v19161_v5 = vpop.f32.mrb[60].mxu1  ;;  %v27092_v48 = vsub.f32 %v27021_v7, %v30532_v11  ;;  %v30535_v0 = vand.u32 4294901760, %v27045_v39 }
 0x621   :  { %v27077_v28 = vpack.c.bf16 %v30531_v38, %v31606_v59  ;;  %v19162_v32 = vpop.f32.mrb[61].mxu1  ;;  %v27082_v27 = vsub.f32 %v27011_v51, %v31608_v20  ;;  %v27087_v50 = vsub.f32 %v27016_v14, %v31609_v43  ;;  %v27100_v59 = vsub.f32 %v27033_v42, %v30533_v10 }
 0x622   :  { %v27095_v60 = vand.u32 4294901760, %v8728_v49  ;;  %v19163_v52 = vadd.f32 %v19162_v32, %v19161_v5  ;;  %v30534_v20 = vand.u32 4294901760, %v27057_v46  ;;  %v31610_v43 = vand.u32 4294901760, %v27006_v62 }
 0x623   :  { %31607 = vst [vmem:[#allocation44_spill] sm:$0xff] %v27077_v28  ;;  %v30540_v32 = vand.u32 4294901760, %v27082_v27  ;;  %v30537_v10 = vand.u32 4294901760, %v27087_v50 }
 0x624   :  { %v27107_v38 = vpack.c.bf16 %v30536_v35, %v31610_v43  ;;  %v8835_v11 = vsub.f32 %v8728_v49, %v27095_v60  ;;  %v8735_v28 = vadd.f32 %v19163_v52, %v8624_v40  ;;  %20496 = vmatprep.subr.mxu0 %v27095_v60  ;;  %v27115_v5 = vpack.c.bf16 %v30534_v20, %v30535_v0 }
 0x625   :  { %20497 = vmatpush3.msra.mxu0 %v27095_v60  ;;  %v30539_v40 = vand.u32 4294901760, %v27092_v48  ;;  %v30538_v49 = vand.u32 4294901760, %v27100_v59  ;;  %v27129_v52 = vpack.c.bf16 %v30537_v10, %v30540_v32 }
 0x626   :  { %31611 = vst [vmem:[#allocation43_spill] sm:$0xff] %v27107_v38  ;;  %31612 = vst [vmem:[#allocation49_spill] sm:$0xff] %v27115_v5  ;;  %v27120_v29 = vand.u32 4294901760, %v8735_v28  ;;  %20499 = vmatmul.mubr.f32.vlgmr.msra.gmra.mrb[24].mxu0 %v8827_v15  ;;  %v8836_v43 = vand.u32 4294901760, %v8835_v11 }
 0x627   :  { %20503 = vmatprep.mubr.f32.mxu0 %v26619_v24  ;;  %31613 = vst [vmem:[#allocation36_spill] sm:$0xff] %v27129_v52  ;;  %v27137_v35 = vpack.c.bf16 %v30538_v49, %v30539_v40  ;;  %v31632_v40 = vand.u32 4294901760, %v26832_v31  ;;  %v31663_v52 = vld [vmem:[#allocation41_spill] sm:$0xff] }
 0x628   :  { %v9326_v20 = vsub.f32 %v8735_v28, %v27120_v29  ;;  %20526 = vmatprep.subr.mxu1 %v27120_v29  ;;  %v8837_v0 = vsub.f32 %v8835_v11, %v8836_v43 }
 0x629   :  { %31614 = vst [vmem:[#allocation38_spill] sm:$0xff] %v27137_v35  ;;  %20527 = vmatpush3.msra.mxu1 %v27120_v29 }
 0x62a   :  { %20529 = vmatmul.mubr.f32.vlgmr.msra.gmra.mrb[24].mxu1 %v8827_v15  ;;  %v8838_v5 = vand.u32 4294901760, %v8837_v0  ;;  %v9327_v38 = vand.u32 4294901760, %v9326_v20  ;;  %v31618_v15 = vand.u32 4294901760, %v26640_v13 }
 0x62b   :  { %20533 = vmatprep.mubr.f32.mxu1 %v26619_v24 }
 0x62c   :  { %20501 = vmatprep.subr.mxu0 %v8838_v5  ;;  %v9328_v10 = vsub.f32 %v9326_v20, %v9327_v38 }
 0x62d   :  { %20502 = vmatpush3.msra.mxu0 %v8838_v5 }
 0x62e   :  { %20504 = vmatmul.mubr.f32.vlgmr.msra.gmra.mrb[24].mxu0 %v26676_v21  ;;  %20506 = vmatprep.subr.mxu0 %v8835_v11  ;;  %v9329_v28 = vand.u32 4294901760, %v9328_v10  ;;  %v31616_v10 = vand.u32 4294901760, %v26691_v63 }
 0x62f   :  { %20507 = vmatpush3.msra.mxu0 %v8835_v11  ;;  %20508 = vmatprep.mubr.f32.mxu0 %v26622_v54 }
 0x630   :  { %20511 = vmatprep.subr.mxu0 %v27095_v60  ;;  %20531 = vmatprep.subr.mxu1 %v9329_v28 }
 0x631   :  { %20532 = vmatpush3.msra.mxu1 %v9329_v28  ;;  %v31621_v28 = vand.u32 4294901760, %v26739_v12 }
 0x632   :  { %20534 = vmatmul.mubr.f32.vlgmr.msra.gmra.mrb[24].mxu1 %v26676_v21  ;;  %20536 = vmatprep.subr.mxu1 %v9326_v20 }
 0x633   :  { %20537 = vmatpush3.msra.mxu1 %v9326_v20  ;;  %20538 = vmatprep.mubr.f32.mxu1 %v26622_v54  ;;  %v31615_v54 = vand.u32 4294901760, %v26686_v16 }
 0x634   :  { %20541 = vmatprep.subr.mxu1 %v27120_v29 }
 0x635   :  { %v10005_v11 = vsub.f32 %v26686_v16, %v31615_v54  ;;  %v10019_v54 = vsub.f32 %v26739_v12, %v31621_v28 }
 0x636   :  { %20509 = vmatmul.mubr.f32.vlgmr.msra.gmra.mrb[24].mxu0 %v26723_v17 }
 0x637   :  { %20512 = vmatpush3.msra.mxu0 %v27095_v60  ;;  %20513 = vmatprep.mubr.f32.mxu0 %v26625_v22  ;;  %v10006_v20 = vand.u32 4294901760, %v10005_v11  ;;  %v31622_v11 = vand.u32 4294901760, %v26752_v45 }
 0x638   :  { %20516 = vmatprep.subr.mxu0 %v8836_v43 }
 0x63a   :  { %20539 = vmatmul.mubr.f32.vlgmr.msra.gmra.mrb[24].mxu1 %v26723_v17  ;;  %v10012_v17 = vsub.f32 %v26691_v63, %v31616_v10  ;;  %v31623_v10 = vand.u32 4294901760, %v26645_v9  ;;  %v31627_v9 = vand.u32 4294901760, %v26782_v36 }
 0x63b   :  { %20542 = vmatpush3.msra.mxu1 %v27120_v29  ;;  %20543 = vmatprep.mubr.f32.mxu1 %v26625_v22  ;;  %v31617_v22 = vand.u32 4294901760, %v26635_v1 }
 0x63c   :  { %20546 = vmatprep.subr.mxu1 %v9327_v38  ;;  %v10013_v5 = vand.u32 4294901760, %v10012_v17  ;;  %v31624_v17 = vand.u32 4294901760, %v26652_v44  ;;  %v10033_v44 = vsub.f32 %v26782_v36, %v31627_v9 }
 0x63d   :  { %v27169_v0 = vpack.c.bf16 %v31618_v15, %v31617_v22  ;;  %v31625_v15 = vand.u32 4294901760, %v26757_v53 }
 0x63e   :  { %20514 = vmatmul.mubr.f32.vlgmr.msra.gmra.mrb[24].mxu0 %v26792_v25  ;;  %v21788_v13 = vpack.c.bf16 %v10013_v5, %v10006_v20  ;;  %v27192_v22 = vpack.c.bf16 %v31624_v17, %v31623_v10  ;;  %v31626_v5 = vand.u32 4294901760, %v26769_v26  ;;  %v31629_v17 = vand.u32 4294901760, %v26661_v4 }
 0x63f   :  { %20517 = vmatpush3.msra.mxu0 %v8836_v43  ;;  %20518 = vmatprep.mubr.f32.mxu0 %v26619_v24  ;;  %v31620_v43 = vand.u32 4294901760, %v26709_v56  ;;  %v9907_v20 = vsub.f32 %v26757_v53, %v31625_v15  ;;  %v31630_v15 = vand.u32 4294901760, %v26667_v18  ;;  %v31633_v4 = vand.u32 4294901760, %v26672_v3 }
 0x640   :  { %20521 = vmatprep.subr.mxu0 %v27095_v60  ;;  %v31634_v18 = vand.u32 4294901760, %v26681_v57  ;;  %v31639_v3 = vand.u32 4294901760, %v26839_v55 }
 0x641   :  { %v9900_v1 = vsub.f32 %v26709_v56, %v31620_v43  ;;  %v27212_v49 = vpack.c.bf16 %v31630_v15, %v31629_v17  ;;  %v31636_v17 = vand.u32 4294901760, %v26702_v58  ;;  %v31637_v15 = vand.u32 4294901760, %v26715_v37  ;;  %v31644_v37 = vld [vmem:[#allocation59_spill] sm:$0xff] }
 0x642   :  { %20544 = vmatmul.mubr.f32.vlgmr.msra.gmra.mrb[24].mxu1 %v26792_v25  ;;  %v10047_v57 = vsub.f32 %v26839_v55, %v31639_v3 }
 0x643   :  { %20547 = vmatpush3.msra.mxu1 %v9327_v38  ;;  %20548 = vmatprep.mubr.f32.mxu1 %v26619_v24  ;;  %v31619_v38 = vand.u32 4294901760, %v26696_v8  ;;  %v9901_v28 = vand.u32 4294901760, %v9900_v1  ;;  %v31631_v1 = vand.u32 4294901760, %v26816_v19 }
 0x644   :  { %20551 = vmatprep.subr.mxu1 %v27120_v29 }
 0x645   :  { %v9893_v25 = vsub.f32 %v26696_v8, %v31619_v38  ;;  %v9914_v38 = vsub.f32 %v26769_v26, %v31626_v5  ;;  %v9921_v9 = vsub.f32 %v26816_v19, %v31631_v1 }
 0x646   :  { %20519 = vmatmul.mubr.f32.vlgmr.msra.gmra.mrb[24].mxu0 %v26676_v21 }
 0x647   :  { %20522 = vmatpush3.msra.mxu0 %v27095_v60  ;;  %20523 = vmatprep.mubr.f32.mxu0 %v26619_v24  ;;  %v10026_v60 = vsub.f32 %v26752_v45, %v31622_v11  ;;  %v9894_v43 = vand.u32 4294901760, %v9893_v25  ;;  %v31628_v11 = vand.u32 4294901760, %v26810_v41  ;;  %v9915_v25 = vand.u32 4294901760, %v9914_v38  ;;  %v31635_v38 = vld [vmem:[#allocation17_spill] sm:$0xff] }
 0x648   :  { %21757 = vmatprep.subr.bf16.mxu0 %v27169_v0 }
 0x649   :  { %v10040_v10 = vsub.f32 %v26810_v41, %v31628_v11  ;;  %v10027_v5 = vand.u32 4294901760, %v10026_v60  ;;  %v9928_v11 = vsub.f32 %v26832_v31, %v31632_v40  ;;  %v10034_v60 = vand.u32 4294901760, %v10033_v44 }
 0x64a   :  { %20549 = vmatmul.mubr.f32.vlgmr.msra.gmra.mrb[24].mxu1 %v26676_v21  ;;  %v27234_v40 = vpack.c.bf16 %v31637_v15, %v31636_v17  ;;  %v31642_v44 = vand.u32 4294901760, %v26729_v23  ;;  %v9922_v15 = vand.u32 4294901760, %v9921_v9 }
 0x64b   :  { %20552 = vmatpush3.msra.mxu1 %v27120_v29  ;;  %20553 = vmatprep.mubr.f32.mxu1 %v26619_v24  ;;  %v10020_v29 = vand.u32 4294901760, %v10019_v54  ;;  %v9908_v24 = vand.u32 4294901760, %v9907_v20  ;;  %v21790_v54 = vpack.c.bf16 %v9901_v28, %v9894_v43  ;;  %v10041_v20 = vand.u32 4294901760, %v10040_v10 }
 0x64c   :  { %21789 = vmatprep.subr.bf16.mxu1 %v21788_v13  ;;  %v27226_v13 = vpack.c.bf16 %v31634_v18, %v31633_v4  ;;  %31638 = vst [vmem:[#allocation42_spill] sm:$0xff] %v27234_v40  ;;  %v31640_v4 = vand.u32 4294901760, %v26849_v47  ;;  %v31641_v28 = vand.u32 4294901760, %v26720_v6  ;;  %v31645_v18 = vand.u32 4294901760, %v31644_v37  ;;  %v31648_v6 = vld [vmem:[#allocation27_spill] sm:$0xff]  ;;  %v31652_v37 = vld [vmem:[#allocation8_spill] sm:$0xff] }
 0x64d   :  { %v21792_v1 = vpack.c.bf16 %v10027_v5, %v10020_v29  ;;  %v21794_v58 = vpack.c.bf16 %v9915_v25, %v9908_v24  ;;  %v31646_v29 = vld [vmem:[#allocation60_spill] sm:$0xff]  ;;  %v9929_v3 = vand.u32 4294901760, %v9928_v11  ;;  %v31649_v32 = vand.u32 4294901760, %v31648_v6 }
 0x64e   :  { %20524 = vmatmul.mubr.f32.vlgmr.msra.gmra.mrb[24].mxu0 %v26676_v21  ;;  %v10054_v43 = vsub.f32 %v26849_v47, %v31640_v4  ;;  %v27246_v10 = vpack.c.bf16 %v31642_v44, %v31641_v28  ;;  %v31647_v5 = vand.u32 4294901760, %v31646_v29  ;;  %v21796_v4 = vpack.c.bf16 %v10041_v20, %v10034_v60  ;;  %v31650_v28 = vld [vmem:[#allocation48_spill] sm:$0xff]  ;;  %v31656_v20 = vld [vmem:[#allocation11_spill] sm:$0xff] }
 0x64f   :  { %21759 = vmatpush3.bf16.msra.mxu0 %v27192_v22  ;;  %9863 = vmatprep.mubr.f32.mxu0 %v31635_v38  ;;  %v9935_v23 = vsub.f32 %v31648_v6, %v31649_v32  ;;  %v31651_v44 = vand.u32 4294901760, %v31650_v28  ;;  %v10048_v24 = vand.u32 4294901760, %v10047_v57  ;;  %v31653_v9 = vand.u32 4294901760, %v31652_v37  ;;  %v31657_v32 = vld [vmem:[#allocation63_spill] sm:$0xff] }
 0x650   :  { %21761 = vmatprep.subr.bf16.mxu0 %v27212_v49  ;;  %31643 = vst [vmem:[#allocation46_spill] sm:$0xff] %v27246_v10  ;;  %v27253_v17 = vpack.c.bf16 %v31647_v5, %v31645_v18  ;;  %v10055_v25 = vand.u32 4294901760, %v10054_v43  ;;  %v31654_v18 = vld [vmem:[#allocation10_spill] sm:$0xff]  ;;  %v31658_v29 = vand.u32 4294901760, %v31657_v32  ;;  %v31659_v5 = vld [vmem:[#allocation64_spill] sm:$0xff]  ;;  %v21798_v35 = vpack.c.bf16 %v9929_v3, %v9922_v15  ;;  %v31667_v3 = vld [vmem:[#allocation51_spill] sm:$0xff] }
 0x651   :  { %v10061_v11 = vsub.f32 %v31652_v37, %v31653_v9  ;;  %v31660_v38 = vand.u32 4294901760, %v31659_v5  ;;  %v31665_v32 = vand.u32 4294901760, %v26965_v2 }
 0x652   :  { %20554 = vmatmul.mubr.f32.vlgmr.msra.gmra.mrb[24].mxu1 %v26676_v21  ;;  %v9942_v21 = vsub.f32 %v31650_v28, %v31651_v44 }
 0x653   :  { %21763 = vmatpush3.bf16.msra.mxu0 %v27226_v13  ;;  %21791 = vmatpush3.bf16.msra.mxu1 %v21790_v54  ;;  %v31655_v54 = vand.u32 4294901760, %v31654_v18  ;;  %v27274_v44 = vpack.c.bf16 %v31660_v38, %v31658_v29  ;;  %v10075_v5 = vsub.f32 %v26965_v2, %v31665_v32  ;;  %v31666_v38 = vand.u32 4294901760, %v26970_v34 }
 0x654   :  { %21765 = vmatprep.subr.bf16.mxu0 %v27234_v40  ;;  %21793 = vmatprep.subr.bf16.mxu1 %v21792_v1  ;;  %v31661_v1 = vld [vmem:[#allocation58_spill] sm:$0xff]  ;;  %v31664_v40 = vand.u32 4294901760, %v31663_v52  ;;  %v31668_v29 = vand.u32 4294901760, %v31667_v3  ;;  %v31676_v3 = vand.u32 4294901760, %v27000_v30 }
 0x655   :  { %v10068_v60 = vsub.f32 %v31654_v18, %v31655_v54  ;;  %10114 = vmatprep.mubr.f32.mxu1 %v31656_v20  ;;  %v31662_v57 = vand.u32 4294901760, %v31661_v1  ;;  %v9936_v54 = vand.u32 4294901760, %v9935_v23  ;;  %v9943_v20 = vand.u32 4294901760, %v9942_v21  ;;  %v31673_v18 = vld [vmem:[#allocation6_spill] sm:$0xff] }
 0x656   :  { %v9956_v9 = vsub.f32 %v31663_v52, %v31664_v40  ;;  %v10082_v15 = vsub.f32 %v26970_v34, %v31666_v38  ;;  %v10062_v23 = vand.u32 4294901760, %v10061_v11  ;;  %v31674_v32 = vand.u32 4294901760, %v31673_v18 }
 0x657   :  { %v9949_v43 = vsub.f32 %v31661_v1, %v31662_v57  ;;  %21767 = vmatpush3.bf16.msra.mxu0 %v27246_v10  ;;  %21795 = vmatpush3.bf16.msra.mxu1 %v21794_v58  ;;  %v31669_v57 = vld [vmem:[#allocation28_spill] sm:$0xff]  ;;  %v21800_v58 = vpack.c.bf16 %v10055_v25, %v10048_v24  ;;  %v10069_v21 = vand.u32 4294901760, %v10068_v60  ;;  %v31671_v1 = vld [vmem:[#allocation45_spill] sm:$0xff]  ;;  %v31675_v34 = vand.u32 4294901760, %v26984_v61  ;;  %v31677_v25 = vld [vmem:[#allocation31_spill] sm:$0xff] }
 0x658   :  { %21769 = vmatprep.subr.bf16.mxu0 %v27253_v17  ;;  %21797 = vmatprep.subr.bf16.mxu1 %v21796_v4  ;;  %v31670_v40 = vand.u32 4294901760, %v31669_v57  ;;  %v31672_v10 = vand.u32 4294901760, %v31671_v1  ;;  %v9957_v38 = vand.u32 4294901760, %v9956_v9  ;;  %v21802_v24 = vpack.c.bf16 %v9943_v20, %v9936_v54  ;;  %v31679_v60 = vld [vmem:[#allocation33_spill] sm:$0xff]  ;;  %v31683_v20 = vld [vmem:[#allocation40_spill] sm:$0xff] }
 0x659   :  { %v9950_v37 = vand.u32 4294901760, %v9949_v43  ;;  %v9963_v4 = vsub.f32 %v26984_v61, %v31675_v34  ;;  %v31678_v11 = vand.u32 4294901760, %v31677_v25  ;;  %v31680_v18 = vand.u32 4294901760, %v31679_v60  ;;  %v31689_v60 = vld [vmem:[#allocation57_spill] sm:$0xff] }
 0x65a   :  { %v27294_v52 = vpack.c.bf16 %v31670_v40, %v31668_v29  ;;  %v27300_v2 = vpack.c.bf16 %v31674_v32, %v31672_v10  ;;  %v9970_v29 = vsub.f32 %v27000_v30, %v31676_v3  ;;  %v10076_v1 = vand.u32 4294901760, %v10075_v5  ;;  %v31685_v32 = vld [vmem:[#allocation61_spill] sm:$0xff] }
 0x65b   :  { %21771 = vmatpush3.bf16.msra.mxu0 %v27274_v44  ;;  %21799 = vmatpush3.bf16.msra.mxu1 %v21798_v35  ;;  %v27313_v10 = vpack.c.bf16 %v31680_v18, %v31678_v11  ;;  %v10083_v43 = vand.u32 4294901760, %v10082_v15  ;;  %v21804_v34 = vpack.c.bf16 %v10069_v21, %v10062_v23  ;;  %v31681_v9 = vand.u32 4294901760, %v27006_v62  ;;  %v31687_v15 = vld [vmem:[#allocation47_spill] sm:$0xff] }
 0x65c   :  { %21773 = vmatprep.subr.bf16.mxu0 %v27294_v52  ;;  %21801 = vmatprep.subr.bf16.mxu1 %v21800_v58  ;;  %v31682_v40 = vand.u32 4294901760, %v27026_v33  ;;  %v31684_v54 = vand.u32 4294901760, %v31683_v20  ;;  %v31686_v3 = vand.u32 4294901760, %v31685_v32  ;;  %v21806_v5 = vpack.c.bf16 %v9957_v38, %v9950_v37 }
 0x65d   :  { %v10089_v57 = vsub.f32 %v27006_v62, %v31681_v9  ;;  %v31688_v11 = vand.u32 4294901760, %v31687_v15  ;;  %v31690_v58 = vand.u32 4294901760, %v31689_v60  ;;  %v9964_v21 = vand.u32 4294901760, %v9963_v4  ;;  %v31697_v15 = vld [vmem:[#allocation7_spill] sm:$0xff] }
 0x65e   :  { %v10096_v35 = vsub.f32 %v27026_v33, %v31682_v40  ;;  %v27326_v25 = vpack.c.bf16 %v31686_v3, %v31684_v54  ;;  %v9971_v18 = vand.u32 4294901760, %v9970_v29  ;;  %v21808_v9 = vpack.c.bf16 %v10083_v43, %v10076_v1  ;;  %v31695_v43 = vld [vmem:[#allocation62_spill] sm:$0xff] }
 0x65f   :  { %v27332_v23 = vpack.c.bf16 %v31690_v58, %v31688_v11  ;;  %21775 = vmatpush3.bf16.msra.mxu0 %v27300_v2  ;;  %21803 = vmatpush3.bf16.msra.mxu1 %v21802_v24  ;;  %v31691_v40 = vand.u32 4294901760, %v27045_v39  ;;  %v31692_v54 = vand.u32 4294901760, %v27057_v46  ;;  %v10090_v38 = vand.u32 4294901760, %v10089_v57 }
 0x660   :  { %21777 = vmatprep.subr.bf16.mxu0 %v27313_v10  ;;  %21805 = vmatprep.subr.bf16.mxu1 %v21804_v34  ;;  %v10097_v32 = vand.u32 4294901760, %v10096_v35  ;;  %v31693_v4 = vand.u32 4294901760, %v27082_v27  ;;  %v31694_v24 = vand.u32 4294901760, %v27087_v50  ;;  %v31696_v3 = vand.u32 4294901760, %v31695_v43 }
 0x661   :  { %v9977_v20 = vsub.f32 %v27045_v39, %v31691_v40  ;;  %v9984_v37 = vsub.f32 %v27057_v46, %v31692_v54  ;;  %v31698_v11 = vand.u32 4294901760, %v31697_v15  ;;  %v21810_v58 = vpack.c.bf16 %v9971_v18, %v9964_v21 }
 0x662   :  { %v10103_v29 = vsub.f32 %v27082_v27, %v31693_v4  ;;  %v10110_v1 = vsub.f32 %v27087_v50, %v31694_v24  ;;  %v31699_v35 = vand.u32 4294901760, %v27092_v48  ;;  %v31700_v54 = vand.u32 4294901760, %v27100_v59 }
 0x663   :  { %v27352_v60 = vpack.c.bf16 %v31698_v11, %v31696_v3  ;;  %21779 = vmatpush3.bf16.msra.mxu0 %v27326_v25  ;;  %21807 = vmatpush3.bf16.msra.mxu1 %v21806_v5  ;;  %v9978_v34 = vand.u32 4294901760, %v9977_v20  ;;  %v9985_v57 = vand.u32 4294901760, %v9984_v37  ;;  %v31701_v24 = vand.u32 4294901760, %v27011_v51 }
 0x664   :  { %v9991_v40 = vsub.f32 %v27092_v48, %v31699_v35  ;;  %v9998_v4 = vsub.f32 %v27100_v59, %v31700_v54  ;;  %21781 = vmatprep.subr.bf16.mxu0 %v27332_v23  ;;  %21809 = vmatprep.subr.bf16.mxu1 %v21808_v9  ;;  %v31702_v21 = vand.u32 4294901760, %v27016_v14  ;;  %v21812_v5 = vpack.c.bf16 %v10097_v32, %v10090_v38  ;;  %v31705_v32 = vld [vmem:[#allocation18_spill] sm:$0xff]  ;;  %v31719_v54 = vld [vmem:[#allocation39_spill] sm:$0xff] }
 0x665   :  { %v10104_v20 = vand.u32 4294901760, %v10103_v29  ;;  %v10111_v37 = vand.u32 4294901760, %v10110_v1  ;;  %v31703_v43 = vand.u32 4294901760, %v27021_v7  ;;  %v31704_v3 = vand.u32 4294901760, %v27033_v42  ;;  %v31714_v1 = vld [vmem:[#allocation10_spill] sm:$0xff] }
 0x666   :  { %v27366_v18 = vpack.c.bf16 %v31702_v21, %v31701_v24  ;;  %v21814_v11 = vpack.c.bf16 %v9985_v57, %v9978_v34  ;;  %v9992_v9 = vand.u32 4294901760, %v9991_v40  ;;  %v9999_v35 = vand.u32 4294901760, %v9998_v4  ;;  %v31715_v34 = vld [vmem:[#allocation15_spill] sm:$0xff]  ;;  %v31718_v57 = vld [vmem:[#allocation41_spill] sm:$0xff]  ;;  %v31720_v4 = vld [vmem:[#allocation30_spill] sm:$0xff] }
 0x667   :  { %21783 = vmatpush3.bf16.msra.mxu0 %v27352_v60  ;;  %21811 = vmatpush3.bf16.msra.mxu1 %v21810_v58  ;;  %v27373_v15 = vpack.c.bf16 %v31704_v3, %v31703_v43  ;;  %v21816_v51 = vpack.c.bf16 %v10111_v37, %v10104_v20  ;;  %v21820_v14 = vpack.c.bf16 %v26691_v63, %v26686_v16  ;;  %v31706_v63 = vld [vmem:[#allocation25_spill] sm:$0xff]  ;;  %v31730_v20 = vld [vmem:[#allocation34_spill] sm:$0xff]  ;;  %v31731_v37 = vld [vmem:[#allocation11_spill] sm:$0xff] }
 0x668   :  { %21785 = vmatprep.subr.bf16.mxu0 %v27366_v18  ;;  %21813 = vmatprep.subr.bf16.mxu1 %v21812_v5  ;;  %v21818_v38 = vpack.c.bf16 %v9999_v35, %v9992_v9  ;;  %v21822_v7 = vpack.c.bf16 %v26709_v56, %v26696_v8  ;;  %v21824_v42 = vpack.c.bf16 %v26752_v45, %v26739_v12  ;;  %v31707_v8 = vld [vmem:[#allocation12_spill] sm:$0xff]  ;;  %v31708_v56 = vld [vmem:[#allocation26_spill] sm:$0xff]  ;;  %v31738_v9 = vld [vmem:[#allocation37_spill] sm:$0xff] }
 0x669   :  { %v21826_v29 = vpack.c.bf16 %v26769_v26, %v26757_v53  ;;  %v21828_v16 = vpack.c.bf16 %v26810_v41, %v26782_v36  ;;  %v21830_v12 = vpack.c.bf16 %v26832_v31, %v26816_v19  ;;  %v21832_v45 = vpack.c.bf16 %v26849_v47, %v26839_v55  ;;  %v31709_v53 = vld [vmem:[#allocation19_spill] sm:$0xff]  ;;  %v31710_v41 = vld [vmem:[#allocation13_spill] sm:$0xff]  ;;  %v31712_v19 = vld [vmem:[#allocation42_spill] sm:$0xff] }
 0x66a   :  { %v31711_v26 = vld [vmem:[#allocation21_spill] sm:$0xff]  ;;  %v21834_v36 = vpack.c.bf16 %v31650_v28, %v31648_v6  ;;  %v31713_v31 = vld [vmem:[#allocation8_spill] sm:$0xff]  ;;  %v31716_v47 = vld [vmem:[#allocation46_spill] sm:$0xff]  ;;  %v21840_v6 = vpack.c.bf16 %v31720_v4, %v31719_v54  ;;  %v21842_v28 = vpack.c.bf16 %v27000_v30, %v26984_v61  ;;  %v21844_v24 = vpack.c.bf16 %v27026_v33, %v27006_v62 }
 0x66b   :  { %21787 = vmatpush3.bf16.msra.mxu0 %v27373_v15  ;;  %21815 = vmatpush3.bf16.msra.mxu1 %v21814_v11  ;;  %v21836_v58 = vpack.c.bf16 %v31714_v1, %v31713_v31  ;;  %v31717_v55 = vld [vmem:[#allocation58_spill] sm:$0xff]  ;;  %v21846_v21 = vpack.c.bf16 %v27057_v46, %v27045_v39  ;;  %v21848_v5 = vpack.c.bf16 %v27087_v50, %v27082_v27  ;;  %v31721_v39 = vld [vmem:[#allocation35_spill] sm:$0xff]  ;;  %v31723_v27 = vld [vmem:[#allocation5_spill] sm:$0xff] }
 0x66c   :  { %21817 = vmatprep.subr.bf16.mxu1 %v21816_v51  ;;  %21821 = vmatprep.subr.bf16.mxu0 %v21820_v14  ;;  %v21838_v40 = vpack.c.bf16 %v31718_v57, %v31717_v55  ;;  %v21850_v61 = vpack.c.bf16 %v27100_v59, %v27092_v48  ;;  %v31722_v30 = vld [vmem:[#allocation14_spill] sm:$0xff]  ;;  %v31724_v62 = vld [vmem:[#allocation20_spill] sm:$0xff]  ;;  %v31725_v33 = vld [vmem:[#allocation9_spill] sm:$0xff] }
 0x66d   :  { %v31726_v46 = vld [vmem:[#allocation23_spill] sm:$0xff]  ;;  %v31727_v50 = vld [vmem:[#allocation16_spill] sm:$0xff]  ;;  %v31729_v59 = vld [vmem:[#allocation22_spill] sm:$0xff] }
 0x66e   :  { %9869 = vmatmul.mubr.f32.vlgmr.msra.gmra.mrb[62].mxu0 %v31705_v32  ;;  %v31728_v48 = vld [vmem:[#allocation56_spill] sm:$0xff]  ;;  %v31736_v11 = vld [vmem:[#allocation55_spill] sm:$0xff]  ;;  %v31741_v51 = vld [vmem:[#allocation49_spill] sm:$0xff] }
 0x66f   :  { %21819 = vmatpush3.bf16.msra.mxu1 %v21818_v38  ;;  %21823 = vmatpush3.bf16.msra.mxu0 %v21822_v7  ;;  %v31732_v43 = vld [vmem:[#allocation24_spill] sm:$0xff]  ;;  %v31740_v35 = vld [vmem:[#allocation43_spill] sm:$0xff]  ;;  %v27824_v32 = vld [vmem:[%s30149_s1 + $0x668] sm:$0xff] }
 0x670   :  { %21825 = vmatprep.subr.bf16.mxu0 %v21824_v42  ;;  %21853 = vmatprep.subr.bf16.mxu1 %v27169_v0  ;;  %v31733_v3 = vld [vmem:[#allocation32_spill] sm:$0xff]  ;;  %31784 = vst [vmem:[#allocation30_spill] sm:$0xff] %v27824_v32 }
 0x671   :  { %9878 = vmatprep.mubr.f32.mxu0 %v31706_v63 }
 0x672   :  { %10116 = vmatmul.mubr.f32.vlgmr.msra.gmra.mrb[62].mxu1 %v31707_v8  ;;  %9884 = vmatmul.mubr.f32.gmra.mrb[64].mxu0 %v31708_v56  ;;  %v27805_v56 = vld [vmem:[%s30149_s1 + $0x660] sm:$0xff] }
 0x673   :  { %21827 = vmatpush3.bf16.msra.mxu0 %v21826_v29  ;;  %21855 = vmatpush3.bf16.msra.mxu1 %v27192_v22  ;;  %31778 = vst [vmem:[#allocation58_spill] sm:$0xff] %v27805_v56 }
 0x674   :  { %21829 = vmatprep.subr.bf16.mxu0 %v21828_v16  ;;  %21857 = vmatprep.subr.bf16.mxu1 %v27212_v49 }
 0x675   :  { %10121 = vmatprep.mubr.f32.mxu1 %v31709_v53  ;;  %10258 = vmatprep.mubr.f32.mxu0 %v31710_v41 }
 0x676   :  { %10123 = vmatmul.mubr.f32.gmra.mrb[64].mxu1 %v31711_v26 }
 0x677   :  { %21831 = vmatpush3.bf16.msra.mxu0 %v21830_v12  ;;  %21859 = vmatpush3.bf16.msra.mxu1 %v27226_v13 }
 0x678   :  { %21833 = vmatprep.subr.bf16.mxu0 %v21832_v45  ;;  %21861 = vmatprep.subr.bf16.mxu1 %v31712_v19 }
 0x679   :  { %10374 = vmatprep.mubr.f32.mxu1 %v31715_v34 }
 0x67b   :  { %21835 = vmatpush3.bf16.msra.mxu0 %v21834_v36  ;;  %21863 = vmatpush3.bf16.msra.mxu1 %v31716_v47 }
 0x67c   :  { %21837 = vmatprep.subr.bf16.mxu0 %v21836_v58  ;;  %21865 = vmatprep.subr.bf16.mxu1 %v27253_v17 }
 0x67f   :  { %21839 = vmatpush3.bf16.msra.mxu0 %v21838_v40  ;;  %21867 = vmatpush3.bf16.msra.mxu1 %v27274_v44 }
 0x680   :  { %21841 = vmatprep.subr.bf16.mxu0 %v21840_v6  ;;  %21869 = vmatprep.subr.bf16.mxu1 %v27294_v52 }
 0x683   :  { %21843 = vmatpush3.bf16.msra.mxu0 %v21842_v28  ;;  %21871 = vmatpush3.bf16.msra.mxu1 %v27300_v2 }
 0x684   :  { %21845 = vmatprep.subr.bf16.mxu0 %v21844_v24  ;;  %21873 = vmatprep.subr.bf16.mxu1 %v27313_v10  ;;  %v17777_v24 = vld [vmem:[%s30150_s2 + $0x58] sm:$0xff] }
 0x687   :  { %21847 = vmatpush3.bf16.msra.mxu0 %v21846_v21  ;;  %21875 = vmatpush3.bf16.msra.mxu1 %v27326_v25 }
 0x688   :  { %21849 = vmatprep.subr.bf16.mxu0 %v21848_v5  ;;  %21877 = vmatprep.subr.bf16.mxu1 %v27332_v23 }
 0x68b   :  { %21851 = vmatpush3.bf16.msra.mxu0 %v21850_v61  ;;  %21879 = vmatpush3.bf16.msra.mxu1 %v27352_v60  ;;  %v27499_v61 = vld [vmem:[%s30149_s1 + $0x680] sm:$0xff] }
 0x68c   :  { %21881 = vmatprep.subr.bf16.mxu1 %v27366_v18  ;;  %21885 = vmatprep.subr.bf16.mxu0 %v31721_v39  ;;  %v27504_v39 = vld [vmem:[%s30149_s1 + $0x688] sm:$0xff] }
 0x68e   :  { %10261 = vmatmul.mubr.f32.vlgmr.msra.gmra.mrb[66].mxu0 %v31722_v30 }
 0x68f   :  { %21883 = vmatpush3.bf16.msra.mxu1 %v27373_v15  ;;  %21887 = vmatpush3.bf16.msra.mxu0 %v31723_v27  ;;  %v27509_v27 = vld [vmem:[%s30149_s1 + $0x600] sm:$0xff] }
 0x690   :  { %10267 = vmatprep.mubr.f32.mxu0 %v31724_v62  ;;  %21889 = vmatprep.subr.bf16.mxu0 %v31725_v33  ;;  %v27743_v62 = vld [vmem:[%s30149_s1 + $0x650] sm:$0xff] }
 0x691   :  { %21917 = vmatprep.subr.bf16.mxu1 %v27169_v0  ;;  %v31734_v0 = vld [vmem:[#allocation29_spill] sm:$0xff]  ;;  %31761 = vst [vmem:[#allocation40_spill] sm:$0xff] %v27743_v62 }
 0x692   :  { %10270 = vmatmul.mubr.f32.gmra.mrb[68].mxu0 %v31726_v46  ;;  %10378 = vmatmul.mubr.f32.vlgmr.msra.gmra.mrb[66].mxu1 %v31727_v50 }
 0x693   :  { %21891 = vmatpush3.bf16.msra.mxu0 %v31728_v48  ;;  %21919 = vmatpush3.bf16.msra.mxu1 %v27192_v22  ;;  %v31735_v22 = vld [vmem:[#allocation50_spill] sm:$0xff] }
 0x694   :  { %10385 = vmatprep.mubr.f32.mxu1 %v31729_v59  ;;  %21893 = vmatprep.subr.bf16.mxu0 %v31730_v20 }
 0x695   :  { %21921 = vmatprep.subr.bf16.mxu1 %v27212_v49  ;;  %10555 = vmatprep.mubr.f32.mxu0 %v31731_v37  ;;  %v31737_v49 = vld [vmem:[#allocation53_spill] sm:$0xff] }
 0x696   :  { %10389 = vmatmul.mubr.f32.gmra.mrb[68].mxu1 %v31732_v43 }
 0x697   :  { %21895 = vmatpush3.bf16.msra.mxu0 %v31733_v3  ;;  %21923 = vmatpush3.bf16.msra.mxu1 %v27226_v13  ;;  %v31739_v13 = vld [vmem:[#allocation44_spill] sm:$0xff]  ;;  %v27516_v3 = vld [vmem:[%s30149_s1 + $0x608] sm:$0xff] }
 0x698   :  { %21897 = vmatprep.subr.bf16.mxu0 %v31734_v0  ;;  %21925 = vmatprep.subr.bf16.mxu1 %v31712_v19 }
 0x699   :  { %10666 = vmatprep.mubr.f32.mxu1 %v31731_v37 }
 0x69b   :  { %21899 = vmatpush3.bf16.msra.mxu0 %v31735_v22  ;;  %21927 = vmatpush3.bf16.msra.mxu1 %v31716_v47  ;;  %v10687_v22 = vsel %vm1934_vm0, %v17777_v24, 0 }
 0x69c   :  { %21901 = vmatprep.subr.bf16.mxu0 %v31736_v11  ;;  %21929 = vmatprep.subr.bf16.mxu1 %v27253_v17  ;;  %v31742_v17 = vld [vmem:[#allocation36_spill] sm:$0xff]  ;;  %v30559_v11 = vand.u32 4294901760, %v27499_v61 }
 0x69f   :  { %21903 = vmatpush3.bf16.msra.mxu0 %v31737_v49  ;;  %21931 = vmatpush3.bf16.msra.mxu1 %v27274_v44  ;;  %v31743_v44 = vld [vmem:[#allocation38_spill] sm:$0xff]  ;;  %v30558_v49 = vand.u32 4294901760, %v27504_v39 }
 0x6a0   :  { %21905 = vmatprep.subr.bf16.mxu0 %v31738_v9  ;;  %21933 = vmatprep.subr.bf16.mxu1 %v27294_v52  ;;  %v30557_v9 = vand.u32 4294901760, %v27509_v27 }
 0x6a3   :  { %21907 = vmatpush3.bf16.msra.mxu0 %v31739_v13  ;;  %21935 = vmatpush3.bf16.msra.mxu1 %v27300_v2  ;;  %v17776_v2 = vld [vmem:[%s30150_s2 + $0x50] sm:$0xff] }
 0x6a4   :  { %21909 = vmatprep.subr.bf16.mxu0 %v31740_v35  ;;  %21937 = vmatprep.subr.bf16.mxu1 %v27313_v10  ;;  %v10684_v52 = vsel %vm1934_vm0, %v17776_v2, 0  ;;  %v27525_v35 = vld [vmem:[%s30149_s1 + $0x690] sm:$0xff] }
 0x6a5   :  { %v27483_v10 = vand.u32 4294901760, %v10684_v52 }
 0x6a7   :  { %21911 = vmatpush3.bf16.msra.mxu0 %v31741_v51  ;;  %21939 = vmatpush3.bf16.msra.mxu1 %v27326_v25  ;;  %v27486_v25 = vsub.f32 %v10684_v52, %v27483_v10  ;;  %v30555_v51 = vand.u32 4294901760, %v27516_v3  ;;  %v27540_v52 = vand.u32 4294901760, %v10687_v22 }
 0x6a8   :  { %21913 = vmatprep.subr.bf16.mxu0 %v31742_v17  ;;  %21941 = vmatprep.subr.bf16.mxu1 %v27332_v23  ;;  %v27531_v17 = vld [vmem:[%s30149_s1 + $0x698] sm:$0xff] }
 0x6a9   :  { %v27489_v23 = vand.u32 4294901760, %v27486_v25 }
 0x6ab   :  { %21915 = vmatpush3.bf16.msra.mxu0 %v31743_v44  ;;  %21943 = vmatpush3.bf16.msra.mxu1 %v27352_v60  ;;  %v10758_v60 = vsub.f32 %v27486_v25, %v27489_v23  ;;  %v27536_v44 = vld [vmem:[%s30149_s1 + $0x610] sm:$0xff] }
 0x6ac   :  { %21945 = vmatprep.subr.bf16.mxu1 %v27366_v18 }
 0x6ad   :  { %v10759_v18 = vand.u32 4294901760, %v10758_v60  ;;  %v27545_v60 = vld [vmem:[%s30149_s1 + $0x618] sm:$0xff] }
 0x6ae   :  { %10557 = vmatmul.mubr.f32.vlgmr.msra.gmra.mrb[70].mxu0 %v31707_v8 }
 0x6af   :  { %21947 = vmatpush3.bf16.msra.mxu1 %v27373_v15  ;;  %10562 = vmatprep.mubr.f32.mxu0 %v31709_v53 }
 0x6b2   :  { %10564 = vmatmul.mubr.f32.gmra.mrb[72].mxu0 %v31711_v26  ;;  %10668 = vmatmul.mubr.f32.vlgmr.msra.gmra.mrb[70].mxu1 %v31707_v8 }
 0x6b3   :  { %10673 = vmatprep.mubr.f32.mxu1 %v31709_v53  ;;  %20558 = vmatprep.mubr.f32.mxu0 %v10759_v18 }
 0x6b6   :  { %10675 = vmatmul.mubr.f32.gmra.mrb[72].mxu1 %v31711_v26 }
 0x6b7   :  { %20588 = vmatprep.mubr.f32.mxu1 %v10759_v18  ;;  %v27550_v18 = vsub.f32 %v27499_v61, %v30559_v11  ;;  %v27708_v11 = vld [vmem:[%s30149_s1 + $0x648] sm:$0xff] }
 0x6b8   :  { %31753 = vst [vmem:[#allocation28_spill] sm:$0xff] %v27708_v11 }
 0x741   :  { %v19232_v15 = vpop.f32.mrb[62].mxu0 }
 0x742   :  { %v19233_v14 = vpop.f32.mrb[63].mxu0 }
 0x743   :  { %v19234_v38 = vadd.f32 %v19233_v14, %v19232_v15  ;;  %v27555_v15 = vsub.f32 %v27504_v39, %v30558_v49  ;;  %v27560_v14 = vsub.f32 %v27509_v27, %v30557_v9 }
 0x745   :  { %v19270_v7 = vpop.f32.mrb[62].mxu1  ;;  %v19235_v42 = vpop.f32.mrb[64].mxu0 }
 0x746   :  { %v19271_v29 = vpop.f32.mrb[63].mxu1  ;;  %v19236_v16 = vpop.f32.mrb[65].mxu0 }
 0x747   :  { %v19272_v12 = vadd.f32 %v19271_v29, %v19270_v7  ;;  %v19237_v45 = vadd.f32 %v19236_v16, %v19235_v42  ;;  %v27566_v7 = vld [vmem:[%s30149_s1 + $0x6a0] sm:$0xff]  ;;  %v30553_v42 = vand.u32 4294901760, %v27531_v17  ;;  %v30551_v29 = vand.u32 4294901760, %v27536_v44 }
 0x748   :  { %v27573_v16 = vsub.f32 %v27516_v3, %v30555_v51  ;;  %v27686_v51 = vld [vmem:[%s30149_s1 + $0x6c8] sm:$0xff] }
 0x749   :  { %v10118_v36 = vadd.f32 %v19272_v12, %v19234_v38  ;;  %v19273_v19 = vpop.f32.mrb[64].mxu1  ;;  %v30554_v38 = vand.u32 4294901760, %v27525_v35  ;;  %v30552_v12 = vand.u32 4294901760, %v27545_v60  ;;  %31751 = vst [vmem:[#allocation64_spill] sm:$0xff] %v27686_v51  ;;  %v31774_v41 = vand.u32 4294901760, %v27686_v51 }
 0x74a   :  { %v19274_v31 = vpop.f32.mrb[65].mxu1 }
 0x74b   :  { %v19275_v1 = vadd.f32 %v19274_v31, %v19273_v19  ;;  %v27587_v19 = vsub.f32 %v10687_v22, %v27540_v52  ;;  %v30556_v31 = vand.u32 4294901760, %v27566_v7  ;;  %v27641_v22 = vld [vmem:[%s30149_s1 + $0x638] sm:$0xff] }
 0x74c   :  { %31747 = vst [vmem:[#allocation60_spill] sm:$0xff] %v27641_v22 }
 0x74d   :  { %v10125_v58 = vadd.f32 %v19275_v1, %v19237_v45  ;;  %v27579_v45 = vld [vmem:[%s30149_s1 + $0x6a8] sm:$0xff] }
 0x74e   :  { %v27593_v1 = vld [vmem:[%s30149_s1 + $0x628] sm:$0xff] }
 0x761   :  { %v19308_v47 = vpop.f32.mrb[66].mxu0 }
 0x762   :  { %v19309_v55 = vpop.f32.mrb[67].mxu0 }
 0x763   :  { %v19310_v57 = vadd.f32 %v19309_v55, %v19308_v47  ;;  %v27603_v47 = vsub.f32 %v27525_v35, %v30554_v38  ;;  %v30561_v55 = vand.u32 4294901760, %v27550_v18 }
 0x765   :  { %v10263_v40 = vadd.f32 %v19310_v57, %v10118_v36  ;;  %v19311_v54 = vpop.f32.mrb[68].mxu0  ;;  %v19346_v4 = vpop.f32.mrb[66].mxu1  ;;  %v27584_v36 = vld [vmem:[%s30149_s1 + $0x620] sm:$0xff]  ;;  %v30560_v57 = vand.u32 4294901760, %v27555_v15  ;;  %v31756_v43 = vand.u32 4294901760, %v27603_v47 }
 0x766   :  { %v19312_v6 = vpop.f32.mrb[69].mxu0  ;;  %v19347_v28 = vpop.f32.mrb[67].mxu1  ;;  %v30564_v24 = vand.u32 4294901760, %v27584_v36 }
 0x767   :  { %v19313_v21 = vadd.f32 %v19312_v6, %v19311_v54  ;;  %v19348_v5 = vadd.f32 %v19347_v28, %v19346_v4  ;;  %v27611_v54 = vld [vmem:[%s30149_s1 + $0x6b8] sm:$0xff]  ;;  %v27616_v4 = vsub.f32 %v27531_v17, %v30553_v42  ;;  %v27621_v6 = vsub.f32 %v27536_v44, %v30551_v29 }
 0x768   :  { %31745 = vst [vmem:[#allocation54_spill] sm:$0xff] %v27611_v54  ;;  %v30563_v28 = vand.u32 4294901760, %v27579_v45  ;;  %v30568_v29 = vand.u32 4294901760, %v27611_v54  ;;  %v27656_v42 = vand.u32 4294901760, %v27587_v19 }
 0x769   :  { %v10272_v33 = vadd.f32 %v19313_v21, %v10125_v58  ;;  %v27511_v48 = vadd.f32 %v19348_v5, %v10263_v40  ;;  %v19349_v20 = vpop.f32.mrb[68].mxu1  ;;  %v27598_v58 = vld [vmem:[%s30149_s1 + $0x6b0] sm:$0xff]  ;;  %v30565_v40 = vand.u32 4294901760, %v27560_v14  ;;  %v27633_v5 = vsub.f32 %v27545_v60, %v30552_v12 }
 0x76a   :  { %v19350_v0 = vpop.f32.mrb[69].mxu1  ;;  %31744 = vst [vmem:[#allocation52_spill] sm:$0xff] %v27598_v58  ;;  %v27628_v21 = vld [vmem:[%s30149_s1 + $0x630] sm:$0xff]  ;;  %v27653_v12 = vpack.c.bf16 %v30560_v57, %v30561_v55  ;;  %v27674_v49 = vsub.f32 %v27579_v45, %v30563_v28  ;;  %v27680_v57 = vsub.f32 %v27584_v36, %v30564_v24  ;;  %v27713_v38 = vsub.f32 %v27611_v54, %v30568_v29 }
 0x76b   :  { %v19351_v13 = vadd.f32 %v19350_v0, %v19349_v20  ;;  %31746 = vst [vmem:[#allocation59_spill] sm:$0xff] %v27628_v21  ;;  %v30566_v20 = vand.u32 4294901760, %v27593_v1  ;;  %v30567_v0 = vand.u32 4294901760, %v27598_v58  ;;  %v31757_v59 = vand.u32 4294901760, %v27616_v4 }
 0x76c   :  { %31748 = vst [vmem:[#allocation27_spill] sm:$0xff] %v27653_v12  ;;  %v31763_v30 = vand.u32 4294901760, %v27633_v5  ;;  %v31790_v63 = vand.u32 4294901760, %v27713_v38 }
 0x76d   :  { %v27538_v2 = vadd.f32 %v19351_v13, %v10272_v33  ;;  %v30562_v33 = vand.u32 4294901760, %v27573_v16  ;;  %v27646_v13 = vsub.f32 %v27566_v7, %v30556_v31  ;;  %v27663_v31 = vld [vmem:[%s30149_s1 + $0x6c0] sm:$0xff]  ;;  %v27696_v28 = vsub.f32 %v27593_v1, %v30566_v20 }
 0x76e   :  { %31749 = vst [vmem:[#allocation48_spill] sm:$0xff] %v27663_v31  ;;  %v27703_v55 = vsub.f32 %v27598_v58, %v30567_v0  ;;  %v27725_v0 = vld [vmem:[%s30149_s1 + $0x6d8] sm:$0xff]  ;;  %v27731_v29 = vpack.c.bf16 %v31757_v59, %v31756_v43  ;;  %v31759_v20 = vand.u32 4294901760, %v27628_v21  ;;  %v30571_v43 = vand.u32 4294901760, %v27674_v49 }
 0x76f   :  { %v27669_v9 = vpack.c.bf16 %v30562_v33, %v30565_v40  ;;  %v27691_v33 = vld [vmem:[%s30149_s1 + $0x640] sm:$0xff]  ;;  %v27720_v40 = vld [vmem:[%s30149_s1 + $0x6d0] sm:$0xff]  ;;  %31755 = vst [vmem:[#allocation6_spill] sm:$0xff] %v27725_v0  ;;  %v31769_v50 = vand.u32 4294901760, %v27663_v31  ;;  %v31772_v46 = vand.u32 4294901760, %v27646_v13 }
 0x770   :  { %31752 = vst [vmem:[#allocation51_spill] sm:$0xff] %v27691_v33  ;;  %31754 = vst [vmem:[#allocation45_spill] sm:$0xff] %v27720_v40  ;;  %v27736_v24 = vsub.f32 %v27628_v21, %v31759_v20  ;;  %v31765_v20 = vand.u32 4294901760, %v27641_v22  ;;  %v31776_v34 = vand.u32 4294901760, %v27691_v33  ;;  %v31789_v53 = vand.u32 4294901760, %v27703_v55 }
 0x771   :  { %31750 = vst [vmem:[#allocation63_spill] sm:$0xff] %v27669_v9  ;;  %31758 = vst [vmem:[#allocation31_spill] sm:$0xff] %v27731_v29  ;;  %v31762_v9 = vand.u32 4294901760, %v27621_v6  ;;  %v27776_v12 = vsub.f32 %v27663_v31, %v31769_v50  ;;  %v27794_v50 = vsub.f32 %v27686_v51, %v31774_v41  ;;  %v31782_v41 = vand.u32 4294901760, %v27708_v11 }
 0x772   :  { %31760 = vst [vmem:[#allocation33_spill] sm:$0xff] %v27736_v24  ;;  %v27755_v29 = vsub.f32 %v27641_v22, %v31765_v20  ;;  %v27771_v20 = vld [vmem:[%s30149_s1 + $0x6e0] sm:$0xff]  ;;  %v27799_v26 = vsub.f32 %v27691_v33, %v31776_v34  ;;  %v31785_v33 = vand.u32 4294901760, %v27720_v40  ;;  %v10768_v51 = vsub.f32 %v27587_v19, %v27656_v42 }
 0x773   :  { %v27749_v59 = vpack.c.bf16 %v31763_v30, %v31762_v9  ;;  %v27766_v9 = vld [vmem:[%s30149_s1 + $0x658] sm:$0xff]  ;;  %31768 = vst [vmem:[#allocation62_spill] sm:$0xff] %v27771_v20  ;;  %31770 = vst [vmem:[#allocation7_spill] sm:$0xff] %v27776_v12  ;;  %v27783_v30 = vld [vmem:[%s30149_s1 + $0x6e8] sm:$0xff]  ;;  %v27816_v8 = vsub.f32 %v27708_v11, %v31782_v41 }
 0x774   :  { %31766 = vst [vmem:[#allocation47_spill] sm:$0xff] %v27755_v29  ;;  %31767 = vst [vmem:[#allocation57_spill] sm:$0xff] %v27766_v9  ;;  %v31794_v34 = vand.u32 4294901760, %v27755_v29 }
 0x775   :  { %31764 = vst [vmem:[#allocation61_spill] sm:$0xff] %v27749_v59  ;;  %31771 = vst [vmem:[#allocation42_spill] sm:$0xff] %v27783_v30  ;;  %v27789_v59 = vpack.c.bf16 %v30571_v43, %v31772_v46  ;;  %v31779_v46 = vand.u32 4294901760, %v27680_v57  ;;  %v31780_v43 = vand.u32 4294901760, %v27696_v28  ;;  %v31803_v54 = vand.u32 4294901760, %v27816_v8 }
 0x776   :  { %31775 = vst [vmem:[#allocation10_spill] sm:$0xff] %v27794_v50  ;;  %31777 = vst [vmem:[#allocation46_spill] sm:$0xff] %v27799_v26 }
 0x777   :  { %31773 = vst [vmem:[#allocation8_spill] sm:$0xff] %v27789_v59  ;;  %v27811_v59 = vpack.c.bf16 %v31780_v43, %v31779_v46  ;;  %31783 = vst [vmem:[#allocation39_spill] sm:$0xff] %v27816_v8  ;;  %v27829_v43 = vsub.f32 %v27720_v40, %v31785_v33  ;;  %v31787_v46 = vand.u32 4294901760, %v27725_v0  ;;  %v31792_v33 = vand.u32 4294901760, %v27743_v62 }
 0x779   :  { %31781 = vst [vmem:[#allocation41_spill] sm:$0xff] %v27811_v59  ;;  %31786 = vst [vmem:[#allocation35_spill] sm:$0xff] %v27829_v43  ;;  %v27834_v41 = vsub.f32 %v27725_v0, %v31787_v46  ;;  %v27841_v59 = vpack.c.bf16 %v31790_v63, %v31789_v53  ;;  %v27848_v40 = vsub.f32 %v27743_v62, %v31792_v33  ;;  %v31793_v0 = vand.u32 4294901760, %v27736_v24  ;;  %v27875_v53 = vld [vmem:[%s30149_s1 + $0x6f0] sm:$0xff] }
 0x77a   :  { %v30595_v63 = vand.u32 4294901760, %v27776_v12  ;;  %v31796_v33 = vand.u32 4294901760, %v27766_v9  ;;  %v31802_v24 = vand.u32 4294901760, %v27799_v26  ;;  %v31806_v8 = vand.u32 4294901760, %v27829_v43 }
 0x77b   :  { %31788 = vst [vmem:[#allocation5_spill] sm:$0xff] %v27834_v41  ;;  %31791 = vst [vmem:[#allocation9_spill] sm:$0xff] %v27841_v59  ;;  %v27855_v31 = vpack.c.bf16 %v31794_v34, %v31793_v0  ;;  %v31797_v0 = vand.u32 4294901760, %v27771_v20  ;;  %v27897_v59 = vld [vmem:[%s30149_s1 + $0x678] sm:$0xff] }
 0x77c   :  { %v27864_v46 = vsub.f32 %v27766_v9, %v31796_v33  ;;  %v31798_v33 = vand.u32 4294901760, %v27783_v30  ;;  %v27916_v12 = vpack.c.bf16 %v31803_v54, %v31802_v24  ;;  %v30605_v54 = vand.u32 4294901760, %v27897_v59 }
 0x77d   :  { %31795 = vst [vmem:[#allocation56_spill] sm:$0xff] %v27855_v31  ;;  %v27870_v34 = vsub.f32 %v27771_v20, %v31797_v0  ;;  %v31799_v31 = vand.u32 4294901760, %v27794_v50  ;;  %v10769_v24 = vand.u32 4294901760, %v10768_v51 }
 0x77e   :  { %v27890_v0 = vsub.f32 %v27783_v30, %v31798_v33  ;;  %v31801_v30 = vand.u32 4294901760, %v27805_v56  ;;  %31804 = vst [vmem:[#allocation32_spill] sm:$0xff] %v27916_v12  ;;  %v30603_v26 = vand.u32 4294901760, %v27864_v46 }
 0x77f   :  { %v27903_v20 = vpack.c.bf16 %v31799_v31, %v30595_v63  ;;  %v31805_v63 = vand.u32 4294901760, %v27824_v32 }
 0x780   :  { %v27909_v21 = vsub.f32 %v27805_v56, %v31801_v30 }
 0x781   :  { %v19384_v11 = vpop.f32.mrb[70].mxu0  ;;  %31800 = vst [vmem:[#allocation34_spill] sm:$0xff] %v27903_v20 }
 0x782   :  { %v19385_v22 = vpop.f32.mrb[71].mxu0 }
 0x783   :  { %v19386_v37 = vadd.f32 %v19385_v22, %v19384_v11  ;;  %v27880_v11 = vld [vmem:[%s30149_s1 + $0x6f8] sm:$0xff]  ;;  %v27885_v22 = vld [vmem:[%s30149_s1 + $0x670] sm:$0xff] }
 0x784   :  { %v30604_v20 = vand.u32 4294901760, %v27885_v22 }
 0x785   :  { %v10559_v9 = vadd.f32 %v19386_v37, %v27511_v48  ;;  %v19387_v29 = vpop.f32.mrb[72].mxu0  ;;  %v19422_v33 = vpop.f32.mrb[70].mxu1  ;;  %v27921_v37 = vsub.f32 %v27824_v32, %v31805_v63  ;;  %v31807_v63 = vand.u32 4294901760, %v27834_v41 }
 0x786   :  { %v19388_v50 = vpop.f32.mrb[73].mxu0  ;;  %v19423_v31 = vpop.f32.mrb[71].mxu1 }
 0x787   :  { %v19389_v62 = vadd.f32 %v19388_v50, %v19387_v29  ;;  %v19424_v56 = vadd.f32 %v19423_v31, %v19422_v33  ;;  %v27933_v32 = vpack.c.bf16 %v31807_v63, %v31806_v8  ;;  %v30608_v29 = vand.u32 4294901760, %v27890_v0 }
 0x788   :  { %v31809_v50 = vand.u32 4294901760, %v27848_v40  ;;  %v31811_v31 = vand.u32 4294901760, %v27875_v53  ;;  %v31812_v8 = vand.u32 4294901760, %v27880_v11 }
 0x789   :  { %31808 = vst [vmem:[#allocation29_spill] sm:$0xff] %v27933_v32  ;;  %v10566_v48 = vadd.f32 %v19389_v62, %v27538_v2  ;;  %v10670_v30 = vadd.f32 %v19424_v56, %v10559_v9  ;;  %v19425_v58 = vpop.f32.mrb[72].mxu1  ;;  %v27956_v56 = vsub.f32 %v27885_v22, %v30604_v20  ;;  %v30607_v2 = vand.u32 4294901760, %v27909_v21 }
 0x78a   :  { %v27941_v33 = vpack.c.bf16 %v30603_v26, %v31809_v50  ;;  %v19426_v51 = vpop.f32.mrb[73].mxu1  ;;  %v27946_v12 = vsub.f32 %v27875_v53, %v31811_v31  ;;  %v27951_v62 = vsub.f32 %v27880_v11, %v31812_v8  ;;  %v27964_v50 = vsub.f32 %v27897_v59, %v30605_v54 }
 0x78b   :  { %v27959_v9 = vand.u32 4294901760, %v10670_v30  ;;  %v19427_v63 = vadd.f32 %v19426_v51, %v19425_v58  ;;  %v30606_v31 = vand.u32 4294901760, %v27921_v37  ;;  %v31813_v8 = vand.u32 4294901760, %v27870_v34 }
 0x78c   :  { %31810 = vst [vmem:[#allocation50_spill] sm:$0xff] %v27941_v33  ;;  %v30612_v51 = vand.u32 4294901760, %v27946_v12  ;;  %v30609_v54 = vand.u32 4294901760, %v27951_v62 }
 0x78d   :  { %v27971_v26 = vpack.c.bf16 %v30608_v29, %v31813_v8  ;;  %v10777_v20 = vsub.f32 %v10670_v30, %v27959_v9  ;;  %v10677_v33 = vadd.f32 %v19427_v63, %v10566_v48  ;;  %20556 = vmatprep.subr.mxu0 %v27959_v9  ;;  %v27979_v58 = vpack.c.bf16 %v30606_v31, %v30607_v2 }
 0x78e   :  { %20557 = vmatpush3.msra.mxu0 %v27959_v9  ;;  %v30611_v48 = vand.u32 4294901760, %v27956_v56  ;;  %v30610_v30 = vand.u32 4294901760, %v27964_v50  ;;  %v27993_v63 = vpack.c.bf16 %v30609_v54, %v30612_v51 }
 0x78f   :  { %31814 = vst [vmem:[#allocation55_spill] sm:$0xff] %v27971_v26  ;;  %31815 = vst [vmem:[#allocation53_spill] sm:$0xff] %v27979_v58  ;;  %v27984_v32 = vand.u32 4294901760, %v10677_v33  ;;  %20559 = vmatmul.mubr.f32.vlgmr.msra.gmra.mrb[24].mxu0 %v10769_v24  ;;  %v10778_v8 = vand.u32 4294901760, %v10777_v20 }
 0x790   :  { %20563 = vmatprep.mubr.f32.mxu0 %v27483_v10  ;;  %31816 = vst [vmem:[#allocation37_spill] sm:$0xff] %v27993_v63  ;;  %v28001_v29 = vpack.c.bf16 %v30610_v30, %v30611_v48  ;;  %v31835_v48 = vand.u32 4294901760, %v27696_v28  ;;  %v31866_v63 = vld [vmem:[#allocation39_spill] sm:$0xff] }
 0x791   :  { %v11268_v31 = vsub.f32 %v10677_v33, %v27984_v32  ;;  %20586 = vmatprep.subr.mxu1 %v27984_v32  ;;  %v10779_v2 = vsub.f32 %v10777_v20, %v10778_v8 }
 0x792   :  { %31817 = vst [vmem:[#allocation44_spill] sm:$0xff] %v28001_v29  ;;  %20587 = vmatpush3.msra.mxu1 %v27984_v32 }
 0x793   :  { %20589 = vmatmul.mubr.f32.vlgmr.msra.gmra.mrb[24].mxu1 %v10769_v24  ;;  %v10780_v58 = vand.u32 4294901760, %v10779_v2  ;;  %v11269_v26 = vand.u32 4294901760, %v11268_v31  ;;  %v31821_v24 = vand.u32 4294901760, %v27504_v39 }
 0x794   :  { %20593 = vmatprep.mubr.f32.mxu1 %v27483_v10 }
 0x795   :  { %20561 = vmatprep.subr.mxu0 %v10780_v58  ;;  %v11270_v54 = vsub.f32 %v11268_v31, %v11269_v26 }
 0x796   :  { %20562 = vmatpush3.msra.mxu0 %v10780_v58 }
 0x797   :  { %20564 = vmatmul.mubr.f32.vlgmr.msra.gmra.mrb[24].mxu0 %v27540_v52  ;;  %20566 = vmatprep.subr.mxu0 %v10777_v20  ;;  %v11271_v33 = vand.u32 4294901760, %v11270_v54  ;;  %v31819_v54 = vand.u32 4294901760, %v27555_v15 }
 0x798   :  { %20567 = vmatpush3.msra.mxu0 %v10777_v20  ;;  %20568 = vmatprep.mubr.f32.mxu0 %v27486_v25 }
 0x799   :  { %20571 = vmatprep.subr.mxu0 %v27959_v9  ;;  %20591 = vmatprep.subr.mxu1 %v11271_v33 }
 0x79a   :  { %20592 = vmatpush3.msra.mxu1 %v11271_v33  ;;  %v31824_v33 = vand.u32 4294901760, %v27603_v47 }
 0x79b   :  { %20594 = vmatmul.mubr.f32.vlgmr.msra.gmra.mrb[24].mxu1 %v27540_v52  ;;  %20596 = vmatprep.subr.mxu1 %v11268_v31 }
 0x79c   :  { %20597 = vmatpush3.msra.mxu1 %v11268_v31  ;;  %20598 = vmatprep.mubr.f32.mxu1 %v27486_v25  ;;  %v31818_v25 = vand.u32 4294901760, %v27550_v18 }
 0x79d   :  { %20601 = vmatprep.subr.mxu1 %v27984_v32 }
 0x79e   :  { %v11947_v20 = vsub.f32 %v27550_v18, %v31818_v25  ;;  %v11961_v25 = vsub.f32 %v27603_v47, %v31824_v33 }
 0x79f   :  { %20569 = vmatmul.mubr.f32.vlgmr.msra.gmra.mrb[24].mxu0 %v27587_v19 }
 0x7a0   :  { %20572 = vmatpush3.msra.mxu0 %v27959_v9  ;;  %20573 = vmatprep.mubr.f32.mxu0 %v27489_v23  ;;  %v11948_v31 = vand.u32 4294901760, %v11947_v20  ;;  %v31825_v20 = vand.u32 4294901760, %v27616_v4 }
 0x7a1   :  { %20576 = vmatprep.subr.mxu0 %v10778_v8 }
 0x7a3   :  { %20599 = vmatmul.mubr.f32.vlgmr.msra.gmra.mrb[24].mxu1 %v27587_v19  ;;  %v11954_v19 = vsub.f32 %v27555_v15, %v31819_v54  ;;  %v31826_v54 = vand.u32 4294901760, %v27509_v27  ;;  %v31830_v27 = vand.u32 4294901760, %v27646_v13 }
 0x7a4   :  { %20602 = vmatpush3.msra.mxu1 %v27984_v32  ;;  %20603 = vmatprep.mubr.f32.mxu1 %v27489_v23  ;;  %v31820_v23 = vand.u32 4294901760, %v27499_v61 }
 0x7a5   :  { %20606 = vmatprep.subr.mxu1 %v11269_v26  ;;  %v11955_v58 = vand.u32 4294901760, %v11954_v19  ;;  %v31827_v19 = vand.u32 4294901760, %v27516_v3  ;;  %v11975_v3 = vsub.f32 %v27646_v13, %v31830_v27 }
 0x7a6   :  { %v28033_v2 = vpack.c.bf16 %v31821_v24, %v31820_v23  ;;  %v31828_v24 = vand.u32 4294901760, %v27621_v6 }
 0x7a7   :  { %20574 = vmatmul.mubr.f32.vlgmr.msra.gmra.mrb[24].mxu0 %v27656_v42  ;;  %v21980_v39 = vpack.c.bf16 %v11955_v58, %v11948_v31  ;;  %v28056_v23 = vpack.c.bf16 %v31827_v19, %v31826_v54  ;;  %v31829_v58 = vand.u32 4294901760, %v27633_v5  ;;  %v31832_v19 = vand.u32 4294901760, %v27525_v35 }
 0x7a8   :  { %20577 = vmatpush3.msra.mxu0 %v10778_v8  ;;  %20578 = vmatprep.mubr.f32.mxu0 %v27483_v10  ;;  %v31823_v8 = vand.u32 4294901760, %v27573_v16  ;;  %v11849_v31 = vsub.f32 %v27621_v6, %v31828_v24  ;;  %v31833_v24 = vand.u32 4294901760, %v27531_v17  ;;  %v31836_v35 = vand.u32 4294901760, %v27536_v44 }
 0x7a9   :  { %20581 = vmatprep.subr.mxu0 %v27959_v9  ;;  %v31837_v17 = vand.u32 4294901760, %v27545_v60  ;;  %v31842_v44 = vand.u32 4294901760, %v27703_v55 }
 0x7aa   :  { %v11842_v61 = vsub.f32 %v27573_v16, %v31823_v8  ;;  %v28076_v30 = vpack.c.bf16 %v31833_v24, %v31832_v19  ;;  %v31839_v19 = vand.u32 4294901760, %v27566_v7  ;;  %v31840_v24 = vand.u32 4294901760, %v27579_v45  ;;  %v31847_v45 = vld [vmem:[#allocation52_spill] sm:$0xff] }
 0x7ab   :  { %20604 = vmatmul.mubr.f32.vlgmr.msra.gmra.mrb[24].mxu1 %v27656_v42  ;;  %v11989_v60 = vsub.f32 %v27703_v55, %v31842_v44 }
 0x7ac   :  { %20607 = vmatpush3.msra.mxu1 %v11269_v26  ;;  %20608 = vmatprep.mubr.f32.mxu1 %v27483_v10  ;;  %v31822_v26 = vand.u32 4294901760, %v27560_v14  ;;  %v11843_v33 = vand.u32 4294901760, %v11842_v61  ;;  %v31834_v61 = vand.u32 4294901760, %v27680_v57 }
 0x7ad   :  { %20611 = vmatprep.subr.mxu1 %v27984_v32 }
 0x7ae   :  { %v11835_v42 = vsub.f32 %v27560_v14, %v31822_v26  ;;  %v11856_v26 = vsub.f32 %v27633_v5, %v31829_v58  ;;  %v11863_v27 = vsub.f32 %v27680_v57, %v31834_v61 }
 0x7af   :  { %20579 = vmatmul.mubr.f32.vlgmr.msra.gmra.mrb[24].mxu0 %v27540_v52 }
 0x7b0   :  { %20582 = vmatpush3.msra.mxu0 %v27959_v9  ;;  %20583 = vmatprep.mubr.f32.mxu0 %v27483_v10  ;;  %v11968_v9 = vsub.f32 %v27616_v4, %v31825_v20  ;;  %v11836_v8 = vand.u32 4294901760, %v11835_v42  ;;  %v31831_v20 = vand.u32 4294901760, %v27674_v49  ;;  %v11857_v42 = vand.u32 4294901760, %v11856_v26  ;;  %v31838_v26 = vld [vmem:[#allocation17_spill] sm:$0xff] }
 0x7b1   :  { %21949 = vmatprep.subr.bf16.mxu0 %v28033_v2 }
 0x7b2   :  { %v11982_v54 = vsub.f32 %v27674_v49, %v31831_v20  ;;  %v11969_v58 = vand.u32 4294901760, %v11968_v9  ;;  %v11870_v20 = vsub.f32 %v27696_v28, %v31835_v48  ;;  %v11976_v9 = vand.u32 4294901760, %v11975_v3 }
 0x7b3   :  { %20609 = vmatmul.mubr.f32.vlgmr.msra.gmra.mrb[24].mxu1 %v27540_v52  ;;  %v28098_v48 = vpack.c.bf16 %v31840_v24, %v31839_v19  ;;  %v31845_v3 = vand.u32 4294901760, %v27593_v1  ;;  %v11864_v24 = vand.u32 4294901760, %v11863_v27 }
 0x7b4   :  { %20612 = vmatpush3.msra.mxu1 %v27984_v32  ;;  %20613 = vmatprep.mubr.f32.mxu1 %v27483_v10  ;;  %v11962_v32 = vand.u32 4294901760, %v11961_v25  ;;  %v11850_v10 = vand.u32 4294901760, %v11849_v31  ;;  %v21982_v25 = vpack.c.bf16 %v11843_v33, %v11836_v8  ;;  %v11983_v31 = vand.u32 4294901760, %v11982_v54 }
 0x7b5   :  { %21981 = vmatprep.subr.bf16.mxu1 %v21980_v39  ;;  %v28090_v39 = vpack.c.bf16 %v31837_v17, %v31836_v35  ;;  %31841 = vst [vmem:[#allocation43_spill] sm:$0xff] %v28098_v48  ;;  %v31843_v35 = vand.u32 4294901760, %v27713_v38  ;;  %v31844_v33 = vand.u32 4294901760, %v27584_v36  ;;  %v31848_v17 = vand.u32 4294901760, %v31847_v45  ;;  %v31851_v36 = vld [vmem:[#allocation33_spill] sm:$0xff]  ;;  %v31855_v45 = vld [vmem:[#allocation7_spill] sm:$0xff] }
 0x7b6   :  { %v21984_v61 = vpack.c.bf16 %v11969_v58, %v11962_v32  ;;  %v21986_v7 = vpack.c.bf16 %v11857_v42, %v11850_v10  ;;  %v31849_v32 = vld [vmem:[#allocation54_spill] sm:$0xff]  ;;  %v11871_v44 = vand.u32 4294901760, %v11870_v20  ;;  %v31852_v51 = vand.u32 4294901760, %v31851_v36 }
 0x7b7   :  { %20584 = vmatmul.mubr.f32.vlgmr.msra.gmra.mrb[24].mxu0 %v27540_v52  ;;  %v11996_v8 = vsub.f32 %v27713_v38, %v31843_v35  ;;  %v28110_v54 = vpack.c.bf16 %v31845_v3, %v31844_v33  ;;  %v31850_v58 = vand.u32 4294901760, %v31849_v32  ;;  %v21988_v35 = vpack.c.bf16 %v11983_v31, %v11976_v9  ;;  %v31853_v33 = vld [vmem:[#allocation47_spill] sm:$0xff] }
 0x7b8   :  { %21951 = vmatpush3.bf16.msra.mxu0 %v28056_v23  ;;  %11805 = vmatprep.mubr.f32.mxu0 %v31838_v26  ;;  %v11877_v1 = vsub.f32 %v31851_v36, %v31852_v51  ;;  %v31854_v3 = vand.u32 4294901760, %v31853_v33  ;;  %v11990_v10 = vand.u32 4294901760, %v11989_v60  ;;  %v31856_v27 = vand.u32 4294901760, %v31855_v45  ;;  %v31859_v31 = vld [vmem:[#allocation11_spill] sm:$0xff] }
 0x7b9   :  { %21953 = vmatprep.subr.bf16.mxu0 %v28076_v30  ;;  %31846 = vst [vmem:[#allocation49_spill] sm:$0xff] %v28110_v54  ;;  %v28117_v19 = vpack.c.bf16 %v31850_v58, %v31848_v17  ;;  %v11997_v42 = vand.u32 4294901760, %v11996_v8  ;;  %v31857_v17 = vld [vmem:[#allocation10_spill] sm:$0xff]  ;;  %v31860_v51 = vld [vmem:[#allocation59_spill] sm:$0xff]  ;;  %v31862_v58 = vld [vmem:[#allocation60_spill] sm:$0xff]  ;;  %v21990_v29 = vpack.c.bf16 %v11871_v44, %v11864_v24 }
 0x7ba   :  { %v12003_v20 = vsub.f32 %v31855_v45, %v31856_v27  ;;  %v31861_v32 = vand.u32 4294901760, %v31860_v51  ;;  %v31863_v26 = vand.u32 4294901760, %v31862_v58  ;;  %v31868_v51 = vand.u32 4294901760, %v27829_v43  ;;  %v31870_v44 = vld [vmem:[#allocation48_spill] sm:$0xff] }
 0x7bb   :  { %20614 = vmatmul.mubr.f32.vlgmr.msra.gmra.mrb[24].mxu1 %v27540_v52  ;;  %v11884_v52 = vsub.f32 %v31853_v33, %v31854_v3 }
 0x7bc   :  { %21955 = vmatpush3.bf16.msra.mxu0 %v28090_v39  ;;  %21983 = vmatpush3.bf16.msra.mxu1 %v21982_v25  ;;  %v31858_v25 = vand.u32 4294901760, %v31857_v17  ;;  %v28138_v3 = vpack.c.bf16 %v31863_v26, %v31861_v32  ;;  %v12017_v58 = vsub.f32 %v27829_v43, %v31868_v51  ;;  %v31869_v26 = vand.u32 4294901760, %v27834_v41 }
 0x7bd   :  { %21957 = vmatprep.subr.bf16.mxu0 %v28098_v48  ;;  %21985 = vmatprep.subr.bf16.mxu1 %v21984_v61  ;;  %v31864_v61 = vld [vmem:[#allocation46_spill] sm:$0xff]  ;;  %v31867_v48 = vand.u32 4294901760, %v31866_v63  ;;  %v31871_v32 = vand.u32 4294901760, %v31870_v44  ;;  %v31879_v44 = vand.u32 4294901760, %v27864_v46 }
 0x7be   :  { %v12010_v9 = vsub.f32 %v31857_v17, %v31858_v25  ;;  %12056 = vmatprep.mubr.f32.mxu1 %v31859_v31  ;;  %v31865_v60 = vand.u32 4294901760, %v31864_v61  ;;  %v11878_v25 = vand.u32 4294901760, %v11877_v1  ;;  %v11885_v31 = vand.u32 4294901760, %v11884_v52  ;;  %v31876_v17 = vld [vmem:[#allocation28_spill] sm:$0xff] }
 0x7bf   :  { %v11898_v27 = vsub.f32 %v31866_v63, %v31867_v48  ;;  %v12024_v24 = vsub.f32 %v27834_v41, %v31869_v26  ;;  %v12004_v1 = vand.u32 4294901760, %v12003_v20  ;;  %v31877_v51 = vand.u32 4294901760, %v31876_v17 }
 0x7c0   :  { %v11891_v8 = vsub.f32 %v31864_v61, %v31865_v60  ;;  %21959 = vmatpush3.bf16.msra.mxu0 %v28110_v54  ;;  %21987 = vmatpush3.bf16.msra.mxu1 %v21986_v7  ;;  %v31872_v60 = vld [vmem:[#allocation64_spill] sm:$0xff]  ;;  %v21992_v7 = vpack.c.bf16 %v11997_v42, %v11990_v10  ;;  %v12011_v52 = vand.u32 4294901760, %v12010_v9  ;;  %v31874_v61 = vld [vmem:[#allocation51_spill] sm:$0xff]  ;;  %v31878_v41 = vand.u32 4294901760, %v27848_v40  ;;  %v31880_v42 = vld [vmem:[#allocation45_spill] sm:$0xff] }
 0x7c1   :  { %21961 = vmatprep.subr.bf16.mxu0 %v28117_v19  ;;  %21989 = vmatprep.subr.bf16.mxu1 %v21988_v35  ;;  %v31873_v48 = vand.u32 4294901760, %v31872_v60  ;;  %v31875_v54 = vand.u32 4294901760, %v31874_v61  ;;  %v11899_v26 = vand.u32 4294901760, %v11898_v27  ;;  %v21994_v10 = vpack.c.bf16 %v11885_v31, %v11878_v25  ;;  %v31882_v9 = vld [vmem:[#allocation6_spill] sm:$0xff]  ;;  %v31886_v31 = vld [vmem:[#allocation40_spill] sm:$0xff] }
 0x7c2   :  { %v11892_v45 = vand.u32 4294901760, %v11891_v8  ;;  %v11905_v35 = vsub.f32 %v27848_v40, %v31878_v41  ;;  %v31881_v20 = vand.u32 4294901760, %v31880_v42  ;;  %v31883_v17 = vand.u32 4294901760, %v31882_v9  ;;  %v31892_v9 = vld [vmem:[#allocation42_spill] sm:$0xff] }
 0x7c3   :  { %v28158_v63 = vpack.c.bf16 %v31873_v48, %v31871_v32  ;;  %v28164_v43 = vpack.c.bf16 %v31877_v51, %v31875_v54  ;;  %v11912_v32 = vsub.f32 %v27864_v46, %v31879_v44  ;;  %v12018_v61 = vand.u32 4294901760, %v12017_v58  ;;  %v31888_v51 = vld [vmem:[#allocation57_spill] sm:$0xff] }
 0x7c4   :  { %21963 = vmatpush3.bf16.msra.mxu0 %v28138_v3  ;;  %21991 = vmatpush3.bf16.msra.mxu1 %v21990_v29  ;;  %v28177_v54 = vpack.c.bf16 %v31883_v17, %v31881_v20  ;;  %v12025_v8 = vand.u32 4294901760, %v12024_v24  ;;  %v21996_v41 = vpack.c.bf16 %v12011_v52, %v12004_v1  ;;  %v31884_v27 = vand.u32 4294901760, %v27870_v34  ;;  %v31890_v24 = vld [vmem:[#allocation62_spill] sm:$0xff] }
 0x7c5   :  { %21965 = vmatprep.subr.bf16.mxu0 %v28158_v63  ;;  %21993 = vmatprep.subr.bf16.mxu1 %v21992_v7  ;;  %v31885_v48 = vand.u32 4294901760, %v27890_v0  ;;  %v31887_v25 = vand.u32 4294901760, %v31886_v31  ;;  %v31889_v44 = vand.u32 4294901760, %v31888_v51  ;;  %v21998_v58 = vpack.c.bf16 %v11899_v26, %v11892_v45 }
 0x7c6   :  { %v12031_v60 = vsub.f32 %v27870_v34, %v31884_v27  ;;  %v31891_v20 = vand.u32 4294901760, %v31890_v24  ;;  %v31893_v7 = vand.u32 4294901760, %v31892_v9  ;;  %v11906_v52 = vand.u32 4294901760, %v11905_v35  ;;  %v31900_v24 = vld [vmem:[#allocation30_spill] sm:$0xff] }
 0x7c7   :  { %v12038_v29 = vsub.f32 %v27890_v0, %v31885_v48  ;;  %v28190_v42 = vpack.c.bf16 %v31889_v44, %v31887_v25  ;;  %v11913_v17 = vand.u32 4294901760, %v11912_v32  ;;  %v22000_v27 = vpack.c.bf16 %v12025_v8, %v12018_v61  ;;  %v31898_v8 = vld [vmem:[#allocation58_spill] sm:$0xff] }
 0x7c8   :  { %v28196_v1 = vpack.c.bf16 %v31893_v7, %v31891_v20  ;;  %21967 = vmatpush3.bf16.msra.mxu0 %v28164_v43  ;;  %21995 = vmatpush3.bf16.msra.mxu1 %v21994_v10  ;;  %v31894_v48 = vand.u32 4294901760, %v27909_v21  ;;  %v31895_v25 = vand.u32 4294901760, %v27921_v37  ;;  %v12032_v26 = vand.u32 4294901760, %v12031_v60 }
 0x7c9   :  { %21969 = vmatprep.subr.bf16.mxu0 %v28177_v54  ;;  %21997 = vmatprep.subr.bf16.mxu1 %v21996_v41  ;;  %v12039_v51 = vand.u32 4294901760, %v12038_v29  ;;  %v31896_v35 = vand.u32 4294901760, %v27946_v12  ;;  %v31897_v10 = vand.u32 4294901760, %v27951_v62  ;;  %v31899_v44 = vand.u32 4294901760, %v31898_v8 }
 0x7ca   :  { %v11919_v31 = vsub.f32 %v27909_v21, %v31894_v48  ;;  %v11926_v45 = vsub.f32 %v27921_v37, %v31895_v25  ;;  %v31901_v20 = vand.u32 4294901760, %v31900_v24  ;;  %v22002_v7 = vpack.c.bf16 %v11913_v17, %v11906_v52 }
 0x7cb   :  { %v12045_v32 = vsub.f32 %v27946_v12, %v31896_v35  ;;  %v12052_v61 = vsub.f32 %v27951_v62, %v31897_v10  ;;  %v31902_v29 = vand.u32 4294901760, %v27956_v56  ;;  %v31903_v25 = vand.u32 4294901760, %v27964_v50 }
 0x7cc   :  { %v28216_v9 = vpack.c.bf16 %v31901_v20, %v31899_v44  ;;  %21971 = vmatpush3.bf16.msra.mxu0 %v28190_v42  ;;  %21999 = vmatpush3.bf16.msra.mxu1 %v21998_v58  ;;  %v11920_v41 = vand.u32 4294901760, %v11919_v31  ;;  %v11927_v60 = vand.u32 4294901760, %v11926_v45  ;;  %v31904_v10 = vand.u32 4294901760, %v27875_v53 }
 0x7cd   :  { %v11933_v48 = vsub.f32 %v27956_v56, %v31902_v29  ;;  %v11940_v35 = vsub.f32 %v27964_v50, %v31903_v25  ;;  %21973 = vmatprep.subr.bf16.mxu0 %v28196_v1  ;;  %22001 = vmatprep.subr.bf16.mxu1 %v22000_v27  ;;  %v31905_v52 = vand.u32 4294901760, %v27880_v11  ;;  %v22004_v58 = vpack.c.bf16 %v12039_v51, %v12032_v26  ;;  %v31908_v51 = vld [vmem:[#allocation18_spill] sm:$0xff]  ;;  %v31922_v25 = vld [vmem:[#allocation35_spill] sm:$0xff] }
 0x7ce   :  { %v12046_v31 = vand.u32 4294901760, %v12045_v32  ;;  %v12053_v45 = vand.u32 4294901760, %v12052_v61  ;;  %v31906_v8 = vand.u32 4294901760, %v27885_v22  ;;  %v31907_v44 = vand.u32 4294901760, %v27897_v59  ;;  %v31917_v61 = vld [vmem:[#allocation10_spill] sm:$0xff] }
 0x7cf   :  { %v28230_v17 = vpack.c.bf16 %v31905_v52, %v31904_v10  ;;  %v22006_v20 = vpack.c.bf16 %v11927_v60, %v11920_v41  ;;  %v11934_v27 = vand.u32 4294901760, %v11933_v48  ;;  %v11941_v29 = vand.u32 4294901760, %v11940_v35  ;;  %v31918_v41 = vld [vmem:[#allocation15_spill] sm:$0xff]  ;;  %v31923_v35 = vld [vmem:[#allocation5_spill] sm:$0xff] }
 0x7d0   :  { %21975 = vmatpush3.bf16.msra.mxu0 %v28216_v9  ;;  %22003 = vmatpush3.bf16.msra.mxu1 %v22002_v7  ;;  %v28237_v24 = vpack.c.bf16 %v31907_v44, %v31906_v8  ;;  %v22008_v53 = vpack.c.bf16 %v12053_v45, %v12046_v31  ;;  %v22012_v11 = vpack.c.bf16 %v27555_v15, %v27550_v18  ;;  %v31909_v15 = vld [vmem:[#allocation25_spill] sm:$0xff]  ;;  %v31921_v60 = vld [vmem:[#allocation39_spill] sm:$0xff]  ;;  %v31933_v31 = vld [vmem:[#allocation8_spill] sm:$0xff] }
 0x7d1   :  { %21977 = vmatprep.subr.bf16.mxu0 %v28230_v17  ;;  %22005 = vmatprep.subr.bf16.mxu1 %v22004_v58  ;;  %v22010_v26 = vpack.c.bf16 %v11941_v29, %v11934_v27  ;;  %v22014_v22 = vpack.c.bf16 %v27573_v16, %v27560_v14  ;;  %v22016_v59 = vpack.c.bf16 %v27616_v4, %v27603_v47  ;;  %v31910_v14 = vld [vmem:[#allocation12_spill] sm:$0xff]  ;;  %v31911_v16 = vld [vmem:[#allocation26_spill] sm:$0xff]  ;;  %v31934_v45 = vld [vmem:[#allocation11_spill] sm:$0xff] }
 0x7d2   :  { %v22018_v32 = vpack.c.bf16 %v27633_v5, %v27621_v6  ;;  %v22020_v18 = vpack.c.bf16 %v27674_v49, %v27646_v13  ;;  %v22022_v47 = vpack.c.bf16 %v27696_v28, %v27680_v57  ;;  %v22024_v4 = vpack.c.bf16 %v27713_v38, %v27703_v55  ;;  %v31912_v6 = vld [vmem:[#allocation19_spill] sm:$0xff]  ;;  %v31913_v49 = vld [vmem:[#allocation13_spill] sm:$0xff]  ;;  %v31920_v55 = vld [vmem:[#allocation46_spill] sm:$0xff] }
 0x7d3   :  { %v31914_v5 = vld [vmem:[#allocation21_spill] sm:$0xff]  ;;  %v22026_v13 = vpack.c.bf16 %v31853_v33, %v31851_v36  ;;  %v31915_v57 = vld [vmem:[#allocation43_spill] sm:$0xff]  ;;  %v22030_v48 = vpack.c.bf16 %v31921_v60, %v31920_v55  ;;  %v22032_v36 = vpack.c.bf16 %v31923_v35, %v31922_v25  ;;  %v22034_v33 = vpack.c.bf16 %v27864_v46, %v27848_v40  ;;  %v31925_v46 = vld [vmem:[#allocation14_spill] sm:$0xff] }
 0x7d4   :  { %21979 = vmatpush3.bf16.msra.mxu0 %v28237_v24  ;;  %22007 = vmatpush3.bf16.msra.mxu1 %v22006_v20  ;;  %v31916_v28 = vld [vmem:[#allocation7_spill] sm:$0xff]  ;;  %v31919_v38 = vld [vmem:[#allocation49_spill] sm:$0xff]  ;;  %v22036_v10 = vpack.c.bf16 %v27890_v0, %v27870_v34  ;;  %v22038_v52 = vpack.c.bf16 %v27921_v37, %v27909_v21  ;;  %v22040_v58 = vpack.c.bf16 %v27951_v62, %v27946_v12  ;;  %v31927_v34 = vld [vmem:[#allocation20_spill] sm:$0xff] }
 0x7d5   :  { %22009 = vmatprep.subr.bf16.mxu1 %v22008_v53  ;;  %22013 = vmatprep.subr.bf16.mxu0 %v22012_v11  ;;  %v22028_v7 = vpack.c.bf16 %v31917_v61, %v31916_v28  ;;  %v22042_v40 = vpack.c.bf16 %v27964_v50, %v27956_v56  ;;  %v31924_v21 = vld [vmem:[#allocation27_spill] sm:$0xff]  ;;  %v31930_v62 = vld [vmem:[#allocation16_spill] sm:$0xff]  ;;  %v31931_v56 = vld [vmem:[#allocation61_spill] sm:$0xff] }
 0x7d6   :  { %v31926_v12 = vld [vmem:[#allocation63_spill] sm:$0xff]  ;;  %v31932_v50 = vld [vmem:[#allocation22_spill] sm:$0xff]  ;;  %v31935_v8 = vld [vmem:[#allocation24_spill] sm:$0xff] }
 0x7d7   :  { %11811 = vmatmul.mubr.f32.vlgmr.msra.gmra.mrb[74].mxu0 %v31908_v51  ;;  %v31928_v0 = vld [vmem:[#allocation31_spill] sm:$0xff]  ;;  %v31936_v44 = vld [vmem:[#allocation41_spill] sm:$0xff]  ;;  %v31939_v20 = vld [vmem:[#allocation34_spill] sm:$0xff] }
 0x7d8   :  { %22011 = vmatpush3.bf16.msra.mxu1 %v22010_v26  ;;  %22015 = vmatpush3.bf16.msra.mxu0 %v22014_v22  ;;  %v31929_v37 = vld [vmem:[#allocation23_spill] sm:$0xff]  ;;  %v31941_v27 = vld [vmem:[#allocation29_spill] sm:$0xff]  ;;  %v28688_v51 = vld [vmem:[%s30149_s1 + $0x768] sm:$0xff] }
 0x7d9   :  { %22017 = vmatprep.subr.bf16.mxu0 %v22016_v59  ;;  %22045 = vmatprep.subr.bf16.mxu1 %v28033_v2  ;;  %v31943_v29 = vld [vmem:[#allocation55_spill] sm:$0xff]  ;;  %v31944_v53 = vld [vmem:[#allocation53_spill] sm:$0xff]  ;;  %31987 = vst [vmem:[#allocation5_spill] sm:$0xff] %v28688_v51 }
 0x7da   :  { %11820 = vmatprep.mubr.f32.mxu0 %v31909_v15 }
 0x7db   :  { %12058 = vmatmul.mubr.f32.vlgmr.msra.gmra.mrb[74].mxu1 %v31910_v14  ;;  %11826 = vmatmul.mubr.f32.gmra.mrb[76].mxu0 %v31911_v16  ;;  %v28669_v16 = vld [vmem:[%s30149_s1 + $0x760] sm:$0xff] }
 0x7dc   :  { %22019 = vmatpush3.bf16.msra.mxu0 %v22018_v32  ;;  %22047 = vmatpush3.bf16.msra.mxu1 %v28056_v23  ;;  %31981 = vst [vmem:[#allocation46_spill] sm:$0xff] %v28669_v16 }
 0x7dd   :  { %22021 = vmatprep.subr.bf16.mxu0 %v22020_v18  ;;  %22049 = vmatprep.subr.bf16.mxu1 %v28076_v30 }
 0x7de   :  { %12063 = vmatprep.mubr.f32.mxu1 %v31912_v6  ;;  %12200 = vmatprep.mubr.f32.mxu0 %v31913_v49 }
 0x7df   :  { %12065 = vmatmul.mubr.f32.gmra.mrb[76].mxu1 %v31914_v5 }
 0x7e0   :  { %22023 = vmatpush3.bf16.msra.mxu0 %v22022_v47  ;;  %22051 = vmatpush3.bf16.msra.mxu1 %v28090_v39 }
 0x7e1   :  { %22025 = vmatprep.subr.bf16.mxu0 %v22024_v4  ;;  %22053 = vmatprep.subr.bf16.mxu1 %v31915_v57 }
 0x7e2   :  { %12316 = vmatprep.mubr.f32.mxu1 %v31918_v41 }
 0x7e4   :  { %22027 = vmatpush3.bf16.msra.mxu0 %v22026_v13  ;;  %22055 = vmatpush3.bf16.msra.mxu1 %v31919_v38 }
 0x7e5   :  { %22029 = vmatprep.subr.bf16.mxu0 %v22028_v7  ;;  %22057 = vmatprep.subr.bf16.mxu1 %v28117_v19 }
 0x7e8   :  { %22031 = vmatpush3.bf16.msra.mxu0 %v22030_v48  ;;  %22059 = vmatpush3.bf16.msra.mxu1 %v28138_v3 }
 0x7e9   :  { %22033 = vmatprep.subr.bf16.mxu0 %v22032_v36  ;;  %22061 = vmatprep.subr.bf16.mxu1 %v28158_v63 }
 0x7ec   :  { %22035 = vmatpush3.bf16.msra.mxu0 %v22034_v33  ;;  %22063 = vmatpush3.bf16.msra.mxu1 %v28164_v43 }
 0x7ed   :  { %22037 = vmatprep.subr.bf16.mxu0 %v22036_v10  ;;  %22065 = vmatprep.subr.bf16.mxu1 %v28177_v54  ;;  %v17811_v10 = vld [vmem:[%s30150_s2 + $0x68] sm:$0xff] }
 0x7f0   :  { %22039 = vmatpush3.bf16.msra.mxu0 %v22038_v52  ;;  %22067 = vmatpush3.bf16.msra.mxu1 %v28190_v42 }
 0x7f1   :  { %22041 = vmatprep.subr.bf16.mxu0 %v22040_v58  ;;  %22069 = vmatprep.subr.bf16.mxu1 %v28196_v1 }
 0x7f4   :  { %22043 = vmatpush3.bf16.msra.mxu0 %v22042_v40  ;;  %22071 = vmatpush3.bf16.msra.mxu1 %v28216_v9  ;;  %v28363_v40 = vld [vmem:[%s30149_s1 + $0x780] sm:$0xff] }
 0x7f5   :  { %22073 = vmatprep.subr.bf16.mxu1 %v28230_v17  ;;  %22077 = vmatprep.subr.bf16.mxu0 %v31924_v21  ;;  %v28368_v21 = vld [vmem:[%s30149_s1 + $0x788] sm:$0xff] }
 0x7f7   :  { %12203 = vmatmul.mubr.f32.vlgmr.msra.gmra.mrb[78].mxu0 %v31925_v46 }
 0x7f8   :  { %22075 = vmatpush3.bf16.msra.mxu1 %v28237_v24  ;;  %22079 = vmatpush3.bf16.msra.mxu0 %v31926_v12  ;;  %v28373_v12 = vld [vmem:[%s30149_s1 + $0x700] sm:$0xff] }
 0x7f9   :  { %12209 = vmatprep.mubr.f32.mxu0 %v31927_v34  ;;  %22081 = vmatprep.subr.bf16.mxu0 %v31928_v0  ;;  %v28607_v34 = vld [vmem:[%s30149_s1 + $0x750] sm:$0xff] }
 0x7fa   :  { %22109 = vmatprep.subr.bf16.mxu1 %v28033_v2  ;;  %v31937_v2 = vld [vmem:[#allocation9_spill] sm:$0xff]  ;;  %31964 = vst [vmem:[#allocation40_spill] sm:$0xff] %v28607_v34 }
 0x7fb   :  { %12212 = vmatmul.mubr.f32.gmra.mrb[80].mxu0 %v31929_v37  ;;  %12320 = vmatmul.mubr.f32.vlgmr.msra.gmra.mrb[78].mxu1 %v31930_v62 }
 0x7fc   :  { %22083 = vmatpush3.bf16.msra.mxu0 %v31931_v56  ;;  %22111 = vmatpush3.bf16.msra.mxu1 %v28056_v23  ;;  %v31938_v23 = vld [vmem:[#allocation56_spill] sm:$0xff] }
 0x7fd   :  { %12327 = vmatprep.mubr.f32.mxu1 %v31932_v50  ;;  %22085 = vmatprep.subr.bf16.mxu0 %v31933_v31 }
 0x7fe   :  { %22113 = vmatprep.subr.bf16.mxu1 %v28076_v30  ;;  %12497 = vmatprep.mubr.f32.mxu0 %v31934_v45  ;;  %v31940_v30 = vld [vmem:[#allocation32_spill] sm:$0xff] }
 0x7ff   :  { %12331 = vmatmul.mubr.f32.gmra.mrb[80].mxu1 %v31935_v8 }
 0x800   :  { %22087 = vmatpush3.bf16.msra.mxu0 %v31936_v44  ;;  %22115 = vmatpush3.bf16.msra.mxu1 %v28090_v39  ;;  %v31942_v39 = vld [vmem:[#allocation50_spill] sm:$0xff] }
 0x801   :  { %22089 = vmatprep.subr.bf16.mxu0 %v31937_v2  ;;  %22117 = vmatprep.subr.bf16.mxu1 %v31915_v57  ;;  %v28380_v44 = vld [vmem:[%s30149_s1 + $0x708] sm:$0xff] }
 0x802   :  { %12608 = vmatprep.mubr.f32.mxu1 %v31934_v45 }
 0x804   :  { %22091 = vmatpush3.bf16.msra.mxu0 %v31938_v23  ;;  %22119 = vmatpush3.bf16.msra.mxu1 %v31919_v38  ;;  %v12629_v23 = vsel %vm1934_vm0, %v17811_v10, 0 }
 0x805   :  { %22093 = vmatprep.subr.bf16.mxu0 %v31939_v20  ;;  %22121 = vmatprep.subr.bf16.mxu1 %v28117_v19  ;;  %v31945_v19 = vld [vmem:[#allocation37_spill] sm:$0xff]  ;;  %v30631_v20 = vand.u32 4294901760, %v28363_v40 }
 0x808   :  { %22095 = vmatpush3.bf16.msra.mxu0 %v31940_v30  ;;  %22123 = vmatpush3.bf16.msra.mxu1 %v28138_v3  ;;  %v31946_v3 = vld [vmem:[#allocation44_spill] sm:$0xff]  ;;  %v30630_v30 = vand.u32 4294901760, %v28368_v21 }
 0x809   :  { %22097 = vmatprep.subr.bf16.mxu0 %v31941_v27  ;;  %22125 = vmatprep.subr.bf16.mxu1 %v28158_v63  ;;  %v30629_v27 = vand.u32 4294901760, %v28373_v12 }
 0x80c   :  { %22099 = vmatpush3.bf16.msra.mxu0 %v31942_v39  ;;  %22127 = vmatpush3.bf16.msra.mxu1 %v28164_v43  ;;  %v17810_v43 = vld [vmem:[%s30150_s2 + $0x60] sm:$0xff] }
 0x80d   :  { %22101 = vmatprep.subr.bf16.mxu0 %v31943_v29  ;;  %22129 = vmatprep.subr.bf16.mxu1 %v28177_v54  ;;  %v12626_v63 = vsel %vm1934_vm0, %v17810_v43, 0  ;;  %v28389_v29 = vld [vmem:[%s30149_s1 + $0x790] sm:$0xff] }
 0x80e   :  { %v28347_v54 = vand.u32 4294901760, %v12626_v63 }
 0x810   :  { %22103 = vmatpush3.bf16.msra.mxu0 %v31944_v53  ;;  %22131 = vmatpush3.bf16.msra.mxu1 %v28190_v42  ;;  %v28350_v42 = vsub.f32 %v12626_v63, %v28347_v54  ;;  %v30627_v53 = vand.u32 4294901760, %v28380_v44  ;;  %v28404_v63 = vand.u32 4294901760, %v12629_v23 }
 0x811   :  { %22105 = vmatprep.subr.bf16.mxu0 %v31945_v19  ;;  %22133 = vmatprep.subr.bf16.mxu1 %v28196_v1  ;;  %v28395_v19 = vld [vmem:[%s30149_s1 + $0x798] sm:$0xff] }
 0x812   :  { %v28353_v1 = vand.u32 4294901760, %v28350_v42 }
 0x814   :  { %22107 = vmatpush3.bf16.msra.mxu0 %v31946_v3  ;;  %22135 = vmatpush3.bf16.msra.mxu1 %v28216_v9  ;;  %v12700_v9 = vsub.f32 %v28350_v42, %v28353_v1  ;;  %v28400_v3 = vld [vmem:[%s30149_s1 + $0x710] sm:$0xff] }
 0x815   :  { %22137 = vmatprep.subr.bf16.mxu1 %v28230_v17 }
 0x816   :  { %v12701_v17 = vand.u32 4294901760, %v12700_v9  ;;  %v28409_v9 = vld [vmem:[%s30149_s1 + $0x718] sm:$0xff] }
 0x817   :  { %12499 = vmatmul.mubr.f32.vlgmr.msra.gmra.mrb[82].mxu0 %v31910_v14 }
 0x818   :  { %22139 = vmatpush3.bf16.msra.mxu1 %v28237_v24  ;;  %12504 = vmatprep.mubr.f32.mxu0 %v31912_v6 }
 0x81b   :  { %12506 = vmatmul.mubr.f32.gmra.mrb[84].mxu0 %v31914_v5  ;;  %12610 = vmatmul.mubr.f32.vlgmr.msra.gmra.mrb[82].mxu1 %v31910_v14 }
 0x81c   :  { %12615 = vmatprep.mubr.f32.mxu1 %v31912_v6  ;;  %20618 = vmatprep.mubr.f32.mxu0 %v12701_v17 }
 0x81f   :  { %12617 = vmatmul.mubr.f32.gmra.mrb[84].mxu1 %v31914_v5 }
 0x820   :  { %20648 = vmatprep.mubr.f32.mxu1 %v12701_v17  ;;  %v28414_v17 = vsub.f32 %v28363_v40, %v30631_v20  ;;  %v28572_v20 = vld [vmem:[%s30149_s1 + $0x748] sm:$0xff] }
 0x821   :  { %31956 = vst [vmem:[#allocation64_spill] sm:$0xff] %v28572_v20 }
 0x8aa   :  { %v19496_v24 = vpop.f32.mrb[74].mxu0 }
 0x8ab   :  { %v19497_v11 = vpop.f32.mrb[75].mxu0 }
 0x8ac   :  { %v19498_v26 = vadd.f32 %v19497_v11, %v19496_v24  ;;  %v28419_v24 = vsub.f32 %v28368_v21, %v30630_v30  ;;  %v28424_v11 = vsub.f32 %v28373_v12, %v30629_v27 }
 0x8ae   :  { %v19534_v22 = vpop.f32.mrb[74].mxu1  ;;  %v19499_v59 = vpop.f32.mrb[76].mxu0 }
 0x8af   :  { %v19535_v32 = vpop.f32.mrb[75].mxu1  ;;  %v19500_v18 = vpop.f32.mrb[77].mxu0 }
 0x8b0   :  { %v19536_v47 = vadd.f32 %v19535_v32, %v19534_v22  ;;  %v19501_v4 = vadd.f32 %v19500_v18, %v19499_v59  ;;  %v28430_v22 = vld [vmem:[%s30149_s1 + $0x7a0] sm:$0xff]  ;;  %v30625_v59 = vand.u32 4294901760, %v28395_v19  ;;  %v30623_v32 = vand.u32 4294901760, %v28400_v3 }
 0x8b1   :  { %v28437_v18 = vsub.f32 %v28380_v44, %v30627_v53  ;;  %v28550_v53 = vld [vmem:[%s30149_s1 + $0x7c8] sm:$0xff] }
 0x8b2   :  { %v12060_v13 = vadd.f32 %v19536_v47, %v19498_v26  ;;  %v19537_v57 = vpop.f32.mrb[76].mxu1  ;;  %v30626_v26 = vand.u32 4294901760, %v28389_v29  ;;  %v30624_v47 = vand.u32 4294901760, %v28409_v9  ;;  %31954 = vst [vmem:[#allocation60_spill] sm:$0xff] %v28550_v53  ;;  %v31977_v49 = vand.u32 4294901760, %v28550_v53 }
 0x8b3   :  { %v19538_v28 = vpop.f32.mrb[77].mxu1 }
 0x8b4   :  { %v19539_v61 = vadd.f32 %v19538_v28, %v19537_v57  ;;  %v28451_v57 = vsub.f32 %v12629_v23, %v28404_v63  ;;  %v30628_v28 = vand.u32 4294901760, %v28430_v22  ;;  %v28505_v23 = vld [vmem:[%s30149_s1 + $0x738] sm:$0xff] }
 0x8b5   :  { %31950 = vst [vmem:[#allocation54_spill] sm:$0xff] %v28505_v23 }
 0x8b6   :  { %v12067_v7 = vadd.f32 %v19539_v61, %v19501_v4  ;;  %v28443_v4 = vld [vmem:[%s30149_s1 + $0x7a8] sm:$0xff] }
 0x8b7   :  { %v28457_v61 = vld [vmem:[%s30149_s1 + $0x728] sm:$0xff] }
 0x8ca   :  { %v19572_v38 = vpop.f32.mrb[78].mxu0 }
 0x8cb   :  { %v19573_v55 = vpop.f32.mrb[79].mxu0 }
 0x8cc   :  { %v19574_v60 = vadd.f32 %v19573_v55, %v19572_v38  ;;  %v28467_v38 = vsub.f32 %v28389_v29, %v30626_v26  ;;  %v30633_v55 = vand.u32 4294901760, %v28414_v17 }
 0x8ce   :  { %v12205_v48 = vadd.f32 %v19574_v60, %v12060_v13  ;;  %v19575_v25 = vpop.f32.mrb[80].mxu0  ;;  %v19610_v35 = vpop.f32.mrb[78].mxu1  ;;  %v28448_v13 = vld [vmem:[%s30149_s1 + $0x720] sm:$0xff]  ;;  %v30632_v60 = vand.u32 4294901760, %v28419_v24  ;;  %v31959_v8 = vand.u32 4294901760, %v28467_v38 }
 0x8cf   :  { %v19576_v36 = vpop.f32.mrb[81].mxu0  ;;  %v19611_v33 = vpop.f32.mrb[79].mxu1  ;;  %v30636_v10 = vand.u32 4294901760, %v28448_v13 }
 0x8d0   :  { %v19577_v52 = vadd.f32 %v19576_v36, %v19575_v25  ;;  %v19612_v58 = vadd.f32 %v19611_v33, %v19610_v35  ;;  %v28475_v25 = vld [vmem:[%s30149_s1 + $0x7b8] sm:$0xff]  ;;  %v28480_v35 = vsub.f32 %v28395_v19, %v30625_v59  ;;  %v28485_v36 = vsub.f32 %v28400_v3, %v30623_v32 }
 0x8d1   :  { %31948 = vst [vmem:[#allocation38_spill] sm:$0xff] %v28475_v25  ;;  %v30635_v33 = vand.u32 4294901760, %v28443_v4  ;;  %v30640_v32 = vand.u32 4294901760, %v28475_v25  ;;  %v28520_v59 = vand.u32 4294901760, %v28451_v57 }
 0x8d2   :  { %v12214_v0 = vadd.f32 %v19577_v52, %v12067_v7  ;;  %v28375_v56 = vadd.f32 %v19612_v58, %v12205_v48  ;;  %v19613_v31 = vpop.f32.mrb[80].mxu1  ;;  %v28462_v7 = vld [vmem:[%s30149_s1 + $0x7b0] sm:$0xff]  ;;  %v30637_v48 = vand.u32 4294901760, %v28424_v11  ;;  %v28497_v58 = vsub.f32 %v28409_v9, %v30624_v47 }
 0x8d3   :  { %v19614_v2 = vpop.f32.mrb[81].mxu1  ;;  %31947 = vst [vmem:[#allocation36_spill] sm:$0xff] %v28462_v7  ;;  %v28492_v52 = vld [vmem:[%s30149_s1 + $0x730] sm:$0xff]  ;;  %v28517_v47 = vpack.c.bf16 %v30632_v60, %v30633_v55  ;;  %v28538_v30 = vsub.f32 %v28443_v4, %v30635_v33  ;;  %v28544_v60 = vsub.f32 %v28448_v13, %v30636_v10  ;;  %v28577_v26 = vsub.f32 %v28475_v25, %v30640_v32 }
 0x8d4   :  { %v19615_v39 = vadd.f32 %v19614_v2, %v19613_v31  ;;  %31949 = vst [vmem:[#allocation52_spill] sm:$0xff] %v28492_v52  ;;  %v30638_v31 = vand.u32 4294901760, %v28457_v61  ;;  %v30639_v2 = vand.u32 4294901760, %v28462_v7  ;;  %v31960_v50 = vand.u32 4294901760, %v28480_v35 }
 0x8d5   :  { %31951 = vst [vmem:[#allocation33_spill] sm:$0xff] %v28517_v47  ;;  %v31966_v46 = vand.u32 4294901760, %v28497_v58  ;;  %v31993_v15 = vand.u32 4294901760, %v28577_v26 }
 0x8d6   :  { %v28402_v43 = vadd.f32 %v19615_v39, %v12214_v0  ;;  %v30634_v0 = vand.u32 4294901760, %v28437_v18  ;;  %v28510_v39 = vsub.f32 %v28430_v22, %v30628_v28  ;;  %v28527_v28 = vld [vmem:[%s30149_s1 + $0x7c0] sm:$0xff]  ;;  %v28560_v33 = vsub.f32 %v28457_v61, %v30638_v31 }
 0x8d7   :  { %31952 = vst [vmem:[#allocation47_spill] sm:$0xff] %v28527_v28  ;;  %v28567_v55 = vsub.f32 %v28462_v7, %v30639_v2  ;;  %v28589_v2 = vld [vmem:[%s30149_s1 + $0x7d8] sm:$0xff]  ;;  %v28595_v32 = vpack.c.bf16 %v31960_v50, %v31959_v8  ;;  %v31962_v31 = vand.u32 4294901760, %v28492_v52  ;;  %v30643_v8 = vand.u32 4294901760, %v28538_v30 }
 0x8d8   :  { %v28533_v27 = vpack.c.bf16 %v30634_v0, %v30637_v48  ;;  %v28555_v0 = vld [vmem:[%s30149_s1 + $0x740] sm:$0xff]  ;;  %v28584_v48 = vld [vmem:[%s30149_s1 + $0x7d0] sm:$0xff]  ;;  %31958 = vst [vmem:[#allocation28_spill] sm:$0xff] %v28589_v2  ;;  %v31972_v62 = vand.u32 4294901760, %v28527_v28  ;;  %v31975_v37 = vand.u32 4294901760, %v28510_v39 }
 0x8d9   :  { %31955 = vst [vmem:[#allocation48_spill] sm:$0xff] %v28555_v0  ;;  %31957 = vst [vmem:[#allocation51_spill] sm:$0xff] %v28584_v48  ;;  %v28600_v10 = vsub.f32 %v28492_v52, %v31962_v31  ;;  %v31968_v31 = vand.u32 4294901760, %v28505_v23  ;;  %v31979_v41 = vand.u32 4294901760, %v28555_v0  ;;  %v31992_v6 = vand.u32 4294901760, %v28567_v55 }
 0x8da   :  { %31953 = vst [vmem:[#allocation59_spill] sm:$0xff] %v28533_v27  ;;  %31961 = vst [vmem:[#allocation45_spill] sm:$0xff] %v28595_v32  ;;  %v31965_v27 = vand.u32 4294901760, %v28485_v36  ;;  %v28640_v47 = vsub.f32 %v28527_v28, %v31972_v62  ;;  %v28658_v62 = vsub.f32 %v28550_v53, %v31977_v49  ;;  %v31985_v49 = vand.u32 4294901760, %v28572_v20 }
 0x8db   :  { %31963 = vst [vmem:[#allocation6_spill] sm:$0xff] %v28600_v10  ;;  %v28619_v32 = vsub.f32 %v28505_v23, %v31968_v31  ;;  %v28635_v31 = vld [vmem:[%s30149_s1 + $0x7e0] sm:$0xff]  ;;  %v28663_v5 = vsub.f32 %v28555_v0, %v31979_v41  ;;  %v31988_v0 = vand.u32 4294901760, %v28584_v48  ;;  %v12710_v53 = vsub.f32 %v28451_v57, %v28520_v59 }
 0x8dc   :  { %v28613_v50 = vpack.c.bf16 %v31966_v46, %v31965_v27  ;;  %v28630_v27 = vld [vmem:[%s30149_s1 + $0x758] sm:$0xff]  ;;  %31971 = vst [vmem:[#allocation58_spill] sm:$0xff] %v28635_v31  ;;  %31973 = vst [vmem:[#allocation30_spill] sm:$0xff] %v28640_v47  ;;  %v28647_v46 = vld [vmem:[%s30149_s1 + $0x7e8] sm:$0xff]  ;;  %v28680_v14 = vsub.f32 %v28572_v20, %v31985_v49 }
 0x8dd   :  { %31969 = vst [vmem:[#allocation62_spill] sm:$0xff] %v28619_v32  ;;  %31970 = vst [vmem:[#allocation42_spill] sm:$0xff] %v28630_v27  ;;  %v31997_v41 = vand.u32 4294901760, %v28619_v32 }
 0x8de   :  { %31967 = vst [vmem:[#allocation57_spill] sm:$0xff] %v28613_v50  ;;  %31974 = vst [vmem:[#allocation43_spill] sm:$0xff] %v28647_v46  ;;  %v28653_v50 = vpack.c.bf16 %v30643_v8, %v31975_v37  ;;  %v31982_v37 = vand.u32 4294901760, %v28544_v60  ;;  %v31983_v8 = vand.u32 4294901760, %v28560_v33  ;;  %v32006_v25 = vand.u32 4294901760, %v28680_v14 }
 0x8df   :  { %31978 = vst [vmem:[#allocation10_spill] sm:$0xff] %v28658_v62  ;;  %31980 = vst [vmem:[#allocation49_spill] sm:$0xff] %v28663_v5 }
 0x8e0   :  { %31976 = vst [vmem:[#allocation7_spill] sm:$0xff] %v28653_v50  ;;  %v28675_v50 = vpack.c.bf16 %v31983_v8, %v31982_v37  ;;  %31986 = vst [vmem:[#allocation35_spill] sm:$0xff] %v28680_v14  ;;  %v28693_v8 = vsub.f32 %v28584_v48, %v31988_v0  ;;  %v31990_v37 = vand.u32 4294901760, %v28589_v2  ;;  %v31995_v0 = vand.u32 4294901760, %v28607_v34 }
 0x8e2   :  { %31984 = vst [vmem:[#allocation39_spill] sm:$0xff] %v28675_v50  ;;  %31989 = vst [vmem:[#allocation27_spill] sm:$0xff] %v28693_v8  ;;  %v28698_v49 = vsub.f32 %v28589_v2, %v31990_v37  ;;  %v28705_v50 = vpack.c.bf16 %v31993_v15, %v31992_v6  ;;  %v28712_v48 = vsub.f32 %v28607_v34, %v31995_v0  ;;  %v31996_v2 = vand.u32 4294901760, %v28600_v10  ;;  %v28739_v6 = vld [vmem:[%s30149_s1 + $0x7f0] sm:$0xff] }
 0x8e3   :  { %v30667_v15 = vand.u32 4294901760, %v28640_v47  ;;  %v31999_v0 = vand.u32 4294901760, %v28630_v27  ;;  %v32005_v10 = vand.u32 4294901760, %v28663_v5  ;;  %v32009_v14 = vand.u32 4294901760, %v28693_v8 }
 0x8e4   :  { %31991 = vst [vmem:[#allocation63_spill] sm:$0xff] %v28698_v49  ;;  %31994 = vst [vmem:[#allocation31_spill] sm:$0xff] %v28705_v50  ;;  %v28719_v28 = vpack.c.bf16 %v31997_v41, %v31996_v2  ;;  %v32000_v2 = vand.u32 4294901760, %v28635_v31  ;;  %v28761_v50 = vld [vmem:[%s30149_s1 + $0x778] sm:$0xff] }
 0x8e5   :  { %v28728_v37 = vsub.f32 %v28630_v27, %v31999_v0  ;;  %v32001_v0 = vand.u32 4294901760, %v28647_v46  ;;  %v28780_v47 = vpack.c.bf16 %v32006_v25, %v32005_v10  ;;  %v30677_v25 = vand.u32 4294901760, %v28761_v50 }
 0x8e6   :  { %31998 = vst [vmem:[#allocation61_spill] sm:$0xff] %v28719_v28  ;;  %v28734_v41 = vsub.f32 %v28635_v31, %v32000_v2  ;;  %v32002_v28 = vand.u32 4294901760, %v28658_v62  ;;  %v12711_v10 = vand.u32 4294901760, %v12710_v53 }
 0x8e7   :  { %v28754_v2 = vsub.f32 %v28647_v46, %v32001_v0  ;;  %v32004_v46 = vand.u32 4294901760, %v28669_v16  ;;  %32007 = vst [vmem:[#allocation41_spill] sm:$0xff] %v28780_v47  ;;  %v30675_v5 = vand.u32 4294901760, %v28728_v37 }
 0x8e8   :  { %v28767_v31 = vpack.c.bf16 %v32002_v28, %v30667_v15  ;;  %v32008_v15 = vand.u32 4294901760, %v28688_v51 }
 0x8e9   :  { %v28773_v52 = vsub.f32 %v28669_v16, %v32004_v46 }
 0x8ea   :  { %v19648_v20 = vpop.f32.mrb[82].mxu0  ;;  %32003 = vst [vmem:[#allocation8_spill] sm:$0xff] %v28767_v31 }
 0x8eb   :  { %v19649_v23 = vpop.f32.mrb[83].mxu0 }
 0x8ec   :  { %v19650_v45 = vadd.f32 %v19649_v23, %v19648_v20  ;;  %v28744_v20 = vld [vmem:[%s30149_s1 + $0x7f8] sm:$0xff]  ;;  %v28749_v23 = vld [vmem:[%s30149_s1 + $0x770] sm:$0xff] }
 0x8ed   :  { %v30676_v31 = vand.u32 4294901760, %v28749_v23 }
 0x8ee   :  { %v12501_v27 = vadd.f32 %v19650_v45, %v28375_v56  ;;  %v19651_v32 = vpop.f32.mrb[84].mxu0  ;;  %v19686_v0 = vpop.f32.mrb[82].mxu1  ;;  %v28785_v45 = vsub.f32 %v28688_v51, %v32008_v15  ;;  %v32010_v15 = vand.u32 4294901760, %v28698_v49 }
 0x8ef   :  { %v19652_v62 = vpop.f32.mrb[85].mxu0  ;;  %v19687_v28 = vpop.f32.mrb[83].mxu1 }
 0x8f0   :  { %v19653_v34 = vadd.f32 %v19652_v62, %v19651_v32  ;;  %v19688_v16 = vadd.f32 %v19687_v28, %v19686_v0  ;;  %v28797_v51 = vpack.c.bf16 %v32010_v15, %v32009_v14  ;;  %v30680_v32 = vand.u32 4294901760, %v28754_v2 }
 0x8f1   :  { %v32012_v62 = vand.u32 4294901760, %v28712_v48  ;;  %v32014_v28 = vand.u32 4294901760, %v28739_v6  ;;  %v32015_v14 = vand.u32 4294901760, %v28744_v20 }
 0x8f2   :  { %32011 = vst [vmem:[#allocation9_spill] sm:$0xff] %v28797_v51  ;;  %v12508_v56 = vadd.f32 %v19653_v34, %v28402_v43  ;;  %v12612_v46 = vadd.f32 %v19688_v16, %v12501_v27  ;;  %v19689_v7 = vpop.f32.mrb[84].mxu1  ;;  %v28820_v16 = vsub.f32 %v28749_v23, %v30676_v31  ;;  %v30679_v43 = vand.u32 4294901760, %v28773_v52 }
 0x8f3   :  { %v28805_v0 = vpack.c.bf16 %v30675_v5, %v32012_v62  ;;  %v19690_v53 = vpop.f32.mrb[85].mxu1  ;;  %v28810_v47 = vsub.f32 %v28739_v6, %v32014_v28  ;;  %v28815_v34 = vsub.f32 %v28744_v20, %v32015_v14  ;;  %v28828_v62 = vsub.f32 %v28761_v50, %v30677_v25 }
 0x8f4   :  { %v28823_v27 = vand.u32 4294901760, %v12612_v46  ;;  %v19691_v15 = vadd.f32 %v19690_v53, %v19689_v7  ;;  %v30678_v28 = vand.u32 4294901760, %v28785_v45  ;;  %v32016_v14 = vand.u32 4294901760, %v28734_v41 }
 0x8f5   :  { %32013 = vst [vmem:[#allocation56_spill] sm:$0xff] %v28805_v0  ;;  %v30684_v53 = vand.u32 4294901760, %v28810_v47  ;;  %v30681_v25 = vand.u32 4294901760, %v28815_v34 }
 0x8f6   :  { %v28835_v5 = vpack.c.bf16 %v30680_v32, %v32016_v14  ;;  %v12719_v31 = vsub.f32 %v12612_v46, %v28823_v27  ;;  %v12619_v0 = vadd.f32 %v19691_v15, %v12508_v56  ;;  %20616 = vmatprep.subr.mxu0 %v28823_v27  ;;  %v28843_v7 = vpack.c.bf16 %v30678_v28, %v30679_v43 }
 0x8f7   :  { %20617 = vmatpush3.msra.mxu0 %v28823_v27  ;;  %v30683_v56 = vand.u32 4294901760, %v28820_v16  ;;  %v30682_v46 = vand.u32 4294901760, %v28828_v62  ;;  %v28857_v15 = vpack.c.bf16 %v30681_v25, %v30684_v53 }
 0x8f8   :  { %32017 = vst [vmem:[#allocation34_spill] sm:$0xff] %v28835_v5  ;;  %32018 = vst [vmem:[#allocation32_spill] sm:$0xff] %v28843_v7  ;;  %v28848_v51 = vand.u32 4294901760, %v12619_v0  ;;  %20619 = vmatmul.mubr.f32.vlgmr.msra.gmra.mrb[24].mxu0 %v12711_v10  ;;  %v12720_v14 = vand.u32 4294901760, %v12719_v31 }
 0x8f9   :  { %20623 = vmatprep.mubr.f32.mxu0 %v28347_v54  ;;  %32019 = vst [vmem:[#allocation29_spill] sm:$0xff] %v28857_v15  ;;  %v28865_v32 = vpack.c.bf16 %v30682_v46, %v30683_v56  ;;  %v32038_v56 = vand.u32 4294901760, %v28560_v33  ;;  %v32069_v15 = vld [vmem:[#allocation35_spill] sm:$0xff] }
 0x8fa   :  { %v13210_v28 = vsub.f32 %v12619_v0, %v28848_v51  ;;  %20646 = vmatprep.subr.mxu1 %v28848_v51  ;;  %v12721_v43 = vsub.f32 %v12719_v31, %v12720_v14 }
 0x8fb   :  { %32020 = vst [vmem:[#allocation50_spill] sm:$0xff] %v28865_v32  ;;  %20647 = vmatpush3.msra.mxu1 %v28848_v51 }
 0x8fc   :  { %20649 = vmatmul.mubr.f32.vlgmr.msra.gmra.mrb[24].mxu1 %v12711_v10  ;;  %v12722_v7 = vand.u32 4294901760, %v12721_v43  ;;  %v13211_v5 = vand.u32 4294901760, %v13210_v28  ;;  %v32024_v10 = vand.u32 4294901760, %v28368_v21 }
 0x8fd   :  { %20653 = vmatprep.mubr.f32.mxu1 %v28347_v54 }
 0x8fe   :  { %20621 = vmatprep.subr.mxu0 %v12722_v7  ;;  %v13212_v25 = vsub.f32 %v13210_v28, %v13211_v5 }
 0x8ff   :  { %20622 = vmatpush3.msra.mxu0 %v12722_v7 }
 0x900   :  { %20624 = vmatmul.mubr.f32.vlgmr.msra.gmra.mrb[24].mxu0 %v28404_v63  ;;  %20626 = vmatprep.subr.mxu0 %v12719_v31  ;;  %v13213_v0 = vand.u32 4294901760, %v13212_v25  ;;  %v32022_v25 = vand.u32 4294901760, %v28419_v24 }
 0x901   :  { %20627 = vmatpush3.msra.mxu0 %v12719_v31  ;;  %20628 = vmatprep.mubr.f32.mxu0 %v28350_v42 }
 0x902   :  { %20631 = vmatprep.subr.mxu0 %v28823_v27  ;;  %20651 = vmatprep.subr.mxu1 %v13213_v0 }
 0x903   :  { %20652 = vmatpush3.msra.mxu1 %v13213_v0  ;;  %v32027_v0 = vand.u32 4294901760, %v28467_v38 }
 0x904   :  { %20654 = vmatmul.mubr.f32.vlgmr.msra.gmra.mrb[24].mxu1 %v28404_v63  ;;  %20656 = vmatprep.subr.mxu1 %v13210_v28 }
 0x905   :  { %20657 = vmatpush3.msra.mxu1 %v13210_v28  ;;  %20658 = vmatprep.mubr.f32.mxu1 %v28350_v42  ;;  %v32021_v42 = vand.u32 4294901760, %v28414_v17 }
 0x906   :  { %20661 = vmatprep.subr.mxu1 %v28848_v51 }
 0x907   :  { %v13889_v31 = vsub.f32 %v28414_v17, %v32021_v42  ;;  %v13903_v42 = vsub.f32 %v28467_v38, %v32027_v0 }
 0x908   :  { %20629 = vmatmul.mubr.f32.vlgmr.msra.gmra.mrb[24].mxu0 %v28451_v57 }
 0x909   :  { %20632 = vmatpush3.msra.mxu0 %v28823_v27  ;;  %20633 = vmatprep.mubr.f32.mxu0 %v28353_v1  ;;  %v13890_v28 = vand.u32 4294901760, %v13889_v31  ;;  %v32028_v31 = vand.u32 4294901760, %v28480_v35 }
 0x90a   :  { %20636 = vmatprep.subr.mxu0 %v12720_v14 }
 0x90c   :  { %20659 = vmatmul.mubr.f32.vlgmr.msra.gmra.mrb[24].mxu1 %v28451_v57  ;;  %v13896_v57 = vsub.f32 %v28419_v24, %v32022_v25  ;;  %v32029_v25 = vand.u32 4294901760, %v28373_v12  ;;  %v32033_v12 = vand.u32 4294901760, %v28510_v39 }
 0x90d   :  { %20662 = vmatpush3.msra.mxu1 %v28848_v51  ;;  %20663 = vmatprep.mubr.f32.mxu1 %v28353_v1  ;;  %v32023_v1 = vand.u32 4294901760, %v28363_v40 }
 0x90e   :  { %20666 = vmatprep.subr.mxu1 %v13211_v5  ;;  %v13897_v7 = vand.u32 4294901760, %v13896_v57  ;;  %v32030_v57 = vand.u32 4294901760, %v28380_v44  ;;  %v13917_v44 = vsub.f32 %v28510_v39, %v32033_v12 }
 0x90f   :  { %v28897_v43 = vpack.c.bf16 %v32024_v10, %v32023_v1  ;;  %v32031_v10 = vand.u32 4294901760, %v28485_v36 }
 0x910   :  { %20634 = vmatmul.mubr.f32.vlgmr.msra.gmra.mrb[24].mxu0 %v28520_v59  ;;  %v22172_v21 = vpack.c.bf16 %v13897_v7, %v13890_v28  ;;  %v28920_v1 = vpack.c.bf16 %v32030_v57, %v32029_v25  ;;  %v32032_v7 = vand.u32 4294901760, %v28497_v58  ;;  %v32035_v57 = vand.u32 4294901760, %v28389_v29 }
 0x911   :  { %20637 = vmatpush3.msra.mxu0 %v12720_v14  ;;  %20638 = vmatprep.mubr.f32.mxu0 %v28347_v54  ;;  %v32026_v14 = vand.u32 4294901760, %v28437_v18  ;;  %v13791_v28 = vsub.f32 %v28485_v36, %v32031_v10  ;;  %v32036_v10 = vand.u32 4294901760, %v28395_v19  ;;  %v32039_v29 = vand.u32 4294901760, %v28400_v3 }
 0x912   :  { %20641 = vmatprep.subr.mxu0 %v28823_v27  ;;  %v32040_v19 = vand.u32 4294901760, %v28409_v9  ;;  %v32045_v3 = vand.u32 4294901760, %v28567_v55 }
 0x913   :  { %v13784_v40 = vsub.f32 %v28437_v18, %v32026_v14  ;;  %v28940_v46 = vpack.c.bf16 %v32036_v10, %v32035_v57  ;;  %v32042_v57 = vand.u32 4294901760, %v28430_v22  ;;  %v32043_v10 = vand.u32 4294901760, %v28443_v4  ;;  %v32050_v4 = vld [vmem:[#allocation36_spill] sm:$0xff] }
 0x914   :  { %20664 = vmatmul.mubr.f32.vlgmr.msra.gmra.mrb[24].mxu1 %v28520_v59  ;;  %v13931_v9 = vsub.f32 %v28567_v55, %v32045_v3 }
 0x915   :  { %20667 = vmatpush3.msra.mxu1 %v13211_v5  ;;  %20668 = vmatprep.mubr.f32.mxu1 %v28347_v54  ;;  %v32025_v5 = vand.u32 4294901760, %v28424_v11  ;;  %v13785_v0 = vand.u32 4294901760, %v13784_v40  ;;  %v32037_v40 = vand.u32 4294901760, %v28544_v60 }
 0x916   :  { %20671 = vmatprep.subr.mxu1 %v28848_v51 }
 0x917   :  { %v13777_v59 = vsub.f32 %v28424_v11, %v32025_v5  ;;  %v13798_v5 = vsub.f32 %v28497_v58, %v32032_v7  ;;  %v13805_v12 = vsub.f32 %v28544_v60, %v32037_v40 }
 0x918   :  { %20639 = vmatmul.mubr.f32.vlgmr.msra.gmra.mrb[24].mxu0 %v28404_v63 }
 0x919   :  { %20642 = vmatpush3.msra.mxu0 %v28823_v27  ;;  %20643 = vmatprep.mubr.f32.mxu0 %v28347_v54  ;;  %v13910_v27 = vsub.f32 %v28480_v35, %v32028_v31  ;;  %v13778_v14 = vand.u32 4294901760, %v13777_v59  ;;  %v32034_v31 = vand.u32 4294901760, %v28538_v30  ;;  %v13799_v59 = vand.u32 4294901760, %v13798_v5  ;;  %v32041_v5 = vld [vmem:[#allocation17_spill] sm:$0xff] }
 0x91a   :  { %22141 = vmatprep.subr.bf16.mxu0 %v28897_v43 }
 0x91b   :  { %v13924_v25 = vsub.f32 %v28538_v30, %v32034_v31  ;;  %v13911_v7 = vand.u32 4294901760, %v13910_v27  ;;  %v13812_v31 = vsub.f32 %v28560_v33, %v32038_v56  ;;  %v13918_v27 = vand.u32 4294901760, %v13917_v44 }
 0x91c   :  { %20669 = vmatmul.mubr.f32.vlgmr.msra.gmra.mrb[24].mxu1 %v28404_v63  ;;  %v28962_v56 = vpack.c.bf16 %v32043_v10, %v32042_v57  ;;  %v32048_v44 = vand.u32 4294901760, %v28457_v61  ;;  %v13806_v10 = vand.u32 4294901760, %v13805_v12 }
 0x91d   :  { %20672 = vmatpush3.msra.mxu1 %v28848_v51  ;;  %20673 = vmatprep.mubr.f32.mxu1 %v28347_v54  ;;  %v13904_v51 = vand.u32 4294901760, %v13903_v42  ;;  %v13792_v54 = vand.u32 4294901760, %v13791_v28  ;;  %v22174_v42 = vpack.c.bf16 %v13785_v0, %v13778_v14  ;;  %v13925_v28 = vand.u32 4294901760, %v13924_v25 }
 0x91e   :  { %22173 = vmatprep.subr.bf16.mxu1 %v22172_v21  ;;  %v28954_v21 = vpack.c.bf16 %v32040_v19, %v32039_v29  ;;  %32044 = vst [vmem:[#allocation55_spill] sm:$0xff] %v28962_v56  ;;  %v32046_v29 = vand.u32 4294901760, %v28577_v26  ;;  %v32047_v0 = vand.u32 4294901760, %v28448_v13  ;;  %v32051_v19 = vand.u32 4294901760, %v32050_v4  ;;  %v32054_v13 = vld [vmem:[#allocation6_spill] sm:$0xff] }
 0x91f   :  { %v22176_v40 = vpack.c.bf16 %v13911_v7, %v13904_v51  ;;  %v22178_v22 = vpack.c.bf16 %v13799_v59, %v13792_v54  ;;  %v32052_v51 = vld [vmem:[#allocation38_spill] sm:$0xff]  ;;  %v13813_v3 = vand.u32 4294901760, %v13812_v31  ;;  %v32055_v53 = vand.u32 4294901760, %v32054_v13 }
 0x920   :  { %20644 = vmatmul.mubr.f32.vlgmr.msra.gmra.mrb[24].mxu0 %v28404_v63  ;;  %v13938_v14 = vsub.f32 %v28577_v26, %v32046_v29  ;;  %v28974_v25 = vpack.c.bf16 %v32048_v44, %v32047_v0  ;;  %v32053_v7 = vand.u32 4294901760, %v32052_v51  ;;  %v22180_v29 = vpack.c.bf16 %v13925_v28, %v13918_v27  ;;  %v32056_v0 = vld [vmem:[#allocation62_spill] sm:$0xff]  ;;  %v32062_v28 = vld [vmem:[#allocation11_spill] sm:$0xff] }
 0x921   :  { %22143 = vmatpush3.bf16.msra.mxu0 %v28920_v1  ;;  %13747 = vmatprep.mubr.f32.mxu0 %v32041_v5  ;;  %v13819_v61 = vsub.f32 %v32054_v13, %v32055_v53  ;;  %v32057_v44 = vand.u32 4294901760, %v32056_v0  ;;  %v13932_v54 = vand.u32 4294901760, %v13931_v9  ;;  %v32058_v4 = vld [vmem:[#allocation30_spill] sm:$0xff]  ;;  %v32063_v53 = vld [vmem:[#allocation52_spill] sm:$0xff]  ;;  %v22182_v32 = vpack.c.bf16 %v13813_v3, %v13806_v10  ;;  %v32073_v3 = vld [vmem:[#allocation47_spill] sm:$0xff] }
 0x922   :  { %22145 = vmatprep.subr.bf16.mxu0 %v28940_v46  ;;  %32049 = vst [vmem:[#allocation53_spill] sm:$0xff] %v28974_v25  ;;  %v28981_v57 = vpack.c.bf16 %v32053_v7, %v32051_v19  ;;  %v13939_v59 = vand.u32 4294901760, %v13938_v14  ;;  %v32059_v12 = vand.u32 4294901760, %v32058_v4  ;;  %v32060_v19 = vld [vmem:[#allocation10_spill] sm:$0xff]  ;;  %v32064_v51 = vand.u32 4294901760, %v32063_v53 }
 0x923   :  { %v32065_v7 = vld [vmem:[#allocation54_spill] sm:$0xff]  ;;  %v32071_v53 = vand.u32 4294901760, %v28693_v8 }
 0x924   :  { %20674 = vmatmul.mubr.f32.vlgmr.msra.gmra.mrb[24].mxu1 %v28404_v63  ;;  %v13826_v63 = vsub.f32 %v32056_v0, %v32057_v44  ;;  %v13945_v31 = vsub.f32 %v32058_v4, %v32059_v12  ;;  %v32066_v5 = vand.u32 4294901760, %v32065_v7 }
 0x925   :  { %22147 = vmatpush3.bf16.msra.mxu0 %v28954_v21  ;;  %22175 = vmatpush3.bf16.msra.mxu1 %v22174_v42  ;;  %v32061_v42 = vand.u32 4294901760, %v32060_v19  ;;  %v13959_v7 = vsub.f32 %v28693_v8, %v32071_v53 }
 0x926   :  { %22149 = vmatprep.subr.bf16.mxu0 %v28962_v56  ;;  %22177 = vmatprep.subr.bf16.mxu1 %v22176_v40  ;;  %v29002_v44 = vpack.c.bf16 %v32066_v5, %v32064_v51  ;;  %v32067_v40 = vld [vmem:[#allocation49_spill] sm:$0xff]  ;;  %v32070_v56 = vand.u32 4294901760, %v32069_v15  ;;  %v32072_v5 = vand.u32 4294901760, %v28698_v49  ;;  %v32074_v51 = vand.u32 4294901760, %v32073_v3 }
 0x927   :  { %v13952_v27 = vsub.f32 %v32060_v19, %v32061_v42  ;;  %13998 = vmatprep.mubr.f32.mxu1 %v32062_v28  ;;  %v32068_v9 = vand.u32 4294901760, %v32067_v40  ;;  %v13820_v42 = vand.u32 4294901760, %v13819_v61  ;;  %v13827_v28 = vand.u32 4294901760, %v13826_v63  ;;  %v32079_v19 = vld [vmem:[#allocation64_spill] sm:$0xff] }
 0x928   :  { %v13840_v12 = vsub.f32 %v32069_v15, %v32070_v56  ;;  %v13966_v10 = vsub.f32 %v28698_v49, %v32072_v5  ;;  %v13946_v61 = vand.u32 4294901760, %v13945_v31  ;;  %v32080_v53 = vand.u32 4294901760, %v32079_v19 }
 0x929   :  { %v13833_v14 = vsub.f32 %v32067_v40, %v32068_v9  ;;  %22151 = vmatpush3.bf16.msra.mxu0 %v28974_v25  ;;  %22179 = vmatpush3.bf16.msra.mxu1 %v22178_v22  ;;  %v32075_v9 = vld [vmem:[#allocation60_spill] sm:$0xff]  ;;  %v22184_v22 = vpack.c.bf16 %v13939_v59, %v13932_v54  ;;  %v13953_v63 = vand.u32 4294901760, %v13952_v27  ;;  %v32081_v49 = vand.u32 4294901760, %v28712_v48  ;;  %v32083_v59 = vld [vmem:[#allocation51_spill] sm:$0xff] }
 0x92a   :  { %22153 = vmatprep.subr.bf16.mxu0 %v28981_v57  ;;  %22181 = vmatprep.subr.bf16.mxu1 %v22180_v29  ;;  %v32076_v56 = vand.u32 4294901760, %v32075_v9  ;;  %v32077_v40 = vld [vmem:[#allocation48_spill] sm:$0xff]  ;;  %v13841_v5 = vand.u32 4294901760, %v13840_v12  ;;  %v32082_v3 = vand.u32 4294901760, %v28728_v37  ;;  %v22186_v54 = vpack.c.bf16 %v13827_v28, %v13820_v42 }
 0x92b   :  { %v32078_v25 = vand.u32 4294901760, %v32077_v40  ;;  %v13834_v4 = vand.u32 4294901760, %v13833_v14  ;;  %v13847_v29 = vsub.f32 %v28712_v48, %v32081_v49  ;;  %v32084_v31 = vand.u32 4294901760, %v32083_v59  ;;  %v32085_v27 = vld [vmem:[#allocation28_spill] sm:$0xff] }
 0x92c   :  { %v29022_v15 = vpack.c.bf16 %v32076_v56, %v32074_v51  ;;  %v13854_v51 = vsub.f32 %v28728_v37, %v32082_v3  ;;  %v32086_v19 = vand.u32 4294901760, %v32085_v27  ;;  %v13960_v40 = vand.u32 4294901760, %v13959_v7  ;;  %v32089_v28 = vld [vmem:[#allocation40_spill] sm:$0xff]  ;;  %v32095_v27 = vld [vmem:[#allocation43_spill] sm:$0xff] }
 0x92d   :  { %v29028_v8 = vpack.c.bf16 %v32080_v53, %v32078_v25  ;;  %22155 = vmatpush3.bf16.msra.mxu0 %v29002_v44  ;;  %22183 = vmatpush3.bf16.msra.mxu1 %v22182_v32  ;;  %v13967_v14 = vand.u32 4294901760, %v13966_v10  ;;  %v22188_v49 = vpack.c.bf16 %v13953_v63, %v13946_v61  ;;  %v32087_v12 = vand.u32 4294901760, %v28734_v41  ;;  %v32091_v53 = vld [vmem:[#allocation42_spill] sm:$0xff] }
 0x92e   :  { %v29041_v25 = vpack.c.bf16 %v32086_v19, %v32084_v31  ;;  %22157 = vmatprep.subr.bf16.mxu0 %v29022_v15  ;;  %22185 = vmatprep.subr.bf16.mxu1 %v22184_v22  ;;  %v32088_v56 = vand.u32 4294901760, %v28754_v2  ;;  %v32090_v42 = vand.u32 4294901760, %v32089_v28  ;;  %v32092_v3 = vand.u32 4294901760, %v32091_v53  ;;  %v32093_v10 = vld [vmem:[#allocation58_spill] sm:$0xff] }
 0x92f   :  { %v13973_v9 = vsub.f32 %v28734_v41, %v32087_v12  ;;  %v22190_v7 = vpack.c.bf16 %v13841_v5, %v13834_v4  ;;  %v32094_v31 = vand.u32 4294901760, %v32093_v10  ;;  %v32096_v22 = vand.u32 4294901760, %v32095_v27  ;;  %v32103_v10 = vld [vmem:[#allocation5_spill] sm:$0xff] }
 0x930   :  { %v13980_v32 = vsub.f32 %v28754_v2, %v32088_v56  ;;  %v29054_v59 = vpack.c.bf16 %v32092_v3, %v32090_v42  ;;  %v13848_v63 = vand.u32 4294901760, %v13847_v29  ;;  %v13855_v19 = vand.u32 4294901760, %v13854_v51 }
 0x931   :  { %v29060_v61 = vpack.c.bf16 %v32096_v22, %v32094_v31  ;;  %22159 = vmatpush3.bf16.msra.mxu0 %v29028_v8  ;;  %22187 = vmatpush3.bf16.msra.mxu1 %v22186_v54  ;;  %v22192_v12 = vpack.c.bf16 %v13967_v14, %v13960_v40  ;;  %v32097_v56 = vand.u32 4294901760, %v28773_v52  ;;  %v32098_v42 = vand.u32 4294901760, %v28785_v45  ;;  %v32101_v14 = vld [vmem:[#allocation46_spill] sm:$0xff] }
 0x932   :  { %22161 = vmatprep.subr.bf16.mxu0 %v29041_v25  ;;  %22189 = vmatprep.subr.bf16.mxu1 %v22188_v49  ;;  %v13974_v5 = vand.u32 4294901760, %v13973_v9  ;;  %v13981_v53 = vand.u32 4294901760, %v13980_v32  ;;  %v32099_v29 = vand.u32 4294901760, %v28810_v47  ;;  %v32100_v54 = vand.u32 4294901760, %v28815_v34 }
 0x933   :  { %v13861_v28 = vsub.f32 %v28773_v52, %v32097_v56  ;;  %v13868_v4 = vsub.f32 %v28785_v45, %v32098_v42  ;;  %v32102_v3 = vand.u32 4294901760, %v32101_v14  ;;  %v32104_v31 = vand.u32 4294901760, %v32103_v10 }
 0x934   :  { %v13987_v51 = vsub.f32 %v28810_v47, %v32099_v29  ;;  %v13994_v40 = vsub.f32 %v28815_v34, %v32100_v54  ;;  %v22194_v22 = vpack.c.bf16 %v13855_v19, %v13848_v63  ;;  %v32105_v32 = vand.u32 4294901760, %v28820_v16 }
 0x935   :  { %v29080_v27 = vpack.c.bf16 %v32104_v31, %v32102_v3  ;;  %22163 = vmatpush3.bf16.msra.mxu0 %v29054_v59  ;;  %22191 = vmatpush3.bf16.msra.mxu1 %v22190_v7  ;;  %v13862_v49 = vand.u32 4294901760, %v13861_v28  ;;  %v13869_v9 = vand.u32 4294901760, %v13868_v4  ;;  %v32106_v42 = vand.u32 4294901760, %v28828_v62 }
 0x936   :  { %v13875_v56 = vsub.f32 %v28820_v16, %v32105_v32  ;;  %22165 = vmatprep.subr.bf16.mxu0 %v29060_v61  ;;  %22193 = vmatprep.subr.bf16.mxu1 %v22192_v12  ;;  %v32107_v54 = vand.u32 4294901760, %v28739_v6  ;;  %v32108_v63 = vand.u32 4294901760, %v28744_v20  ;;  %v22196_v7 = vpack.c.bf16 %v13981_v53, %v13974_v5  ;;  %v32111_v53 = vld [vmem:[#allocation18_spill] sm:$0xff] }
 0x937   :  { %v13882_v29 = vsub.f32 %v28828_v62, %v32106_v42  ;;  %v13988_v28 = vand.u32 4294901760, %v13987_v51  ;;  %v13995_v4 = vand.u32 4294901760, %v13994_v40  ;;  %v32109_v14 = vand.u32 4294901760, %v28749_v23  ;;  %v32120_v40 = vld [vmem:[#allocation10_spill] sm:$0xff]  ;;  %v32125_v42 = vld [vmem:[#allocation27_spill] sm:$0xff] }
 0x938   :  { %v29094_v19 = vpack.c.bf16 %v32108_v63, %v32107_v54  ;;  %v32110_v3 = vand.u32 4294901760, %v28761_v50  ;;  %v22198_v31 = vpack.c.bf16 %v13869_v9, %v13862_v49  ;;  %v13876_v12 = vand.u32 4294901760, %v13875_v56  ;;  %v32121_v49 = vld [vmem:[#allocation15_spill] sm:$0xff] }
 0x939   :  { %22167 = vmatpush3.bf16.msra.mxu0 %v29080_v27  ;;  %22195 = vmatpush3.bf16.msra.mxu1 %v22194_v22  ;;  %v13883_v32 = vand.u32 4294901760, %v13882_v29  ;;  %v22200_v6 = vpack.c.bf16 %v13995_v4, %v13988_v28  ;;  %v22204_v20 = vpack.c.bf16 %v28419_v24, %v28414_v17  ;;  %v22206_v23 = vpack.c.bf16 %v28437_v18, %v28424_v11  ;;  %v32112_v24 = vld [vmem:[#allocation25_spill] sm:$0xff]  ;;  %v32113_v11 = vld [vmem:[#allocation12_spill] sm:$0xff]  ;;  %v32114_v18 = vld [vmem:[#allocation26_spill] sm:$0xff] }
 0x93a   :  { %v29101_v10 = vpack.c.bf16 %v32110_v3, %v32109_v14  ;;  %22169 = vmatprep.subr.bf16.mxu0 %v29094_v19  ;;  %22197 = vmatprep.subr.bf16.mxu1 %v22196_v7  ;;  %v22208_v50 = vpack.c.bf16 %v28480_v35, %v28467_v38  ;;  %v22210_v51 = vpack.c.bf16 %v28497_v58, %v28485_v36  ;;  %v32115_v36 = vld [vmem:[#allocation19_spill] sm:$0xff]  ;;  %v32117_v58 = vld [vmem:[#allocation21_spill] sm:$0xff]  ;;  %v32138_v14 = vld [vmem:[#allocation24_spill] sm:$0xff] }
 0x93b   :  { %v22202_v5 = vpack.c.bf16 %v13883_v32, %v13876_v12  ;;  %v22212_v17 = vpack.c.bf16 %v28538_v30, %v28510_v39  ;;  %v22214_v38 = vpack.c.bf16 %v28560_v33, %v28544_v60  ;;  %v22216_v35 = vpack.c.bf16 %v28577_v26, %v28567_v55  ;;  %v32116_v30 = vld [vmem:[#allocation13_spill] sm:$0xff]  ;;  %v32118_v60 = vld [vmem:[#allocation55_spill] sm:$0xff]  ;;  %v32119_v33 = vld [vmem:[#allocation30_spill] sm:$0xff] }
 0x93c   :  { %v22218_v39 = vpack.c.bf16 %v32056_v0, %v32054_v13  ;;  %v22220_v22 = vpack.c.bf16 %v32120_v40, %v32119_v33  ;;  %v32122_v26 = vld [vmem:[#allocation53_spill] sm:$0xff]  ;;  %v32124_v9 = vld [vmem:[#allocation35_spill] sm:$0xff]  ;;  %v22226_v0 = vpack.c.bf16 %v28728_v37, %v28712_v48  ;;  %v22228_v54 = vpack.c.bf16 %v28754_v2, %v28734_v41  ;;  %v32128_v37 = vld [vmem:[#allocation14_spill] sm:$0xff] }
 0x93d   :  { %22171 = vmatpush3.bf16.msra.mxu0 %v29101_v10  ;;  %22199 = vmatpush3.bf16.msra.mxu1 %v22198_v31  ;;  %v32123_v55 = vld [vmem:[#allocation49_spill] sm:$0xff]  ;;  %v32126_v29 = vld [vmem:[#allocation63_spill] sm:$0xff]  ;;  %v22230_v63 = vpack.c.bf16 %v28785_v45, %v28773_v52  ;;  %v22232_v7 = vpack.c.bf16 %v28815_v34, %v28810_v47  ;;  %v22234_v48 = vpack.c.bf16 %v28828_v62, %v28820_v16  ;;  %v32130_v41 = vld [vmem:[#allocation20_spill] sm:$0xff] }
 0x93e   :  { %22201 = vmatprep.subr.bf16.mxu1 %v22200_v6  ;;  %22205 = vmatprep.subr.bf16.mxu0 %v22204_v20  ;;  %v22222_v56 = vpack.c.bf16 %v32124_v9, %v32123_v55  ;;  %v22224_v13 = vpack.c.bf16 %v32126_v29, %v32125_v42  ;;  %v32127_v52 = vld [vmem:[#allocation33_spill] sm:$0xff]  ;;  %v32129_v47 = vld [vmem:[#allocation59_spill] sm:$0xff]  ;;  %v32133_v34 = vld [vmem:[#allocation16_spill] sm:$0xff] }
 0x93f   :  { %v32131_v2 = vld [vmem:[#allocation45_spill] sm:$0xff]  ;;  %v32132_v45 = vld [vmem:[#allocation23_spill] sm:$0xff]  ;;  %v32135_v62 = vld [vmem:[#allocation22_spill] sm:$0xff] }
 0x940   :  { %13753 = vmatmul.mubr.f32.vlgmr.msra.gmra.mrb[86].mxu0 %v32111_v53  ;;  %v32134_v16 = vld [vmem:[#allocation57_spill] sm:$0xff]  ;;  %v32136_v28 = vld [vmem:[#allocation7_spill] sm:$0xff]  ;;  %v32142_v31 = vld [vmem:[#allocation8_spill] sm:$0xff] }
 0x941   :  { %22203 = vmatpush3.bf16.msra.mxu1 %v22202_v5  ;;  %22207 = vmatpush3.bf16.msra.mxu0 %v22206_v23  ;;  %v32137_v4 = vld [vmem:[#allocation11_spill] sm:$0xff]  ;;  %v32144_v12 = vld [vmem:[#allocation9_spill] sm:$0xff]  ;;  %v32146_v32 = vld [vmem:[#allocation34_spill] sm:$0xff] }
 0x942   :  { %22209 = vmatprep.subr.bf16.mxu0 %v22208_v50  ;;  %22237 = vmatprep.subr.bf16.mxu1 %v28897_v43  ;;  %v32139_v3 = vld [vmem:[#allocation39_spill] sm:$0xff]  ;;  %v32147_v6 = vld [vmem:[#allocation32_spill] sm:$0xff]  ;;  %v29552_v53 = vld [vmem:[%s30149_s1 + $0x868] sm:$0xff] }
 0x943   :  { %13762 = vmatprep.mubr.f32.mxu0 %v32112_v24  ;;  %32190 = vst [vmem:[#allocation63_spill] sm:$0xff] %v29552_v53 }
 0x944   :  { %14000 = vmatmul.mubr.f32.vlgmr.msra.gmra.mrb[86].mxu1 %v32113_v11  ;;  %13768 = vmatmul.mubr.f32.gmra.mrb[88].mxu0 %v32114_v18  ;;  %v29533_v18 = vld [vmem:[%s30149_s1 + $0x860] sm:$0xff] }
 0x945   :  { %22211 = vmatpush3.bf16.msra.mxu0 %v22210_v51  ;;  %22239 = vmatpush3.bf16.msra.mxu1 %v28920_v1  ;;  %32184 = vst [vmem:[#allocation49_spill] sm:$0xff] %v29533_v18 }
 0x946   :  { %22213 = vmatprep.subr.bf16.mxu0 %v22212_v17  ;;  %22241 = vmatprep.subr.bf16.mxu1 %v28940_v46 }
 0x947   :  { %14005 = vmatprep.mubr.f32.mxu1 %v32115_v36  ;;  %14142 = vmatprep.mubr.f32.mxu0 %v32116_v30 }
 0x948   :  { %14007 = vmatmul.mubr.f32.gmra.mrb[88].mxu1 %v32117_v58 }
 0x949   :  { %22215 = vmatpush3.bf16.msra.mxu0 %v22214_v38  ;;  %22243 = vmatpush3.bf16.msra.mxu1 %v28954_v21 }
 0x94a   :  { %22217 = vmatprep.subr.bf16.mxu0 %v22216_v35  ;;  %22245 = vmatprep.subr.bf16.mxu1 %v32118_v60 }
 0x94b   :  { %14258 = vmatprep.mubr.f32.mxu1 %v32121_v49 }
 0x94d   :  { %22219 = vmatpush3.bf16.msra.mxu0 %v22218_v39  ;;  %22247 = vmatpush3.bf16.msra.mxu1 %v32122_v26 }
 0x94e   :  { %22221 = vmatprep.subr.bf16.mxu0 %v22220_v22  ;;  %22249 = vmatprep.subr.bf16.mxu1 %v28981_v57 }
 0x951   :  { %22223 = vmatpush3.bf16.msra.mxu0 %v22222_v56  ;;  %22251 = vmatpush3.bf16.msra.mxu1 %v29002_v44 }
 0x952   :  { %22225 = vmatprep.subr.bf16.mxu0 %v22224_v13  ;;  %22253 = vmatprep.subr.bf16.mxu1 %v29022_v15 }
 0x955   :  { %22227 = vmatpush3.bf16.msra.mxu0 %v22226_v0  ;;  %22255 = vmatpush3.bf16.msra.mxu1 %v29028_v8 }
 0x956   :  { %22229 = vmatprep.subr.bf16.mxu0 %v22228_v54  ;;  %22257 = vmatprep.subr.bf16.mxu1 %v29041_v25  ;;  %v17845_v54 = vld [vmem:[%s30150_s2 + $0x78] sm:$0xff] }
 0x959   :  { %22231 = vmatpush3.bf16.msra.mxu0 %v22230_v63  ;;  %22259 = vmatpush3.bf16.msra.mxu1 %v29054_v59 }
 0x95a   :  { %22233 = vmatprep.subr.bf16.mxu0 %v22232_v7  ;;  %22261 = vmatprep.subr.bf16.mxu1 %v29060_v61 }
 0x95d   :  { %22235 = vmatpush3.bf16.msra.mxu0 %v22234_v48  ;;  %22263 = vmatpush3.bf16.msra.mxu1 %v29080_v27  ;;  %v29227_v48 = vld [vmem:[%s30149_s1 + $0x880] sm:$0xff] }
 0x95e   :  { %22265 = vmatprep.subr.bf16.mxu1 %v29094_v19  ;;  %22269 = vmatprep.subr.bf16.mxu0 %v32127_v52  ;;  %v29232_v52 = vld [vmem:[%s30149_s1 + $0x888] sm:$0xff] }
 0x960   :  { %14145 = vmatmul.mubr.f32.vlgmr.msra.gmra.mrb[90].mxu0 %v32128_v37 }
 0x961   :  { %22267 = vmatpush3.bf16.msra.mxu1 %v29101_v10  ;;  %22271 = vmatpush3.bf16.msra.mxu0 %v32129_v47  ;;  %v29237_v47 = vld [vmem:[%s30149_s1 + $0x800] sm:$0xff] }
 0x962   :  { %14151 = vmatprep.mubr.f32.mxu0 %v32130_v41  ;;  %22273 = vmatprep.subr.bf16.mxu0 %v32131_v2  ;;  %v29471_v41 = vld [vmem:[%s30149_s1 + $0x850] sm:$0xff] }
 0x963   :  { %22301 = vmatprep.subr.bf16.mxu1 %v28897_v43  ;;  %v32140_v43 = vld [vmem:[#allocation31_spill] sm:$0xff]  ;;  %32167 = vst [vmem:[#allocation40_spill] sm:$0xff] %v29471_v41 }
 0x964   :  { %14154 = vmatmul.mubr.f32.gmra.mrb[92].mxu0 %v32132_v45  ;;  %14262 = vmatmul.mubr.f32.vlgmr.msra.gmra.mrb[90].mxu1 %v32133_v34 }
 0x965   :  { %22275 = vmatpush3.bf16.msra.mxu0 %v32134_v16  ;;  %22303 = vmatpush3.bf16.msra.mxu1 %v28920_v1  ;;  %v32141_v1 = vld [vmem:[#allocation61_spill] sm:$0xff] }
 0x966   :  { %14269 = vmatprep.mubr.f32.mxu1 %v32135_v62  ;;  %22277 = vmatprep.subr.bf16.mxu0 %v32136_v28 }
 0x967   :  { %22305 = vmatprep.subr.bf16.mxu1 %v28940_v46  ;;  %14439 = vmatprep.mubr.f32.mxu0 %v32137_v4  ;;  %v32143_v46 = vld [vmem:[#allocation41_spill] sm:$0xff] }
 0x968   :  { %14273 = vmatmul.mubr.f32.gmra.mrb[92].mxu1 %v32138_v14 }
 0x969   :  { %22279 = vmatpush3.bf16.msra.mxu0 %v32139_v3  ;;  %22307 = vmatpush3.bf16.msra.mxu1 %v28954_v21  ;;  %v32145_v21 = vld [vmem:[#allocation56_spill] sm:$0xff]  ;;  %v29244_v3 = vld [vmem:[%s30149_s1 + $0x808] sm:$0xff] }
 0x96a   :  { %22281 = vmatprep.subr.bf16.mxu0 %v32140_v43  ;;  %22309 = vmatprep.subr.bf16.mxu1 %v32118_v60 }
 0x96b   :  { %14550 = vmatprep.mubr.f32.mxu1 %v32137_v4 }
 0x96d   :  { %22283 = vmatpush3.bf16.msra.mxu0 %v32141_v1  ;;  %22311 = vmatpush3.bf16.msra.mxu1 %v32122_v26  ;;  %v14571_v1 = vsel %vm1934_vm0, %v17845_v54, 0 }
 0x96e   :  { %22285 = vmatprep.subr.bf16.mxu0 %v32142_v31  ;;  %22313 = vmatprep.subr.bf16.mxu1 %v28981_v57  ;;  %v32148_v57 = vld [vmem:[#allocation29_spill] sm:$0xff]  ;;  %v30703_v31 = vand.u32 4294901760, %v29227_v48 }
 0x971   :  { %22287 = vmatpush3.bf16.msra.mxu0 %v32143_v46  ;;  %22315 = vmatpush3.bf16.msra.mxu1 %v29002_v44  ;;  %v32149_v44 = vld [vmem:[#allocation50_spill] sm:$0xff]  ;;  %v30702_v46 = vand.u32 4294901760, %v29232_v52 }
 0x972   :  { %22289 = vmatprep.subr.bf16.mxu0 %v32144_v12  ;;  %22317 = vmatprep.subr.bf16.mxu1 %v29022_v15  ;;  %v30701_v12 = vand.u32 4294901760, %v29237_v47 }
 0x975   :  { %22291 = vmatpush3.bf16.msra.mxu0 %v32145_v21  ;;  %22319 = vmatpush3.bf16.msra.mxu1 %v29028_v8  ;;  %v17844_v8 = vld [vmem:[%s30150_s2 + $0x70] sm:$0xff] }
 0x976   :  { %22293 = vmatprep.subr.bf16.mxu0 %v32146_v32  ;;  %22321 = vmatprep.subr.bf16.mxu1 %v29041_v25  ;;  %v14568_v15 = vsel %vm1934_vm0, %v17844_v8, 0  ;;  %v29253_v32 = vld [vmem:[%s30149_s1 + $0x890] sm:$0xff] }
 0x977   :  { %v29211_v25 = vand.u32 4294901760, %v14568_v15 }
 0x979   :  { %22295 = vmatpush3.bf16.msra.mxu0 %v32147_v6  ;;  %22323 = vmatpush3.bf16.msra.mxu1 %v29054_v59  ;;  %v29214_v59 = vsub.f32 %v14568_v15, %v29211_v25  ;;  %v30699_v6 = vand.u32 4294901760, %v29244_v3  ;;  %v29268_v15 = vand.u32 4294901760, %v14571_v1 }
 0x97a   :  { %22297 = vmatprep.subr.bf16.mxu0 %v32148_v57  ;;  %22325 = vmatprep.subr.bf16.mxu1 %v29060_v61  ;;  %v29259_v57 = vld [vmem:[%s30149_s1 + $0x898] sm:$0xff] }
 0x97b   :  { %v29217_v61 = vand.u32 4294901760, %v29214_v59 }
 0x97d   :  { %22299 = vmatpush3.bf16.msra.mxu0 %v32149_v44  ;;  %22327 = vmatpush3.bf16.msra.mxu1 %v29080_v27  ;;  %v14642_v27 = vsub.f32 %v29214_v59, %v29217_v61  ;;  %v29264_v44 = vld [vmem:[%s30149_s1 + $0x810] sm:$0xff] }
 0x97e   :  { %22329 = vmatprep.subr.bf16.mxu1 %v29094_v19 }
 0x97f   :  { %v14643_v19 = vand.u32 4294901760, %v14642_v27  ;;  %v29273_v27 = vld [vmem:[%s30149_s1 + $0x818] sm:$0xff] }
 0x980   :  { %14441 = vmatmul.mubr.f32.vlgmr.msra.gmra.mrb[94].mxu0 %v32113_v11 }
 0x981   :  { %22331 = vmatpush3.bf16.msra.mxu1 %v29101_v10  ;;  %14446 = vmatprep.mubr.f32.mxu0 %v32115_v36 }
 0x984   :  { %14448 = vmatmul.mubr.f32.gmra.mrb[96].mxu0 %v32117_v58  ;;  %14552 = vmatmul.mubr.f32.vlgmr.msra.gmra.mrb[94].mxu1 %v32113_v11 }
 0x985   :  { %14557 = vmatprep.mubr.f32.mxu1 %v32115_v36  ;;  %20678 = vmatprep.mubr.f32.mxu0 %v14643_v19 }
 0x988   :  { %14559 = vmatmul.mubr.f32.gmra.mrb[96].mxu1 %v32117_v58 }
 0x989   :  { %20708 = vmatprep.mubr.f32.mxu1 %v14643_v19  ;;  %v29278_v19 = vsub.f32 %v29227_v48, %v30703_v31  ;;  %v29436_v31 = vld [vmem:[%s30149_s1 + $0x848] sm:$0xff] }
 0x98a   :  { %32159 = vst [vmem:[#allocation60_spill] sm:$0xff] %v29436_v31 }
 0xa13   :  { %v19760_v10 = vpop.f32.mrb[86].mxu0 }
 0xa14   :  { %v19761_v20 = vpop.f32.mrb[87].mxu0 }
 0xa15   :  { %v19762_v5 = vadd.f32 %v19761_v20, %v19760_v10  ;;  %v29283_v10 = vsub.f32 %v29232_v52, %v30702_v46  ;;  %v29288_v20 = vsub.f32 %v29237_v47, %v30701_v12 }
 0xa17   :  { %v19798_v23 = vpop.f32.mrb[86].mxu1  ;;  %v19763_v50 = vpop.f32.mrb[88].mxu0 }
 0xa18   :  { %v19799_v51 = vpop.f32.mrb[87].mxu1  ;;  %v19764_v17 = vpop.f32.mrb[89].mxu0 }
 0xa19   :  { %v19800_v38 = vadd.f32 %v19799_v51, %v19798_v23  ;;  %v19765_v35 = vadd.f32 %v19764_v17, %v19763_v50  ;;  %v29294_v23 = vld [vmem:[%s30149_s1 + $0x8a0] sm:$0xff]  ;;  %v30697_v50 = vand.u32 4294901760, %v29259_v57  ;;  %v30695_v51 = vand.u32 4294901760, %v29264_v44 }
 0xa1a   :  { %v29301_v17 = vsub.f32 %v29244_v3, %v30699_v6  ;;  %v29414_v6 = vld [vmem:[%s30149_s1 + $0x8c8] sm:$0xff] }
 0xa1b   :  { %v14002_v39 = vadd.f32 %v19800_v38, %v19762_v5  ;;  %v19801_v60 = vpop.f32.mrb[88].mxu1  ;;  %v30698_v5 = vand.u32 4294901760, %v29253_v32  ;;  %v30696_v38 = vand.u32 4294901760, %v29273_v27  ;;  %32157 = vst [vmem:[#allocation54_spill] sm:$0xff] %v29414_v6  ;;  %v32180_v30 = vand.u32 4294901760, %v29414_v6 }
 0xa1c   :  { %v19802_v33 = vpop.f32.mrb[89].mxu1 }
 0xa1d   :  { %v19803_v40 = vadd.f32 %v19802_v33, %v19801_v60  ;;  %v29315_v60 = vsub.f32 %v14571_v1, %v29268_v15  ;;  %v30700_v33 = vand.u32 4294901760, %v29294_v23  ;;  %v29369_v1 = vld [vmem:[%s30149_s1 + $0x838] sm:$0xff] }
 0xa1e   :  { %32153 = vst [vmem:[#allocation38_spill] sm:$0xff] %v29369_v1 }
 0xa1f   :  { %v14009_v22 = vadd.f32 %v19803_v40, %v19765_v35  ;;  %v29307_v35 = vld [vmem:[%s30149_s1 + $0x8a8] sm:$0xff] }
 0xa20   :  { %v29321_v40 = vld [vmem:[%s30149_s1 + $0x828] sm:$0xff] }
 0xa33   :  { %v19836_v26 = vpop.f32.mrb[90].mxu0 }
 0xa34   :  { %v19837_v55 = vpop.f32.mrb[91].mxu0 }
 0xa35   :  { %v19838_v9 = vadd.f32 %v19837_v55, %v19836_v26  ;;  %v29331_v26 = vsub.f32 %v29253_v32, %v30698_v5  ;;  %v30705_v55 = vand.u32 4294901760, %v29278_v19 }
 0xa37   :  { %v14147_v56 = vadd.f32 %v19838_v9, %v14002_v39  ;;  %v19839_v42 = vpop.f32.mrb[92].mxu0  ;;  %v19874_v29 = vpop.f32.mrb[90].mxu1  ;;  %v29312_v39 = vld [vmem:[%s30149_s1 + $0x820] sm:$0xff]  ;;  %v30704_v9 = vand.u32 4294901760, %v29283_v10  ;;  %v32162_v14 = vand.u32 4294901760, %v29331_v26 }
 0xa38   :  { %v19840_v13 = vpop.f32.mrb[93].mxu0  ;;  %v19875_v0 = vpop.f32.mrb[91].mxu1  ;;  %v30708_v54 = vand.u32 4294901760, %v29312_v39 }
 0xa39   :  { %v19841_v63 = vadd.f32 %v19840_v13, %v19839_v42  ;;  %v19876_v7 = vadd.f32 %v19875_v0, %v19874_v29  ;;  %v29339_v42 = vld [vmem:[%s30149_s1 + $0x8b8] sm:$0xff]  ;;  %v29344_v29 = vsub.f32 %v29259_v57, %v30697_v50  ;;  %v29349_v13 = vsub.f32 %v29264_v44, %v30695_v51 }
 0xa3a   :  { %32151 = vst [vmem:[#allocation44_spill] sm:$0xff] %v29339_v42  ;;  %v30707_v0 = vand.u32 4294901760, %v29307_v35  ;;  %v30712_v51 = vand.u32 4294901760, %v29339_v42  ;;  %v29384_v50 = vand.u32 4294901760, %v29315_v60 }
 0xa3b   :  { %v14156_v2 = vadd.f32 %v19841_v63, %v14009_v22  ;;  %v29239_v16 = vadd.f32 %v19876_v7, %v14147_v56  ;;  %v19877_v28 = vpop.f32.mrb[92].mxu1  ;;  %v29326_v22 = vld [vmem:[%s30149_s1 + $0x8b0] sm:$0xff]  ;;  %v30709_v56 = vand.u32 4294901760, %v29288_v20  ;;  %v29361_v7 = vsub.f32 %v29273_v27, %v30696_v38 }
 0xa3c   :  { %v19878_v43 = vpop.f32.mrb[93].mxu1  ;;  %32150 = vst [vmem:[#allocation37_spill] sm:$0xff] %v29326_v22  ;;  %v29356_v63 = vld [vmem:[%s30149_s1 + $0x830] sm:$0xff]  ;;  %v29381_v38 = vpack.c.bf16 %v30704_v9, %v30705_v55  ;;  %v29402_v46 = vsub.f32 %v29307_v35, %v30707_v0  ;;  %v29408_v9 = vsub.f32 %v29312_v39, %v30708_v54  ;;  %v29441_v5 = vsub.f32 %v29339_v42, %v30712_v51 }
 0xa3d   :  { %v19879_v21 = vadd.f32 %v19878_v43, %v19877_v28  ;;  %32152 = vst [vmem:[#allocation36_spill] sm:$0xff] %v29356_v63  ;;  %v30710_v28 = vand.u32 4294901760, %v29321_v40  ;;  %v30711_v43 = vand.u32 4294901760, %v29326_v22  ;;  %v32163_v62 = vand.u32 4294901760, %v29344_v29 }
 0xa3e   :  { %32154 = vst [vmem:[#allocation6_spill] sm:$0xff] %v29381_v38  ;;  %v32169_v37 = vand.u32 4294901760, %v29361_v7  ;;  %v32196_v24 = vand.u32 4294901760, %v29441_v5 }
 0xa3f   :  { %v29266_v8 = vadd.f32 %v19879_v21, %v14156_v2  ;;  %v30706_v2 = vand.u32 4294901760, %v29301_v17  ;;  %v29374_v21 = vsub.f32 %v29294_v23, %v30700_v33  ;;  %v29391_v33 = vld [vmem:[%s30149_s1 + $0x8c0] sm:$0xff]  ;;  %v29424_v0 = vsub.f32 %v29321_v40, %v30710_v28 }
 0xa40   :  { %32155 = vst [vmem:[#allocation62_spill] sm:$0xff] %v29391_v33  ;;  %v29431_v55 = vsub.f32 %v29326_v22, %v30711_v43  ;;  %v29453_v43 = vld [vmem:[%s30149_s1 + $0x8d8] sm:$0xff]  ;;  %v29459_v51 = vpack.c.bf16 %v32163_v62, %v32162_v14  ;;  %v32165_v28 = vand.u32 4294901760, %v29356_v63  ;;  %v30715_v14 = vand.u32 4294901760, %v29402_v46 }
 0xa41   :  { %v29397_v12 = vpack.c.bf16 %v30706_v2, %v30709_v56  ;;  %v29419_v2 = vld [vmem:[%s30149_s1 + $0x840] sm:$0xff]  ;;  %v29448_v56 = vld [vmem:[%s30149_s1 + $0x8d0] sm:$0xff]  ;;  %32161 = vst [vmem:[#allocation64_spill] sm:$0xff] %v29453_v43  ;;  %v32175_v34 = vand.u32 4294901760, %v29391_v33  ;;  %v32178_v45 = vand.u32 4294901760, %v29374_v21 }
 0xa42   :  { %32158 = vst [vmem:[#allocation47_spill] sm:$0xff] %v29419_v2  ;;  %32160 = vst [vmem:[#allocation48_spill] sm:$0xff] %v29448_v56  ;;  %v29464_v54 = vsub.f32 %v29356_v63, %v32165_v28  ;;  %v32171_v28 = vand.u32 4294901760, %v29369_v1  ;;  %v32182_v49 = vand.u32 4294901760, %v29419_v2  ;;  %v32195_v36 = vand.u32 4294901760, %v29431_v55 }
 0xa43   :  { %32156 = vst [vmem:[#allocation52_spill] sm:$0xff] %v29397_v12  ;;  %32164 = vst [vmem:[#allocation51_spill] sm:$0xff] %v29459_v51  ;;  %v32168_v12 = vand.u32 4294901760, %v29349_v13  ;;  %v29504_v38 = vsub.f32 %v29391_v33, %v32175_v34  ;;  %v29522_v34 = vsub.f32 %v29414_v6, %v32180_v30  ;;  %v32188_v30 = vand.u32 4294901760, %v29436_v31 }
 0xa44   :  { %32166 = vst [vmem:[#allocation28_spill] sm:$0xff] %v29464_v54  ;;  %v29483_v51 = vsub.f32 %v29369_v1, %v32171_v28  ;;  %v29499_v28 = vld [vmem:[%s30149_s1 + $0x8e0] sm:$0xff]  ;;  %v29527_v58 = vsub.f32 %v29419_v2, %v32182_v49  ;;  %v32191_v2 = vand.u32 4294901760, %v29448_v56  ;;  %v14652_v6 = vsub.f32 %v29315_v60, %v29384_v50 }
 0xa45   :  { %v29477_v62 = vpack.c.bf16 %v32169_v37, %v32168_v12  ;;  %v29494_v12 = vld [vmem:[%s30149_s1 + $0x858] sm:$0xff]  ;;  %32174 = vst [vmem:[#allocation46_spill] sm:$0xff] %v29499_v28  ;;  %32176 = vst [vmem:[#allocation5_spill] sm:$0xff] %v29504_v38  ;;  %v29511_v37 = vld [vmem:[%s30149_s1 + $0x8e8] sm:$0xff]  ;;  %v29544_v11 = vsub.f32 %v29436_v31, %v32188_v30 }
 0xa46   :  { %32172 = vst [vmem:[#allocation58_spill] sm:$0xff] %v29483_v51  ;;  %32173 = vst [vmem:[#allocation43_spill] sm:$0xff] %v29494_v12  ;;  %v32200_v49 = vand.u32 4294901760, %v29483_v51 }
 0xa47   :  { %32170 = vst [vmem:[#allocation42_spill] sm:$0xff] %v29477_v62  ;;  %32177 = vst [vmem:[#allocation55_spill] sm:$0xff] %v29511_v37  ;;  %v29517_v62 = vpack.c.bf16 %v30715_v14, %v32178_v45  ;;  %v32185_v45 = vand.u32 4294901760, %v29408_v9  ;;  %v32186_v14 = vand.u32 4294901760, %v29424_v0  ;;  %v32209_v42 = vand.u32 4294901760, %v29544_v11 }
 0xa48   :  { %32181 = vst [vmem:[#allocation10_spill] sm:$0xff] %v29522_v34  ;;  %32183 = vst [vmem:[#allocation53_spill] sm:$0xff] %v29527_v58 }
 0xa49   :  { %32179 = vst [vmem:[#allocation30_spill] sm:$0xff] %v29517_v62  ;;  %v29539_v62 = vpack.c.bf16 %v32186_v14, %v32185_v45  ;;  %32189 = vst [vmem:[#allocation27_spill] sm:$0xff] %v29544_v11  ;;  %v29557_v14 = vsub.f32 %v29448_v56, %v32191_v2  ;;  %v32193_v45 = vand.u32 4294901760, %v29453_v43  ;;  %v32198_v2 = vand.u32 4294901760, %v29471_v41 }
 0xa4b   :  { %32187 = vst [vmem:[#allocation35_spill] sm:$0xff] %v29539_v62  ;;  %32192 = vst [vmem:[#allocation33_spill] sm:$0xff] %v29557_v14  ;;  %v29562_v30 = vsub.f32 %v29453_v43, %v32193_v45  ;;  %v29569_v62 = vpack.c.bf16 %v32196_v24, %v32195_v36  ;;  %v29576_v56 = vsub.f32 %v29471_v41, %v32198_v2  ;;  %v32199_v43 = vand.u32 4294901760, %v29464_v54  ;;  %v29603_v36 = vld [vmem:[%s30149_s1 + $0x8f0] sm:$0xff] }
 0xa4c   :  { %v30739_v24 = vand.u32 4294901760, %v29504_v38  ;;  %v32202_v2 = vand.u32 4294901760, %v29494_v12  ;;  %v32208_v54 = vand.u32 4294901760, %v29527_v58  ;;  %v32212_v11 = vand.u32 4294901760, %v29557_v14 }
 0xa4d   :  { %32194 = vst [vmem:[#allocation59_spill] sm:$0xff] %v29562_v30  ;;  %32197 = vst [vmem:[#allocation45_spill] sm:$0xff] %v29569_v62  ;;  %v29583_v33 = vpack.c.bf16 %v32200_v49, %v32199_v43  ;;  %v32203_v43 = vand.u32 4294901760, %v29499_v28  ;;  %v29625_v62 = vld [vmem:[%s30149_s1 + $0x878] sm:$0xff] }
 0xa4e   :  { %v29592_v45 = vsub.f32 %v29494_v12, %v32202_v2  ;;  %v32204_v2 = vand.u32 4294901760, %v29511_v37  ;;  %v29644_v38 = vpack.c.bf16 %v32209_v42, %v32208_v54  ;;  %v30749_v42 = vand.u32 4294901760, %v29625_v62 }
 0xa4f   :  { %32201 = vst [vmem:[#allocation57_spill] sm:$0xff] %v29583_v33  ;;  %v29598_v49 = vsub.f32 %v29499_v28, %v32203_v43  ;;  %v32205_v33 = vand.u32 4294901760, %v29522_v34  ;;  %v14653_v54 = vand.u32 4294901760, %v14652_v6 }
 0xa50   :  { %v29618_v43 = vsub.f32 %v29511_v37, %v32204_v2  ;;  %v32207_v37 = vand.u32 4294901760, %v29533_v18  ;;  %32210 = vst [vmem:[#allocation39_spill] sm:$0xff] %v29644_v38  ;;  %v30747_v58 = vand.u32 4294901760, %v29592_v45 }
 0xa51   :  { %v29631_v28 = vpack.c.bf16 %v32205_v33, %v30739_v24  ;;  %v32211_v24 = vand.u32 4294901760, %v29552_v53 }
 0xa52   :  { %v29637_v63 = vsub.f32 %v29533_v18, %v32207_v37 }
 0xa53   :  { %v19912_v31 = vpop.f32.mrb[94].mxu0  ;;  %32206 = vst [vmem:[#allocation7_spill] sm:$0xff] %v29631_v28 }
 0xa54   :  { %v19913_v1 = vpop.f32.mrb[95].mxu0 }
 0xa55   :  { %v19914_v4 = vadd.f32 %v19913_v1, %v19912_v31  ;;  %v29608_v31 = vld [vmem:[%s30149_s1 + $0x8f8] sm:$0xff]  ;;  %v29613_v1 = vld [vmem:[%s30149_s1 + $0x870] sm:$0xff] }
 0xa56   :  { %v30748_v28 = vand.u32 4294901760, %v29613_v1 }
 0xa57   :  { %v14443_v12 = vadd.f32 %v19914_v4, %v29239_v16  ;;  %v19915_v51 = vpop.f32.mrb[96].mxu0  ;;  %v19950_v2 = vpop.f32.mrb[94].mxu1  ;;  %v29649_v4 = vsub.f32 %v29552_v53, %v32211_v24  ;;  %v32213_v24 = vand.u32 4294901760, %v29562_v30 }
 0xa58   :  { %v19916_v34 = vpop.f32.mrb[97].mxu0  ;;  %v19951_v33 = vpop.f32.mrb[95].mxu1 }
 0xa59   :  { %v19917_v41 = vadd.f32 %v19916_v34, %v19915_v51  ;;  %v19952_v18 = vadd.f32 %v19951_v33, %v19950_v2  ;;  %v29661_v53 = vpack.c.bf16 %v32213_v24, %v32212_v11  ;;  %v30752_v51 = vand.u32 4294901760, %v29618_v43 }
 0xa5a   :  { %v32215_v34 = vand.u32 4294901760, %v29576_v56  ;;  %v32217_v33 = vand.u32 4294901760, %v29603_v36  ;;  %v32218_v11 = vand.u32 4294901760, %v29608_v31 }
 0xa5b   :  { %32214 = vst [vmem:[#allocation31_spill] sm:$0xff] %v29661_v53  ;;  %v14450_v16 = vadd.f32 %v19917_v41, %v29266_v8  ;;  %v14554_v37 = vadd.f32 %v19952_v18, %v14443_v12  ;;  %v19953_v22 = vpop.f32.mrb[96].mxu1  ;;  %v29684_v18 = vsub.f32 %v29613_v1, %v30748_v28  ;;  %v30751_v8 = vand.u32 4294901760, %v29637_v63 }
 0xa5c   :  { %v29669_v2 = vpack.c.bf16 %v30747_v58, %v32215_v34  ;;  %v19954_v6 = vpop.f32.mrb[97].mxu1  ;;  %v29674_v38 = vsub.f32 %v29603_v36, %v32217_v33  ;;  %v29679_v41 = vsub.f32 %v29608_v31, %v32218_v11  ;;  %v29692_v34 = vsub.f32 %v29625_v62, %v30749_v42 }
 0xa5d   :  { %v29687_v12 = vand.u32 4294901760, %v14554_v37  ;;  %v19955_v24 = vadd.f32 %v19954_v6, %v19953_v22  ;;  %v30750_v33 = vand.u32 4294901760, %v29649_v4  ;;  %v32219_v11 = vand.u32 4294901760, %v29598_v49 }
 0xa5e   :  { %32216 = vst [vmem:[#allocation61_spill] sm:$0xff] %v29669_v2  ;;  %v30756_v6 = vand.u32 4294901760, %v29674_v38  ;;  %v30753_v42 = vand.u32 4294901760, %v29679_v41 }
 0xa5f   :  { %v29699_v58 = vpack.c.bf16 %v30752_v51, %v32219_v11  ;;  %v14661_v28 = vsub.f32 %v14554_v37, %v29687_v12  ;;  %v14561_v2 = vadd.f32 %v19955_v24, %v14450_v16  ;;  %20676 = vmatprep.subr.mxu0 %v29687_v12  ;;  %v29707_v22 = vpack.c.bf16 %v30750_v33, %v30751_v8 }
 0xa60   :  { %20677 = vmatpush3.msra.mxu0 %v29687_v12  ;;  %v30755_v16 = vand.u32 4294901760, %v29684_v18  ;;  %v30754_v37 = vand.u32 4294901760, %v29692_v34  ;;  %v29721_v24 = vpack.c.bf16 %v30753_v42, %v30756_v6 }
 0xa61   :  { %32220 = vst [vmem:[#allocation8_spill] sm:$0xff] %v29699_v58  ;;  %32221 = vst [vmem:[#allocation41_spill] sm:$0xff] %v29707_v22  ;;  %v29712_v53 = vand.u32 4294901760, %v14561_v2  ;;  %20679 = vmatmul.mubr.f32.vlgmr.msra.gmra.mrb[24].mxu0 %v14653_v54  ;;  %v14662_v11 = vand.u32 4294901760, %v14661_v28 }
 0xa62   :  { %20683 = vmatprep.mubr.f32.mxu0 %v29211_v25  ;;  %32222 = vst [vmem:[#allocation9_spill] sm:$0xff] %v29721_v24  ;;  %v29729_v51 = vpack.c.bf16 %v30754_v37, %v30755_v16  ;;  %v32241_v16 = vand.u32 4294901760, %v29424_v0  ;;  %v32272_v24 = vld [vmem:[#allocation27_spill] sm:$0xff] }
 0xa63   :  { %v15152_v33 = vsub.f32 %v14561_v2, %v29712_v53  ;;  %20706 = vmatprep.subr.mxu1 %v29712_v53  ;;  %v14663_v8 = vsub.f32 %v14661_v28, %v14662_v11 }
 0xa64   :  { %32223 = vst [vmem:[#allocation56_spill] sm:$0xff] %v29729_v51  ;;  %20707 = vmatpush3.msra.mxu1 %v29712_v53 }
 0xa65   :  { %20709 = vmatmul.mubr.f32.vlgmr.msra.gmra.mrb[24].mxu1 %v14653_v54  ;;  %v14664_v22 = vand.u32 4294901760, %v14663_v8  ;;  %v15153_v58 = vand.u32 4294901760, %v15152_v33  ;;  %v32227_v54 = vand.u32 4294901760, %v29232_v52 }
 0xa66   :  { %20713 = vmatprep.mubr.f32.mxu1 %v29211_v25 }
 0xa67   :  { %20681 = vmatprep.subr.mxu0 %v14664_v22  ;;  %v15154_v42 = vsub.f32 %v15152_v33, %v15153_v58 }
 0xa68   :  { %20682 = vmatpush3.msra.mxu0 %v14664_v22 }
 0xa69   :  { %20684 = vmatmul.mubr.f32.vlgmr.msra.gmra.mrb[24].mxu0 %v29268_v15  ;;  %20686 = vmatprep.subr.mxu0 %v14661_v28  ;;  %v15155_v2 = vand.u32 4294901760, %v15154_v42  ;;  %v32225_v42 = vand.u32 4294901760, %v29283_v10 }
 0xa6a   :  { %20687 = vmatpush3.msra.mxu0 %v14661_v28  ;;  %20688 = vmatprep.mubr.f32.mxu0 %v29214_v59 }
 0xa6b   :  { %20691 = vmatprep.subr.mxu0 %v29687_v12  ;;  %20711 = vmatprep.subr.mxu1 %v15155_v2 }
 0xa6c   :  { %20712 = vmatpush3.msra.mxu1 %v15155_v2  ;;  %v32230_v2 = vand.u32 4294901760, %v29331_v26 }
 0xa6d   :  { %20714 = vmatmul.mubr.f32.vlgmr.msra.gmra.mrb[24].mxu1 %v29268_v15  ;;  %20716 = vmatprep.subr.mxu1 %v15152_v33 }
 0xa6e   :  { %20717 = vmatpush3.msra.mxu1 %v15152_v33  ;;  %20718 = vmatprep.mubr.f32.mxu1 %v29214_v59  ;;  %v32224_v59 = vand.u32 4294901760, %v29278_v19 }
 0xa6f   :  { %20721 = vmatprep.subr.mxu1 %v29712_v53 }
 0xa70   :  { %v15831_v28 = vsub.f32 %v29278_v19, %v32224_v59  ;;  %v15845_v59 = vsub.f32 %v29331_v26, %v32230_v2 }
 0xa71   :  { %20689 = vmatmul.mubr.f32.vlgmr.msra.gmra.mrb[24].mxu0 %v29315_v60 }
 0xa72   :  { %20692 = vmatpush3.msra.mxu0 %v29687_v12  ;;  %20693 = vmatprep.mubr.f32.mxu0 %v29217_v61  ;;  %v15832_v33 = vand.u32 4294901760, %v15831_v28  ;;  %v32231_v28 = vand.u32 4294901760, %v29344_v29 }
 0xa73   :  { %20696 = vmatprep.subr.mxu0 %v14662_v11 }
 0xa75   :  { %20719 = vmatmul.mubr.f32.vlgmr.msra.gmra.mrb[24].mxu1 %v29315_v60  ;;  %v15838_v60 = vsub.f32 %v29283_v10, %v32225_v42  ;;  %v32232_v42 = vand.u32 4294901760, %v29237_v47  ;;  %v32236_v47 = vand.u32 4294901760, %v29374_v21 }
 0xa76   :  { %20722 = vmatpush3.msra.mxu1 %v29712_v53  ;;  %20723 = vmatprep.mubr.f32.mxu1 %v29217_v61  ;;  %v32226_v61 = vand.u32 4294901760, %v29227_v48 }
 0xa77   :  { %20726 = vmatprep.subr.mxu1 %v15153_v58  ;;  %v15839_v22 = vand.u32 4294901760, %v15838_v60  ;;  %v32233_v60 = vand.u32 4294901760, %v29244_v3  ;;  %v15859_v3 = vsub.f32 %v29374_v21, %v32236_v47 }
 0xa78   :  { %v29761_v8 = vpack.c.bf16 %v32227_v54, %v32226_v61  ;;  %v32234_v54 = vand.u32 4294901760, %v29349_v13 }
 0xa79   :  { %20694 = vmatmul.mubr.f32.vlgmr.msra.gmra.mrb[24].mxu0 %v29384_v50  ;;  %v22364_v52 = vpack.c.bf16 %v15839_v22, %v15832_v33  ;;  %v29784_v61 = vpack.c.bf16 %v32233_v60, %v32232_v42  ;;  %v32235_v22 = vand.u32 4294901760, %v29361_v7  ;;  %v32238_v60 = vand.u32 4294901760, %v29253_v32 }
 0xa7a   :  { %20697 = vmatpush3.msra.mxu0 %v14662_v11  ;;  %20698 = vmatprep.mubr.f32.mxu0 %v29211_v25  ;;  %v32229_v11 = vand.u32 4294901760, %v29301_v17  ;;  %v15733_v33 = vsub.f32 %v29349_v13, %v32234_v54  ;;  %v32239_v54 = vand.u32 4294901760, %v29259_v57  ;;  %v32242_v32 = vand.u32 4294901760, %v29264_v44 }
 0xa7b   :  { %20701 = vmatprep.subr.mxu0 %v29687_v12  ;;  %v32243_v57 = vand.u32 4294901760, %v29273_v27  ;;  %v32248_v44 = vand.u32 4294901760, %v29431_v55 }
 0xa7c   :  { %v15726_v48 = vsub.f32 %v29301_v17, %v32229_v11  ;;  %v29804_v37 = vpack.c.bf16 %v32239_v54, %v32238_v60  ;;  %v32245_v60 = vand.u32 4294901760, %v29294_v23  ;;  %v32246_v54 = vand.u32 4294901760, %v29307_v35  ;;  %v32253_v35 = vld [vmem:[#allocation37_spill] sm:$0xff] }
 0xa7d   :  { %20724 = vmatmul.mubr.f32.vlgmr.msra.gmra.mrb[24].mxu1 %v29384_v50  ;;  %v15873_v27 = vsub.f32 %v29431_v55, %v32248_v44 }
 0xa7e   :  { %20727 = vmatpush3.msra.mxu1 %v15153_v58  ;;  %20728 = vmatprep.mubr.f32.mxu1 %v29211_v25  ;;  %v32228_v58 = vand.u32 4294901760, %v29288_v20  ;;  %v15727_v2 = vand.u32 4294901760, %v15726_v48  ;;  %v32240_v48 = vand.u32 4294901760, %v29408_v9 }
 0xa7f   :  { %20731 = vmatprep.subr.mxu1 %v29712_v53 }
 0xa80   :  { %v15719_v50 = vsub.f32 %v29288_v20, %v32228_v58  ;;  %v15740_v58 = vsub.f32 %v29361_v7, %v32235_v22  ;;  %v15747_v47 = vsub.f32 %v29408_v9, %v32240_v48 }
 0xa81   :  { %20699 = vmatmul.mubr.f32.vlgmr.msra.gmra.mrb[24].mxu0 %v29268_v15 }
 0xa82   :  { %20702 = vmatpush3.msra.mxu0 %v29687_v12  ;;  %20703 = vmatprep.mubr.f32.mxu0 %v29211_v25  ;;  %v15852_v12 = vsub.f32 %v29344_v29, %v32231_v28  ;;  %v15720_v11 = vand.u32 4294901760, %v15719_v50  ;;  %v32237_v28 = vand.u32 4294901760, %v29402_v46  ;;  %v15741_v50 = vand.u32 4294901760, %v15740_v58  ;;  %v32244_v58 = vld [vmem:[#allocation17_spill] sm:$0xff] }
 0xa83   :  { %22333 = vmatprep.subr.bf16.mxu0 %v29761_v8 }
 0xa84   :  { %v15866_v42 = vsub.f32 %v29402_v46, %v32237_v28  ;;  %v15853_v22 = vand.u32 4294901760, %v15852_v12  ;;  %v15754_v28 = vsub.f32 %v29424_v0, %v32241_v16  ;;  %v15860_v12 = vand.u32 4294901760, %v15859_v3 }
 0xa85   :  { %20729 = vmatmul.mubr.f32.vlgmr.msra.gmra.mrb[24].mxu1 %v29268_v15  ;;  %v29826_v16 = vpack.c.bf16 %v32246_v54, %v32245_v60  ;;  %v32251_v3 = vand.u32 4294901760, %v29321_v40  ;;  %v15748_v60 = vand.u32 4294901760, %v15747_v47 }
 0xa86   :  { %20732 = vmatpush3.msra.mxu1 %v29712_v53  ;;  %20733 = vmatprep.mubr.f32.mxu1 %v29211_v25  ;;  %v15846_v53 = vand.u32 4294901760, %v15845_v59  ;;  %v15734_v25 = vand.u32 4294901760, %v15733_v33  ;;  %v22366_v59 = vpack.c.bf16 %v15727_v2, %v15720_v11  ;;  %v15867_v33 = vand.u32 4294901760, %v15866_v42 }
 0xa87   :  { %22365 = vmatprep.subr.bf16.mxu1 %v22364_v52  ;;  %v29818_v52 = vpack.c.bf16 %v32243_v57, %v32242_v32  ;;  %32247 = vst [vmem:[#allocation34_spill] sm:$0xff] %v29826_v16  ;;  %v32249_v32 = vand.u32 4294901760, %v29441_v5  ;;  %v32250_v2 = vand.u32 4294901760, %v29312_v39  ;;  %v32254_v57 = vand.u32 4294901760, %v32253_v35  ;;  %v32257_v39 = vld [vmem:[#allocation28_spill] sm:$0xff]  ;;  %v32261_v35 = vld [vmem:[#allocation5_spill] sm:$0xff] }
 0xa88   :  { %v22368_v48 = vpack.c.bf16 %v15853_v22, %v15846_v53  ;;  %v22370_v23 = vpack.c.bf16 %v15741_v50, %v15734_v25  ;;  %v32255_v53 = vld [vmem:[#allocation44_spill] sm:$0xff]  ;;  %v15755_v54 = vand.u32 4294901760, %v15754_v28  ;;  %v22372_v44 = vpack.c.bf16 %v15867_v33, %v15860_v12  ;;  %v32265_v33 = vld [vmem:[#allocation11_spill] sm:$0xff] }
 0xa89   :  { %20704 = vmatmul.mubr.f32.vlgmr.msra.gmra.mrb[24].mxu0 %v29268_v15  ;;  %v15880_v11 = vsub.f32 %v29441_v5, %v32249_v32  ;;  %v29838_v42 = vpack.c.bf16 %v32251_v3, %v32250_v2  ;;  %v32256_v22 = vand.u32 4294901760, %v32255_v53  ;;  %v32258_v32 = vand.u32 4294901760, %v32257_v39  ;;  %v32259_v2 = vld [vmem:[#allocation58_spill] sm:$0xff]  ;;  %v32266_v53 = vld [vmem:[#allocation36_spill] sm:$0xff] }
 0xa8a   :  { %22335 = vmatpush3.bf16.msra.mxu0 %v29784_v61  ;;  %15689 = vmatprep.mubr.f32.mxu0 %v32244_v58  ;;  %v32260_v3 = vand.u32 4294901760, %v32259_v2  ;;  %v15874_v25 = vand.u32 4294901760, %v15873_v27  ;;  %v32262_v47 = vand.u32 4294901760, %v32261_v35  ;;  %v22374_v51 = vpack.c.bf16 %v15755_v54, %v15748_v60  ;;  %v32276_v54 = vld [vmem:[#allocation62_spill] sm:$0xff] }
 0xa8b   :  { %22337 = vmatprep.subr.bf16.mxu0 %v29804_v37  ;;  %32252 = vst [vmem:[#allocation32_spill] sm:$0xff] %v29838_v42  ;;  %v29845_v58 = vpack.c.bf16 %v32256_v22, %v32254_v57  ;;  %v15761_v40 = vsub.f32 %v32257_v39, %v32258_v32  ;;  %v15881_v50 = vand.u32 4294901760, %v15880_v11  ;;  %v32263_v57 = vld [vmem:[#allocation10_spill] sm:$0xff]  ;;  %v32267_v22 = vand.u32 4294901760, %v32266_v53 }
 0xa8c   :  { %v15887_v28 = vsub.f32 %v32261_v35, %v32262_v47  ;;  %v32268_v32 = vld [vmem:[#allocation38_spill] sm:$0xff]  ;;  %v32274_v53 = vand.u32 4294901760, %v29557_v14 }
 0xa8d   :  { %20734 = vmatmul.mubr.f32.vlgmr.msra.gmra.mrb[24].mxu1 %v29268_v15  ;;  %v15768_v15 = vsub.f32 %v32259_v2, %v32260_v3  ;;  %v32269_v6 = vand.u32 4294901760, %v32268_v32 }
 0xa8e   :  { %22339 = vmatpush3.bf16.msra.mxu0 %v29818_v52  ;;  %22367 = vmatpush3.bf16.msra.mxu1 %v22366_v59  ;;  %v32264_v59 = vand.u32 4294901760, %v32263_v57  ;;  %v15901_v32 = vsub.f32 %v29557_v14, %v32274_v53 }
 0xa8f   :  { %22341 = vmatprep.subr.bf16.mxu0 %v29826_v16  ;;  %22369 = vmatprep.subr.bf16.mxu1 %v22368_v48  ;;  %v29866_v3 = vpack.c.bf16 %v32269_v6, %v32267_v22  ;;  %v32270_v48 = vld [vmem:[#allocation53_spill] sm:$0xff]  ;;  %v32273_v16 = vand.u32 4294901760, %v32272_v24  ;;  %v32275_v6 = vand.u32 4294901760, %v29562_v30  ;;  %v32277_v22 = vand.u32 4294901760, %v32276_v54 }
 0xa90   :  { %v15894_v12 = vsub.f32 %v32263_v57, %v32264_v59  ;;  %15940 = vmatprep.mubr.f32.mxu1 %v32265_v33  ;;  %v32271_v27 = vand.u32 4294901760, %v32270_v48  ;;  %v15762_v59 = vand.u32 4294901760, %v15761_v40  ;;  %v15769_v33 = vand.u32 4294901760, %v15768_v15  ;;  %v32282_v57 = vld [vmem:[#allocation60_spill] sm:$0xff] }
 0xa91   :  { %v15782_v47 = vsub.f32 %v32272_v24, %v32273_v16  ;;  %v15908_v60 = vsub.f32 %v29562_v30, %v32275_v6  ;;  %v15888_v40 = vand.u32 4294901760, %v15887_v28  ;;  %v32283_v53 = vand.u32 4294901760, %v32282_v57 }
 0xa92   :  { %v15775_v11 = vsub.f32 %v32270_v48, %v32271_v27  ;;  %22343 = vmatpush3.bf16.msra.mxu0 %v29838_v42  ;;  %22371 = vmatpush3.bf16.msra.mxu1 %v22370_v23  ;;  %v32278_v27 = vld [vmem:[#allocation54_spill] sm:$0xff]  ;;  %v22376_v23 = vpack.c.bf16 %v15881_v50, %v15874_v25  ;;  %v15895_v15 = vand.u32 4294901760, %v15894_v12  ;;  %v32280_v48 = vld [vmem:[#allocation47_spill] sm:$0xff]  ;;  %v32284_v30 = vand.u32 4294901760, %v29576_v56  ;;  %v32286_v50 = vld [vmem:[#allocation48_spill] sm:$0xff] }
 0xa93   :  { %22345 = vmatprep.subr.bf16.mxu0 %v29845_v58  ;;  %22373 = vmatprep.subr.bf16.mxu1 %v22372_v44  ;;  %v32279_v16 = vand.u32 4294901760, %v32278_v27  ;;  %v32281_v42 = vand.u32 4294901760, %v32280_v48  ;;  %v15783_v6 = vand.u32 4294901760, %v15782_v47  ;;  %v32285_v54 = vand.u32 4294901760, %v29592_v45  ;;  %v32288_v12 = vld [vmem:[#allocation64_spill] sm:$0xff] }
 0xa94   :  { %v15776_v35 = vand.u32 4294901760, %v15775_v11  ;;  %v15789_v44 = vsub.f32 %v29576_v56, %v32284_v30  ;;  %v22378_v25 = vpack.c.bf16 %v15769_v33, %v15762_v59  ;;  %v32287_v28 = vand.u32 4294901760, %v32286_v50  ;;  %v32292_v33 = vld [vmem:[#allocation40_spill] sm:$0xff] }
 0xa95   :  { %v29886_v24 = vpack.c.bf16 %v32279_v16, %v32277_v22  ;;  %v29892_v14 = vpack.c.bf16 %v32283_v53, %v32281_v42  ;;  %v15796_v22 = vsub.f32 %v29592_v45, %v32285_v54  ;;  %v32289_v57 = vand.u32 4294901760, %v32288_v12  ;;  %v32294_v53 = vld [vmem:[#allocation43_spill] sm:$0xff] }
 0xa96   :  { %22347 = vmatpush3.bf16.msra.mxu0 %v29866_v3  ;;  %22375 = vmatpush3.bf16.msra.mxu1 %v22374_v51  ;;  %v15902_v48 = vand.u32 4294901760, %v15901_v32  ;;  %v15909_v11 = vand.u32 4294901760, %v15908_v60  ;;  %v22380_v30 = vpack.c.bf16 %v15895_v15, %v15888_v40  ;;  %v32290_v47 = vand.u32 4294901760, %v29598_v49  ;;  %v32296_v60 = vld [vmem:[#allocation46_spill] sm:$0xff]  ;;  %v32298_v12 = vld [vmem:[#allocation55_spill] sm:$0xff] }
 0xa97   :  { %v29905_v42 = vpack.c.bf16 %v32289_v57, %v32287_v28  ;;  %22349 = vmatprep.subr.bf16.mxu0 %v29886_v24  ;;  %22377 = vmatprep.subr.bf16.mxu1 %v22376_v23  ;;  %v32291_v16 = vand.u32 4294901760, %v29618_v43  ;;  %v32293_v59 = vand.u32 4294901760, %v32292_v33  ;;  %v32295_v54 = vand.u32 4294901760, %v32294_v53 }
 0xa98   :  { %v15915_v27 = vsub.f32 %v29598_v49, %v32290_v47  ;;  %v22382_v32 = vpack.c.bf16 %v15783_v6, %v15776_v35  ;;  %v32297_v28 = vand.u32 4294901760, %v32296_v60  ;;  %v32299_v23 = vand.u32 4294901760, %v32298_v12  ;;  %v32306_v60 = vld [vmem:[#allocation63_spill] sm:$0xff] }
 0xa99   :  { %v15922_v51 = vsub.f32 %v29618_v43, %v32291_v16  ;;  %v29918_v50 = vpack.c.bf16 %v32295_v54, %v32293_v59  ;;  %v15790_v15 = vand.u32 4294901760, %v15789_v44  ;;  %v15797_v57 = vand.u32 4294901760, %v15796_v22 }
 0xa9a   :  { %v29924_v40 = vpack.c.bf16 %v32299_v23, %v32297_v28  ;;  %22351 = vmatpush3.bf16.msra.mxu0 %v29892_v14  ;;  %22379 = vmatpush3.bf16.msra.mxu1 %v22378_v25  ;;  %v22384_v47 = vpack.c.bf16 %v15909_v11, %v15902_v48  ;;  %v32300_v16 = vand.u32 4294901760, %v29637_v63  ;;  %v32301_v59 = vand.u32 4294901760, %v29649_v4  ;;  %v32304_v11 = vld [vmem:[#allocation49_spill] sm:$0xff] }
 0xa9b   :  { %22353 = vmatprep.subr.bf16.mxu0 %v29905_v42  ;;  %22381 = vmatprep.subr.bf16.mxu1 %v22380_v30  ;;  %v15916_v6 = vand.u32 4294901760, %v15915_v27  ;;  %v15923_v53 = vand.u32 4294901760, %v15922_v51  ;;  %v32302_v44 = vand.u32 4294901760, %v29674_v38  ;;  %v32303_v25 = vand.u32 4294901760, %v29679_v41 }
 0xa9c   :  { %v15803_v33 = vsub.f32 %v29637_v63, %v32300_v16  ;;  %v15810_v35 = vsub.f32 %v29649_v4, %v32301_v59  ;;  %v32305_v54 = vand.u32 4294901760, %v32304_v11  ;;  %v32307_v28 = vand.u32 4294901760, %v32306_v60 }
 0xa9d   :  { %v15929_v22 = vsub.f32 %v29674_v38, %v32302_v44  ;;  %v15936_v48 = vsub.f32 %v29679_v41, %v32303_v25  ;;  %v22386_v23 = vpack.c.bf16 %v15797_v57, %v15790_v15  ;;  %v32308_v51 = vand.u32 4294901760, %v29684_v18 }
 0xa9e   :  { %v29944_v12 = vpack.c.bf16 %v32307_v28, %v32305_v54  ;;  %22355 = vmatpush3.bf16.msra.mxu0 %v29918_v50  ;;  %22383 = vmatpush3.bf16.msra.mxu1 %v22382_v32  ;;  %v15804_v30 = vand.u32 4294901760, %v15803_v33  ;;  %v15811_v27 = vand.u32 4294901760, %v15810_v35  ;;  %v32309_v59 = vand.u32 4294901760, %v29692_v34 }
 0xa9f   :  { %v15817_v16 = vsub.f32 %v29684_v18, %v32308_v51  ;;  %22357 = vmatprep.subr.bf16.mxu0 %v29924_v40  ;;  %22385 = vmatprep.subr.bf16.mxu1 %v22384_v47  ;;  %v32310_v25 = vand.u32 4294901760, %v29603_v36  ;;  %v32311_v15 = vand.u32 4294901760, %v29608_v31  ;;  %v22388_v32 = vpack.c.bf16 %v15923_v53, %v15916_v6  ;;  %v32314_v53 = vld [vmem:[#allocation18_spill] sm:$0xff] }
 0xaa0   :  { %v15824_v44 = vsub.f32 %v29692_v34, %v32309_v59  ;;  %v15930_v33 = vand.u32 4294901760, %v15929_v22  ;;  %v15937_v35 = vand.u32 4294901760, %v15936_v48  ;;  %v32312_v11 = vand.u32 4294901760, %v29613_v1  ;;  %v32323_v48 = vld [vmem:[#allocation10_spill] sm:$0xff]  ;;  %v32328_v59 = vld [vmem:[#allocation33_spill] sm:$0xff] }
 0xaa1   :  { %v29958_v57 = vpack.c.bf16 %v32311_v15, %v32310_v25  ;;  %v32313_v54 = vand.u32 4294901760, %v29625_v62  ;;  %v22390_v28 = vpack.c.bf16 %v15811_v27, %v15804_v30  ;;  %v15818_v47 = vand.u32 4294901760, %v15817_v16  ;;  %v32324_v30 = vld [vmem:[#allocation15_spill] sm:$0xff] }
 0xaa2   :  { %22359 = vmatpush3.bf16.msra.mxu0 %v29944_v12  ;;  %22387 = vmatpush3.bf16.msra.mxu1 %v22386_v23  ;;  %v15825_v51 = vand.u32 4294901760, %v15824_v44  ;;  %v22392_v36 = vpack.c.bf16 %v15937_v35, %v15930_v33  ;;  %v22396_v31 = vpack.c.bf16 %v29283_v10, %v29278_v19  ;;  %v22398_v1 = vpack.c.bf16 %v29301_v17, %v29288_v20  ;;  %v32315_v10 = vld [vmem:[#allocation25_spill] sm:$0xff]  ;;  %v32316_v20 = vld [vmem:[#allocation12_spill] sm:$0xff]  ;;  %v32317_v17 = vld [vmem:[#allocation26_spill] sm:$0xff] }
 0xaa3   :  { %v29965_v60 = vpack.c.bf16 %v32313_v54, %v32312_v11  ;;  %22361 = vmatprep.subr.bf16.mxu0 %v29958_v57  ;;  %22389 = vmatprep.subr.bf16.mxu1 %v22388_v32  ;;  %v22400_v62 = vpack.c.bf16 %v29344_v29, %v29331_v26  ;;  %v22402_v22 = vpack.c.bf16 %v29361_v7, %v29349_v13  ;;  %v32318_v13 = vld [vmem:[#allocation19_spill] sm:$0xff]  ;;  %v32320_v7 = vld [vmem:[#allocation21_spill] sm:$0xff]  ;;  %v32339_v33 = vld [vmem:[#allocation30_spill] sm:$0xff] }
 0xaa4   :  { %v22394_v6 = vpack.c.bf16 %v15825_v51, %v15818_v47  ;;  %v22404_v19 = vpack.c.bf16 %v29402_v46, %v29374_v21  ;;  %v22406_v26 = vpack.c.bf16 %v29424_v0, %v29408_v9  ;;  %v22408_v29 = vpack.c.bf16 %v29441_v5, %v29431_v55  ;;  %v32319_v46 = vld [vmem:[#allocation13_spill] sm:$0xff]  ;;  %v32321_v9 = vld [vmem:[#allocation34_spill] sm:$0xff]  ;;  %v32325_v5 = vld [vmem:[#allocation32_spill] sm:$0xff] }
 0xaa5   :  { %v22410_v21 = vpack.c.bf16 %v32259_v2, %v32257_v39  ;;  %v32322_v0 = vld [vmem:[#allocation5_spill] sm:$0xff]  ;;  %v32327_v27 = vld [vmem:[#allocation27_spill] sm:$0xff]  ;;  %v22418_v2 = vpack.c.bf16 %v29592_v45, %v29576_v56  ;;  %v22420_v25 = vpack.c.bf16 %v29618_v43, %v29598_v49  ;;  %v22422_v15 = vpack.c.bf16 %v29649_v4, %v29637_v63  ;;  %v32330_v63 = vld [vmem:[#allocation6_spill] sm:$0xff] }
 0xaa6   :  { %22363 = vmatpush3.bf16.msra.mxu0 %v29965_v60  ;;  %22391 = vmatpush3.bf16.msra.mxu1 %v22390_v28  ;;  %v22412_v23 = vpack.c.bf16 %v32323_v48, %v32322_v0  ;;  %v32326_v55 = vld [vmem:[#allocation53_spill] sm:$0xff]  ;;  %v32329_v44 = vld [vmem:[#allocation59_spill] sm:$0xff]  ;;  %v22424_v32 = vpack.c.bf16 %v29679_v41, %v29674_v38  ;;  %v22426_v56 = vpack.c.bf16 %v29692_v34, %v29684_v18  ;;  %v32331_v45 = vld [vmem:[#allocation14_spill] sm:$0xff] }
 0xaa7   :  { %22393 = vmatprep.subr.bf16.mxu1 %v22392_v36  ;;  %22397 = vmatprep.subr.bf16.mxu0 %v22396_v31  ;;  %v22414_v16 = vpack.c.bf16 %v32327_v27, %v32326_v55  ;;  %v22416_v39 = vpack.c.bf16 %v32329_v44, %v32328_v59  ;;  %v32332_v38 = vld [vmem:[#allocation52_spill] sm:$0xff]  ;;  %v32334_v43 = vld [vmem:[#allocation51_spill] sm:$0xff]  ;;  %v32337_v18 = vld [vmem:[#allocation42_spill] sm:$0xff]  ;;  %v22771_v31 = vmov 0  }
 0xaa8   :  { %v32333_v49 = vld [vmem:[#allocation20_spill] sm:$0xff]  ;;  %v32335_v4 = vld [vmem:[#allocation23_spill] sm:$0xff]  ;;  %v32338_v34 = vld [vmem:[#allocation22_spill] sm:$0xff]  ;;  %22741 = vset.pattern.permute.xlu0 %v22771_v31  ;;  %22742 = vset.pattern.permute.xlu1 %v22771_v31 }
 0xaa9   :  { %15695 = vmatmul.mubr.f32.vlgmr.msra.gmra.mrb[98].mxu0 %v32314_v53  ;;  %v32336_v41 = vld [vmem:[#allocation16_spill] sm:$0xff]  ;;  %v32340_v35 = vld [vmem:[#allocation11_spill] sm:$0xff]  ;;  %v32350_v36 = vld [vmem:[#allocation41_spill] sm:$0xff] }
 0xaaa   :  { %22395 = vmatpush3.bf16.msra.mxu1 %v22394_v6  ;;  %22399 = vmatpush3.bf16.msra.mxu0 %v22398_v1  ;;  %v32341_v11 = vld [vmem:[#allocation24_spill] sm:$0xff]  ;;  %v32342_v54 = vld [vmem:[#allocation35_spill] sm:$0xff]  ;;  %v17509_v6 = vld [vmem:[%s30151_s3 + $0x8] sm:$0xff] }
 0xaab   :  { %22401 = vmatprep.subr.bf16.mxu0 %v22400_v62  ;;  %22429 = vmatprep.subr.bf16.mxu1 %v29761_v8  ;;  %v32345_v28 = vld [vmem:[#allocation7_spill] sm:$0xff]  ;;  %v32349_v51 = vld [vmem:[#allocation8_spill] sm:$0xff] }
 0xaac   :  { %15704 = vmatprep.mubr.f32.mxu0 %v32315_v10  ;;  %v32347_v47 = vld [vmem:[#allocation31_spill] sm:$0xff] }
 0xaad   :  { %15942 = vmatmul.mubr.f32.vlgmr.msra.gmra.mrb[98].mxu1 %v32316_v20  ;;  %15710 = vmatmul.mubr.f32.gmra.mrb[100].mxu0 %v32317_v17 }
 0xaae   :  { %22403 = vmatpush3.bf16.msra.mxu0 %v22402_v22  ;;  %22431 = vmatpush3.bf16.msra.mxu1 %v29784_v61 }
 0xaaf   :  { %22405 = vmatprep.subr.bf16.mxu0 %v22404_v19  ;;  %22433 = vmatprep.subr.bf16.mxu1 %v29804_v37 }
 0xab0   :  { %15947 = vmatprep.mubr.f32.mxu1 %v32318_v13  ;;  %16084 = vmatprep.mubr.f32.mxu0 %v32319_v46 }
 0xab1   :  { %15949 = vmatmul.mubr.f32.gmra.mrb[100].mxu1 %v32320_v7 }
 0xab2   :  { %22407 = vmatpush3.bf16.msra.mxu0 %v22406_v26  ;;  %22435 = vmatpush3.bf16.msra.mxu1 %v29818_v52 }
 0xab3   :  { %22409 = vmatprep.subr.bf16.mxu0 %v22408_v29  ;;  %22437 = vmatprep.subr.bf16.mxu1 %v32321_v9 }
 0xab4   :  { %16200 = vmatprep.mubr.f32.mxu1 %v32324_v30 }
 0xab6   :  { %22411 = vmatpush3.bf16.msra.mxu0 %v22410_v21  ;;  %22439 = vmatpush3.bf16.msra.mxu1 %v32325_v5 }
 0xab7   :  { %22413 = vmatprep.subr.bf16.mxu0 %v22412_v23  ;;  %22441 = vmatprep.subr.bf16.mxu1 %v29845_v58 }
 0xaba   :  { %22415 = vmatpush3.bf16.msra.mxu0 %v22414_v16  ;;  %22443 = vmatpush3.bf16.msra.mxu1 %v29866_v3 }
 0xabb   :  { %22417 = vmatprep.subr.bf16.mxu0 %v22416_v39  ;;  %22445 = vmatprep.subr.bf16.mxu1 %v29886_v24 }
 0xabe   :  { %22419 = vmatpush3.bf16.msra.mxu0 %v22418_v2  ;;  %22447 = vmatpush3.bf16.msra.mxu1 %v29892_v14 }
 0xabf   :  { %22421 = vmatprep.subr.bf16.mxu0 %v22420_v25  ;;  %22449 = vmatprep.subr.bf16.mxu1 %v29905_v42 }
 0xac2   :  { %22423 = vmatpush3.bf16.msra.mxu0 %v22422_v15  ;;  %22451 = vmatpush3.bf16.msra.mxu1 %v29918_v50 }
 0xac3   :  { %22425 = vmatprep.subr.bf16.mxu0 %v22424_v32  ;;  %22453 = vmatprep.subr.bf16.mxu1 %v29924_v40 }
 0xac6   :  { %22427 = vmatpush3.bf16.msra.mxu0 %v22426_v56  ;;  %22455 = vmatpush3.bf16.msra.mxu1 %v29944_v12  ;;  %v17879_v56 = vld [vmem:[%s30150_s2 + $0x88] sm:$0xff] }
 0xac7   :  { %22457 = vmatprep.subr.bf16.mxu1 %v29958_v57  ;;  %22461 = vmatprep.subr.bf16.mxu0 %v32330_v63  ;;  %v16513_v63 = vsel %vm1934_vm0, %v17879_v56, 0 }
 0xac9   :  { %16087 = vmatmul.mubr.f32.vlgmr.msra.gmra.mrb[102].mxu0 %v32331_v45  ;;  %v30095_v45 = vand.u32 4294901760, %v16513_v63 }
 0xaca   :  { %22459 = vmatpush3.bf16.msra.mxu1 %v29965_v60  ;;  %22463 = vmatpush3.bf16.msra.mxu0 %v32332_v38 }
 0xacb   :  { %16093 = vmatprep.mubr.f32.mxu0 %v32333_v49  ;;  %22465 = vmatprep.subr.bf16.mxu0 %v32334_v43  ;;  %v16592_v38 = vsub.f32 %v16513_v63, %v30095_v45 }
 0xacc   :  { %22493 = vmatprep.subr.bf16.mxu1 %v29761_v8  ;;  %v32343_v8 = vld [vmem:[#allocation45_spill] sm:$0xff] }
 0xacd   :  { %16096 = vmatmul.mubr.f32.gmra.mrb[104].mxu0 %v32335_v4  ;;  %16204 = vmatmul.mubr.f32.vlgmr.msra.gmra.mrb[102].mxu1 %v32336_v41  ;;  %v16593_v41 = vand.u32 4294901760, %v16592_v38 }
 0xace   :  { %22467 = vmatpush3.bf16.msra.mxu0 %v32337_v18  ;;  %22495 = vmatpush3.bf16.msra.mxu1 %v29784_v61  ;;  %v32344_v61 = vld [vmem:[#allocation57_spill] sm:$0xff] }
 0xacf   :  { %16211 = vmatprep.mubr.f32.mxu1 %v32338_v34  ;;  %22469 = vmatprep.subr.bf16.mxu0 %v32339_v33 }
 0xad0   :  { %22497 = vmatprep.subr.bf16.mxu1 %v29804_v37  ;;  %16381 = vmatprep.mubr.f32.mxu0 %v32340_v35  ;;  %v32346_v37 = vld [vmem:[#allocation39_spill] sm:$0xff] }
 0xad1   :  { %16215 = vmatmul.mubr.f32.gmra.mrb[104].mxu1 %v32341_v11 }
 0xad2   :  { %22471 = vmatpush3.bf16.msra.mxu0 %v32342_v54  ;;  %22499 = vmatpush3.bf16.msra.mxu1 %v29818_v52  ;;  %v32348_v52 = vld [vmem:[#allocation61_spill] sm:$0xff] }
 0xad3   :  { %22473 = vmatprep.subr.bf16.mxu0 %v32343_v8  ;;  %22501 = vmatprep.subr.bf16.mxu1 %v32321_v9 }
 0xad4   :  { %16492 = vmatprep.mubr.f32.mxu1 %v32340_v35 }
 0xad6   :  { %22475 = vmatpush3.bf16.msra.mxu0 %v32344_v61  ;;  %22503 = vmatpush3.bf16.msra.mxu1 %v32325_v5  ;;  %v16594_v61 = vsub.f32 %v16592_v38, %v16593_v41 }
 0xad7   :  { %22477 = vmatprep.subr.bf16.mxu0 %v32345_v28  ;;  %22505 = vmatprep.subr.bf16.mxu1 %v29845_v58  ;;  %v32351_v58 = vld [vmem:[#allocation9_spill] sm:$0xff] }
 0xada   :  { %22479 = vmatpush3.bf16.msra.mxu0 %v32346_v37  ;;  %22507 = vmatpush3.bf16.msra.mxu1 %v29866_v3  ;;  %v32352_v3 = vld [vmem:[#allocation56_spill] sm:$0xff] }
 0xadb   :  { %22481 = vmatprep.subr.bf16.mxu0 %v32347_v47  ;;  %22509 = vmatprep.subr.bf16.mxu1 %v29886_v24 }
 0xade   :  { %22483 = vmatpush3.bf16.msra.mxu0 %v32348_v52  ;;  %22511 = vmatpush3.bf16.msra.mxu1 %v29892_v14  ;;  %v17878_v14 = vld [vmem:[%s30150_s2 + $0x80] sm:$0xff]  ;;  %s22772_s2 = smov 64  }
 0xadf   :  { %22485 = vmatprep.subr.bf16.mxu0 %v32349_v51  ;;  %22513 = vmatprep.subr.bf16.mxu1 %v29905_v42  ;;  %v16510_v24 = vsel %vm1934_vm0, %v17878_v14, 0 }
 0xae0   :  { %v30075_v42 = vand.u32 4294901760, %v16510_v24 }
 0xae2   :  { %22487 = vmatpush3.bf16.msra.mxu0 %v32350_v36  ;;  %22515 = vmatpush3.bf16.msra.mxu1 %v29918_v50  ;;  %v30078_v50 = vsub.f32 %v16510_v24, %v30075_v42 }
 0xae3   :  { %22489 = vmatprep.subr.bf16.mxu0 %v32351_v58  ;;  %22517 = vmatprep.subr.bf16.mxu1 %v29924_v40  ;;  %v16595_v58 = vand.u32 4294901760, %v16594_v61 }
 0xae4   :  { %v30081_v40 = vand.u32 4294901760, %v30078_v50 }
 0xae6   :  { %22491 = vmatpush3.bf16.msra.mxu0 %v32352_v3  ;;  %22519 = vmatpush3.bf16.msra.mxu1 %v29944_v12  ;;  %v16584_v12 = vsub.f32 %v30078_v50, %v30081_v40 }
 0xae7   :  { %22521 = vmatprep.subr.bf16.mxu1 %v29958_v57 }
 0xae8   :  { %v16585_v57 = vand.u32 4294901760, %v16584_v12 }
 0xae9   :  { %16383 = vmatmul.mubr.f32.vlgmr.msra.gmra.mrb[106].mxu0 %v32316_v20 }
 0xaea   :  { %22523 = vmatpush3.bf16.msra.mxu1 %v29965_v60  ;;  %16388 = vmatprep.mubr.f32.mxu0 %v32318_v13  ;;  %v17508_v60 = vld [vmem:[%s30151_s3] sm:$0xff] }
 0xaeb   :  { %17512 = vperm.xlu0 %22741, %v17508_v60  }
 0xaed   :  { %16390 = vmatmul.mubr.f32.gmra.mrb[108].mxu0 %v32320_v7  ;;  %16494 = vmatmul.mubr.f32.vlgmr.msra.gmra.mrb[106].mxu1 %v32316_v20 }
 0xaee   :  { %16499 = vmatprep.mubr.f32.mxu1 %v32318_v13  ;;  %20738 = vmatprep.mubr.f32.mxu0 %v16585_v57 }
 0xaef   :  { %17517 = vperm.xlu0 %22741, %v17509_v6  }
 0xaf1   :  { %16501 = vmatmul.mubr.f32.gmra.mrb[108].mxu1 %v32320_v7 }
 0xaf2   :  { %20768 = vmatprep.mubr.f32.mxu1 %v16585_v57 }
 0xb7c   :  { %v20024_v1 = vpop.f32.mrb[98].mxu0 }
 0xb7d   :  { %v20025_v62 = vpop.f32.mrb[99].mxu0 }
 0xb7e   :  { %v20026_v53 = vadd.f32 %v20025_v62, %v20024_v1 }
 0xb80   :  { %v20062_v22 = vpop.f32.mrb[98].mxu1  ;;  %v20027_v19 = vpop.f32.mrb[100].mxu0 }
 0xb81   :  { %v20063_v10 = vpop.f32.mrb[99].mxu1  ;;  %v20028_v20 = vpop.f32.mrb[101].mxu0 }
 0xb82   :  { %v20064_v17 = vadd.f32 %v20063_v10, %v20062_v22  ;;  %v20029_v26 = vadd.f32 %v20028_v20, %v20027_v19  ;;  %v17513_v19 = vpop.permute.xlu0 %17512 }
 0xb84   :  { %v15944_v29 = vadd.f32 %v20064_v17, %v20026_v53  ;;  %v20065_v13 = vpop.f32.mrb[100].mxu1 }
 0xb85   :  { %v20066_v46 = vpop.f32.mrb[101].mxu1 }
 0xb86   :  { %v20067_v7 = vadd.f32 %v20066_v46, %v20065_v13  ;;  %v17545_v46 = vld [vmem:[%s30152_s4] sm:$0xff] }
 0xb88   :  { %v15951_v21 = vadd.f32 %v20067_v7, %v20029_v26  ;;  %v17518_v26 = vpop.permute.xlu0 %17517  ;;  %v17559_v7 = vld [vmem:[%s30153_s5] sm:$0xff] }
 0xb9c   :  { %v20100_v9 = vpop.f32.mrb[102].mxu0 }
 0xb9d   :  { %v20101_v0 = vpop.f32.mrb[103].mxu0 }
 0xb9e   :  { %v20102_v48 = vadd.f32 %v20101_v0, %v20100_v9 }
 0xba0   :  { %v16089_v23 = vadd.f32 %v20102_v48, %v15944_v29  ;;  %v20103_v30 = vpop.f32.mrb[104].mxu0  ;;  %v20138_v5 = vpop.f32.mrb[102].mxu1 }
 0xba1   :  { %v20104_v55 = vpop.f32.mrb[105].mxu0  ;;  %v20139_v27 = vpop.f32.mrb[103].mxu1 }
 0xba2   :  { %v20105_v16 = vadd.f32 %v20104_v55, %v20103_v30  ;;  %v20140_v59 = vadd.f32 %v20139_v27, %v20138_v5 }
 0xba4   :  { %v16098_v44 = vadd.f32 %v20105_v16, %v15951_v21  ;;  %v16206_v39 = vadd.f32 %v20140_v59, %v16089_v23  ;;  %v20141_v2 = vpop.f32.mrb[104].mxu1  ;;  %v17560_v21 = vld [vmem:[%s30153_s5 + $0x8] sm:$0xff] }
 0xba5   :  { %v20142_v25 = vpop.f32.mrb[105].mxu1  ;;  %v17546_v16 = vld [vmem:[%s30152_s4 + $0x8] sm:$0xff]  ;;  %s22773_s4 = smov [#allocation2]  }
 0xba6   :  { %v20143_v15 = vadd.f32 %v20142_v25, %v20141_v2  ;;  %s17597_s5 = sshll.u32 %s22773_s4, 4  ;;  %s17598_s5 = int_to_ptr.vmem [resolvable:$true] %s17597_s5 }
 0xba7   :  { %s22747_s28 = scalar_lea.vmem %s17598_s5, 512  ;;  %p22752_p1 = scmp.lt.s32.totalorder %s17598_s5, %s17598_s5 }
 0xba8   :  { %v16217_v32 = vadd.f32 %v20143_v15, %v16098_v44  ;;  %p22748_p0 = scmp.ne.s32.totalorder %s17598_s5, %s22747_s28  ;;  %p22753_p2 = scmp.lt.s32.totalorder %s22747_s28, %s22747_s28 }
 0xbaa   :  { %p22754_p3 = por %p22753_p2, %p22752_p1 }
 0xbac   :  { %p22755_p4 = pnand %p22754_p3, %p22748_p0 }
 0xbbc   :  { %v20176_v49 = vpop.f32.mrb[106].mxu0 }
 0xbbd   :  { %v20177_v43 = vpop.f32.mrb[107].mxu0 }
 0xbbe   :  { %v20178_v4 = vadd.f32 %v20177_v43, %v20176_v49 }
 0xbc0   :  { %v16385_v18 = vadd.f32 %v20178_v4, %v16206_v39  ;;  %v20179_v34 = vpop.f32.mrb[108].mxu0  ;;  %v20214_v33 = vpop.f32.mrb[106].mxu1 }
 0xbc1   :  { %v20180_v35 = vpop.f32.mrb[109].mxu0  ;;  %v20215_v11 = vpop.f32.mrb[107].mxu1 }
 0xbc2   :  { %v20181_v54 = vadd.f32 %v20180_v35, %v20179_v34  ;;  %v20216_v8 = vadd.f32 %v20215_v11, %v20214_v33 }
 0xbc4   :  { %v16392_v28 = vadd.f32 %v20181_v54, %v16217_v32  ;;  %v16496_v37 = vadd.f32 %v20216_v8, %v16385_v18  ;;  %v20217_v47 = vpop.f32.mrb[108].mxu1 }
 0xbc5   :  { %v20218_v52 = vpop.f32.mrb[109].mxu1 }
 0xbc6   :  { %v16516_v51 = vand.u32 4294901760, %v16496_v37  ;;  %v20219_v36 = vadd.f32 %v20218_v52, %v20217_v47 }
 0xbc8   :  { %v16603_v3 = vsub.f32 %v16496_v37, %v16516_v51  ;;  %v16503_v14 = vadd.f32 %v20219_v36, %v16392_v28  ;;  %20736 = vmatprep.subr.mxu0 %v16516_v51 }
 0xbc9   :  { %20737 = vmatpush3.msra.mxu0 %v16516_v51 }
 0xbca   :  { %v17007_v24 = vand.u32 4294901760, %v16503_v14  ;;  %20739 = vmatmul.mubr.f32.vlgmr.msra.gmra.mrb[24].mxu0 %v16595_v58  ;;  %v16604_v12 = vand.u32 4294901760, %v16603_v3 }
 0xbcb   :  { %20743 = vmatprep.mubr.f32.mxu0 %v30075_v42 }
 0xbcc   :  { %v17094_v57 = vsub.f32 %v16503_v14, %v17007_v24  ;;  %20766 = vmatprep.subr.mxu1 %v17007_v24  ;;  %v16605_v60 = vsub.f32 %v16603_v3, %v16604_v12 }
 0xbcd   :  { %20767 = vmatpush3.msra.mxu1 %v17007_v24 }
 0xbce   :  { %20769 = vmatmul.mubr.f32.vlgmr.msra.gmra.mrb[24].mxu1 %v16595_v58  ;;  %v16606_v31 = vand.u32 4294901760, %v16605_v60  ;;  %v17095_v6 = vand.u32 4294901760, %v17094_v57 }
 0xbcf   :  { %20773 = vmatprep.mubr.f32.mxu1 %v30075_v42 }
 0xbd0   :  { %20741 = vmatprep.subr.mxu0 %v16606_v31  ;;  %v17096_v1 = vsub.f32 %v17094_v57, %v17095_v6 }
 0xbd1   :  { %20742 = vmatpush3.msra.mxu0 %v16606_v31 }
 0xbd2   :  { %20744 = vmatmul.mubr.f32.vlgmr.msra.gmra.mrb[24].mxu0 %v30095_v45  ;;  %20746 = vmatprep.subr.mxu0 %v16603_v3  ;;  %v17097_v62 = vand.u32 4294901760, %v17096_v1 }
 0xbd3   :  { %20747 = vmatpush3.msra.mxu0 %v16603_v3  ;;  %20748 = vmatprep.mubr.f32.mxu0 %v30078_v50 }
 0xbd4   :  { %20751 = vmatprep.subr.mxu0 %v16516_v51  ;;  %20771 = vmatprep.subr.mxu1 %v17097_v62 }
 0xbd5   :  { %20772 = vmatpush3.msra.mxu1 %v17097_v62 }
 0xbd6   :  { %20774 = vmatmul.mubr.f32.vlgmr.msra.gmra.mrb[24].mxu1 %v30095_v45  ;;  %20776 = vmatprep.subr.mxu1 %v17094_v57 }
 0xbd7   :  { %20777 = vmatpush3.msra.mxu1 %v17094_v57  ;;  %20778 = vmatprep.mubr.f32.mxu1 %v30078_v50 }
 0xbd8   :  { %20781 = vmatprep.subr.mxu1 %v17007_v24 }
 0xbda   :  { %20749 = vmatmul.mubr.f32.vlgmr.msra.gmra.mrb[24].mxu0 %v16592_v38 }
 0xbdb   :  { %20752 = vmatpush3.msra.mxu0 %v16516_v51  ;;  %20753 = vmatprep.mubr.f32.mxu0 %v30081_v40 }
 0xbdc   :  { %20756 = vmatprep.subr.mxu0 %v16604_v12 }
 0xbde   :  { %20779 = vmatmul.mubr.f32.vlgmr.msra.gmra.mrb[24].mxu1 %v16592_v38 }
 0xbdf   :  { %20782 = vmatpush3.msra.mxu1 %v17007_v24  ;;  %20783 = vmatprep.mubr.f32.mxu1 %v30081_v40 }
 0xbe0   :  { %20786 = vmatprep.subr.mxu1 %v17095_v6 }
 0xbe2   :  { %20754 = vmatmul.mubr.f32.vlgmr.msra.gmra.mrb[24].mxu0 %v16593_v41 }
 0xbe3   :  { %20757 = vmatpush3.msra.mxu0 %v16604_v12  ;;  %20758 = vmatprep.mubr.f32.mxu0 %v30075_v42 }
 0xbe4   :  { %20761 = vmatprep.subr.mxu0 %v16516_v51 }
 0xbe6   :  { %20784 = vmatmul.mubr.f32.vlgmr.msra.gmra.mrb[24].mxu1 %v16593_v41 }
 0xbe7   :  { %20787 = vmatpush3.msra.mxu1 %v17095_v6  ;;  %20788 = vmatprep.mubr.f32.mxu1 %v30075_v42 }
 0xbe8   :  { %20791 = vmatprep.subr.mxu1 %v17007_v24 }
 0xbea   :  { %20759 = vmatmul.mubr.f32.vlgmr.msra.gmra.mrb[24].mxu0 %v30095_v45 }
 0xbeb   :  { %20762 = vmatpush3.msra.mxu0 %v16516_v51  ;;  %20763 = vmatprep.mubr.f32.mxu0 %v30075_v42 }
 0xbee   :  { %20789 = vmatmul.mubr.f32.vlgmr.msra.gmra.mrb[24].mxu1 %v30095_v45 }
 0xbef   :  { %20792 = vmatpush3.msra.mxu1 %v17007_v24  ;;  %20793 = vmatprep.mubr.f32.mxu1 %v30075_v42 }
 0xbf2   :  { %20764 = vmatmul.mubr.f32.vlgmr.msra.gmra.mrb[24].mxu0 %v30095_v45 }
 0xbf6   :  { %20794 = vmatmul.mubr.f32.vlgmr.msra.gmra.mrb[24].mxu1 %v30095_v45 }
 0xcc5   :  { %v20765_v50 = vpop.f32.mrb[24].mxu0 }
 0xcc6   :  { %v16994_v40 = vpop.f32.mrb[25].mxu0 }
 0xcc9   :  { %v20795_v53 = vpop.f32.mrb[24].mxu1 }
 0xcca   :  { %v17485_v22 = vpop.f32.mrb[25].mxu1 }
 0xccb   :  { %17499 = vrot.lane.b32.xlu1 %v17485_v22, %s22772_s2 }
 0xccf   :  { %17501 = vrot.lane.b32.xlu1 %v20795_v53, %s22772_s2 }
 0xd3d   :  { %v17500_v10 = vpop.permute.xlu1 %17499 }
 0xd3e   :  { %v17506_v20 = vsel %vm17505_vm1, %v16994_v40, %v17500_v10 }
 0xd3f   :  { %v17520_v17 = vadd.f32 %v17513_v19, %v17506_v20 }
 0xd41   :  { %v17502_v42 = vpop.permute.xlu1 %17501  ;;  %17522 = vadd.xlane.f32.xlu0 %v17520_v17 }
 0xd42   :  { %v17507_v29 = vsel %vm17505_vm1, %v20765_v50, %v17502_v42 }
 0xd43   :  { %v17521_v13 = vadd.f32 %v17518_v26, %v17507_v29 }
 0xd45   :  { %17524 = vadd.xlane.f32.xlu1 %v17521_v13 }
 0xd56   :  { %17549 = vperm.xlu1 %22742, %v17545_v46  }
 0xd5a   :  { %17563 = vperm.xlu1 %22742, %v17559_v7  }
 0xd5e   :  { %17568 = vperm.xlu1 %22742, %v17560_v21  }
 0xdce   :  { %v17523_v9 = vpop.xlane.xlu0 %17522 }
 0xdcf   :  { %v17527_v48 = vmul.f32 0.0078125, %v17523_v9 }
 0xdd1   :  { %v17529_v5 = vsub.f32 %v17520_v17, %v17527_v48 }
 0xdd2   :  { %v17525_v0 = vpop.xlane.xlu1 %17524 }
 0xdd3   :  { %v17528_v23 = vmul.f32 0.0078125, %v17525_v0  ;;  %v17531_v27 = vmul.f32 %v17529_v5, %v17529_v5 }
 0xdd5   :  { %v17530_v30 = vsub.f32 %v17521_v13, %v17528_v23 }
 0xdd6   :  { %v17550_v32 = vpop.permute.xlu1 %17549 }
 0xdd7   :  { %v17532_v55 = vmul.f32 %v17530_v30, %v17530_v30 }
 0xdd9   :  { %17535 = vadd.xlane.f32.xlu0 %v17532_v55 }
 0xdda   :  { %v17564_v56 = vpop.permute.xlu1 %17563 }
 0xddd   :  { %17533 = vadd.xlane.f32.xlu0 %v17531_v27 }
 0xdde   :  { %v17569_v4 = vpop.permute.xlu1 %17568 }
 0xdf3   :  { %17554 = vperm.xlu0 %22741, %v17546_v16  }
 0xe66   :  { %v17536_v59 = vpop.xlane.xlu0 %17535 }
 0xe67   :  { %v17538_v44 = vmul.f32 0.0078125, %v17536_v59 }
 0xe69   :  { %v17540_v39 = vadd.f32 1e-05, %v17538_v44 }
 0xe6a   :  { %v17534_v2 = vpop.xlane.xlu0 %17533 }
 0xe6b   :  { %22743 = vrsqrt.f32 %v17540_v39  ;;  %v17537_v25 = vmul.f32 0.0078125, %v17534_v2 }
 0xe6d   :  { %v17539_v15 = vadd.f32 1e-05, %v17537_v25 }
 0xe6f   :  { %22745 = vrsqrt.f32 %v17539_v15 }
 0xe72   :  { %v17555_v38 = vpop.permute.xlu0 %17554 }
 0xe75   :  { %v22744_v63 = vpop.eup %22743 }
 0xe76   :  { %v17544_v45 = vmul.f32 %v22744_v63, %v17530_v30 }
 0xe78   :  { %v17558_v49 = vmul.f32 %v17555_v38, %v17544_v45 }
 0xe79   :  { %v22746_v43 = vpop.eup %22745 }
 0xe7a   :  { %v17543_v41 = vmul.f32 %v22746_v43, %v17529_v5  ;;  %v17572_v18 = vadd.f32 %v17569_v4, %v17558_v49 }
 0xe7c   :  { %v17557_v34 = vmul.f32 %v17550_v32, %v17543_v41  ;;  %v17576_v33 = vmul.f32 0.01, %v17572_v18  ;;  %vm17574_vm2 = vcmp.ge.f32.partialorder %v17572_v18, 0.0 }
 0xe7e   :  { %v17571_v35 = vadd.f32 %v17564_v56, %v17557_v34  ;;  %v17578_v11 = vsel %vm17574_vm2, %v17572_v18, %v17576_v33 }
 0xe7f   :  { %17585 = vrot.lane.b32.xlu1 %v17578_v11, %s22772_s2  ;;  %17580 = vst.msk [vmem:[#allocation2 + $0x8] sm:$0xff] %vm17505_vm1, %v17578_v11 }
 0xe80   :  { %v17575_v54 = vmul.f32 0.01, %v17571_v35  ;;  %vm17573_vm3 = vcmp.ge.f32.partialorder %v17571_v35, 0.0 }
 0xe82   :  { %v17577_v8 = vsel %vm17573_vm3, %v17571_v35, %v17575_v54 }
 0xe83   :  { %17583 = vrot.lane.b32.xlu0 %v17577_v8, %s22772_s2  ;;  %17579 = vst.msk [vmem:[#allocation2] sm:$0xff] %vm17505_vm1, %v17577_v8 }
 0xef1   :  { %v17586_v61 = vpop.permute.xlu1 %17585 }
 0xef2   :  { %17591 = vst.msk [vmem:[#allocation2 + $0x18] sm:$0xff] %vm17505_vm1, %v17586_v61 }
 0xef5   :  { %v17584_v28 = vpop.permute.xlu0 %17583 }
 0xef6   :  { %17590 = vst.msk [vmem:[#allocation2 + $0x10] sm:$0xff] %vm17505_vm1, %v17584_v28 }
 0xef7   :  { %22758 = shalt.err (!%p22755_p4)
}
 0xef8   :  { %s22759_s7 = scalar_lea.hbm %s30154_s6, 512 }
 0xef9   :  { %p22760_p5 = scmp.ne.s32.totalorder %s30154_s6, %s22759_s7  ;;  %p22763_p6 = scmp.lt.u32.totalorder %s22759_s7, %s30154_s6 }
 0xefb   :  { %p22765_p7 = pnand %p22763_p6, %p22760_p5 }
 0xefd   :  { %22768 = shalt.err (!%p22765_p7)
}
 0xefe   :  { %s22774_s12 = smov 128   ;;  %s22775_s13 = smov 8  }
 0xeff   :  { %17603 = dma.vmem_to_hbm [thread:$0]  %s17598_s5, 512, %s30154_s6, [#allocation3], %s22774_s12, %s22774_s12, %s22775_s13  }
 0xf00   :  { %22769 = dma.done.wait [#allocation3], 512  }
 0xf01   :  { %22770 = vsyncadd [#allocation3], 4294966784 }
 0xf02   :  { %17607 = vsyncpa [#allocation3], 1 }

</bundles_post_ra>
